<compile_context>
chip_gen: v6e
topology: v6e:2x2x1
jax: 0.10.0
libtpu: 0.0.40
codegen_flags: <defaults>
</compile_context>

<pallas_src>
import functools
import math

import jax
import jax.numpy as jnp
from jax import lax
from jax.experimental import pallas as pl
from jax.experimental.pallas import tpu as pltpu


_VMEM_LIMIT = 48 * 1024 * 1024   # above the 32 MiB default, below v7x's 64 MiB physical VMEM


def _pick_tile(n, max_t, quantum=8):
    """Largest tile <= max_t that divides n and is a multiple of `quantum`;
    falls back to n itself (single full block)."""
    if n <= max_t:
        return n
    t = (max_t // quantum) * quantum
    while t >= quantum:
        if n % t == 0:
            return t
        t -= quantum
    return n


# ----------------------------------------------------------------------------
# Kernel 1: fused 3x3 conv (9 shifted matmuls, no im2col) + folded BN +
#           LeakyReLU(0.01) [+ optional fused 1x1 classifier with bias].
#           Accepts several inputs / weight stacks so conv3x3(concat([a, b]))
#           is computed as accumulated split-K convs without materializing the
#           concat in HBM.
# ----------------------------------------------------------------------------
def _fused_conv3x3_kernel(*refs, n_in, th, W, Cout, slope, with_cls):
    xp_refs = refs[:n_in]                       # each (1, H+2, W+2, Cin_i)  f32 (padded)
    w_refs = refs[n_in:2 * n_in]                # each (9, Cin_i, Cout)      bf16
    scale_ref = refs[2 * n_in]                  # (1, Cout) f32  folded BN scale
    bias_ref = refs[2 * n_in + 1]               # (1, Cout) f32  folded BN bias
    if with_cls:
        clsw_ref = refs[2 * n_in + 2]           # (Cout, NCp) bf16   (lane-padded classifier)
        clsb_ref = refs[2 * n_in + 3]           # (1, NCp)    f32
        o_ref = refs[2 * n_in + 4]
    else:
        o_ref = refs[2 * n_in + 2]              # (1, th, W, C_final)

    h0 = pl.program_id(1) * th                  # first output row of this tile
    acc = jnp.zeros((th * W, Cout), jnp.float32)
    for xp_ref, w_ref in zip(xp_refs, w_refs):
        cin = xp_ref.shape[-1]
        for dy in range(3):
            # rows for this vertical tap; dynamic offset is on an outer (untiled) dim
            rows = xp_ref[0, pl.ds(h0 + dy, th)]                    # (th, W+2, cin)
            for dx in range(3):
                patch = rows[:, dx:dx + W, :].reshape(th * W, cin)  # shifted window
                acc = acc + jnp.dot(patch.astype(jnp.bfloat16), w_ref[3 * dy + dx],
                                    preferred_element_type=jnp.float32)

    y = acc * scale_ref[...] + bias_ref[...]
    y = jnp.where(y >= 0, y, slope * y)         # InPlaceABNSync leaky_relu(0.01)
    if with_cls:
        # TODO(synk): nn.Dropout2d(0.1) precedes the classifier; identity under eval semantics.
        y = jnp.dot(y.astype(clsw_ref.dtype), clsw_ref[...],
                    preferred_element_type=jnp.float32) + clsb_ref[...]
    o_ref[0] = y.reshape(th, W, y.shape[-1]).astype(o_ref.dtype)


def conv3x3_bn_act(inputs, weights, scale, bias, *, slope=0.01, classifier=None,
                   out_dtype=jnp.bfloat16):
    """inputs: list of (B,H,W,Cin_i); weights: list of (3,3,Cin_i,Cout).
    Computes leaky_relu(BN(conv3x3(concat(inputs)))) [optionally + 1x1 classifier]."""
    B, H, W, _ = inputs[0].shape
    Cout = weights[0].shape[-1]
    n_in = len(inputs)
    # row tile: aim for >=128 matmul rows per grid step while keeping >1 spatial tile
    th = _pick_tile(H, max(1, 128 // W), quantum=1)

    args, in_specs = [], []
    for x in inputs:
        cin = x.shape[-1]
        xp = jnp.pad(x.astype(jnp.float32), ((0, 0), (1, 1), (1, 1), (0, 0)))
        args.append(xp)
        in_specs.append(pl.BlockSpec((1, H + 2, W + 2, cin), lambda b, h: (b, 0, 0, 0)))
    for w in weights:
        cin = w.shape[2]
        args.append(w.reshape(9, cin, Cout).astype(jnp.bfloat16))
        in_specs.append(pl.BlockSpec((9, cin, Cout), lambda b, h: (0, 0, 0)))
    args += [scale.reshape(1, Cout).astype(jnp.float32),
             bias.reshape(1, Cout).astype(jnp.float32)]
    in_specs += [pl.BlockSpec((1, Cout), lambda b, h: (0, 0))] * 2

    if classifier is not None:
        cls_w, cls_b = classifier
        nc = cls_w.shape[-1]
        ncp = ((nc + 127) // 128) * 128          # lane-dense classifier output
        args += [jnp.pad(cls_w, ((0, 0), (0, ncp - nc))).astype(jnp.bfloat16),
                 jnp.pad(cls_b, ((0, ncp - nc),)).reshape(1, ncp).astype(jnp.float32)]
        in_specs += [pl.BlockSpec((Cout, ncp), lambda b, h: (0, 0)),
                     pl.BlockSpec((1, ncp), lambda b, h: (0, 0))]
        c_final = ncp
    else:
        c_final = Cout

    out = pl.pallas_call(
        functools.partial(_fused_conv3x3_kernel, n_in=n_in, th=th, W=W, Cout=Cout,
                          slope=slope, with_cls=classifier is not None),
        out_shape=jax.ShapeDtypeStruct((B, H, W, c_final), out_dtype),
        grid=(B, H // th),
        in_specs=in_specs,
        out_specs=pl.BlockSpec((1, th, W, c_final), lambda b, h: (b, h, 0, 0)),
        compiler_params=pltpu.CompilerParams(
            dimension_semantics=("parallel", "parallel"),
            vmem_limit_bytes=_VMEM_LIMIT),
    )(*args)

    if classifier is not None:
        out = out[..., :classifier[0].shape[-1]]
    return out


# ----------------------------------------------------------------------------
# Kernel 2: NonLocal2d (embedded-Gaussian) as a flash-style attention kernel.
#           Fused q / (k|v) 1x1 projections, online softmax over kv chunks,
#           output 1x1 projection + residual. Projection width padded to 128.
# ----------------------------------------------------------------------------
def _nl_flash_kernel(xq_ref, xkv_ref, wq_ref, bq_ref, wkv_ref, bkv_ref, wo_ref, bo_ref,
                     o_ref, q_sc, m_sc, l_sc, acc_sc, *, Pp):
    ki = pl.program_id(2)

    @pl.when(ki == 0)
    def _():
        q = jnp.dot(xq_ref[0], wq_ref[...],
                    preferred_element_type=jnp.float32) + bq_ref[...]   # scale pre-folded
        q_sc[...] = q.astype(q_sc.dtype)
        m_sc[...] = jnp.full_like(m_sc, -jnp.inf)
        l_sc[...] = jnp.zeros_like(l_sc)
        acc_sc[...] = jnp.zeros_like(acc_sc)

    kv = jnp.dot(xkv_ref[0], wkv_ref[...],
                 preferred_element_type=jnp.float32) + bkv_ref[...]      # (tk, 2*Pp)
    k = kv[:, :Pp].astype(jnp.bfloat16)
    v = kv[:, Pp:].astype(jnp.bfloat16)

    # q @ k^T with the transpose absorbed into the matmul (no explicit k.T)
    s = lax.dot_general(q_sc[...], k, (((1,), (1,)), ((), ())),
                        preferred_element_type=jnp.float32)              # (tq, tk)
    m_prev = m_sc[...]
    m_new = jnp.maximum(m_prev, jnp.max(s, axis=-1, keepdims=True))
    alpha = jnp.exp(m_prev - m_new)
    p = jnp.exp(s - m_new)
    l_sc[...] = alpha * l_sc[...] + jnp.sum(p, axis=-1, keepdims=True)
    acc_sc[...] = alpha * acc_sc[...] + jnp.dot(p.astype(jnp.bfloat16), v,
                                                preferred_element_type=jnp.float32)
    m_sc[...] = m_new

    @pl.when(ki == pl.num_programs(2) - 1)
    def _():
        ctx = (acc_sc[...] * pl.reciprocal(l_sc[...], approx=True)).astype(jnp.bfloat16)
        out = jnp.dot(ctx, wo_ref[...], preferred_element_type=jnp.float32) + bo_ref[...]
        o_ref[0] = (out + xq_ref[0].astype(jnp.float32)).astype(o_ref.dtype)   # residual


def nonlocal2d(x, wq, bq, wk, bk, wv, bv, wo, bo):
    """x: (B, H, W, C) -> (B, H, W, C). NonLocal2d(C, C//2), embedded-Gaussian with scale."""
    B, H, W, C = x.shape
    P = wq.shape[-1]
    HW = H * W
    Pp = max(128, -(-P // 128) * 128)          # pad projection width to a lane multiple
    scale = 1.0 / math.sqrt(P)                 # use_scale semantics (as previous version)

    def pad_p(w_, b_):
        return jnp.pad(w_, ((0, 0), (0, Pp - P))), jnp.pad(b_, ((0, Pp - P),))

    wq_p, bq_p = pad_p(wq * scale, bq * scale)  # fold softmax scale into q projection
    wk_p, bk_p = pad_p(wk, bk)
    wv_p, bv_p = pad_p(wv, bv)
    wkv = jnp.concatenate([wk_p, wv_p], axis=-1)       # fused k|v projection
    bkv = jnp.concatenate([bk_p, bv_p], axis=-1)
    wo_p = jnp.pad(wo, ((0, Pp - P), (0, 0)))          # zero rows: padded ctx lanes contribute 0

    tq = _pick_tile(HW, 128)
    tk = _pick_tile(HW, 128)
    xf = x.reshape(B, HW, C).astype(jnp.bfloat16)

    out = pl.pallas_call(
        functools.partial(_nl_flash_kernel, Pp=Pp),
        out_shape=jax.ShapeDtypeStruct((B, HW, C), jnp.bfloat16),
        grid=(B, HW // tq, HW // tk),
        in_specs=[
            pl.BlockSpec((1, tq, C), lambda b, qi, ki: (b, qi, 0)),     # x for q / residual
            pl.BlockSpec((1, tk, C), lambda b, qi, ki: (b, ki, 0)),     # x for k,v
            pl.BlockSpec((C, Pp), lambda b, qi, ki: (0, 0)),
            pl.BlockSpec((1, Pp), lambda b, qi, ki: (0, 0)),
            pl.BlockSpec((C, 2 * Pp), lambda b, qi, ki: (0, 0)),
            pl.BlockSpec((1, 2 * Pp), lambda b, qi, ki: (0, 0)),
            pl.BlockSpec((Pp, C), lambda b, qi, ki: (0, 0)),
            pl.BlockSpec((1, C), lambda b, qi, ki: (0, 0)),
        ],
        out_specs=pl.BlockSpec((1, tq, C), lambda b, qi, ki: (b, qi, 0)),
        scratch_shapes=[
            pltpu.VMEM((tq, Pp), jnp.bfloat16),   # q (scale pre-folded)
            pltpu.VMEM((tq, 1), jnp.float32),     # running max
            pltpu.VMEM((tq, 1), jnp.float32),     # running denominator
            pltpu.VMEM((tq, Pp), jnp.float32),    # context accumulator
        ],
        compiler_params=pltpu.CompilerParams(
            dimension_semantics=("parallel", "parallel", "arbitrary"),
            vmem_limit_bytes=_VMEM_LIMIT),
    )(xf, xf,
      wq_p.astype(jnp.bfloat16), bq_p.reshape(1, Pp).astype(jnp.float32),
      wkv.astype(jnp.bfloat16), bkv.reshape(1, 2 * Pp).astype(jnp.float32),
      wo_p.astype(jnp.bfloat16), bo.reshape(1, C).astype(jnp.float32))
    return out.reshape(B, H, W, C)


# ----------------------------------------------------------------------------
# Parameters (deterministic, synthetic) and module forward
# ----------------------------------------------------------------------------
def init_params(key, in_channels, out_channels, num_classes):
    inter = in_channels // 4
    planes = inter // 2        # NonLocal2d(inter, inter // 2)
    keys = jax.random.split(key, 20)
    eps = 1e-5

    def w(k, shape, s=0.1):
        return jax.random.normal(k, shape, jnp.float32) * s

    def bn(kg, kb, c):
        gamma = 1.0 + 0.1 * jax.random.normal(kg, (c,), jnp.float32)
        beta = 0.1 * jax.random.normal(kb, (c,), jnp.float32)
        # running_mean = 0, running_var = 1 (synthetic) folded into scale/bias
        return gamma / jnp.sqrt(1.0 + eps), beta

    p = {}
    p['conva_w'] = w(keys[0], (3, 3, in_channels, inter))
    p['conva_scale'], p['conva_bias'] = bn(keys[1], keys[2], inter)

    p['nl_wq'] = w(keys[3], (inter, planes)); p['nl_bq'] = w(keys[4], (planes,))
    p['nl_wk'] = w(keys[5], (inter, planes)); p['nl_bk'] = w(keys[6], (planes,))
    p['nl_wv'] = w(keys[7], (inter, planes)); p['nl_bv'] = w(keys[8], (planes,))
    p['nl_wo'] = w(keys[9], (planes, inter)); p['nl_bo'] = w(keys[10], (inter,))

    p['convb_w'] = w(keys[11], (3, 3, inter, inter))
    p['convb_scale'], p['convb_bias'] = bn(keys[12], keys[13], inter)

    p['bott_w'] = w(keys[14], (3, 3, in_channels + inter, out_channels))
    p['bott_scale'], p['bott_bias'] = bn(keys[15], keys[16], out_channels)

    # Original hardcodes nn.Conv2d(512, num_classes); here input = out_channels.
    p['cls_w'] = w(keys[17], (out_channels, num_classes))
    p['cls_b'] = w(keys[18], (num_classes,))
    return p


def gcb_module_forward(x_nchw, p, recurrence=1):
    """Matches GCBModule(type='nl').forward (inference semantics). NCHW in/out."""
    x = jnp.transpose(x_nchw, (0, 2, 3, 1)).astype(jnp.float32)        # -> NHWC
    out = conv3x3_bn_act([x], [p['conva_w']], p['conva_scale'], p['conva_bias'])
    for _ in range(recurrence):
        out = nonlocal2d(out, p['nl_wq'], p['nl_bq'], p['nl_wk'], p['nl_bk'],
                         p['nl_wv'], p['nl_bv'], p['nl_wo'], p['nl_bo'])
    out = conv3x3_bn_act([out], [p['convb_w']], p['convb_scale'], p['convb_bias'])
    # bottleneck: conv3x3(cat([x, out])) as split-K accumulation (no concat in HBM),
    # fused with folded BN + leaky_relu + (Dropout2d eval identity) + 1x1 classifier.
    cx = x.shape[-1]
    logits = conv3x3_bn_act(
        [x, out],
        [p['bott_w'][:, :, :cx, :], p['bott_w'][:, :, cx:, :]],
        p['bott_scale'], p['bott_bias'],
        classifier=(p['cls_w'], p['cls_b']),
        out_dtype=jnp.float32)
    return jnp.transpose(logits, (0, 3, 1, 2))                          # -> NCHW


if __name__ == "__main__":
    B, in_channels, H, W = 2, 16, 16, 16
    out_channels, num_classes = 32, 5

    key = jax.random.PRNGKey(0)
    kx, kp = jax.random.split(key)
    x = jax.random.normal(kx, (B, in_channels, H, W), jnp.float32)
    params = init_params(kp, in_channels, out_channels, num_classes)

    fwd = jax.jit(functools.partial(gcb_module_forward, recurrence=1))
    y = fwd(x, params)
    y = jax.block_until_ready(y)
    assert y.shape == (B, num_classes, H, W), y.shape
    assert bool(jnp.all(jnp.isfinite(y)))
    print("KERNEL_OK")
</pallas_src>

<mosaic_0001>
module attributes {stable_mosaic.version = 11 : i64} {
  func.func @_fused_conv3x3_kernel(%arg0: i32, %arg1: i32, %arg2: memref<1x18x18x16xf32, #tpu.memory_space<vmem>>, %arg3: memref<9x16x4xbf16, #tpu.memory_space<vmem>>, %arg4: memref<1x4xf32, #tpu.memory_space<vmem>>, %arg5: memref<1x4xf32, #tpu.memory_space<vmem>>, %arg6: memref<1x8x16x4xbf16, #tpu.memory_space<vmem>>) attributes {dimension_semantics = [#tpu.dimension_semantics<parallel>, #tpu.dimension_semantics<parallel>], iteration_bounds = array<i64: 2, 2>, scalar_prefetch = 0 : i64, scratch_operands = 0 : i64, tpu.core_type = #tpu.core_type<tc>, window_params = [{transform_indices = @transform_0, window_bounds = array<i64: 1, 18, 18, 16>}, {pipeline_mode = #tpu.pipeline_mode<synchronous>, transform_indices = @transform_1, window_bounds = array<i64: 9, 16, 4>}, {pipeline_mode = #tpu.pipeline_mode<synchronous>, transform_indices = @transform_2, window_bounds = array<i64: 1, 4>}, {pipeline_mode = #tpu.pipeline_mode<synchronous>, transform_indices = @transform_3, window_bounds = array<i64: 1, 4>}, {transform_indices = @transform_4, window_bounds = array<i64: 1, 8, 16, 4>}]} {
    %c8_i32 = arith.constant 8 : i32
    %0 = arith.muli %arg1, %c8_i32 : i32
    %cst = arith.constant 0.000000e+00 : f32
    %1 = vector.broadcast %cst : f32 to vector<128x4xf32>
    %c0_i32 = arith.constant 0 : i32
    %2 = arith.addi %0, %c0_i32 : i32
    %c0 = arith.constant 0 : index
    %3 = arith.index_cast %2 : i32 to index
    %c0_0 = arith.constant 0 : index
    %c0_1 = arith.constant 0 : index
    %4 = vector.load %arg2[%c0, %3, %c0_0, %c0_1] : memref<1x18x18x16xf32, #tpu.memory_space<vmem>>, vector<1x8x18x16xf32>
    %5 = vector.shape_cast %4 : vector<1x8x18x16xf32> to vector<8x18x16xf32>
    %6 = vector.extract_strided_slice %5 {offsets = [0, 0, 0], sizes = [8, 16, 16], strides = [1, 1, 1]} : vector<8x18x16xf32> to vector<8x16x16xf32>
    %7 = vector.shape_cast %6 : vector<8x16x16xf32> to vector<128x16xf32>
    %8 = arith.truncf %7 : vector<128x16xf32> to vector<128x16xbf16>
    %c0_2 = arith.constant 0 : index
    %c0_3 = arith.constant 0 : index
    %c0_4 = arith.constant 0 : index
    %9 = vector.load %arg3[%c0_2, %c0_3, %c0_4] : memref<9x16x4xbf16, #tpu.memory_space<vmem>>, vector<1x16x4xbf16>
    %10 = vector.shape_cast %9 : vector<1x16x4xbf16> to vector<16x4xbf16>
    %cst_5 = arith.constant dense<0.000000e+00> : vector<128x4xf32>
    %11 = tpu.matmul %8, %10, %cst_5 {dimension_numbers = #tpu.dot_dimension_numbers<[1], [0], [0], [1], [0, 0, 1, 1], [], []>} : vector<128x16xbf16>, vector<16x4xbf16>, vector<128x4xf32> -> vector<128x4xf32>
    %12 = arith.addf %1, %11 : vector<128x4xf32>
    %13 = vector.extract_strided_slice %5 {offsets = [0, 1, 0], sizes = [8, 16, 16], strides = [1, 1, 1]} : vector<8x18x16xf32> to vector<8x16x16xf32>
    %14 = vector.shape_cast %13 : vector<8x16x16xf32> to vector<128x16xf32>
    %15 = arith.truncf %14 : vector<128x16xf32> to vector<128x16xbf16>
    %c1 = arith.constant 1 : index
    %c0_6 = arith.constant 0 : index
    %c0_7 = arith.constant 0 : index
    %16 = vector.load %arg3[%c1, %c0_6, %c0_7] : memref<9x16x4xbf16, #tpu.memory_space<vmem>>, vector<1x16x4xbf16>
    %17 = vector.shape_cast %16 : vector<1x16x4xbf16> to vector<16x4xbf16>
    %cst_8 = arith.constant dense<0.000000e+00> : vector<128x4xf32>
    %18 = tpu.matmul %15, %17, %cst_8 {dimension_numbers = #tpu.dot_dimension_numbers<[1], [0], [0], [1], [0, 0, 1, 1], [], []>} : vector<128x16xbf16>, vector<16x4xbf16>, vector<128x4xf32> -> vector<128x4xf32>
    %19 = arith.addf %12, %18 : vector<128x4xf32>
    %20 = vector.extract_strided_slice %5 {offsets = [0, 2, 0], sizes = [8, 16, 16], strides = [1, 1, 1]} : vector<8x18x16xf32> to vector<8x16x16xf32>
    %21 = vector.shape_cast %20 : vector<8x16x16xf32> to vector<128x16xf32>
    %22 = arith.truncf %21 : vector<128x16xf32> to vector<128x16xbf16>
    %c2 = arith.constant 2 : index
    %c0_9 = arith.constant 0 : index
    %c0_10 = arith.constant 0 : index
    %23 = vector.load %arg3[%c2, %c0_9, %c0_10] : memref<9x16x4xbf16, #tpu.memory_space<vmem>>, vector<1x16x4xbf16>
    %24 = vector.shape_cast %23 : vector<1x16x4xbf16> to vector<16x4xbf16>
    %cst_11 = arith.constant dense<0.000000e+00> : vector<128x4xf32>
    %25 = tpu.matmul %22, %24, %cst_11 {dimension_numbers = #tpu.dot_dimension_numbers<[1], [0], [0], [1], [0, 0, 1, 1], [], []>} : vector<128x16xbf16>, vector<16x4xbf16>, vector<128x4xf32> -> vector<128x4xf32>
    %26 = arith.addf %19, %25 : vector<128x4xf32>
    %c1_i32 = arith.constant 1 : i32
    %27 = arith.addi %0, %c1_i32 : i32
    %c0_12 = arith.constant 0 : index
    %28 = arith.index_cast %27 : i32 to index
    %c0_13 = arith.constant 0 : index
    %c0_14 = arith.constant 0 : index
    %29 = vector.load %arg2[%c0_12, %28, %c0_13, %c0_14] : memref<1x18x18x16xf32, #tpu.memory_space<vmem>>, vector<1x8x18x16xf32>
    %30 = vector.shape_cast %29 : vector<1x8x18x16xf32> to vector<8x18x16xf32>
    %31 = vector.extract_strided_slice %30 {offsets = [0, 0, 0], sizes = [8, 16, 16], strides = [1, 1, 1]} : vector<8x18x16xf32> to vector<8x16x16xf32>
    %32 = vector.shape_cast %31 : vector<8x16x16xf32> to vector<128x16xf32>
    %33 = arith.truncf %32 : vector<128x16xf32> to vector<128x16xbf16>
    %c3 = arith.constant 3 : index
    %c0_15 = arith.constant 0 : index
    %c0_16 = arith.constant 0 : index
    %34 = vector.load %arg3[%c3, %c0_15, %c0_16] : memref<9x16x4xbf16, #tpu.memory_space<vmem>>, vector<1x16x4xbf16>
    %35 = vector.shape_cast %34 : vector<1x16x4xbf16> to vector<16x4xbf16>
    %cst_17 = arith.constant dense<0.000000e+00> : vector<128x4xf32>
    %36 = tpu.matmul %33, %35, %cst_17 {dimension_numbers = #tpu.dot_dimension_numbers<[1], [0], [0], [1], [0, 0, 1, 1], [], []>} : vector<128x16xbf16>, vector<16x4xbf16>, vector<128x4xf32> -> vector<128x4xf32>
    %37 = arith.addf %26, %36 : vector<128x4xf32>
    %38 = vector.extract_strided_slice %30 {offsets = [0, 1, 0], sizes = [8, 16, 16], strides = [1, 1, 1]} : vector<8x18x16xf32> to vector<8x16x16xf32>
    %39 = vector.shape_cast %38 : vector<8x16x16xf32> to vector<128x16xf32>
    %40 = arith.truncf %39 : vector<128x16xf32> to vector<128x16xbf16>
    %c4 = arith.constant 4 : index
    %c0_18 = arith.constant 0 : index
    %c0_19 = arith.constant 0 : index
    %41 = vector.load %arg3[%c4, %c0_18, %c0_19] : memref<9x16x4xbf16, #tpu.memory_space<vmem>>, vector<1x16x4xbf16>
    %42 = vector.shape_cast %41 : vector<1x16x4xbf16> to vector<16x4xbf16>
    %cst_20 = arith.constant dense<0.000000e+00> : vector<128x4xf32>
    %43 = tpu.matmul %40, %42, %cst_20 {dimension_numbers = #tpu.dot_dimension_numbers<[1], [0], [0], [1], [0, 0, 1, 1], [], []>} : vector<128x16xbf16>, vector<16x4xbf16>, vector<128x4xf32> -> vector<128x4xf32>
    %44 = arith.addf %37, %43 : vector<128x4xf32>
    %45 = vector.extract_strided_slice %30 {offsets = [0, 2, 0], sizes = [8, 16, 16], strides = [1, 1, 1]} : vector<8x18x16xf32> to vector<8x16x16xf32>
    %46 = vector.shape_cast %45 : vector<8x16x16xf32> to vector<128x16xf32>
    %47 = arith.truncf %46 : vector<128x16xf32> to vector<128x16xbf16>
    %c5 = arith.constant 5 : index
    %c0_21 = arith.constant 0 : index
    %c0_22 = arith.constant 0 : index
    %48 = vector.load %arg3[%c5, %c0_21, %c0_22] : memref<9x16x4xbf16, #tpu.memory_space<vmem>>, vector<1x16x4xbf16>
    %49 = vector.shape_cast %48 : vector<1x16x4xbf16> to vector<16x4xbf16>
    %cst_23 = arith.constant dense<0.000000e+00> : vector<128x4xf32>
    %50 = tpu.matmul %47, %49, %cst_23 {dimension_numbers = #tpu.dot_dimension_numbers<[1], [0], [0], [1], [0, 0, 1, 1], [], []>} : vector<128x16xbf16>, vector<16x4xbf16>, vector<128x4xf32> -> vector<128x4xf32>
    %51 = arith.addf %44, %50 : vector<128x4xf32>
    %c2_i32 = arith.constant 2 : i32
    %52 = arith.addi %0, %c2_i32 : i32
    %c0_24 = arith.constant 0 : index
    %53 = arith.index_cast %52 : i32 to index
    %c0_25 = arith.constant 0 : index
    %c0_26 = arith.constant 0 : index
    %54 = vector.load %arg2[%c0_24, %53, %c0_25, %c0_26] : memref<1x18x18x16xf32, #tpu.memory_space<vmem>>, vector<1x8x18x16xf32>
    %55 = vector.shape_cast %54 : vector<1x8x18x16xf32> to vector<8x18x16xf32>
    %56 = vector.extract_strided_slice %55 {offsets = [0, 0, 0], sizes = [8, 16, 16], strides = [1, 1, 1]} : vector<8x18x16xf32> to vector<8x16x16xf32>
    %57 = vector.shape_cast %56 : vector<8x16x16xf32> to vector<128x16xf32>
    %58 = arith.truncf %57 : vector<128x16xf32> to vector<128x16xbf16>
    %c6 = arith.constant 6 : index
    %c0_27 = arith.constant 0 : index
    %c0_28 = arith.constant 0 : index
    %59 = vector.load %arg3[%c6, %c0_27, %c0_28] : memref<9x16x4xbf16, #tpu.memory_space<vmem>>, vector<1x16x4xbf16>
    %60 = vector.shape_cast %59 : vector<1x16x4xbf16> to vector<16x4xbf16>
    %cst_29 = arith.constant dense<0.000000e+00> : vector<128x4xf32>
    %61 = tpu.matmul %58, %60, %cst_29 {dimension_numbers = #tpu.dot_dimension_numbers<[1], [0], [0], [1], [0, 0, 1, 1], [], []>} : vector<128x16xbf16>, vector<16x4xbf16>, vector<128x4xf32> -> vector<128x4xf32>
    %62 = arith.addf %51, %61 : vector<128x4xf32>
    %63 = vector.extract_strided_slice %55 {offsets = [0, 1, 0], sizes = [8, 16, 16], strides = [1, 1, 1]} : vector<8x18x16xf32> to vector<8x16x16xf32>
    %64 = vector.shape_cast %63 : vector<8x16x16xf32> to vector<128x16xf32>
    %65 = arith.truncf %64 : vector<128x16xf32> to vector<128x16xbf16>
    %c7 = arith.constant 7 : index
    %c0_30 = arith.constant 0 : index
    %c0_31 = arith.constant 0 : index
    %66 = vector.load %arg3[%c7, %c0_30, %c0_31] : memref<9x16x4xbf16, #tpu.memory_space<vmem>>, vector<1x16x4xbf16>
    %67 = vector.shape_cast %66 : vector<1x16x4xbf16> to vector<16x4xbf16>
    %cst_32 = arith.constant dense<0.000000e+00> : vector<128x4xf32>
    %68 = tpu.matmul %65, %67, %cst_32 {dimension_numbers = #tpu.dot_dimension_numbers<[1], [0], [0], [1], [0, 0, 1, 1], [], []>} : vector<128x16xbf16>, vector<16x4xbf16>, vector<128x4xf32> -> vector<128x4xf32>
    %69 = arith.addf %62, %68 : vector<128x4xf32>
    %70 = vector.extract_strided_slice %55 {offsets = [0, 2, 0], sizes = [8, 16, 16], strides = [1, 1, 1]} : vector<8x18x16xf32> to vector<8x16x16xf32>
    %71 = vector.shape_cast %70 : vector<8x16x16xf32> to vector<128x16xf32>
    %72 = arith.truncf %71 : vector<128x16xf32> to vector<128x16xbf16>
    %c8 = arith.constant 8 : index
    %c0_33 = arith.constant 0 : index
    %c0_34 = arith.constant 0 : index
    %73 = vector.load %arg3[%c8, %c0_33, %c0_34] : memref<9x16x4xbf16, #tpu.memory_space<vmem>>, vector<1x16x4xbf16>
    %74 = vector.shape_cast %73 : vector<1x16x4xbf16> to vector<16x4xbf16>
    %cst_35 = arith.constant dense<0.000000e+00> : vector<128x4xf32>
    %75 = tpu.matmul %72, %74, %cst_35 {dimension_numbers = #tpu.dot_dimension_numbers<[1], [0], [0], [1], [0, 0, 1, 1], [], []>} : vector<128x16xbf16>, vector<16x4xbf16>, vector<128x4xf32> -> vector<128x4xf32>
    %76 = arith.addf %69, %75 : vector<128x4xf32>
    %c0_36 = arith.constant 0 : index
    %c0_37 = arith.constant 0 : index
    %77 = vector.load %arg4[%c0_36, %c0_37] : memref<1x4xf32, #tpu.memory_space<vmem>>, vector<1x4xf32>
    %78 = vector.broadcast %77 : vector<1x4xf32> to vector<128x4xf32>
    %79 = arith.mulf %76, %78 : vector<128x4xf32>
    %c0_38 = arith.constant 0 : index
    %c0_39 = arith.constant 0 : index
    %80 = vector.load %arg5[%c0_38, %c0_39] : memref<1x4xf32, #tpu.memory_space<vmem>>, vector<1x4xf32>
    %81 = vector.broadcast %80 : vector<1x4xf32> to vector<128x4xf32>
    %82 = arith.addf %79, %81 : vector<128x4xf32>
    %cst_40 = arith.constant 0.000000e+00 : f32
    %83 = vector.broadcast %cst_40 : f32 to vector<128x4xf32>
    %84 = arith.cmpf oge, %82, %83 : vector<128x4xf32>
    %cst_41 = arith.constant 0.00999999977 : f32
    %85 = vector.broadcast %cst_41 : f32 to vector<128x4xf32>
    %86 = arith.mulf %85, %82 : vector<128x4xf32>
    %87 = arith.select %84, %82, %86 : vector<128x4xi1>, vector<128x4xf32>
    %88 = vector.shape_cast %87 : vector<128x4xf32> to vector<8x16x4xf32>
    %89 = arith.truncf %88 : vector<8x16x4xf32> to vector<8x16x4xbf16>
    %c0_42 = arith.constant 0 : index
    %c0_43 = arith.constant 0 : index
    %c0_44 = arith.constant 0 : index
    %c0_45 = arith.constant 0 : index
    %90 = vector.load %arg6[%c0_42, %c0_43, %c0_44, %c0_45] : memref<1x8x16x4xbf16, #tpu.memory_space<vmem>>, vector<1x8x16x4xbf16>
    %91 = vector.shape_cast %90 : vector<1x8x16x4xbf16> to vector<8x16x4xbf16>
    %92 = vector.shape_cast %89 : vector<8x16x4xbf16> to vector<1x8x16x4xbf16>
    tpu.vector_store %arg6[%c0_42, %c0_43, %c0_44, %c0_45], %92 {strides = array<i32>} : memref<1x8x16x4xbf16, #tpu.memory_space<vmem>>, vector<1x8x16x4xbf16>,
    return
  }
  func.func @transform_0(%arg0: i32, %arg1: i32) -> (i32, i32, i32, i32) {
    %c0_i32 = arith.constant 0 : i32
    %c0_i32_0 = arith.constant 0 : i32
    %c0_i32_1 = arith.constant 0 : i32
    %c0_i32_2 = arith.constant 0 : i32
    return %arg0, %c0_i32, %c0_i32_0, %c0_i32_1 : i32, i32, i32, i32
  }
  func.func @transform_1(%arg0: i32, %arg1: i32) -> (i32, i32, i32) {
    %c0_i32 = arith.constant 0 : i32
    %c0_i32_0 = arith.constant 0 : i32
    %c0_i32_1 = arith.constant 0 : i32
    %c0_i32_2 = arith.constant 0 : i32
    return %c0_i32, %c0_i32_0, %c0_i32_1 : i32, i32, i32
  }
  func.func @transform_2(%arg0: i32, %arg1: i32) -> (i32, i32) {
    %c0_i32 = arith.constant 0 : i32
    %c0_i32_0 = arith.constant 0 : i32
    %c0_i32_1 = arith.constant 0 : i32
    return %c0_i32, %c0_i32_0 : i32, i32
  }
  func.func @transform_3(%arg0: i32, %arg1: i32) -> (i32, i32) {
    %c0_i32 = arith.constant 0 : i32
    %c0_i32_0 = arith.constant 0 : i32
    %c0_i32_1 = arith.constant 0 : i32
    return %c0_i32, %c0_i32_0 : i32, i32
  }
  func.func @transform_4(%arg0: i32, %arg1: i32) -> (i32, i32, i32, i32) {
    %c0_i32 = arith.constant 0 : i32
    %c0_i32_0 = arith.constant 0 : i32
    %c0_i32_1 = arith.constant 0 : i32
    return %arg0, %arg1, %c0_i32, %c0_i32_0 : i32, i32, i32, i32
  }
}

module attributes {stable_mosaic.version = 11 : i64} {
  func.func @_nl_flash_kernel(%arg0: i32, %arg1: i32, %arg2: i32, %arg3: memref<1x128x4xbf16, #tpu.memory_space<vmem>>, %arg4: memref<1x128x4xbf16, #tpu.memory_space<vmem>>, %arg5: memref<4x128xbf16, #tpu.memory_space<vmem>>, %arg6: memref<1x128xf32, #tpu.memory_space<vmem>>, %arg7: memref<4x256xbf16, #tpu.memory_space<vmem>>, %arg8: memref<1x256xf32, #tpu.memory_space<vmem>>, %arg9: memref<128x4xbf16, #tpu.memory_space<vmem>>, %arg10: memref<1x4xf32, #tpu.memory_space<vmem>>, %arg11: memref<1x128x4xbf16, #tpu.memory_space<vmem>>, %arg12: memref<128x128xbf16, #tpu.memory_space<vmem>>, %arg13: memref<128x1xf32, #tpu.memory_space<vmem>>, %arg14: memref<128x1xf32, #tpu.memory_space<vmem>>, %arg15: memref<128x128xf32, #tpu.memory_space<vmem>>) attributes {dimension_semantics = [#tpu.dimension_semantics<parallel>, #tpu.dimension_semantics<parallel>, #tpu.dimension_semantics<arbitrary>], iteration_bounds = array<i64: 2, 2, 2>, scalar_prefetch = 0 : i64, scratch_operands = 4 : i64, tpu.core_type = #tpu.core_type<tc>, window_params = [{transform_indices = @transform_0, window_bounds = array<i64: 1, 128, 4>}, {transform_indices = @transform_1, window_bounds = array<i64: 1, 128, 4>}, {pipeline_mode = #tpu.pipeline_mode<synchronous>, transform_indices = @transform_2, window_bounds = array<i64: 4, 128>}, {pipeline_mode = #tpu.pipeline_mode<synchronous>, transform_indices = @transform_3, window_bounds = array<i64: 1, 128>}, {pipeline_mode = #tpu.pipeline_mode<synchronous>, transform_indices = @transform_4, window_bounds = array<i64: 4, 256>}, {pipeline_mode = #tpu.pipeline_mode<synchronous>, transform_indices = @transform_5, window_bounds = array<i64: 1, 256>}, {pipeline_mode = #tpu.pipeline_mode<synchronous>, transform_indices = @transform_6, window_bounds = array<i64: 128, 4>}, {pipeline_mode = #tpu.pipeline_mode<synchronous>, transform_indices = @transform_7, window_bounds = array<i64: 1, 4>}, {transform_indices = @transform_8, window_bounds = array<i64: 1, 128, 4>}]} {
    %c0_i32 = arith.constant 0 : i32
    %0 = arith.cmpi eq, %arg2, %c0_i32 : i32
    %1 = arith.extui %0 : i1 to i32
    %c0_i32_0 = arith.constant 0 : i32
    %2 = arith.cmpi ne, %1, %c0_i32_0 : i32
    scf.if %2 {
      %c0_26 = arith.constant 0 : index
      %c0_27 = arith.constant 0 : index
      %c0_28 = arith.constant 0 : index
      %42 = vector.load %arg3[%c0_26, %c0_27, %c0_28] : memref<1x128x4xbf16, #tpu.memory_space<vmem>>, vector<1x128x4xbf16>
      %43 = vector.shape_cast %42 : vector<1x128x4xbf16> to vector<128x4xbf16>
      %c0_29 = arith.constant 0 : index
      %c0_30 = arith.constant 0 : index
      %44 = vector.load %arg5[%c0_29, %c0_30] : memref<4x128xbf16, #tpu.memory_space<vmem>>, vector<4x128xbf16>
      %cst_31 = arith.constant dense<0.000000e+00> : vector<128x128xf32>
      %45 = tpu.matmul %43, %44, %cst_31 {dimension_numbers = #tpu.dot_dimension_numbers<[1], [0], [0], [1], [0, 0, 1, 1], [], []>} : vector<128x4xbf16>, vector<4x128xbf16>, vector<128x128xf32> -> vector<128x128xf32>
      %c0_32 = arith.constant 0 : index
      %c0_33 = arith.constant 0 : index
      %46 = vector.load %arg6[%c0_32, %c0_33] : memref<1x128xf32, #tpu.memory_space<vmem>>, vector<1x128xf32>
      %47 = vector.broadcast %46 : vector<1x128xf32> to vector<128x128xf32>
      %48 = arith.addf %45, %47 : vector<128x128xf32>
      %49 = arith.truncf %48 : vector<128x128xf32> to vector<128x128xbf16>
      %c0_34 = arith.constant 0 : index
      %c0_35 = arith.constant 0 : index
      %50 = vector.load %arg12[%c0_34, %c0_35] : memref<128x128xbf16, #tpu.memory_space<vmem>>, vector<128x128xbf16>
      tpu.vector_store %arg12[%c0_34, %c0_35], %49 {strides = array<i32>} : memref<128x128xbf16, #tpu.memory_space<vmem>>, vector<128x128xbf16>,
      %cst_36 = arith.constant 0xFF800000 : f32
      %51 = vector.broadcast %cst_36 : f32 to vector<128x1xf32>
      %c0_37 = arith.constant 0 : index
      %c0_38 = arith.constant 0 : index
      %52 = vector.load %arg13[%c0_37, %c0_38] : memref<128x1xf32, #tpu.memory_space<vmem>>, vector<128x1xf32>
      tpu.vector_store %arg13[%c0_37, %c0_38], %51 {strides = array<i32>} : memref<128x1xf32, #tpu.memory_space<vmem>>, vector<128x1xf32>,
      %cst_39 = arith.constant 0.000000e+00 : f32
      %53 = vector.broadcast %cst_39 : f32 to vector<128x1xf32>
      %c0_40 = arith.constant 0 : index
      %c0_41 = arith.constant 0 : index
      %54 = vector.load %arg14[%c0_40, %c0_41] : memref<128x1xf32, #tpu.memory_space<vmem>>, vector<128x1xf32>
      tpu.vector_store %arg14[%c0_40, %c0_41], %53 {strides = array<i32>} : memref<128x1xf32, #tpu.memory_space<vmem>>, vector<128x1xf32>,
      %cst_42 = arith.constant 0.000000e+00 : f32
      %55 = vector.broadcast %cst_42 : f32 to vector<128x128xf32>
      %c0_43 = arith.constant 0 : index
      %c0_44 = arith.constant 0 : index
      %56 = vector.load %arg15[%c0_43, %c0_44] : memref<128x128xf32, #tpu.memory_space<vmem>>, vector<128x128xf32>
      tpu.vector_store %arg15[%c0_43, %c0_44], %55 {strides = array<i32>} : memref<128x128xf32, #tpu.memory_space<vmem>>, vector<128x128xf32>,
    } else {
    }
    %c0 = arith.constant 0 : index
    %c0_1 = arith.constant 0 : index
    %c0_2 = arith.constant 0 : index
    %3 = vector.load %arg4[%c0, %c0_1, %c0_2] : memref<1x128x4xbf16, #tpu.memory_space<vmem>>, vector<1x128x4xbf16>
    %4 = vector.shape_cast %3 : vector<1x128x4xbf16> to vector<128x4xbf16>
    %c0_3 = arith.constant 0 : index
    %c0_4 = arith.constant 0 : index
    %5 = vector.load %arg7[%c0_3, %c0_4] : memref<4x256xbf16, #tpu.memory_space<vmem>>, vector<4x256xbf16>
    %cst = arith.constant dense<0.000000e+00> : vector<128x256xf32>
    %6 = tpu.matmul %4, %5, %cst {dimension_numbers = #tpu.dot_dimension_numbers<[1], [0], [0], [1], [0, 0, 1, 1], [], []>} : vector<128x4xbf16>, vector<4x256xbf16>, vector<128x256xf32> -> vector<128x256xf32>
    %c0_5 = arith.constant 0 : index
    %c0_6 = arith.constant 0 : index
    %7 = vector.load %arg8[%c0_5, %c0_6] : memref<1x256xf32, #tpu.memory_space<vmem>>, vector<1x256xf32>
    %8 = vector.broadcast %7 : vector<1x256xf32> to vector<128x256xf32>
    %9 = arith.addf %6, %8 : vector<128x256xf32>
    %10 = vector.extract_strided_slice %9 {offsets = [0, 0], sizes = [128, 128], strides = [1, 1]} : vector<128x256xf32> to vector<128x128xf32>
    %11 = arith.truncf %10 : vector<128x128xf32> to vector<128x128xbf16>
    %12 = vector.extract_strided_slice %9 {offsets = [0, 128], sizes = [128, 128], strides = [1, 1]} : vector<128x256xf32> to vector<128x128xf32>
    %13 = arith.truncf %12 : vector<128x128xf32> to vector<128x128xbf16>
    %c0_7 = arith.constant 0 : index
    %c0_8 = arith.constant 0 : index
    %14 = vector.load %arg12[%c0_7, %c0_8] : memref<128x128xbf16, #tpu.memory_space<vmem>>, vector<128x128xbf16>
    %cst_9 = arith.constant dense<0.000000e+00> : vector<128x128xf32>
    %15 = tpu.matmul %14, %11, %cst_9 {dimension_numbers = #tpu.dot_dimension_numbers<[1], [1], [0], [0], [0, 0, 1, 0], [], []>} : vector<128x128xbf16>, vector<128x128xbf16>, vector<128x128xf32> -> vector<128x128xf32>
    %c0_10 = arith.constant 0 : index
    %c0_11 = arith.constant 0 : index
    %16 = vector.load %arg13[%c0_10, %c0_11] : memref<128x1xf32, #tpu.memory_space<vmem>>, vector<128x1xf32>
    %cst_12 = arith.constant dense<0xFF800000> : vector<128xf32>
    %17 = vector.multi_reduction <maximumf>, %15, %cst_12 [1] : vector<128x128xf32> to vector<128xf32>
    %18 = vector.shape_cast %17 : vector<128xf32> to vector<128x1xf32>
    %19 = arith.maximumf %16, %18 : vector<128x1xf32>
    %20 = arith.subf %16, %19 : vector<128x1xf32>
    %21 = math.exp %20 : vector<128x1xf32>
    %22 = vector.broadcast %19 : vector<128x1xf32> to vector<128x128xf32>
    %23 = arith.subf %15, %22 : vector<128x128xf32>
    %24 = math.exp %23 : vector<128x128xf32>
    %c0_13 = arith.constant 0 : index
    %c0_14 = arith.constant 0 : index
    %25 = vector.load %arg14[%c0_13, %c0_14] : memref<128x1xf32, #tpu.memory_space<vmem>>, vector<128x1xf32>
    %26 = arith.mulf %21, %25 : vector<128x1xf32>
    %cst_15 = arith.constant dense<0.000000e+00> : vector<128xf32>
    %27 = vector.multi_reduction <add>, %24, %cst_15 [1] : vector<128x128xf32> to vector<128xf32>
    %28 = vector.shape_cast %27 : vector<128xf32> to vector<128x1xf32>
    %29 = arith.addf %26, %28 : vector<128x1xf32>
    %c0_16 = arith.constant 0 : index
    %c0_17 = arith.constant 0 : index
    %30 = vector.load %arg14[%c0_16, %c0_17] : memref<128x1xf32, #tpu.memory_space<vmem>>, vector<128x1xf32>
    tpu.vector_store %arg14[%c0_16, %c0_17], %29 {strides = array<i32>} : memref<128x1xf32, #tpu.memory_space<vmem>>, vector<128x1xf32>,
    %c0_18 = arith.constant 0 : index
    %c0_19 = arith.constant 0 : index
    %31 = vector.load %arg15[%c0_18, %c0_19] : memref<128x128xf32, #tpu.memory_space<vmem>>, vector<128x128xf32>
    %32 = vector.broadcast %21 : vector<128x1xf32> to vector<128x128xf32>
    %33 = arith.mulf %32, %31 : vector<128x128xf32>
    %34 = arith.truncf %24 : vector<128x128xf32> to vector<128x128xbf16>
    %cst_20 = arith.constant dense<0.000000e+00> : vector<128x128xf32>
    %35 = tpu.matmul %34, %13, %cst_20 {dimension_numbers = #tpu.dot_dimension_numbers<[1], [0], [0], [1], [0, 0, 1, 1], [], []>} : vector<128x128xbf16>, vector<128x128xbf16>, vector<128x128xf32> -> vector<128x128xf32>
    %36 = arith.addf %33, %35 : vector<128x128xf32>
    %c0_21 = arith.constant 0 : index
    %c0_22 = arith.constant 0 : index
    %37 = vector.load %arg15[%c0_21, %c0_22] : memref<128x128xf32, #tpu.memory_space<vmem>>, vector<128x128xf32>
    tpu.vector_store %arg15[%c0_21, %c0_22], %36 {strides = array<i32>} : memref<128x128xf32, #tpu.memory_space<vmem>>, vector<128x128xf32>,
    %c0_23 = arith.constant 0 : index
    %c0_24 = arith.constant 0 : index
    %38 = vector.load %arg13[%c0_23, %c0_24] : memref<128x1xf32, #tpu.memory_space<vmem>>, vector<128x1xf32>
    tpu.vector_store %arg13[%c0_23, %c0_24], %19 {strides = array<i32>} : memref<128x1xf32, #tpu.memory_space<vmem>>, vector<128x1xf32>,
    %c1_i32 = arith.constant 1 : i32
    %39 = arith.cmpi eq, %arg2, %c1_i32 : i32
    %40 = arith.extui %39 : i1 to i32
    %c0_i32_25 = arith.constant 0 : i32
    %41 = arith.cmpi ne, %40, %c0_i32_25 : i32
    scf.if %41 {
      %c0_26 = arith.constant 0 : index
      %c0_27 = arith.constant 0 : index
      %42 = vector.load %arg15[%c0_26, %c0_27] : memref<128x128xf32, #tpu.memory_space<vmem>>, vector<128x128xf32>
      %c0_28 = arith.constant 0 : index
      %c0_29 = arith.constant 0 : index
      %43 = vector.load %arg14[%c0_28, %c0_29] : memref<128x1xf32, #tpu.memory_space<vmem>>, vector<128x1xf32>
      %44 = tpu.reciprocal %43 {approx = true} : vector<128x1xf32> -> vector<128x1xf32>
      %45 = vector.broadcast %44 : vector<128x1xf32> to vector<128x128xf32>
      %46 = arith.mulf %42, %45 : vector<128x128xf32>
      %47 = arith.truncf %46 : vector<128x128xf32> to vector<128x128xbf16>
      %c0_30 = arith.constant 0 : index
      %c0_31 = arith.constant 0 : index
      %48 = vector.load %arg9[%c0_30, %c0_31] : memref<128x4xbf16, #tpu.memory_space<vmem>>, vector<128x4xbf16>
      %cst_32 = arith.constant dense<0.000000e+00> : vector<128x4xf32>
      %49 = tpu.matmul %47, %48, %cst_32 {dimension_numbers = #tpu.dot_dimension_numbers<[1], [0], [0], [1], [0, 0, 1, 1], [], []>} : vector<128x128xbf16>, vector<128x4xbf16>, vector<128x4xf32> -> vector<128x4xf32>
      %c0_33 = arith.constant 0 : index
      %c0_34 = arith.constant 0 : index
      %50 = vector.load %arg10[%c0_33, %c0_34] : memref<1x4xf32, #tpu.memory_space<vmem>>, vector<1x4xf32>
      %51 = vector.broadcast %50 : vector<1x4xf32> to vector<128x4xf32>
      %52 = arith.addf %49, %51 : vector<128x4xf32>
      %c0_35 = arith.constant 0 : index
      %c0_36 = arith.constant 0 : index
      %c0_37 = arith.constant 0 : index
      %53 = vector.load %arg3[%c0_35, %c0_36, %c0_37] : memref<1x128x4xbf16, #tpu.memory_space<vmem>>, vector<1x128x4xbf16>
      %54 = vector.shape_cast %53 : vector<1x128x4xbf16> to vector<128x4xbf16>
      %55 = arith.extf %54 : vector<128x4xbf16> to vector<128x4xf32>
      %56 = arith.addf %52, %55 : vector<128x4xf32>
      %57 = arith.truncf %56 : vector<128x4xf32> to vector<128x4xbf16>
      %c0_38 = arith.constant 0 : index
      %c0_39 = arith.constant 0 : index
      %c0_40 = arith.constant 0 : index
      %58 = vector.load %arg11[%c0_38, %c0_39, %c0_40] : memref<1x128x4xbf16, #tpu.memory_space<vmem>>, vector<1x128x4xbf16>
      %59 = vector.shape_cast %58 : vector<1x128x4xbf16> to vector<128x4xbf16>
      %60 = vector.shape_cast %57 : vector<128x4xbf16> to vector<1x128x4xbf16>
      tpu.vector_store %arg11[%c0_38, %c0_39, %c0_40], %60 {strides = array<i32>} : memref<1x128x4xbf16, #tpu.memory_space<vmem>>, vector<1x128x4xbf16>,
    } else {
    }
    return
  }
  func.func @transform_0(%arg0: i32, %arg1: i32, %arg2: i32) -> (i32, i32, i32) {
    %c0_i32 = arith.constant 0 : i32
    %c0_i32_0 = arith.constant 0 : i32
    return %arg0, %arg1, %c0_i32 : i32, i32, i32
  }
  func.func @transform_1(%arg0: i32, %arg1: i32, %arg2: i32) -> (i32, i32, i32) {
    %c0_i32 = arith.constant 0 : i32
    %c0_i32_0 = arith.constant 0 : i32
    return %arg0, %arg2, %c0_i32 : i32, i32, i32
  }
  func.func @transform_2(%arg0: i32, %arg1: i32, %arg2: i32) -> (i32, i32) {
    %c0_i32 = arith.constant 0 : i32
    %c0_i32_0 = arith.constant 0 : i32
    %c0_i32_1 = arith.constant 0 : i32
    return %c0_i32, %c0_i32_0 : i32, i32
  }
  func.func @transform_3(%arg0: i32, %arg1: i32, %arg2: i32) -> (i32, i32) {
    %c0_i32 = arith.constant 0 : i32
    %c0_i32_0 = arith.constant 0 : i32
    %c0_i32_1 = arith.constant 0 : i32
    return %c0_i32, %c0_i32_0 : i32, i32
  }
  func.func @transform_4(%arg0: i32, %arg1: i32, %arg2: i32) -> (i32, i32) {
    %c0_i32 = arith.constant 0 : i32
    %c0_i32_0 = arith.constant 0 : i32
    %c0_i32_1 = arith.constant 0 : i32
    return %c0_i32, %c0_i32_0 : i32, i32
  }
  func.func @transform_5(%arg0: i32, %arg1: i32, %arg2: i32) -> (i32, i32) {
    %c0_i32 = arith.constant 0 : i32
    %c0_i32_0 = arith.constant 0 : i32
    %c0_i32_1 = arith.constant 0 : i32
    return %c0_i32, %c0_i32_0 : i32, i32
  }
  func.func @transform_6(%arg0: i32, %arg1: i32, %arg2: i32) -> (i32, i32) {
    %c0_i32 = arith.constant 0 : i32
    %c0_i32_0 = arith.constant 0 : i32
    %c0_i32_1 = arith.constant 0 : i32
    return %c0_i32, %c0_i32_0 : i32, i32
  }
  func.func @transform_7(%arg0: i32, %arg1: i32, %arg2: i32) -> (i32, i32) {
    %c0_i32 = arith.constant 0 : i32
    %c0_i32_0 = arith.constant 0 : i32
    %c0_i32_1 = arith.constant 0 : i32
    return %c0_i32, %c0_i32_0 : i32, i32
  }
  func.func @transform_8(%arg0: i32, %arg1: i32, %arg2: i32) -> (i32, i32, i32) {
    %c0_i32 = arith.constant 0 : i32
    %c0_i32_0 = arith.constant 0 : i32
    return %arg0, %arg1, %c0_i32 : i32, i32, i32
  }
}

module attributes {stable_mosaic.version = 11 : i64} {
  func.func @_fused_conv3x3_kernel(%arg0: i32, %arg1: i32, %arg2: memref<1x18x18x4xf32, #tpu.memory_space<vmem>>, %arg3: memref<9x4x4xbf16, #tpu.memory_space<vmem>>, %arg4: memref<1x4xf32, #tpu.memory_space<vmem>>, %arg5: memref<1x4xf32, #tpu.memory_space<vmem>>, %arg6: memref<1x8x16x4xbf16, #tpu.memory_space<vmem>>) attributes {dimension_semantics = [#tpu.dimension_semantics<parallel>, #tpu.dimension_semantics<parallel>], iteration_bounds = array<i64: 2, 2>, scalar_prefetch = 0 : i64, scratch_operands = 0 : i64, tpu.core_type = #tpu.core_type<tc>, window_params = [{transform_indices = @transform_0, window_bounds = array<i64: 1, 18, 18, 4>}, {pipeline_mode = #tpu.pipeline_mode<synchronous>, transform_indices = @transform_1, window_bounds = array<i64: 9, 4, 4>}, {pipeline_mode = #tpu.pipeline_mode<synchronous>, transform_indices = @transform_2, window_bounds = array<i64: 1, 4>}, {pipeline_mode = #tpu.pipeline_mode<synchronous>, transform_indices = @transform_3, window_bounds = array<i64: 1, 4>}, {transform_indices = @transform_4, window_bounds = array<i64: 1, 8, 16, 4>}]} {
    %c8_i32 = arith.constant 8 : i32
    %0 = arith.muli %arg1, %c8_i32 : i32
    %cst = arith.constant 0.000000e+00 : f32
    %1 = vector.broadcast %cst : f32 to vector<128x4xf32>
    %c0_i32 = arith.constant 0 : i32
    %2 = arith.addi %0, %c0_i32 : i32
    %c0 = arith.constant 0 : index
    %3 = arith.index_cast %2 : i32 to index
    %c0_0 = arith.constant 0 : index
    %c0_1 = arith.constant 0 : index
    %4 = vector.load %arg2[%c0, %3, %c0_0, %c0_1] : memref<1x18x18x4xf32, #tpu.memory_space<vmem>>, vector<1x8x18x4xf32>
    %5 = vector.shape_cast %4 : vector<1x8x18x4xf32> to vector<8x18x4xf32>
    %6 = vector.extract_strided_slice %5 {offsets = [0, 0, 0], sizes = [8, 16, 4], strides = [1, 1, 1]} : vector<8x18x4xf32> to vector<8x16x4xf32>
    %7 = vector.shape_cast %6 : vector<8x16x4xf32> to vector<128x4xf32>
    %8 = arith.truncf %7 : vector<128x4xf32> to vector<128x4xbf16>
    %c0_2 = arith.constant 0 : index
    %c0_3 = arith.constant 0 : index
    %c0_4 = arith.constant 0 : index
    %9 = vector.load %arg3[%c0_2, %c0_3, %c0_4] : memref<9x4x4xbf16, #tpu.memory_space<vmem>>, vector<1x4x4xbf16>
    %10 = vector.shape_cast %9 : vector<1x4x4xbf16> to vector<4x4xbf16>
    %cst_5 = arith.constant dense<0.000000e+00> : vector<128x4xf32>
    %11 = tpu.matmul %8, %10, %cst_5 {dimension_numbers = #tpu.dot_dimension_numbers<[1], [0], [0], [1], [0, 0, 1, 1], [], []>} : vector<128x4xbf16>, vector<4x4xbf16>, vector<128x4xf32> -> vector<128x4xf32>
    %12 = arith.addf %1, %11 : vector<128x4xf32>
    %13 = vector.extract_strided_slice %5 {offsets = [0, 1, 0], sizes = [8, 16, 4], strides = [1, 1, 1]} : vector<8x18x4xf32> to vector<8x16x4xf32>
    %14 = vector.shape_cast %13 : vector<8x16x4xf32> to vector<128x4xf32>
    %15 = arith.truncf %14 : vector<128x4xf32> to vector<128x4xbf16>
    %c1 = arith.constant 1 : index
    %c0_6 = arith.constant 0 : index
    %c0_7 = arith.constant 0 : index
    %16 = vector.load %arg3[%c1, %c0_6, %c0_7] : memref<9x4x4xbf16, #tpu.memory_space<vmem>>, vector<1x4x4xbf16>
    %17 = vector.shape_cast %16 : vector<1x4x4xbf16> to vector<4x4xbf16>
    %cst_8 = arith.constant dense<0.000000e+00> : vector<128x4xf32>
    %18 = tpu.matmul %15, %17, %cst_8 {dimension_numbers = #tpu.dot_dimension_numbers<[1], [0], [0], [1], [0, 0, 1, 1], [], []>} : vector<128x4xbf16>, vector<4x4xbf16>, vector<128x4xf32> -> vector<128x4xf32>
    %19 = arith.addf %12, %18 : vector<128x4xf32>
    %20 = vector.extract_strided_slice %5 {offsets = [0, 2, 0], sizes = [8, 16, 4], strides = [1, 1, 1]} : vector<8x18x4xf32> to vector<8x16x4xf32>
    %21 = vector.shape_cast %20 : vector<8x16x4xf32> to vector<128x4xf32>
    %22 = arith.truncf %21 : vector<128x4xf32> to vector<128x4xbf16>
    %c2 = arith.constant 2 : index
    %c0_9 = arith.constant 0 : index
    %c0_10 = arith.constant 0 : index
    %23 = vector.load %arg3[%c2, %c0_9, %c0_10] : memref<9x4x4xbf16, #tpu.memory_space<vmem>>, vector<1x4x4xbf16>
    %24 = vector.shape_cast %23 : vector<1x4x4xbf16> to vector<4x4xbf16>
    %cst_11 = arith.constant dense<0.000000e+00> : vector<128x4xf32>
    %25 = tpu.matmul %22, %24, %cst_11 {dimension_numbers = #tpu.dot_dimension_numbers<[1], [0], [0], [1], [0, 0, 1, 1], [], []>} : vector<128x4xbf16>, vector<4x4xbf16>, vector<128x4xf32> -> vector<128x4xf32>
    %26 = arith.addf %19, %25 : vector<128x4xf32>
    %c1_i32 = arith.constant 1 : i32
    %27 = arith.addi %0, %c1_i32 : i32
    %c0_12 = arith.constant 0 : index
    %28 = arith.index_cast %27 : i32 to index
    %c0_13 = arith.constant 0 : index
    %c0_14 = arith.constant 0 : index
    %29 = vector.load %arg2[%c0_12, %28, %c0_13, %c0_14] : memref<1x18x18x4xf32, #tpu.memory_space<vmem>>, vector<1x8x18x4xf32>
    %30 = vector.shape_cast %29 : vector<1x8x18x4xf32> to vector<8x18x4xf32>
    %31 = vector.extract_strided_slice %30 {offsets = [0, 0, 0], sizes = [8, 16, 4], strides = [1, 1, 1]} : vector<8x18x4xf32> to vector<8x16x4xf32>
    %32 = vector.shape_cast %31 : vector<8x16x4xf32> to vector<128x4xf32>
    %33 = arith.truncf %32 : vector<128x4xf32> to vector<128x4xbf16>
    %c3 = arith.constant 3 : index
    %c0_15 = arith.constant 0 : index
    %c0_16 = arith.constant 0 : index
    %34 = vector.load %arg3[%c3, %c0_15, %c0_16] : memref<9x4x4xbf16, #tpu.memory_space<vmem>>, vector<1x4x4xbf16>
    %35 = vector.shape_cast %34 : vector<1x4x4xbf16> to vector<4x4xbf16>
    %cst_17 = arith.constant dense<0.000000e+00> : vector<128x4xf32>
    %36 = tpu.matmul %33, %35, %cst_17 {dimension_numbers = #tpu.dot_dimension_numbers<[1], [0], [0], [1], [0, 0, 1, 1], [], []>} : vector<128x4xbf16>, vector<4x4xbf16>, vector<128x4xf32> -> vector<128x4xf32>
    %37 = arith.addf %26, %36 : vector<128x4xf32>
    %38 = vector.extract_strided_slice %30 {offsets = [0, 1, 0], sizes = [8, 16, 4], strides = [1, 1, 1]} : vector<8x18x4xf32> to vector<8x16x4xf32>
    %39 = vector.shape_cast %38 : vector<8x16x4xf32> to vector<128x4xf32>
    %40 = arith.truncf %39 : vector<128x4xf32> to vector<128x4xbf16>
    %c4 = arith.constant 4 : index
    %c0_18 = arith.constant 0 : index
    %c0_19 = arith.constant 0 : index
    %41 = vector.load %arg3[%c4, %c0_18, %c0_19] : memref<9x4x4xbf16, #tpu.memory_space<vmem>>, vector<1x4x4xbf16>
    %42 = vector.shape_cast %41 : vector<1x4x4xbf16> to vector<4x4xbf16>
    %cst_20 = arith.constant dense<0.000000e+00> : vector<128x4xf32>
    %43 = tpu.matmul %40, %42, %cst_20 {dimension_numbers = #tpu.dot_dimension_numbers<[1], [0], [0], [1], [0, 0, 1, 1], [], []>} : vector<128x4xbf16>, vector<4x4xbf16>, vector<128x4xf32> -> vector<128x4xf32>
    %44 = arith.addf %37, %43 : vector<128x4xf32>
    %45 = vector.extract_strided_slice %30 {offsets = [0, 2, 0], sizes = [8, 16, 4], strides = [1, 1, 1]} : vector<8x18x4xf32> to vector<8x16x4xf32>
    %46 = vector.shape_cast %45 : vector<8x16x4xf32> to vector<128x4xf32>
    %47 = arith.truncf %46 : vector<128x4xf32> to vector<128x4xbf16>
    %c5 = arith.constant 5 : index
    %c0_21 = arith.constant 0 : index
    %c0_22 = arith.constant 0 : index
    %48 = vector.load %arg3[%c5, %c0_21, %c0_22] : memref<9x4x4xbf16, #tpu.memory_space<vmem>>, vector<1x4x4xbf16>
    %49 = vector.shape_cast %48 : vector<1x4x4xbf16> to vector<4x4xbf16>
    %cst_23 = arith.constant dense<0.000000e+00> : vector<128x4xf32>
    %50 = tpu.matmul %47, %49, %cst_23 {dimension_numbers = #tpu.dot_dimension_numbers<[1], [0], [0], [1], [0, 0, 1, 1], [], []>} : vector<128x4xbf16>, vector<4x4xbf16>, vector<128x4xf32> -> vector<128x4xf32>
    %51 = arith.addf %44, %50 : vector<128x4xf32>
    %c2_i32 = arith.constant 2 : i32
    %52 = arith.addi %0, %c2_i32 : i32
    %c0_24 = arith.constant 0 : index
    %53 = arith.index_cast %52 : i32 to index
    %c0_25 = arith.constant 0 : index
    %c0_26 = arith.constant 0 : index
    %54 = vector.load %arg2[%c0_24, %53, %c0_25, %c0_26] : memref<1x18x18x4xf32, #tpu.memory_space<vmem>>, vector<1x8x18x4xf32>
    %55 = vector.shape_cast %54 : vector<1x8x18x4xf32> to vector<8x18x4xf32>
    %56 = vector.extract_strided_slice %55 {offsets = [0, 0, 0], sizes = [8, 16, 4], strides = [1, 1, 1]} : vector<8x18x4xf32> to vector<8x16x4xf32>
    %57 = vector.shape_cast %56 : vector<8x16x4xf32> to vector<128x4xf32>
    %58 = arith.truncf %57 : vector<128x4xf32> to vector<128x4xbf16>
    %c6 = arith.constant 6 : index
    %c0_27 = arith.constant 0 : index
    %c0_28 = arith.constant 0 : index
    %59 = vector.load %arg3[%c6, %c0_27, %c0_28] : memref<9x4x4xbf16, #tpu.memory_space<vmem>>, vector<1x4x4xbf16>
    %60 = vector.shape_cast %59 : vector<1x4x4xbf16> to vector<4x4xbf16>
    %cst_29 = arith.constant dense<0.000000e+00> : vector<128x4xf32>
    %61 = tpu.matmul %58, %60, %cst_29 {dimension_numbers = #tpu.dot_dimension_numbers<[1], [0], [0], [1], [0, 0, 1, 1], [], []>} : vector<128x4xbf16>, vector<4x4xbf16>, vector<128x4xf32> -> vector<128x4xf32>
    %62 = arith.addf %51, %61 : vector<128x4xf32>
    %63 = vector.extract_strided_slice %55 {offsets = [0, 1, 0], sizes = [8, 16, 4], strides = [1, 1, 1]} : vector<8x18x4xf32> to vector<8x16x4xf32>
    %64 = vector.shape_cast %63 : vector<8x16x4xf32> to vector<128x4xf32>
    %65 = arith.truncf %64 : vector<128x4xf32> to vector<128x4xbf16>
    %c7 = arith.constant 7 : index
    %c0_30 = arith.constant 0 : index
    %c0_31 = arith.constant 0 : index
    %66 = vector.load %arg3[%c7, %c0_30, %c0_31] : memref<9x4x4xbf16, #tpu.memory_space<vmem>>, vector<1x4x4xbf16>
    %67 = vector.shape_cast %66 : vector<1x4x4xbf16> to vector<4x4xbf16>
    %cst_32 = arith.constant dense<0.000000e+00> : vector<128x4xf32>
    %68 = tpu.matmul %65, %67, %cst_32 {dimension_numbers = #tpu.dot_dimension_numbers<[1], [0], [0], [1], [0, 0, 1, 1], [], []>} : vector<128x4xbf16>, vector<4x4xbf16>, vector<128x4xf32> -> vector<128x4xf32>
    %69 = arith.addf %62, %68 : vector<128x4xf32>
    %70 = vector.extract_strided_slice %55 {offsets = [0, 2, 0], sizes = [8, 16, 4], strides = [1, 1, 1]} : vector<8x18x4xf32> to vector<8x16x4xf32>
    %71 = vector.shape_cast %70 : vector<8x16x4xf32> to vector<128x4xf32>
    %72 = arith.truncf %71 : vector<128x4xf32> to vector<128x4xbf16>
    %c8 = arith.constant 8 : index
    %c0_33 = arith.constant 0 : index
    %c0_34 = arith.constant 0 : index
    %73 = vector.load %arg3[%c8, %c0_33, %c0_34] : memref<9x4x4xbf16, #tpu.memory_space<vmem>>, vector<1x4x4xbf16>
    %74 = vector.shape_cast %73 : vector<1x4x4xbf16> to vector<4x4xbf16>
    %cst_35 = arith.constant dense<0.000000e+00> : vector<128x4xf32>
    %75 = tpu.matmul %72, %74, %cst_35 {dimension_numbers = #tpu.dot_dimension_numbers<[1], [0], [0], [1], [0, 0, 1, 1], [], []>} : vector<128x4xbf16>, vector<4x4xbf16>, vector<128x4xf32> -> vector<128x4xf32>
    %76 = arith.addf %69, %75 : vector<128x4xf32>
    %c0_36 = arith.constant 0 : index
    %c0_37 = arith.constant 0 : index
    %77 = vector.load %arg4[%c0_36, %c0_37] : memref<1x4xf32, #tpu.memory_space<vmem>>, vector<1x4xf32>
    %78 = vector.broadcast %77 : vector<1x4xf32> to vector<128x4xf32>
    %79 = arith.mulf %76, %78 : vector<128x4xf32>
    %c0_38 = arith.constant 0 : index
    %c0_39 = arith.constant 0 : index
    %80 = vector.load %arg5[%c0_38, %c0_39] : memref<1x4xf32, #tpu.memory_space<vmem>>, vector<1x4xf32>
    %81 = vector.broadcast %80 : vector<1x4xf32> to vector<128x4xf32>
    %82 = arith.addf %79, %81 : vector<128x4xf32>
    %cst_40 = arith.constant 0.000000e+00 : f32
    %83 = vector.broadcast %cst_40 : f32 to vector<128x4xf32>
    %84 = arith.cmpf oge, %82, %83 : vector<128x4xf32>
    %cst_41 = arith.constant 0.00999999977 : f32
    %85 = vector.broadcast %cst_41 : f32 to vector<128x4xf32>
    %86 = arith.mulf %85, %82 : vector<128x4xf32>
    %87 = arith.select %84, %82, %86 : vector<128x4xi1>, vector<128x4xf32>
    %88 = vector.shape_cast %87 : vector<128x4xf32> to vector<8x16x4xf32>
    %89 = arith.truncf %88 : vector<8x16x4xf32> to vector<8x16x4xbf16>
    %c0_42 = arith.constant 0 : index
    %c0_43 = arith.constant 0 : index
    %c0_44 = arith.constant 0 : index
    %c0_45 = arith.constant 0 : index
    %90 = vector.load %arg6[%c0_42, %c0_43, %c0_44, %c0_45] : memref<1x8x16x4xbf16, #tpu.memory_space<vmem>>, vector<1x8x16x4xbf16>
    %91 = vector.shape_cast %90 : vector<1x8x16x4xbf16> to vector<8x16x4xbf16>
    %92 = vector.shape_cast %89 : vector<8x16x4xbf16> to vector<1x8x16x4xbf16>
    tpu.vector_store %arg6[%c0_42, %c0_43, %c0_44, %c0_45], %92 {strides = array<i32>} : memref<1x8x16x4xbf16, #tpu.memory_space<vmem>>, vector<1x8x16x4xbf16>,
    return
  }
  func.func @transform_0(%arg0: i32, %arg1: i32) -> (i32, i32, i32, i32) {
    %c0_i32 = arith.constant 0 : i32
    %c0_i32_0 = arith.constant 0 : i32
    %c0_i32_1 = arith.constant 0 : i32
    %c0_i32_2 = arith.constant 0 : i32
    return %arg0, %c0_i32, %c0_i32_0, %c0_i32_1 : i32, i32, i32, i32
  }
  func.func @transform_1(%arg0: i32, %arg1: i32) -> (i32, i32, i32) {
    %c0_i32 = arith.constant 0 : i32
    %c0_i32_0 = arith.constant 0 : i32
    %c0_i32_1 = arith.constant 0 : i32
    %c0_i32_2 = arith.constant 0 : i32
    return %c0_i32, %c0_i32_0, %c0_i32_1 : i32, i32, i32
  }
  func.func @transform_2(%arg0: i32, %arg1: i32) -> (i32, i32) {
    %c0_i32 = arith.constant 0 : i32
    %c0_i32_0 = arith.constant 0 : i32
    %c0_i32_1 = arith.constant 0 : i32
    return %c0_i32, %c0_i32_0 : i32, i32
  }
  func.func @transform_3(%arg0: i32, %arg1: i32) -> (i32, i32) {
    %c0_i32 = arith.constant 0 : i32
    %c0_i32_0 = arith.constant 0 : i32
    %c0_i32_1 = arith.constant 0 : i32
    return %c0_i32, %c0_i32_0 : i32, i32
  }
  func.func @transform_4(%arg0: i32, %arg1: i32) -> (i32, i32, i32, i32) {
    %c0_i32 = arith.constant 0 : i32
    %c0_i32_0 = arith.constant 0 : i32
    %c0_i32_1 = arith.constant 0 : i32
    return %arg0, %arg1, %c0_i32, %c0_i32_0 : i32, i32, i32, i32
  }
}

module attributes {stable_mosaic.version = 11 : i64} {
  func.func @_fused_conv3x3_kernel(%arg0: i32, %arg1: i32, %arg2: memref<1x18x18x16xf32, #tpu.memory_space<vmem>>, %arg3: memref<1x18x18x4xf32, #tpu.memory_space<vmem>>, %arg4: memref<9x16x32xbf16, #tpu.memory_space<vmem>>, %arg5: memref<9x4x32xbf16, #tpu.memory_space<vmem>>, %arg6: memref<1x32xf32, #tpu.memory_space<vmem>>, %arg7: memref<1x32xf32, #tpu.memory_space<vmem>>, %arg8: memref<32x128xbf16, #tpu.memory_space<vmem>>, %arg9: memref<1x128xf32, #tpu.memory_space<vmem>>, %arg10: memref<1x8x16x128xf32, #tpu.memory_space<vmem>>) attributes {dimension_semantics = [#tpu.dimension_semantics<parallel>, #tpu.dimension_semantics<parallel>], iteration_bounds = array<i64: 2, 2>, scalar_prefetch = 0 : i64, scratch_operands = 0 : i64, tpu.core_type = #tpu.core_type<tc>, window_params = [{transform_indices = @transform_0, window_bounds = array<i64: 1, 18, 18, 16>}, {transform_indices = @transform_1, window_bounds = array<i64: 1, 18, 18, 4>}, {pipeline_mode = #tpu.pipeline_mode<synchronous>, transform_indices = @transform_2, window_bounds = array<i64: 9, 16, 32>}, {pipeline_mode = #tpu.pipeline_mode<synchronous>, transform_indices = @transform_3, window_bounds = array<i64: 9, 4, 32>}, {pipeline_mode = #tpu.pipeline_mode<synchronous>, transform_indices = @transform_4, window_bounds = array<i64: 1, 32>}, {pipeline_mode = #tpu.pipeline_mode<synchronous>, transform_indices = @transform_5, window_bounds = array<i64: 1, 32>}, {pipeline_mode = #tpu.pipeline_mode<synchronous>, transform_indices = @transform_6, window_bounds = array<i64: 32, 128>}, {pipeline_mode = #tpu.pipeline_mode<synchronous>, transform_indices = @transform_7, window_bounds = array<i64: 1, 128>}, {transform_indices = @transform_8, window_bounds = array<i64: 1, 8, 16, 128>}]} {
    %c8_i32 = arith.constant 8 : i32
    %0 = arith.muli %arg1, %c8_i32 : i32
    %cst = arith.constant 0.000000e+00 : f32
    %1 = vector.broadcast %cst : f32 to vector<128x32xf32>
    %c0_i32 = arith.constant 0 : i32
    %2 = arith.addi %0, %c0_i32 : i32
    %c0 = arith.constant 0 : index
    %3 = arith.index_cast %2 : i32 to index
    %c0_0 = arith.constant 0 : index
    %c0_1 = arith.constant 0 : index
    %4 = vector.load %arg2[%c0, %3, %c0_0, %c0_1] : memref<1x18x18x16xf32, #tpu.memory_space<vmem>>, vector<1x8x18x16xf32>
    %5 = vector.shape_cast %4 : vector<1x8x18x16xf32> to vector<8x18x16xf32>
    %6 = vector.extract_strided_slice %5 {offsets = [0, 0, 0], sizes = [8, 16, 16], strides = [1, 1, 1]} : vector<8x18x16xf32> to vector<8x16x16xf32>
    %7 = vector.shape_cast %6 : vector<8x16x16xf32> to vector<128x16xf32>
    %8 = arith.truncf %7 : vector<128x16xf32> to vector<128x16xbf16>
    %c0_2 = arith.constant 0 : index
    %c0_3 = arith.constant 0 : index
    %c0_4 = arith.constant 0 : index
    %9 = vector.load %arg4[%c0_2, %c0_3, %c0_4] : memref<9x16x32xbf16, #tpu.memory_space<vmem>>, vector<1x16x32xbf16>
    %10 = vector.shape_cast %9 : vector<1x16x32xbf16> to vector<16x32xbf16>
    %cst_5 = arith.constant dense<0.000000e+00> : vector<128x32xf32>
    %11 = tpu.matmul %8, %10, %cst_5 {dimension_numbers = #tpu.dot_dimension_numbers<[1], [0], [0], [1], [0, 0, 1, 1], [], []>} : vector<128x16xbf16>, vector<16x32xbf16>, vector<128x32xf32> -> vector<128x32xf32>
    %12 = arith.addf %1, %11 : vector<128x32xf32>
    %13 = vector.extract_strided_slice %5 {offsets = [0, 1, 0], sizes = [8, 16, 16], strides = [1, 1, 1]} : vector<8x18x16xf32> to vector<8x16x16xf32>
    %14 = vector.shape_cast %13 : vector<8x16x16xf32> to vector<128x16xf32>
    %15 = arith.truncf %14 : vector<128x16xf32> to vector<128x16xbf16>
    %c1 = arith.constant 1 : index
    %c0_6 = arith.constant 0 : index
    %c0_7 = arith.constant 0 : index
    %16 = vector.load %arg4[%c1, %c0_6, %c0_7] : memref<9x16x32xbf16, #tpu.memory_space<vmem>>, vector<1x16x32xbf16>
    %17 = vector.shape_cast %16 : vector<1x16x32xbf16> to vector<16x32xbf16>
    %cst_8 = arith.constant dense<0.000000e+00> : vector<128x32xf32>
    %18 = tpu.matmul %15, %17, %cst_8 {dimension_numbers = #tpu.dot_dimension_numbers<[1], [0], [0], [1], [0, 0, 1, 1], [], []>} : vector<128x16xbf16>, vector<16x32xbf16>, vector<128x32xf32> -> vector<128x32xf32>
    %19 = arith.addf %12, %18 : vector<128x32xf32>
    %20 = vector.extract_strided_slice %5 {offsets = [0, 2, 0], sizes = [8, 16, 16], strides = [1, 1, 1]} : vector<8x18x16xf32> to vector<8x16x16xf32>
    %21 = vector.shape_cast %20 : vector<8x16x16xf32> to vector<128x16xf32>
    %22 = arith.truncf %21 : vector<128x16xf32> to vector<128x16xbf16>
    %c2 = arith.constant 2 : index
    %c0_9 = arith.constant 0 : index
    %c0_10 = arith.constant 0 : index
    %23 = vector.load %arg4[%c2, %c0_9, %c0_10] : memref<9x16x32xbf16, #tpu.memory_space<vmem>>, vector<1x16x32xbf16>
    %24 = vector.shape_cast %23 : vector<1x16x32xbf16> to vector<16x32xbf16>
    %cst_11 = arith.constant dense<0.000000e+00> : vector<128x32xf32>
    %25 = tpu.matmul %22, %24, %cst_11 {dimension_numbers = #tpu.dot_dimension_numbers<[1], [0], [0], [1], [0, 0, 1, 1], [], []>} : vector<128x16xbf16>, vector<16x32xbf16>, vector<128x32xf32> -> vector<128x32xf32>
    %26 = arith.addf %19, %25 : vector<128x32xf32>
    %c1_i32 = arith.constant 1 : i32
    %27 = arith.addi %0, %c1_i32 : i32
    %c0_12 = arith.constant 0 : index
    %28 = arith.index_cast %27 : i32 to index
    %c0_13 = arith.constant 0 : index
    %c0_14 = arith.constant 0 : index
    %29 = vector.load %arg2[%c0_12, %28, %c0_13, %c0_14] : memref<1x18x18x16xf32, #tpu.memory_space<vmem>>, vector<1x8x18x16xf32>
    %30 = vector.shape_cast %29 : vector<1x8x18x16xf32> to vector<8x18x16xf32>
    %31 = vector.extract_strided_slice %30 {offsets = [0, 0, 0], sizes = [8, 16, 16], strides = [1, 1, 1]} : vector<8x18x16xf32> to vector<8x16x16xf32>
    %32 = vector.shape_cast %31 : vector<8x16x16xf32> to vector<128x16xf32>
    %33 = arith.truncf %32 : vector<128x16xf32> to vector<128x16xbf16>
    %c3 = arith.constant 3 : index
    %c0_15 = arith.constant 0 : index
    %c0_16 = arith.constant 0 : index
    %34 = vector.load %arg4[%c3, %c0_15, %c0_16] : memref<9x16x32xbf16, #tpu.memory_space<vmem>>, vector<1x16x32xbf16>
    %35 = vector.shape_cast %34 : vector<1x16x32xbf16> to vector<16x32xbf16>
    %cst_17 = arith.constant dense<0.000000e+00> : vector<128x32xf32>
    %36 = tpu.matmul %33, %35, %cst_17 {dimension_numbers = #tpu.dot_dimension_numbers<[1], [0], [0], [1], [0, 0, 1, 1], [], []>} : vector<128x16xbf16>, vector<16x32xbf16>, vector<128x32xf32> -> vector<128x32xf32>
    %37 = arith.addf %26, %36 : vector<128x32xf32>
    %38 = vector.extract_strided_slice %30 {offsets = [0, 1, 0], sizes = [8, 16, 16], strides = [1, 1, 1]} : vector<8x18x16xf32> to vector<8x16x16xf32>
    %39 = vector.shape_cast %38 : vector<8x16x16xf32> to vector<128x16xf32>
    %40 = arith.truncf %39 : vector<128x16xf32> to vector<128x16xbf16>
    %c4 = arith.constant 4 : index
    %c0_18 = arith.constant 0 : index
    %c0_19 = arith.constant 0 : index
    %41 = vector.load %arg4[%c4, %c0_18, %c0_19] : memref<9x16x32xbf16, #tpu.memory_space<vmem>>, vector<1x16x32xbf16>
    %42 = vector.shape_cast %41 : vector<1x16x32xbf16> to vector<16x32xbf16>
    %cst_20 = arith.constant dense<0.000000e+00> : vector<128x32xf32>
    %43 = tpu.matmul %40, %42, %cst_20 {dimension_numbers = #tpu.dot_dimension_numbers<[1], [0], [0], [1], [0, 0, 1, 1], [], []>} : vector<128x16xbf16>, vector<16x32xbf16>, vector<128x32xf32> -> vector<128x32xf32>
    %44 = arith.addf %37, %43 : vector<128x32xf32>
    %45 = vector.extract_strided_slice %30 {offsets = [0, 2, 0], sizes = [8, 16, 16], strides = [1, 1, 1]} : vector<8x18x16xf32> to vector<8x16x16xf32>
    %46 = vector.shape_cast %45 : vector<8x16x16xf32> to vector<128x16xf32>
    %47 = arith.truncf %46 : vector<128x16xf32> to vector<128x16xbf16>
    %c5 = arith.constant 5 : index
    %c0_21 = arith.constant 0 : index
    %c0_22 = arith.constant 0 : index
    %48 = vector.load %arg4[%c5, %c0_21, %c0_22] : memref<9x16x32xbf16, #tpu.memory_space<vmem>>, vector<1x16x32xbf16>
    %49 = vector.shape_cast %48 : vector<1x16x32xbf16> to vector<16x32xbf16>
    %cst_23 = arith.constant dense<0.000000e+00> : vector<128x32xf32>
    %50 = tpu.matmul %47, %49, %cst_23 {dimension_numbers = #tpu.dot_dimension_numbers<[1], [0], [0], [1], [0, 0, 1, 1], [], []>} : vector<128x16xbf16>, vector<16x32xbf16>, vector<128x32xf32> -> vector<128x32xf32>
    %51 = arith.addf %44, %50 : vector<128x32xf32>
    %c2_i32 = arith.constant 2 : i32
    %52 = arith.addi %0, %c2_i32 : i32
    %c0_24 = arith.constant 0 : index
    %53 = arith.index_cast %52 : i32 to index
    %c0_25 = arith.constant 0 : index
    %c0_26 = arith.constant 0 : index
    %54 = vector.load %arg2[%c0_24, %53, %c0_25, %c0_26] : memref<1x18x18x16xf32, #tpu.memory_space<vmem>>, vector<1x8x18x16xf32>
    %55 = vector.shape_cast %54 : vector<1x8x18x16xf32> to vector<8x18x16xf32>
    %56 = vector.extract_strided_slice %55 {offsets = [0, 0, 0], sizes = [8, 16, 16], strides = [1, 1, 1]} : vector<8x18x16xf32> to vector<8x16x16xf32>
    %57 = vector.shape_cast %56 : vector<8x16x16xf32> to vector<128x16xf32>
    %58 = arith.truncf %57 : vector<128x16xf32> to vector<128x16xbf16>
    %c6 = arith.constant 6 : index
    %c0_27 = arith.constant 0 : index
    %c0_28 = arith.constant 0 : index
    %59 = vector.load %arg4[%c6, %c0_27, %c0_28] : memref<9x16x32xbf16, #tpu.memory_space<vmem>>, vector<1x16x32xbf16>
    %60 = vector.shape_cast %59 : vector<1x16x32xbf16> to vector<16x32xbf16>
    %cst_29 = arith.constant dense<0.000000e+00> : vector<128x32xf32>
    %61 = tpu.matmul %58, %60, %cst_29 {dimension_numbers = #tpu.dot_dimension_numbers<[1], [0], [0], [1], [0, 0, 1, 1], [], []>} : vector<128x16xbf16>, vector<16x32xbf16>, vector<128x32xf32> -> vector<128x32xf32>
    %62 = arith.addf %51, %61 : vector<128x32xf32>
    %63 = vector.extract_strided_slice %55 {offsets = [0, 1, 0], sizes = [8, 16, 16], strides = [1, 1, 1]} : vector<8x18x16xf32> to vector<8x16x16xf32>
    %64 = vector.shape_cast %63 : vector<8x16x16xf32> to vector<128x16xf32>
    %65 = arith.truncf %64 : vector<128x16xf32> to vector<128x16xbf16>
    %c7 = arith.constant 7 : index
    %c0_30 = arith.constant 0 : index
    %c0_31 = arith.constant 0 : index
    %66 = vector.load %arg4[%c7, %c0_30, %c0_31] : memref<9x16x32xbf16, #tpu.memory_space<vmem>>, vector<1x16x32xbf16>
    %67 = vector.shape_cast %66 : vector<1x16x32xbf16> to vector<16x32xbf16>
    %cst_32 = arith.constant dense<0.000000e+00> : vector<128x32xf32>
    %68 = tpu.matmul %65, %67, %cst_32 {dimension_numbers = #tpu.dot_dimension_numbers<[1], [0], [0], [1], [0, 0, 1, 1], [], []>} : vector<128x16xbf16>, vector<16x32xbf16>, vector<128x32xf32> -> vector<128x32xf32>
    %69 = arith.addf %62, %68 : vector<128x32xf32>
    %70 = vector.extract_strided_slice %55 {offsets = [0, 2, 0], sizes = [8, 16, 16], strides = [1, 1, 1]} : vector<8x18x16xf32> to vector<8x16x16xf32>
    %71 = vector.shape_cast %70 : vector<8x16x16xf32> to vector<128x16xf32>
    %72 = arith.truncf %71 : vector<128x16xf32> to vector<128x16xbf16>
    %c8 = arith.constant 8 : index
    %c0_33 = arith.constant 0 : index
    %c0_34 = arith.constant 0 : index
    %73 = vector.load %arg4[%c8, %c0_33, %c0_34] : memref<9x16x32xbf16, #tpu.memory_space<vmem>>, vector<1x16x32xbf16>
    %74 = vector.shape_cast %73 : vector<1x16x32xbf16> to vector<16x32xbf16>
    %cst_35 = arith.constant dense<0.000000e+00> : vector<128x32xf32>
    %75 = tpu.matmul %72, %74, %cst_35 {dimension_numbers = #tpu.dot_dimension_numbers<[1], [0], [0], [1], [0, 0, 1, 1], [], []>} : vector<128x16xbf16>, vector<16x32xbf16>, vector<128x32xf32> -> vector<128x32xf32>
    %76 = arith.addf %69, %75 : vector<128x32xf32>
    %c0_i32_36 = arith.constant 0 : i32
    %77 = arith.addi %0, %c0_i32_36 : i32
    %c0_37 = arith.constant 0 : index
    %78 = arith.index_cast %77 : i32 to index
    %c0_38 = arith.constant 0 : index
    %c0_39 = arith.constant 0 : index
    %79 = vector.load %arg3[%c0_37, %78, %c0_38, %c0_39] : memref<1x18x18x4xf32, #tpu.memory_space<vmem>>, vector<1x8x18x4xf32>
    %80 = vector.shape_cast %79 : vector<1x8x18x4xf32> to vector<8x18x4xf32>
    %81 = vector.extract_strided_slice %80 {offsets = [0, 0, 0], sizes = [8, 16, 4], strides = [1, 1, 1]} : vector<8x18x4xf32> to vector<8x16x4xf32>
    %82 = vector.shape_cast %81 : vector<8x16x4xf32> to vector<128x4xf32>
    %83 = arith.truncf %82 : vector<128x4xf32> to vector<128x4xbf16>
    %c0_40 = arith.constant 0 : index
    %c0_41 = arith.constant 0 : index
    %c0_42 = arith.constant 0 : index
    %84 = vector.load %arg5[%c0_40, %c0_41, %c0_42] : memref<9x4x32xbf16, #tpu.memory_space<vmem>>, vector<1x4x32xbf16>
    %85 = vector.shape_cast %84 : vector<1x4x32xbf16> to vector<4x32xbf16>
    %cst_43 = arith.constant dense<0.000000e+00> : vector<128x32xf32>
    %86 = tpu.matmul %83, %85, %cst_43 {dimension_numbers = #tpu.dot_dimension_numbers<[1], [0], [0], [1], [0, 0, 1, 1], [], []>} : vector<128x4xbf16>, vector<4x32xbf16>, vector<128x32xf32> -> vector<128x32xf32>
    %87 = arith.addf %76, %86 : vector<128x32xf32>
    %88 = vector.extract_strided_slice %80 {offsets = [0, 1, 0], sizes = [8, 16, 4], strides = [1, 1, 1]} : vector<8x18x4xf32> to vector<8x16x4xf32>
    %89 = vector.shape_cast %88 : vector<8x16x4xf32> to vector<128x4xf32>
    %90 = arith.truncf %89 : vector<128x4xf32> to vector<128x4xbf16>
    %c1_44 = arith.constant 1 : index
    %c0_45 = arith.constant 0 : index
    %c0_46 = arith.constant 0 : index
    %91 = vector.load %arg5[%c1_44, %c0_45, %c0_46] : memref<9x4x32xbf16, #tpu.memory_space<vmem>>, vector<1x4x32xbf16>
    %92 = vector.shape_cast %91 : vector<1x4x32xbf16> to vector<4x32xbf16>
    %cst_47 = arith.constant dense<0.000000e+00> : vector<128x32xf32>
    %93 = tpu.matmul %90, %92, %cst_47 {dimension_numbers = #tpu.dot_dimension_numbers<[1], [0], [0], [1], [0, 0, 1, 1], [], []>} : vector<128x4xbf16>, vector<4x32xbf16>, vector<128x32xf32> -> vector<128x32xf32>
    %94 = arith.addf %87, %93 : vector<128x32xf32>
    %95 = vector.extract_strided_slice %80 {offsets = [0, 2, 0], sizes = [8, 16, 4], strides = [1, 1, 1]} : vector<8x18x4xf32> to vector<8x16x4xf32>
    %96 = vector.shape_cast %95 : vector<8x16x4xf32> to vector<128x4xf32>
    %97 = arith.truncf %96 : vector<128x4xf32> to vector<128x4xbf16>
    %c2_48 = arith.constant 2 : index
    %c0_49 = arith.constant 0 : index
    %c0_50 = arith.constant 0 : index
    %98 = vector.load %arg5[%c2_48, %c0_49, %c0_50] : memref<9x4x32xbf16, #tpu.memory_space<vmem>>, vector<1x4x32xbf16>
    %99 = vector.shape_cast %98 : vector<1x4x32xbf16> to vector<4x32xbf16>
    %cst_51 = arith.constant dense<0.000000e+00> : vector<128x32xf32>
    %100 = tpu.matmul %97, %99, %cst_51 {dimension_numbers = #tpu.dot_dimension_numbers<[1], [0], [0], [1], [0, 0, 1, 1], [], []>} : vector<128x4xbf16>, vector<4x32xbf16>, vector<128x32xf32> -> vector<128x32xf32>
    %101 = arith.addf %94, %100 : vector<128x32xf32>
    %c1_i32_52 = arith.constant 1 : i32
    %102 = arith.addi %0, %c1_i32_52 : i32
    %c0_53 = arith.constant 0 : index
    %103 = arith.index_cast %102 : i32 to index
    %c0_54 = arith.constant 0 : index
    %c0_55 = arith.constant 0 : index
    %104 = vector.load %arg3[%c0_53, %103, %c0_54, %c0_55] : memref<1x18x18x4xf32, #tpu.memory_space<vmem>>, vector<1x8x18x4xf32>
    %105 = vector.shape_cast %104 : vector<1x8x18x4xf32> to vector<8x18x4xf32>
    %106 = vector.extract_strided_slice %105 {offsets = [0, 0, 0], sizes = [8, 16, 4], strides = [1, 1, 1]} : vector<8x18x4xf32> to vector<8x16x4xf32>
    %107 = vector.shape_cast %106 : vector<8x16x4xf32> to vector<128x4xf32>
    %108 = arith.truncf %107 : vector<128x4xf32> to vector<128x4xbf16>
    %c3_56 = arith.constant 3 : index
    %c0_57 = arith.constant 0 : index
    %c0_58 = arith.constant 0 : index
    %109 = vector.load %arg5[%c3_56, %c0_57, %c0_58] : memref<9x4x32xbf16, #tpu.memory_space<vmem>>, vector<1x4x32xbf16>
    %110 = vector.shape_cast %109 : vector<1x4x32xbf16> to vector<4x32xbf16>
    %cst_59 = arith.constant dense<0.000000e+00> : vector<128x32xf32>
    %111 = tpu.matmul %108, %110, %cst_59 {dimension_numbers = #tpu.dot_dimension_numbers<[1], [0], [0], [1], [0, 0, 1, 1], [], []>} : vector<128x4xbf16>, vector<4x32xbf16>, vector<128x32xf32> -> vector<128x32xf32>
    %112 = arith.addf %101, %111 : vector<128x32xf32>
    %113 = vector.extract_strided_slice %105 {offsets = [0, 1, 0], sizes = [8, 16, 4], strides = [1, 1, 1]} : vector<8x18x4xf32> to vector<8x16x4xf32>
    %114 = vector.shape_cast %113 : vector<8x16x4xf32> to vector<128x4xf32>
    %115 = arith.truncf %114 : vector<128x4xf32> to vector<128x4xbf16>
    %c4_60 = arith.constant 4 : index
    %c0_61 = arith.constant 0 : index
    %c0_62 = arith.constant 0 : index
    %116 = vector.load %arg5[%c4_60, %c0_61, %c0_62] : memref<9x4x32xbf16, #tpu.memory_space<vmem>>, vector<1x4x32xbf16>
    %117 = vector.shape_cast %116 : vector<1x4x32xbf16> to vector<4x32xbf16>
    %cst_63 = arith.constant dense<0.000000e+00> : vector<128x32xf32>
    %118 = tpu.matmul %115, %117, %cst_63 {dimension_numbers = #tpu.dot_dimension_numbers<[1], [0], [0], [1], [0, 0, 1, 1], [], []>} : vector<128x4xbf16>, vector<4x32xbf16>, vector<128x32xf32> -> vector<128x32xf32>
    %119 = arith.addf %112, %118 : vector<128x32xf32>
    %120 = vector.extract_strided_slice %105 {offsets = [0, 2, 0], sizes = [8, 16, 4], strides = [1, 1, 1]} : vector<8x18x4xf32> to vector<8x16x4xf32>
    %121 = vector.shape_cast %120 : vector<8x16x4xf32> to vector<128x4xf32>
    %122 = arith.truncf %121 : vector<128x4xf32> to vector<128x4xbf16>
    %c5_64 = arith.constant 5 : index
    %c0_65 = arith.constant 0 : index
    %c0_66 = arith.constant 0 : index
    %123 = vector.load %arg5[%c5_64, %c0_65, %c0_66] : memref<9x4x32xbf16, #tpu.memory_space<vmem>>, vector<1x4x32xbf16>
    %124 = vector.shape_cast %123 : vector<1x4x32xbf16> to vector<4x32xbf16>
    %cst_67 = arith.constant dense<0.000000e+00> : vector<128x32xf32>
    %125 = tpu.matmul %122, %124, %cst_67 {dimension_numbers = #tpu.dot_dimension_numbers<[1], [0], [0], [1], [0, 0, 1, 1], [], []>} : vector<128x4xbf16>, vector<4x32xbf16>, vector<128x32xf32> -> vector<128x32xf32>
    %126 = arith.addf %119, %125 : vector<128x32xf32>
    %c2_i32_68 = arith.constant 2 : i32
    %127 = arith.addi %0, %c2_i32_68 : i32
    %c0_69 = arith.constant 0 : index
    %128 = arith.index_cast %127 : i32 to index
    %c0_70 = arith.constant 0 : index
    %c0_71 = arith.constant 0 : index
    %129 = vector.load %arg3[%c0_69, %128, %c0_70, %c0_71] : memref<1x18x18x4xf32, #tpu.memory_space<vmem>>, vector<1x8x18x4xf32>
    %130 = vector.shape_cast %129 : vector<1x8x18x4xf32> to vector<8x18x4xf32>
    %131 = vector.extract_strided_slice %130 {offsets = [0, 0, 0], sizes = [8, 16, 4], strides = [1, 1, 1]} : vector<8x18x4xf32> to vector<8x16x4xf32>
    %132 = vector.shape_cast %131 : vector<8x16x4xf32> to vector<128x4xf32>
    %133 = arith.truncf %132 : vector<128x4xf32> to vector<128x4xbf16>
    %c6_72 = arith.constant 6 : index
    %c0_73 = arith.constant 0 : index
    %c0_74 = arith.constant 0 : index
    %134 = vector.load %arg5[%c6_72, %c0_73, %c0_74] : memref<9x4x32xbf16, #tpu.memory_space<vmem>>, vector<1x4x32xbf16>
    %135 = vector.shape_cast %134 : vector<1x4x32xbf16> to vector<4x32xbf16>
    %cst_75 = arith.constant dense<0.000000e+00> : vector<128x32xf32>
    %136 = tpu.matmul %133, %135, %cst_75 {dimension_numbers = #tpu.dot_dimension_numbers<[1], [0], [0], [1], [0, 0, 1, 1], [], []>} : vector<128x4xbf16>, vector<4x32xbf16>, vector<128x32xf32> -> vector<128x32xf32>
    %137 = arith.addf %126, %136 : vector<128x32xf32>
    %138 = vector.extract_strided_slice %130 {offsets = [0, 1, 0], sizes = [8, 16, 4], strides = [1, 1, 1]} : vector<8x18x4xf32> to vector<8x16x4xf32>
    %139 = vector.shape_cast %138 : vector<8x16x4xf32> to vector<128x4xf32>
    %140 = arith.truncf %139 : vector<128x4xf32> to vector<128x4xbf16>
    %c7_76 = arith.constant 7 : index
    %c0_77 = arith.constant 0 : index
    %c0_78 = arith.constant 0 : index
    %141 = vector.load %arg5[%c7_76, %c0_77, %c0_78] : memref<9x4x32xbf16, #tpu.memory_space<vmem>>, vector<1x4x32xbf16>
    %142 = vector.shape_cast %141 : vector<1x4x32xbf16> to vector<4x32xbf16>
    %cst_79 = arith.constant dense<0.000000e+00> : vector<128x32xf32>
    %143 = tpu.matmul %140, %142, %cst_79 {dimension_numbers = #tpu.dot_dimension_numbers<[1], [0], [0], [1], [0, 0, 1, 1], [], []>} : vector<128x4xbf16>, vector<4x32xbf16>, vector<128x32xf32> -> vector<128x32xf32>
    %144 = arith.addf %137, %143 : vector<128x32xf32>
    %145 = vector.extract_strided_slice %130 {offsets = [0, 2, 0], sizes = [8, 16, 4], strides = [1, 1, 1]} : vector<8x18x4xf32> to vector<8x16x4xf32>
    %146 = vector.shape_cast %145 : vector<8x16x4xf32> to vector<128x4xf32>
    %147 = arith.truncf %146 : vector<128x4xf32> to vector<128x4xbf16>
    %c8_80 = arith.constant 8 : index
    %c0_81 = arith.constant 0 : index
    %c0_82 = arith.constant 0 : index
    %148 = vector.load %arg5[%c8_80, %c0_81, %c0_82] : memref<9x4x32xbf16, #tpu.memory_space<vmem>>, vector<1x4x32xbf16>
    %149 = vector.shape_cast %148 : vector<1x4x32xbf16> to vector<4x32xbf16>
    %cst_83 = arith.constant dense<0.000000e+00> : vector<128x32xf32>
    %150 = tpu.matmul %147, %149, %cst_83 {dimension_numbers = #tpu.dot_dimension_numbers<[1], [0], [0], [1], [0, 0, 1, 1], [], []>} : vector<128x4xbf16>, vector<4x32xbf16>, vector<128x32xf32> -> vector<128x32xf32>
    %151 = arith.addf %144, %150 : vector<128x32xf32>
    %c0_84 = arith.constant 0 : index
    %c0_85 = arith.constant 0 : index
    %152 = vector.load %arg6[%c0_84, %c0_85] : memref<1x32xf32, #tpu.memory_space<vmem>>, vector<1x32xf32>
    %153 = vector.broadcast %152 : vector<1x32xf32> to vector<128x32xf32>
    %154 = arith.mulf %151, %153 : vector<128x32xf32>
    %c0_86 = arith.constant 0 : index
    %c0_87 = arith.constant 0 : index
    %155 = vector.load %arg7[%c0_86, %c0_87] : memref<1x32xf32, #tpu.memory_space<vmem>>, vector<1x32xf32>
    %156 = vector.broadcast %155 : vector<1x32xf32> to vector<128x32xf32>
    %157 = arith.addf %154, %156 : vector<128x32xf32>
    %cst_88 = arith.constant 0.000000e+00 : f32
    %158 = vector.broadcast %cst_88 : f32 to vector<128x32xf32>
    %159 = arith.cmpf oge, %157, %158 : vector<128x32xf32>
    %cst_89 = arith.constant 0.00999999977 : f32
    %160 = vector.broadcast %cst_89 : f32 to vector<128x32xf32>
    %161 = arith.mulf %160, %157 : vector<128x32xf32>
    %162 = arith.select %159, %157, %161 : vector<128x32xi1>, vector<128x32xf32>
    %163 = arith.truncf %162 : vector<128x32xf32> to vector<128x32xbf16>
    %c0_90 = arith.constant 0 : index
    %c0_91 = arith.constant 0 : index
    %164 = vector.load %arg8[%c0_90, %c0_91] : memref<32x128xbf16, #tpu.memory_space<vmem>>, vector<32x128xbf16>
    %cst_92 = arith.constant dense<0.000000e+00> : vector<128x128xf32>
    %165 = tpu.matmul %163, %164, %cst_92 {dimension_numbers = #tpu.dot_dimension_numbers<[1], [0], [0], [1], [0, 0, 1, 1], [], []>} : vector<128x32xbf16>, vector<32x128xbf16>, vector<128x128xf32> -> vector<128x128xf32>
    %c0_93 = arith.constant 0 : index
    %c0_94 = arith.constant 0 : index
    %166 = vector.load %arg9[%c0_93, %c0_94] : memref<1x128xf32, #tpu.memory_space<vmem>>, vector<1x128xf32>
    %167 = vector.broadcast %166 : vector<1x128xf32> to vector<128x128xf32>
    %168 = arith.addf %165, %167 : vector<128x128xf32>
    %169 = vector.shape_cast %168 : vector<128x128xf32> to vector<8x16x128xf32>
    %c0_95 = arith.constant 0 : index
    %c0_96 = arith.constant 0 : index
    %c0_97 = arith.constant 0 : index
    %c0_98 = arith.constant 0 : index
    %170 = vector.load %arg10[%c0_95, %c0_96, %c0_97, %c0_98] : memref<1x8x16x128xf32, #tpu.memory_space<vmem>>, vector<1x8x16x128xf32>
    %171 = vector.shape_cast %170 : vector<1x8x16x128xf32> to vector<8x16x128xf32>
    %172 = vector.shape_cast %169 : vector<8x16x128xf32> to vector<1x8x16x128xf32>
    tpu.vector_store %arg10[%c0_95, %c0_96, %c0_97, %c0_98], %172 {strides = array<i32>} : memref<1x8x16x128xf32, #tpu.memory_space<vmem>>, vector<1x8x16x128xf32>,
    return
  }
  func.func @transform_0(%arg0: i32, %arg1: i32) -> (i32, i32, i32, i32) {
    %c0_i32 = arith.constant 0 : i32
    %c0_i32_0 = arith.constant 0 : i32
    %c0_i32_1 = arith.constant 0 : i32
    %c0_i32_2 = arith.constant 0 : i32
    return %arg0, %c0_i32, %c0_i32_0, %c0_i32_1 : i32, i32, i32, i32
  }
  func.func @transform_1(%arg0: i32, %arg1: i32) -> (i32, i32, i32, i32) {
    %c0_i32 = arith.constant 0 : i32
    %c0_i32_0 = arith.constant 0 : i32
    %c0_i32_1 = arith.constant 0 : i32
    %c0_i32_2 = arith.constant 0 : i32
    return %arg0, %c0_i32, %c0_i32_0, %c0_i32_1 : i32, i32, i32, i32
  }
  func.func @transform_2(%arg0: i32, %arg1: i32) -> (i32, i32, i32) {
    %c0_i32 = arith.constant 0 : i32
    %c0_i32_0 = arith.constant 0 : i32
    %c0_i32_1 = arith.constant 0 : i32
    %c0_i32_2 = arith.constant 0 : i32
    return %c0_i32, %c0_i32_0, %c0_i32_1 : i32, i32, i32
  }
  func.func @transform_3(%arg0: i32, %arg1: i32) -> (i32, i32, i32) {
    %c0_i32 = arith.constant 0 : i32
    %c0_i32_0 = arith.constant 0 : i32
    %c0_i32_1 = arith.constant 0 : i32
    %c0_i32_2 = arith.constant 0 : i32
    return %c0_i32, %c0_i32_0, %c0_i32_1 : i32, i32, i32
  }
  func.func @transform_4(%arg0: i32, %arg1: i32) -> (i32, i32) {
    %c0_i32 = arith.constant 0 : i32
    %c0_i32_0 = arith.constant 0 : i32
    %c0_i32_1 = arith.constant 0 : i32
    return %c0_i32, %c0_i32_0 : i32, i32
  }
  func.func @transform_5(%arg0: i32, %arg1: i32) -> (i32, i32) {
    %c0_i32 = arith.constant 0 : i32
    %c0_i32_0 = arith.constant 0 : i32
    %c0_i32_1 = arith.constant 0 : i32
    return %c0_i32, %c0_i32_0 : i32, i32
  }
  func.func @transform_6(%arg0: i32, %arg1: i32) -> (i32, i32) {
    %c0_i32 = arith.constant 0 : i32
    %c0_i32_0 = arith.constant 0 : i32
    %c0_i32_1 = arith.constant 0 : i32
    return %c0_i32, %c0_i32_0 : i32, i32
  }
  func.func @transform_7(%arg0: i32, %arg1: i32) -> (i32, i32) {
    %c0_i32 = arith.constant 0 : i32
    %c0_i32_0 = arith.constant 0 : i32
    %c0_i32_1 = arith.constant 0 : i32
    return %c0_i32, %c0_i32_0 : i32, i32
  }
  func.func @transform_8(%arg0: i32, %arg1: i32) -> (i32, i32, i32, i32) {
    %c0_i32 = arith.constant 0 : i32
    %c0_i32_0 = arith.constant 0 : i32
    %c0_i32_1 = arith.constant 0 : i32
    return %arg0, %arg1, %c0_i32, %c0_i32_0 : i32, i32, i32, i32
  }
}

</mosaic_0001>

<bundles_post_ra>
// kernel: gcb_module_forward.4
= control target key start
LH: loop header
LB: loop body
LE: loop exit
PB: predicated region body
PF: predicated region fallthrough
CT: control target
= control target key end

     0   :  { %s2901_s15 = smov 0   ;;  %s2903_s16 = smov 0   ;;  %s4025_s0 = inlined_call_operand.vmem [shape: f32[2,18,18,16], index: 0, kind: input, shape index: {}]   ;;  %s4026_s1 = inlined_call_operand.vmem [shape: bf16[9,16,4], index: 1, kind: input, shape index: {}]   ;;  %s4027_s2 = inlined_call_operand.vmem [shape: f32[1,4], index: 2, kind: input, shape index: {}]   ;;  %s4028_s3 = inlined_call_operand.vmem [shape: f32[1,4], index: 3, kind: input, shape index: {}]   ;;  %s4029_s4 = inlined_call_operand.vmem [shape: bf16[2,16,16,4], index: 4, kind: output, shape index: {}]  }
   0x1   :  { %s2905_s17 = smov 0   ;;  %s2907_s18 = smov 0  }
   0x2   :  { %s2909_s19 = smov 0  }
   0x3 LB: > { %s23_s20 = sadd.s32 1, %s2866_s17  ;;  %s26_s21 = sadd.s32 1, %s2870_s18  ;;  %s2874_s19 = sphi %s2909_s19, %s14_s19   ;;  %s2870_s18 = sphi %s2907_s18, %s4129_s18   ;;  %s2866_s17 = sphi %s2905_s17, %s4128_s17   ;;  %s2862_s16 = sphi %s2903_s16, %s4127_s16   ;;  %s2858_s15 = sphi %s2901_s15, %s4126_s15  }
   0x4   : > { %p24_p0 = scmp.ge.s32.totalorder %s23_s20, 2  ;;  %p2348_p1 = scmp.ge.s32.totalorder %s2874_s19, 1 }
   0x5   : > { %p176_p2 = scmp.lt.s32.totalorder %s2874_s19, 5 }
   0x6   : > { %s4131_s20 = smov (%p24_p0, %s23_s20), 0  ;;  %s4133_s21 = smov (!%p24_p0, %s26_s21), %s2870_s18 }
   0x7   : > { %p177_p3 = pnand %p2348_p1, %p176_p2  ;;  %p28_p4 = scmp.ge.s32.totalorder %s4133_s21, 2 }
   0x9   : > { %s4135_s21 = smov (%p28_p4, %s4133_s21), 0  ;;  %180 = sbr.rel (%p177_p3) target bundleno = 384 (0x180), region = 36 }
   0xe   : > { %v2827_v0 = vld [vmem:[%s4026_s1 + $0x8] sm:$0xff]   ;;  %p207_p5 = scmp.lt.s32.totalorder %s2862_s16, 1  ;;  %v2939_v1 = vld [vmem:[%s4026_s1] sm:$0xff]   ;;  %v2946_v2 = vld [vmem:[%s4026_s1 + $0x10] sm:$0xff]   ;;  %s2355_s28 = smul.u32 192, %s2858_s15  ;;  %vm285_vm0 = vcmask 1046528  }
   0xf   : > { %2784 = vmatprep.subr.bf16.mxu1 %v2827_v0  ;;  %2622 = vmatprep.subr.bf16.mxu0 %v2827_v0  ;;  %vm359_vm1 = vcmask 130048   ;;  %vm608_vm2 = vcmask 1045504   ;;  %v3064_v50 = vld [vmem:[%s4026_s1 + $0x20] sm:$0xff]   ;;  %s2350_s27 = sshll.u32 %s2858_s15, 3  ;;  %vm2227_vm3 = vcmask 27648  }
  0x10   : > { %s4137_s16 = smov (!%p207_p5, %s2862_s16), 1  ;;  %2785 = vmatpush3.bf16.msra.mxu1 %v2827_v0  ;;  %2623 = vmatpush3.bf16.msra.mxu0 %v2827_v0  ;;  %p3840_p6 = scmp.lt.s32.totalorder %s2350_s27, 15 }
  0x11   : > { %s2786_s29 = smul.u32 432, %s4137_s16  ;;  %2640 = vmatprep.subr.bf16.mxu1 %v2939_v1  ;;  %2658 = vmatprep.subr.bf16.mxu0 %v2946_v2 }
  0x12   : > { %s4139_s27 = smov (!%p3840_p6, %s2350_s27), 15 }
  0x13   : > { %s211_s6 = scalar_lea.vmem %s4025_s0, %s2786_s29  ;;  %s2351_s15 = sshll.u32 %s4139_s27, 1 }
  0x14   : > { %s2955_s7 = scalar_lea.vmem %s211_s6, %s2355_s28  ;;  %s2352_s29 = sshll.u32 %s4137_s16, 5 }
  0x15   : > { %v2958_v3 = vld [vmem:[%s2955_s7] sm:$0xff]  ;;  %v2961_v4 = vld [vmem:[%s2955_s7 + $0x8] sm:$0xff]  ;;  %v2964_v5 = vld [vmem:[%s2955_s7 + $0x10] sm:$0x3] }
  0x16   : > { %v286_v6 = vrot.slane %v2958_v3, 1  ;;  %v287_v7 = vrot.slane %v2961_v4, 1  ;;  %v289_v8 = vrot.slane %v2964_v5, 1  ;;  %v2970_v9 = vld [vmem:[%s2955_s7 + $0x60] sm:$0xff]  ;;  %v2973_v10 = vld [vmem:[%s2955_s7 + $0x68] sm:$0xff]  ;;  %v2986_v17 = vld [vmem:[%s2955_s7 + $0x18] sm:$0xff] }
  0x17   : > { %v2976_v11 = vld [vmem:[%s2955_s7 + $0x70] sm:$0x3]  ;;  %v306_v12 = vrot.slane %v2970_v9, 1  ;;  %v2980_v13 = vrot.slane %v2973_v10, 1  ;;  %v2989_v18 = vld [vmem:[%s2955_s7 + $0x20] sm:$0xff]  ;;  %v609_v21 = vrot.slane %v2958_v3, 2 }
  0x18   : > { %v288_v14 = vsel %vm285_vm0, %v286_v6, %v287_v7  ;;  %v290_v15 = vsel %vm285_vm0, %v287_v7, %v289_v8  ;;  %v309_v16 = vrot.slane %v2976_v11, 1  ;;  %v2992_v19 = vld [vmem:[%s2955_s7 + $0x28] sm:$0x3]  ;;  %v610_v22 = vrot.slane %v2961_v4, 2  ;;  %v3001_v24 = vld [vmem:[%s2955_s7 + $0x78] sm:$0xff]  ;;  %v3004_v25 = vld [vmem:[%s2955_s7 + $0x80] sm:$0xff] }
  0x19   : > { %v342_v20 = vpack.c.bf16 %v290_v15, %v288_v14  ;;  %v2998_v23 = vsel %vm285_vm0, %v306_v12, %v2980_v13  ;;  %v3007_v26 = vld [vmem:[%s2955_s7 + $0x88] sm:$0x3]  ;;  %v291_v28 = vrot.slane %v2986_v17, 1  ;;  %v3013_v29 = vrot.slane %v2989_v18, 1  ;;  %v3017_v31 = vld [vmem:[%s2955_s7 + $0x30] sm:$0xff]  ;;  %v3020_v32 = vld [vmem:[%s2955_s7 + $0x38] sm:$0xff] }
  0x1a   : > { %v310_v27 = vsel %vm285_vm0, %v2980_v13, %v309_v16  ;;  %v294_v30 = vrot.slane %v2992_v19, 1  ;;  %v612_v33 = vrot.slane %v2964_v5, 2  ;;  %v614_v35 = vrot.slane %v2986_v17, 2  ;;  %v3027_v36 = vld [vmem:[%s2955_s7 + $0x40] sm:$0x3]  ;;  %v3030_v37 = vld [vmem:[%s2955_s7 + $0x90] sm:$0xff] }
  0x1b   : > { %2624 = vmatprep.mubr.msk.bf16.mxu0 %vm359_vm1, %v342_v20  ;;  %v346_v34 = vpack.c.bf16 %v310_v27, %v2998_v23  ;;  %v3033_v38 = vld [vmem:[%s2955_s7 + $0x98] sm:$0xff]  ;;  %v3037_v39 = vsel %vm285_vm0, %v291_v28, %v3013_v29  ;;  %v311_v41 = vrot.slane %v3001_v24, 1  ;;  %v3043_v42 = vrot.slane %v3004_v25, 1  ;;  %v3046_v43 = vld [vmem:[%s2955_s7 + $0xa0] sm:$0x3]  ;;  %v3049_v44 = vld [vmem:[%s2955_s7 + $0x48] sm:$0xff] }
  0x1c   : > { %v295_v40 = vsel %vm285_vm0, %v3013_v29, %v294_v30  ;;  %v314_v46 = vrot.slane %v3007_v26, 1  ;;  %v296_v47 = vrot.slane %v3017_v31, 1  ;;  %v3056_v48 = vrot.slane %v3020_v32, 1  ;;  %v3059_v49 = vld [vmem:[%s2955_s7 + $0x50] sm:$0xff]  ;;  %v3076_v55 = vld [vmem:[%s2955_s7 + $0x58] sm:$0x3] }
  0x1d   : > { %2632 = vmatprep.mubr.msk.bf16.mxu1 %vm359_vm1, %v346_v34  ;;  %v343_v45 = vpack.c.bf16 %v295_v40, %v3037_v39  ;;  %v3068_v51 = vsel %vm285_vm0, %v311_v41, %v3043_v42  ;;  %v299_v52 = vrot.slane %v3027_v36, 1  ;;  %v316_v53 = vrot.slane %v3030_v37, 1  ;;  %v3079_v56 = vld [vmem:[%s2955_s7 + $0xa8] sm:$0xff]  ;;  %v3091_v61 = vld [vmem:[%s2955_s7 + $0xb0] sm:$0xff]  ;;  %v3094_v62 = vld [vmem:[%s2955_s7 + $0xb8] sm:$0x3] }
  0x1e   : > { %v3073_v54 = vrot.slane %v3033_v38, 1  ;;  %v315_v57 = vsel %vm285_vm0, %v3043_v42, %v314_v46  ;;  %v3086_v58 = vsel %vm285_vm0, %v296_v47, %v3056_v48  ;;  %v319_v59 = vrot.slane %v3046_v43, 1 }
  0x1f   : > { %2625 = vmatmul.mubr.msk.bf16.vlgmr.msra.gmra.mxu0 %vm359_vm1, %v343_v45  ;;  %v301_v60 = vrot.slane %v3049_v44, 1  ;;  %v347_v63 = vpack.c.bf16 %v315_v57, %v3068_v51  ;;  %v300_v0 = vsel %vm285_vm0, %v3056_v48, %v299_v52  ;;  %v3105_v6 = vrot.slane %v3059_v49, 1 }
  0x20   : > { %2659 = vmatpush3.bf16.msra.mxu0 %v2946_v2  ;;  %v3102_v5 = vsel %vm285_vm0, %v316_v53, %v3073_v54  ;;  %v344_v7 = vpack.c.bf16 %v300_v0, %v3086_v58  ;;  %v320_v8 = vsel %vm285_vm0, %v3073_v54, %v319_v59  ;;  %v304_v12 = vrot.slane %v3076_v55, 1  ;;  %v3115_v2 = vld [vmem:[%s4026_s1 + $0x18] sm:$0xff]  }
  0x21   : > { %v321_v14 = vrot.slane %v3079_v56, 1  ;;  %2694 = vmatprep.subr.bf16.mxu0 %v3064_v50  ;;  %2633 = vmatmul.mubr.msk.bf16.vlgmr.msra.gmra.mxu1 %vm359_vm1, %v347_v63  ;;  %v348_v15 = vpack.c.bf16 %v320_v8, %v3102_v5  ;;  %v3122_v16 = vsel %vm285_vm0, %v301_v60, %v3105_v6  ;;  %v3125_v20 = vrot.slane %v3091_v61, 1 }
  0x22   : > { %v324_v27 = vrot.slane %v3094_v62, 1  ;;  %v3129_v28 = vrot.slane %v2989_v18, 2  ;;  %v617_v30 = vrot.slane %v2992_v19, 2  ;;  %2641 = vmatpush3.bf16.msra.mxu1 %v2939_v1  ;;  %2628 = vmatprep.mubr.msk.bf16.mxu0 %vm359_vm1, %v344_v7  ;;  %v305_v34 = vsel %vm285_vm0, %v3105_v6, %v304_v12 }
  0x23   : > { %v611_v40 = vsel %vm608_vm2, %v609_v21, %v610_v22  ;;  %2636 = vmatprep.mubr.msk.bf16.mxu1 %vm359_vm1, %v348_v15  ;;  %v345_v41 = vpack.c.bf16 %v305_v34, %v3122_v16  ;;  %v3145_v19 = vsel %vm285_vm0, %v321_v14, %v3125_v20  ;;  %v613_v45 = vsel %vm608_vm2, %v610_v22, %v612_v33  ;;  %v3212_v34 = vld [vmem:[%s2955_s7 + $0xa0] sm:$0x3] }
  0x24   : > { %4043 = vst [vmem:[#allocation2_spill] sm:$0xff] %v3129_v28  ;;  %v325_v1 = vsel %vm285_vm0, %v3125_v20, %v324_v27  ;;  %v665_v46 = vpack.c.bf16 %v613_v45, %v611_v40  ;;  %2676 = vmatprep.subr.bf16.mxu1 %v3115_v2  ;;  %v619_v21 = vrot.slane %v3017_v31, 2  ;;  %v3156_v52 = vrot.slane %v3020_v32, 2  ;;  %v3259_v45 = vld [vmem:[%s2955_s7 + $0xc0] sm:$0xff] }
  0x25   : > { %v349_v47 = vpack.c.bf16 %v325_v1, %v3145_v19  ;;  %v622_v53 = vrot.slane %v3027_v36, 2  ;;  %v251_v57 = vpack.c.bf16 %v2961_v4, %v2958_v3  ;;  %v629_v59 = vrot.slane %v2970_v9, 2  ;;  %4045 = vst [vmem:[#allocation4_spill] sm:$0xff] %v3259_v45 }
  0x26   : > { %v3164_v22 = vrot.slane %v2973_v10, 2  ;;  %v3171_v33 = vsel %vm608_vm2, %v614_v35, %v3129_v28  ;;  %v618_v36 = vsel %vm608_vm2, %v3129_v28, %v617_v30  ;;  %v632_v60 = vrot.slane %v2976_v11, 2  ;;  %v3205_v30 = vld [vmem:[%s4026_s1 + $0x30] sm:$0xff]  }
  0x27   : > { %2629 = vmatmul.mubr.msk.bf16.gmra.mxu0 %vm359_vm1, %v345_v41  ;;  %4044 = vst [vmem:[#allocation3_spill] sm:$0xff] %v3171_v33  ;;  %v3178_v3 = vsel %vm608_vm2, %v619_v21, %v3156_v52  ;;  %v623_v4 = vsel %vm608_vm2, %v3156_v52, %v622_v53  ;;  %v666_v35 = vpack.c.bf16 %v618_v36, %v3171_v33  ;;  %v624_v63 = vrot.slane %v3049_v44, 2 }
  0x28   : > { %2660 = vmatprep.mubr.msk.bf16.mxu0 %vm359_vm1, %v665_v46  ;;  %v667_v0 = vpack.c.bf16 %v623_v4, %v3178_v3  ;;  %v3188_v11 = vrot.slane %v3059_v49, 2  ;;  %v627_v7 = vrot.slane %v3076_v55, 2  ;;  %v3193_v8 = vsel %vm608_vm2, %v629_v59, %v3164_v22  ;;  %v3276_v59 = vld [vmem:[%s2955_s7 + $0xc8] sm:$0xff]  ;;  %v2412_v4 = vld [vmem:[%s2955_s7 + $0xd0] sm:$0x3] }
  0x29   : > { %2637 = vmatmul.mubr.msk.bf16.gmra.mxu1 %vm359_vm1, %v349_v47  ;;  %v633_v12 = vsel %vm608_vm2, %v3164_v22, %v632_v60  ;;  %v634_v14 = vrot.slane %v3001_v24, 2  ;;  %v3199_v15 = vrot.slane %v3004_v25, 2  ;;  %v637_v27 = vrot.slane %v3007_v26, 2  ;;  %4047 = vst [vmem:[#allocation6_spill] sm:$0xff] %v3276_v59 }
  0x2a   : > { %2642 = vmatprep.mubr.msk.bf16.mxu1 %vm359_vm1, %v251_v57  ;;  %v3209_v55 = vpack.c.bf16 %v2989_v18, %v2986_v17  ;;  %v3217_v40 = vpack.c.bf16 %v3020_v32, %v3017_v31  ;;  %v3221_v26 = vpack.c.bf16 %v3059_v49, %v3049_v44  ;;  %v3225_v41 = vpack.c.bf16 %v2973_v10, %v2970_v9  ;;  %v3240_v9 = vld [vmem:[%s4026_s1 + $0x28] sm:$0xff]   ;;  %v3243_v10 = vld [vmem:[%s2955_s7 + $0xb8] sm:$0x3] }
  0x2b   : > { %v3231_v17 = vsel %vm608_vm2, %v624_v63, %v3188_v11  ;;  %v628_v18 = vsel %vm608_vm2, %v3188_v11, %v627_v7  ;;  %v669_v31 = vpack.c.bf16 %v633_v12, %v3193_v8  ;;  %v639_v32 = vrot.slane %v3030_v37, 2  ;;  %v3273_v57 = vld [vmem:[%s2955_s7 + $0x28] sm:$0x3] }
  0x2c   : > { %v3247_v44 = vsel %vm608_vm2, %v634_v14, %v3199_v15  ;;  %v3251_v49 = vsel %vm608_vm2, %v3199_v15, %v637_v27  ;;  %v1052_v1 = vrot.slane %v3212_v34, 1  ;;  %v3265_v46 = vpack.c.bf16 %v3004_v25, %v3001_v24  ;;  %4046 = vst [vmem:[#allocation5_spill] sm:$0xff] %v3273_v57  ;;  %v3321_v14 = vld [vmem:[%s2955_s7 + $0x58] sm:$0x3]  ;;  %v3324_v27 = vld [vmem:[%s2955_s7 + $0x70] sm:$0x3] }
  0x2d   : > { %v642_v21 = vrot.slane %v3046_v43, 2  ;;  %v644_v47 = vrot.slane %v3079_v56, 2  ;;  %v3270_v53 = vrot.slane %v3091_v61, 2  ;;  %v668_v36 = vpack.c.bf16 %v628_v18, %v3231_v17  ;;  %v2394_v43 = vld [vmem:[%s2955_s7 + $0x40] sm:$0x3]  ;;  %4048 = vst [vmem:[#allocation7_spill] sm:$0xff] %v3321_v14 }
  0x2e   : > { %v3284_v24 = vpack.c.bf16 %v3033_v38, %v3030_v37  ;;  %v647_v25 = vrot.slane %v3094_v62, 2  ;;  %v1057_v60 = vrot.slane %v3243_v10, 1  ;;  %v3299_v37 = vsel %vm285_vm0, %v3073_v54, %v1052_v1 }
  0x2f   : > { %2661 = vmatmul.mubr.msk.bf16.vlgmr.msra.gmra.mxu0 %vm359_vm1, %v666_v35  ;;  %v3294_v35 = vpack.c.bf16 %v3091_v61, %v3079_v56  ;;  %v1027_v63 = vrot.slane %v3273_v57, 1  ;;  %v3312_v56 = vrot.slane %v3276_v59, 1  ;;  %v3318_v7 = vsel %vm608_vm2, %v644_v47, %v3270_v53 }
  0x30   : > { %2695 = vmatpush3.bf16.msra.mxu0 %v3064_v50  ;;  %2664 = vmatprep.mubr.msk.bf16.mxu0 %vm359_vm1, %v667_v0  ;;  %v3254_v50 = vrot.slane %v3033_v38, 2  ;;  %v1059_v38 = vrot.slane %v3259_v45, 1  ;;  %v3309_v0 = vsel %vm285_vm0, %v3125_v20, %v1057_v60  ;;  %v1032_v12 = vrot.slane %v2394_v43, 1 }
  0x31   : > { %2730 = vmatprep.subr.bf16.mxu0 %v3205_v30  ;;  %2643 = vmatmul.mubr.msk.bf16.vlgmr.msra.gmra.mxu1 %vm359_vm1, %v3209_v55  ;;  %v1062_v18 = vrot.slane %v2412_v4, 1  ;;  %v1242_v1 = vrot.slane %v2394_v43, 2  ;;  %v1269_v47 = vrot.slane %v3259_v45, 2  ;;  %v3339_v60 = vrot.slane %v3276_v59, 2 }
  0x32   : > { %2677 = vmatpush3.bf16.msra.mxu1 %v3115_v2  ;;  %2646 = vmatprep.mubr.msk.bf16.mxu1 %vm359_vm1, %v3217_v40  ;;  %v670_v2 = vpack.c.bf16 %v3251_v49, %v3247_v44  ;;  %v3304_v62 = vsel %vm608_vm2, %v639_v32, %v3254_v50  ;;  %v643_v61 = vsel %vm608_vm2, %v3254_v50, %v642_v21  ;;  %v1252_v21 = vrot.slane %v3324_v27, 2 }
  0x33   : > { %2712 = vmatprep.subr.bf16.mxu1 %v3240_v9  ;;  %v3329_v32 = vsel %vm608_vm2, %v3270_v53, %v647_v25  ;;  %v3333_v49 = vsel %vm285_vm0, %v1059_v38, %v3312_v56  ;;  %v1262_v25 = vrot.slane %v3212_v34, 2  ;;  %v3348_v38 = vsel %vm285_vm0, %v3013_v29, %v1027_v63 }
  0x34   : > { %v1037_v43 = vrot.slane %v3321_v14, 1  ;;  %v3355_v33 = vsel %vm608_vm2, %v3156_v52, %v1242_v1  ;;  %v671_v34 = vpack.c.bf16 %v643_v61, %v3304_v62  ;;  %v3372_v1 = vsel %vm285_vm0, %v3056_v48, %v1032_v12  ;;  %v3391_v61 = vld [vmem:[%s2955_s7 + $0xd8] sm:$0xff] }
  0x35   : > { %4050 = vst [vmem:[#allocation9_spill] sm:$0xff] %v3355_v33  ;;  %v1267_v63 = vrot.slane %v3243_v10, 2  ;;  %v3388_v12 = vsel %vm608_vm2, %v1269_v47, %v3339_v60  ;;  %v1272_v14 = vrot.slane %v2412_v4, 2  ;;  %4053 = vst [vmem:[#allocation12_spill] sm:$0xff] %v3391_v61  ;;  %v1684_v33 = vrot.slane %v3391_v61, 1 }
  0x36   : > { %v3399_v10 = vsel %vm285_vm0, %v3105_v6, %v1037_v43  ;;  %v2456_v47 = vld [vmem:[%s2955_s7 + $0x70] sm:$0x3]  ;;  %v1894_v59 = vrot.slane %v3391_v61, 2 }
  0x37   : > { %2665 = vmatmul.mubr.msk.bf16.gmra.mxu0 %vm359_vm1, %v668_v36  ;;  %v3343_v36 = vsel %vm285_vm0, %v3312_v56, %v1062_v18  ;;  %v3366_v18 = vsel %vm608_vm2, %v3164_v22, %v1252_v21  ;;  %v2450_v21 = vld [vmem:[%s2955_s7 + $0x40] sm:$0x3]  ;;  %v3403_v29 = vsel %vm608_vm2, %v3270_v53, %v1267_v63  ;;  %v3411_v4 = vsel %vm608_vm2, %v3339_v60, %v1272_v14 }
  0x38   : > { %2668 = vmatprep.mubr.msk.bf16.mxu0 %vm359_vm1, %v669_v31  ;;  %4049 = vst [vmem:[#allocation8_spill] sm:$0xff] %v3343_v36  ;;  %4051 = vst [vmem:[#allocation10_spill] sm:$0xff] %v3366_v18  ;;  %v3378_v31 = vsel %vm608_vm2, %v3254_v50, %v1262_v25  ;;  %v3394_v18 = vld [vmem:[%s2955_s7 + $0xe0] sm:$0xff]  ;;  %v2453_v25 = vld [vmem:[%s2955_s7 + $0x58] sm:$0x3]  ;;  %v1652_v43 = vrot.slane %v2450_v21, 1 }
  0x39   : > { %2647 = vmatmul.mubr.msk.bf16.gmra.mxu1 %vm359_vm1, %v3221_v26  ;;  %4052 = vst [vmem:[#allocation11_spill] sm:$0xff] %v3378_v31  ;;  %4054 = vst [vmem:[#allocation13_spill] sm:$0xff] %v3403_v29  ;;  %v2459_v36 = vld [vmem:[%s2955_s7 + $0x88] sm:$0x3]  ;;  %v1862_v29 = vrot.slane %v2450_v21, 2  ;;  %v1657_v28 = vrot.slane %v2453_v25, 1 }
  0x3a   : > { %2650 = vmatprep.mubr.msk.bf16.mxu1 %vm359_vm1, %v3225_v41  ;;  %v1867_v31 = vrot.slane %v2453_v25, 2  ;;  %v3421_v14 = vsel %vm285_vm0, %v3056_v48, %v1652_v43  ;;  %v1662_v61 = vrot.slane %v2456_v47, 1  ;;  %v1872_v45 = vrot.slane %v2456_v47, 2  ;;  %v2462_v48 = vld [vmem:[%s2955_s7 + $0xa0] sm:$0x3] }
  0x3b   : > { %v1667_v57 = vrot.slane %v2459_v36, 1  ;;  %v3427_v63 = vsel %vm608_vm2, %v3156_v52, %v1862_v29  ;;  %v3431_v21 = vsel %vm285_vm0, %v3105_v6, %v1657_v28  ;;  %v2465_v28 = vld [vmem:[%s2955_s7 + $0xb8] sm:$0x3]  ;;  %v1877_v52 = vrot.slane %v2459_v36, 2 }
  0x3c   : > { %4055 = vst [vmem:[#allocation14_spill] sm:$0xff] %v3431_v21  ;;  %v3448_v6 = vsel %vm285_vm0, %v2980_v13, %v1662_v61  ;;  %v3458_v43 = vsel %vm608_vm2, %v3164_v22, %v1872_v45  ;;  %v1672_v25 = vrot.slane %v2462_v48, 1  ;;  %v1882_v21 = vrot.slane %v2462_v48, 2  ;;  %v2471_v48 = vld [vmem:[%s2955_s7 + $0xe8] sm:$0x3] }
  0x3d   : > { %4056 = vst [vmem:[#allocation15_spill] sm:$0xff] %v3448_v6  ;;  %v3462_v47 = vsel %vm285_vm0, %v3043_v42, %v1667_v57  ;;  %v3470_v29 = vsel %vm608_vm2, %v3199_v15, %v1877_v52  ;;  %v1677_v6 = vrot.slane %v2465_v28, 1  ;;  %v1887_v22 = vrot.slane %v2465_v28, 2 }
  0x3e   : > { %v3476_v36 = vsel %vm285_vm0, %v3073_v54, %v1672_v25  ;;  %v3480_v61 = vsel %vm608_vm2, %v3254_v50, %v1882_v21  ;;  %v4057_v52 = vpack.c.bf16 %v3329_v32, %v3318_v7  ;;  %v4058_v32 = vpack.c.bf16 %v3348_v38, %v3037_v39 }
  0x3f   : > { %2669 = vmatmul.mubr.msk.bf16.gmra.mxu0 %vm359_vm1, %v670_v2  ;;  %v1709_v28 = vpack.c.bf16 %v3476_v36, %v3102_v5  ;;  %v1919_v57 = vpack.c.bf16 %v3480_v61, %v3304_v62  ;;  %v3493_v54 = vsel %vm285_vm0, %v3125_v20, %v1677_v6  ;;  %v3497_v50 = vsel %vm608_vm2, %v3270_v53, %v1887_v22 }
  0x40   : > { %2672 = vmatprep.mubr.msk.bf16.mxu0 %vm359_vm1, %v671_v34  ;;  %v3435_v34 = vsel %vm608_vm2, %v3188_v11, %v1867_v31  ;;  %v2468_v31 = vld [vmem:[%s2955_s7 + $0xd0] sm:$0x3]  ;;  %v1710_v21 = vpack.c.bf16 %v3493_v54, %v3145_v19  ;;  %v1920_v25 = vpack.c.bf16 %v3497_v50, %v3318_v7  ;;  %v4059_v38 = vrot.slane %v3394_v18, 1 }
  0x41   : > { %2651 = vmatmul.mubr.msk.bf16.gmra.mxu1 %vm359_vm1, %v3265_v46  ;;  %v1682_v45 = vrot.slane %v2468_v31, 1  ;;  %v1892_v2 = vrot.slane %v2468_v31, 2  ;;  %v1687_v22 = vrot.slane %v2471_v48, 1  ;;  %v1042_v53 = vrot.slane %v3324_v27, 1 }
  0x42   : > { %2654 = vmatprep.mubr.msk.bf16.mxu1 %vm359_vm1, %v3284_v24  ;;  %v3522_v6 = vsel %vm285_vm0, %v1684_v33, %v4059_v38  ;;  %v4061_v33 = vmov %v4059_v38  ;;  %v1082_v38 = vpack.c.bf16 %v3399_v10, %v3122_v16  ;;  %v2834_v10 = vld [vmem:[%s4026_s1 + $0x38] sm:$0xff]  }
  0x43   : > { %v3509_v31 = vsel %vm285_vm0, %v3312_v56, %v1682_v45  ;;  %v3513_v20 = vsel %vm608_vm2, %v3339_v60, %v1892_v2  ;;  %v2403_v56 = vld [vmem:[%s2955_s7 + $0x88] sm:$0x3]  ;;  %v4060_v45 = vrot.slane %v3394_v18, 2  ;;  %v1897_v2 = vrot.slane %v2471_v48, 2  ;;  %s3906_s7 = sadd.s32 %s2352_s29, %s2351_s15 }
  0x44   : > { %v1921_v39 = vpack.c.bf16 %v3513_v20, %v3388_v12  ;;  %v1043_v27 = vsel %vm285_vm0, %v2980_v13, %v1042_v53  ;;  %v4063_v53 = vld [vmem:[#allocation5_spill] sm:$0xff]  ;;  %s2353_s8 = sshll.u32 %s3906_s7, 2 }
  0x45   : > { %v3530_v60 = vsel %vm608_vm2, %v1894_v59, %v4060_v45  ;;  %v4062_v48 = vmov %v4060_v45  ;;  %v1047_v45 = vrot.slane %v2403_v56, 1  ;;  %s3935_s11 = scalar_lea.vmem %s4029_s4, %s2353_s8 }
  0x47   : > { %2673 = vmatmul.mubr.msk.bf16.gmra.mxu0 %vm359_vm1, %v4057_v52  ;;  %v1081_v52 = vpack.c.bf16 %v3372_v1, %v3086_v58  ;;  %v2835_v1 = vld [vmem:[%s4026_s1 + $0x40] sm:$0xff]  }
  0x48   : > { %2696 = vmatprep.mubr.msk.bf16.mxu0 %vm359_vm1, %v4058_v32  ;;  %v3539_v32 = vsel %vm285_vm0, %v4061_v33, %v1687_v22  ;;  %v4064_v33 = vld [vmem:[#allocation2_spill] sm:$0xff] }
  0x49   : > { %2655 = vmatmul.mubr.msk.bf16.gmra.mxu1 %vm359_vm1, %v3294_v35  ;;  %v1712_v59 = vpack.c.bf16 %v3539_v32, %v3522_v6 }
  0x4a   : > { %2678 = vmatprep.mubr.msk.bf16.mxu1 %vm359_vm1, %v3209_v55  ;;  %v3549_v55 = vsel %vm608_vm2, %v4062_v48, %v1897_v2  ;;  %v1048_v2 = vsel %vm285_vm0, %v3043_v42, %v1047_v45  ;;  %v1085_v42 = vpack.c.bf16 %v3299_v37, %v3102_v5  ;;  %v4065_v48 = vld [vmem:[#allocation4_spill] sm:$0xff]  ;;  %v4066_v37 = vld [vmem:[#allocation6_spill] sm:$0xff] }
  0x4b   : > { %v1922_v22 = vpack.c.bf16 %v3549_v55, %v3530_v60  ;;  %v1084_v13 = vpack.c.bf16 %v1048_v2, %v3068_v51  ;;  %v853_v45 = vpack.c.bf16 %v4066_v37, %v4065_v48  ;;  %v4069_v2 = vld [vmem:[#allocation3_spill] sm:$0xff]  ;;  %v4080_v48 = vpack.c.bf16 %v3411_v4, %v3388_v12 }
  0x4c   : > { %v4081_v37 = vpack.c.bf16 %v3421_v14, %v3086_v58 }
  0x4f   : > { %2697 = vmatmul.mubr.msk.bf16.vlgmr.msra.gmra.mxu0 %vm359_vm1, %v1081_v52  ;;  %v1237_v52 = vrot.slane %v4063_v53, 2 }
  0x50   : > { %2731 = vmatpush3.bf16.msra.mxu0 %v3205_v30  ;;  %2700 = vmatprep.mubr.msk.bf16.mxu0 %vm359_vm1, %v1082_v38  ;;  %v1083_v30 = vpack.c.bf16 %v1043_v27, %v2998_v23  ;;  %v4067_v27 = vld [vmem:[#allocation8_spill] sm:$0xff] }
  0x51   : > { %2766 = vmatprep.subr.bf16.mxu0 %v2835_v1  ;;  %2679 = vmatmul.mubr.msk.bf16.vlgmr.msra.gmra.mxu1 %vm359_vm1, %v3217_v40  ;;  %v1238_v38 = vsel %vm608_vm2, %v4064_v33, %v1237_v52  ;;  %v1257_v52 = vrot.slane %v2403_v56, 2 }
  0x52   : > { %2713 = vmatpush3.bf16.msra.mxu1 %v3240_v9  ;;  %2682 = vmatprep.mubr.msk.bf16.mxu1 %vm359_vm1, %v3221_v26  ;;  %v1086_v9 = vpack.c.bf16 %v3309_v0, %v3145_v19  ;;  %v4068_v0 = vpack.c.bf16 %v4067_v27, %v3333_v49 }
  0x53   : > { %2748 = vmatprep.subr.bf16.mxu1 %v2834_v10 }
  0x57   : > { %2701 = vmatmul.mubr.msk.bf16.gmra.mxu0 %vm359_vm1, %v1083_v30  ;;  %v1290_v30 = vpack.c.bf16 %v1238_v38, %v4069_v2 }
  0x58   : > { %2704 = vmatprep.mubr.msk.bf16.mxu0 %vm359_vm1, %v1084_v13  ;;  %v4070_v13 = vld [vmem:[#allocation7_spill] sm:$0xff] }
  0x59   : > { %2683 = vmatmul.mubr.msk.bf16.gmra.mxu1 %vm359_vm1, %v3225_v41 }
  0x5a   : > { %2686 = vmatprep.mubr.msk.bf16.mxu1 %vm359_vm1, %v3265_v46 }
  0x5f   : > { %2705 = vmatmul.mubr.msk.bf16.gmra.mxu0 %vm359_vm1, %v1085_v42  ;;  %v1247_v42 = vrot.slane %v4070_v13, 2 }
  0x60   : > { %2708 = vmatprep.mubr.msk.bf16.mxu0 %vm359_vm1, %v1086_v9 }
  0x61   : > { %2687 = vmatmul.mubr.msk.bf16.gmra.mxu1 %vm359_vm1, %v3284_v24  ;;  %v1248_v9 = vsel %vm608_vm2, %v3188_v11, %v1247_v42  ;;  %v1258_v11 = vsel %vm608_vm2, %v3199_v15, %v1257_v52  ;;  %v4075_v15 = vld [vmem:[#allocation13_spill] sm:$0xff] }
  0x62   : > { %2690 = vmatprep.mubr.msk.bf16.mxu1 %vm359_vm1, %v3294_v35  ;;  %v1292_v53 = vpack.c.bf16 %v1248_v9, %v3231_v17 }
  0x67   : > { %2709 = vmatmul.mubr.msk.bf16.gmra.mxu0 %vm359_vm1, %v4068_v0 }
  0x68   : > { %2732 = vmatprep.mubr.msk.bf16.mxu0 %vm359_vm1, %v3217_v40  ;;  %v4071_v40 = vld [vmem:[#allocation9_spill] sm:$0xff] }
  0x69   : > { %2691 = vmatmul.mubr.msk.bf16.gmra.mxu1 %vm359_vm1, %v853_v45  ;;  %v4072_v33 = vpack.c.bf16 %v4071_v40, %v3178_v3 }
  0x6a   : > { %2714 = vmatprep.mubr.msk.bf16.mxu1 %vm359_vm1, %v1290_v30 }
  0x6f   : > { %2733 = vmatmul.mubr.msk.bf16.vlgmr.msra.gmra.mxu0 %vm359_vm1, %v3221_v26  ;;  %v1294_v26 = vpack.c.bf16 %v1258_v11, %v3247_v44 }
  0x70   : > { %2767 = vmatpush3.bf16.msra.mxu0 %v2835_v1  ;;  %2736 = vmatprep.mubr.msk.bf16.mxu0 %vm359_vm1, %v3225_v41  ;;  %v4073_v41 = vld [vmem:[#allocation10_spill] sm:$0xff]  ;;  %v1296_v1 = vpack.c.bf16 %v4075_v15, %v3318_v7 }
  0x71   : > { %2715 = vmatmul.mubr.msk.bf16.vlgmr.msra.gmra.mxu1 %vm359_vm1, %v4072_v33  ;;  %v4074_v56 = vpack.c.bf16 %v4073_v41, %v3193_v8 }
  0x72   : > { %2749 = vmatpush3.bf16.msra.mxu1 %v2834_v10  ;;  %2718 = vmatprep.mubr.msk.bf16.mxu1 %vm359_vm1, %v1292_v53 }
  0x77   : > { %2737 = vmatmul.mubr.msk.bf16.gmra.mxu0 %vm359_vm1, %v3265_v46  ;;  %v4076_v46 = vld [vmem:[#allocation11_spill] sm:$0xff] }
  0x78   : > { %2740 = vmatprep.mubr.msk.bf16.mxu0 %vm359_vm1, %v3284_v24  ;;  %v4077_v10 = vpack.c.bf16 %v4076_v46, %v3304_v62  ;;  %v4078_v24 = vld [vmem:[#allocation12_spill] sm:$0xff] }
  0x79   : > { %2719 = vmatmul.mubr.msk.bf16.gmra.mxu1 %vm359_vm1, %v4074_v56  ;;  %v1478_v38 = vpack.c.bf16 %v3394_v18, %v4078_v24  ;;  %v4082_v18 = vpack.c.bf16 %v3435_v34, %v3231_v17  ;;  %v4088_v17 = vpack.c.bf16 %v3470_v29, %v3247_v44 }
  0x7a   : > { %2722 = vmatprep.mubr.msk.bf16.mxu1 %vm359_vm1, %v1294_v26 }
  0x7f   : > { %2741 = vmatmul.mubr.msk.bf16.gmra.mxu0 %vm359_vm1, %v3294_v35  ;;  %v4079_v35 = vpack.c.bf16 %v3427_v63, %v3178_v3  ;;  %v4083_v3 = vpack.c.bf16 %v3458_v43, %v3193_v8  ;;  %v4084_v63 = vld [vmem:[#allocation14_spill] sm:$0xff] }
  0x80   : > { %2744 = vmatprep.mubr.msk.bf16.mxu0 %vm359_vm1, %v853_v45  ;;  %v4085_v4 = vpack.c.bf16 %v4084_v63, %v3122_v16  ;;  %v4086_v45 = vld [vmem:[#allocation15_spill] sm:$0xff]  ;;  %v4089_v16 = vpack.c.bf16 %v3462_v47, %v3068_v51 }
  0x81   : > { %2723 = vmatmul.mubr.msk.bf16.gmra.mxu1 %vm359_vm1, %v4077_v10  ;;  %v4087_v58 = vpack.c.bf16 %v4086_v45, %v2998_v23  ;;  %v4090_v23 = vpack.c.bf16 %v3509_v31, %v3333_v49 }
  0x82   : > { %2726 = vmatprep.mubr.msk.bf16.mxu1 %vm359_vm1, %v1296_v1 }
  0x87   : > { %2745 = vmatmul.mubr.msk.bf16.gmra.mxu0 %vm359_vm1, %v1478_v38 }
  0x88   : > { %2768 = vmatprep.mubr.msk.bf16.mxu0 %vm359_vm1, %v4079_v35 }
  0x89   : > { %2727 = vmatmul.mubr.msk.bf16.gmra.mxu1 %vm359_vm1, %v4080_v48 }
  0x8a   : > { %2750 = vmatprep.mubr.msk.bf16.mxu1 %vm359_vm1, %v4081_v37 }
  0x8f   : > { %2769 = vmatmul.mubr.msk.bf16.vlgmr.msra.gmra.mxu0 %vm359_vm1, %v4082_v18 }
  0x90   : > { %2772 = vmatprep.mubr.msk.bf16.mxu0 %vm359_vm1, %v4083_v3 }
  0x91   : > { %2751 = vmatmul.mubr.msk.bf16.vlgmr.msra.gmra.mxu1 %vm359_vm1, %v4085_v4 }
  0x92   : > { %2754 = vmatprep.mubr.msk.bf16.mxu1 %vm359_vm1, %v4087_v58 }
  0x97   : > { %2773 = vmatmul.mubr.msk.bf16.gmra.mxu0 %vm359_vm1, %v4088_v17 }
  0x98   : > { %2776 = vmatprep.mubr.msk.bf16.mxu0 %vm359_vm1, %v1919_v57 }
  0x99   : > { %2755 = vmatmul.mubr.msk.bf16.gmra.mxu1 %vm359_vm1, %v4089_v16 }
  0x9a   : > { %2758 = vmatprep.mubr.msk.bf16.mxu1 %vm359_vm1, %v1709_v28 }
  0x9f   : > { %2777 = vmatmul.mubr.msk.bf16.gmra.mxu0 %vm359_vm1, %v1920_v25 }
  0xa0   : > { %2780 = vmatprep.mubr.msk.bf16.mxu0 %vm359_vm1, %v1921_v39 }
  0xa1   : > { %2759 = vmatmul.mubr.msk.bf16.gmra.mxu1 %vm359_vm1, %v1710_v21 }
  0xa2   : > { %2762 = vmatprep.mubr.msk.bf16.mxu1 %vm359_vm1, %v4090_v23 }
  0xa7   : > { %2781 = vmatmul.mubr.msk.bf16.gmra.mxu0 %vm359_vm1, %v1922_v22 }
  0xa9   : > { %2763 = vmatmul.mubr.msk.bf16.gmra.mxu1 %vm359_vm1, %v1712_v59 }
  0xdf   : > { %v2626_v51 = vpop.f32.mrf.mxu0 }
  0xe1   : > { %v418_v5 = vpop.f32.mrf.mxu0  ;;  %v2634_v19 = vpop.f32.mrf.mxu1 }
  0xe3   : > { %v2627_v8 = vpop.f32.mrf.mxu0  ;;  %v450_v44 = vpop.f32.mrf.mxu1 }
  0xe5   : > { %v421_v62 = vpop.f32.mrf.mxu0  ;;  %v2635_v7 = vpop.f32.mrf.mxu1 }
  0xe7   : > { %v2630_v49 = vpop.f32.mrf.mxu0  ;;  %v453_v12 = vpop.f32.mrf.mxu1 }
  0xe9   : > { %v434_v14 = vpop.f32.mrf.mxu0  ;;  %v2638_v34 = vpop.f32.mrf.mxu1 }
  0xeb   : > { %v2631_v47 = vpop.f32.mrf.mxu0  ;;  %v466_v29 = vpop.f32.mrf.mxu1 }
  0xed   : > { %v437_v43 = vpop.f32.mrf.mxu0  ;;  %v2639_v61 = vpop.f32.mrf.mxu1 }
  0xef   : > { %v2662_v57 = vpop.f32.mrf.mxu0  ;;  %v3709_v36 = vpop.f32.mrf.mxu1 }
  0xf1   : > { %v740_v28 = vpop.f32.mrf.mxu0  ;;  %v2644_v54 = vpop.f32.mrf.mxu1 }
  0xf2   : > { %v554_v50 = vadd.f32 %v2644_v54, %v2626_v51 }
  0xf3   : > { %v2663_v21 = vpop.f32.mrf.mxu0  ;;  %v545_v25 = vpop.f32.mrf.mxu1 }
  0xf4   : > { %v3711_v31 = vadd.f32 %v2662_v57, %v554_v50  ;;  %v546_v20 = vadd.f32 %v545_v25, %v418_v5 }
  0xf5   : > { %v743_v39 = vpop.f32.mrf.mxu0  ;;  %v2645_v6 = vpop.f32.mrf.mxu1 }
  0xf6   : > { %v3713_v60 = vadd.f32 %v740_v28, %v546_v20  ;;  %v557_v32 = vadd.f32 %v2645_v6, %v2627_v8 }
  0xf7   : > { %v2666_v59 = vpop.f32.mrf.mxu0  ;;  %v548_v55 = vpop.f32.mrf.mxu1 }
  0xf8   : > { %v3715_v22 = vadd.f32 %v2663_v21, %v557_v32  ;;  %v549_v27 = vadd.f32 %v548_v55, %v421_v62 }
  0xf9   : > { %v756_v0 = vpop.f32.mrf.mxu0  ;;  %v2648_v2 = vpop.f32.mrf.mxu1 }
  0xfa   : > { %v3717_v30 = vadd.f32 %v743_v39, %v549_v27  ;;  %v570_v13 = vadd.f32 %v2648_v2, %v2630_v49 }
  0xfb   : > { %v2667_v42 = vpop.f32.mrf.mxu0  ;;  %v561_v9 = vpop.f32.mrf.mxu1 }
  0xfc   : > { %v3719_v53 = vadd.f32 %v2666_v59, %v570_v13  ;;  %v562_v52 = vadd.f32 %v561_v9, %v434_v14 }
  0xfd   : > { %v759_v40 = vpop.f32.mrf.mxu0  ;;  %v2649_v33 = vpop.f32.mrf.mxu1 }
  0xfe   : > { %v3721_v11 = vadd.f32 %v756_v0, %v562_v52  ;;  %v573_v26 = vadd.f32 %v2649_v33, %v2631_v47 }
  0xff   : > { %v2670_v41 = vpop.f32.mrf.mxu0  ;;  %v564_v56 = vpop.f32.mrf.mxu1 }
 0x100   : > { %v3723_v15 = vadd.f32 %v2667_v42, %v573_v26  ;;  %v565_v1 = vadd.f32 %v564_v56, %v437_v43 }
 0x101   : > { %v772_v46 = vpop.f32.mrf.mxu0  ;;  %v2652_v10 = vpop.f32.mrf.mxu1 }
 0x102   : > { %v3725_v24 = vadd.f32 %v759_v40, %v565_v1  ;;  %v586_v38 = vadd.f32 %v2652_v10, %v2634_v19 }
 0x103   : > { %v2671_v35 = vpop.f32.mrf.mxu0  ;;  %v577_v48 = vpop.f32.mrf.mxu1 }
 0x104   : > { %v3727_v37 = vadd.f32 %v2670_v41, %v586_v38  ;;  %v578_v18 = vadd.f32 %v577_v48, %v450_v44 }
 0x105   : > { %v775_v3 = vpop.f32.mrf.mxu0  ;;  %v2653_v63 = vpop.f32.mrf.mxu1 }
 0x106   : > { %v3729_v4 = vadd.f32 %v772_v46, %v578_v18  ;;  %v589_v45 = vadd.f32 %v2653_v63, %v2635_v7 }
 0x107   : > { %v2674_v58 = vpop.f32.mrf.mxu0  ;;  %v580_v17 = vpop.f32.mrf.mxu1 }
 0x108   : > { %v3731_v16 = vadd.f32 %v2671_v35, %v589_v45  ;;  %v581_v23 = vadd.f32 %v580_v17, %v453_v12 }
 0x109   : > { %v788_v51 = vpop.f32.mrf.mxu0  ;;  %v2656_v5 = vpop.f32.mrf.mxu1 }
 0x10a   : > { %v3733_v8 = vadd.f32 %v775_v3, %v581_v23  ;;  %v602_v19 = vadd.f32 %v2656_v5, %v2638_v34 }
 0x10b   : > { %v2675_v62 = vpop.f32.mrf.mxu0  ;;  %v593_v49 = vpop.f32.mrf.mxu1 }
 0x10c   : > { %v3735_v14 = vadd.f32 %v2674_v58, %v602_v19  ;;  %v594_v44 = vadd.f32 %v593_v49, %v466_v29 }
 0x10d   : > { %v791_v47 = vpop.f32.mrf.mxu0  ;;  %v2657_v43 = vpop.f32.mrf.mxu1 }
 0x10e   : > { %v3737_v57 = vadd.f32 %v788_v51, %v594_v44  ;;  %v605_v7 = vadd.f32 %v2657_v43, %v2639_v61 }
 0x10f   : > { %v3739_v28 = vpop.f32.mrf.mxu0  ;;  %v596_v54 = vpop.f32.mrf.mxu1 }
 0x110   : > { %v3741_v50 = vadd.f32 %v2675_v62, %v605_v7  ;;  %v597_v12 = vadd.f32 %v596_v54, %v3709_v36 }
 0x111   : > { %v3744_v21 = vpop.f32.mrf.mxu0  ;;  %v2680_v34 = vpop.f32.mrf.mxu1 }
 0x112   : > { %v3746_v25 = vadd.f32 %v791_v47, %v597_v12 }
 0x113   : > { %v3748_v20 = vpop.f32.mrf.mxu0  ;;  %v921_v29 = vpop.f32.mrf.mxu1 }
 0x115   : > { %v3750_v39 = vpop.f32.mrf.mxu0  ;;  %v2681_v6 = vpop.f32.mrf.mxu1 }
 0x117   : > { %v3752_v32 = vpop.f32.mrf.mxu0  ;;  %v924_v61 = vpop.f32.mrf.mxu1 }
 0x119   : > { %v3754_v59 = vpop.f32.mrf.mxu0  ;;  %v2684_v55 = vpop.f32.mrf.mxu1 }
 0x11b   : > { %v3756_v27 = vpop.f32.mrf.mxu0  ;;  %v937_v36 = vpop.f32.mrf.mxu1 }
 0x11d   : > { %v3758_v0 = vpop.f32.mrf.mxu0  ;;  %v2685_v2 = vpop.f32.mrf.mxu1 }
 0x11f   : > { %v3760_v13 = vpop.f32.mrf.mxu0  ;;  %v940_v42 = vpop.f32.mrf.mxu1 }
 0x121   : > { %v3762_v9 = vpop.f32.mrf.mxu0  ;;  %v2688_v52 = vpop.f32.mrf.mxu1 }
 0x123   : > { %v3764_v40 = vpop.f32.mrf.mxu0  ;;  %v953_v33 = vpop.f32.mrf.mxu1 }
 0x125   : > { %v3766_v26 = vpop.f32.mrf.mxu0  ;;  %v2689_v41 = vpop.f32.mrf.mxu1 }
 0x127   : > { %v3768_v56 = vpop.f32.mrf.mxu0  ;;  %v956_v1 = vpop.f32.mrf.mxu1 }
 0x129   : > { %v3770_v46 = vpop.f32.mrf.mxu0  ;;  %v2692_v10 = vpop.f32.mrf.mxu1 }
 0x12b   : > { %v3772_v38 = vpop.f32.mrf.mxu0  ;;  %v969_v35 = vpop.f32.mrf.mxu1 }
 0x12d   : > { %v3774_v48 = vpop.f32.mrf.mxu0  ;;  %v2693_v18 = vpop.f32.mrf.mxu1 }
 0x12e   : > { %4091 = vst [vmem:[#allocation5_spill] sm:$0xff] %v3774_v48 }
 0x12f   : > { %v3776_v3 = vpop.f32.mrf.mxu0  ;;  %v972_v63 = vpop.f32.mrf.mxu1 }
 0x131   : > { %v3778_v45 = vpop.f32.mrf.mxu0  ;;  %v2716_v58 = vpop.f32.mrf.mxu1 }
 0x133   : > { %v3780_v17 = vpop.f32.mrf.mxu0  ;;  %v1365_v23 = vpop.f32.mrf.mxu1 }
 0x134   : > { %4092 = vst [vmem:[#allocation2_spill] sm:$0xff] %v3780_v17 }
 0x135   : > { %v3782_v51 = vpop.f32.mrf.mxu0  ;;  %v2717_v5 = vpop.f32.mrf.mxu1 }
 0x136   : > { %4093 = vst [vmem:[#allocation4_spill] sm:$0xff] %v3782_v51 }
 0x137   : > { %v3784_v19 = vpop.f32.mrf.mxu0  ;;  %v1368_v62 = vpop.f32.mrf.mxu1 }
 0x138   : > { %4094 = vst [vmem:[#allocation6_spill] sm:$0xff] %v3784_v19 }
 0x139   : > { %v3786_v49 = vpop.f32.mrf.mxu0  ;;  %v3788_v44 = vpop.f32.mrf.mxu1 }
 0x13a   : > { %4095 = vst [vmem:[#allocation8_spill] sm:$0xff] %v3786_v49 }
 0x13b   : > { %v3790_v47 = vpop.f32.mrf.mxu0  ;;  %v3792_v43 = vpop.f32.mrf.mxu1 }
 0x13c   : > { %4096 = vst [vmem:[#allocation3_spill] sm:$0xff] %v3790_v47  ;;  %4097 = vst [vmem:[#allocation7_spill] sm:$0xff] %v3792_v43 }
 0x13d   : > { %v3794_v7 = vpop.f32.mrf.mxu0  ;;  %v3796_v54 = vpop.f32.mrf.mxu1 }
 0x13e   : > { %4098 = vst [vmem:[#allocation9_spill] sm:$0xff] %v3794_v7  ;;  %4099 = vst [vmem:[#allocation10_spill] sm:$0xff] %v3796_v54  ;;  %v986_v7 = vadd.f32 %v2680_v34, %v3711_v31  ;;  %v990_v31 = vadd.f32 %v2684_v55, %v3719_v53  ;;  %v988_v34 = vadd.f32 %v937_v36, %v3721_v11 }
 0x13f   : > { %v3798_v12 = vpop.f32.mrf.mxu0  ;;  %v3800_v51 = vpop.f32.mrf.mxu1  ;;  %v996_v55 = vadd.f32 %v969_v35, %v3737_v57 }
 0x140   : > { %4100 = vst [vmem:[#allocation13_spill] sm:$0xff] %v3798_v12  ;;  %4101 = vst [vmem:[#allocation11_spill] sm:$0xff] %v3800_v51  ;;  %v984_v12 = vadd.f32 %v921_v29, %v3713_v60  ;;  %v991_v29 = vadd.f32 %v2685_v2, %v3723_v15  ;;  %v995_v15 = vadd.f32 %v2689_v41, %v3731_v16 }
 0x141   : > { %v3802_v17 = vpop.f32.mrf.mxu0  ;;  %v3804_v19 = vpop.f32.mrf.mxu1  ;;  %v1230_v41 = vadd.f32 %v3770_v46, %v996_v55  ;;  %v3892_v46 = vld [vmem:[%s4027_s2] ss:$0 sm:$0xff] }
 0x142   : > { %4102 = vst [vmem:[#allocation12_spill] sm:$0xff] %v3802_v17  ;;  %4103 = vst [vmem:[#allocation14_spill] sm:$0xff] %v3804_v19  ;;  %v987_v17 = vadd.f32 %v2681_v6, %v3715_v22  ;;  %v985_v19 = vadd.f32 %v924_v61, %v3717_v30  ;;  %v1218_v60 = vadd.f32 %v3744_v21, %v984_v12 }
 0x143   : > { %v3806_v49 = vpop.f32.mrf.mxu0  ;;  %v3808_v48 = vpop.f32.mrf.mxu1  ;;  %v989_v22 = vadd.f32 %v940_v42, %v3725_v24  ;;  %v994_v30 = vadd.f32 %v2688_v52, %v3727_v37  ;;  %v993_v24 = vadd.f32 %v956_v1, %v3733_v8  ;;  %v998_v37 = vadd.f32 %v2692_v10, %v3735_v14 }
 0x144   : > { %4104 = vst [vmem:[#allocation15_spill] sm:$0xff] %v3806_v49  ;;  %4105 = vst [vmem:[#allocation16_spill] sm:$0xff] %v3808_v48  ;;  %v1221_v53 = vadd.f32 %v3748_v20, %v987_v17  ;;  %v1219_v11 = vadd.f32 %v3750_v39, %v985_v19  ;;  %v1224_v20 = vadd.f32 %v3752_v32, %v990_v31 }
 0x145   : > { %v3810_v47 = vpop.f32.mrf.mxu0  ;;  %v3812_v43 = vpop.f32.mrf.mxu1  ;;  %v1222_v39 = vadd.f32 %v3754_v59, %v988_v34  ;;  %v1428_v2 = vadd.f32 %v1365_v23, %v1218_v60  ;;  %v1225_v52 = vadd.f32 %v3756_v27, %v991_v29  ;;  %v1223_v16 = vadd.f32 %v3758_v0, %v989_v22 }
 0x146   : > { %4106 = vst [vmem:[#allocation17_spill] sm:$0xff] %v3810_v47  ;;  %v1220_v47 = vadd.f32 %v3739_v28, %v986_v7  ;;  %v992_v28 = vadd.f32 %v953_v33, %v3729_v4  ;;  %v999_v4 = vadd.f32 %v2693_v18, %v3741_v50  ;;  %v1228_v8 = vadd.f32 %v3760_v13, %v994_v30 }
 0x147   : > { %v3815_v54 = vpop.f32.mrf.mxu0  ;;  %v3818_v51 = vpop.f32.mrf.mxu1  ;;  %v997_v14 = vadd.f32 %v972_v63, %v3746_v25  ;;  %v1431_v32 = vadd.f32 %v2717_v5, %v1221_v53  ;;  %v1429_v59 = vadd.f32 %v1368_v62, %v1219_v11  ;;  %v1229_v0 = vadd.f32 %v3764_v40, %v995_v15  ;;  %v4109_v63 = vld [vmem:[#allocation5_spill] sm:$0xff]  ;;  %v4110_v40 = vld [vmem:[#allocation7_spill] sm:$0xff]  ;;  %v4114_v62 = vld [vmem:[#allocation4_spill] sm:$0xff] }
 0x148   : > { %4107 = vst [vmem:[#allocation18_spill] sm:$0xff] %v3815_v54  ;;  %v1430_v21 = vadd.f32 %v2716_v58, %v1220_v47  ;;  %v1226_v57 = vadd.f32 %v3762_v9, %v992_v28  ;;  %v1227_v13 = vadd.f32 %v3766_v26, %v993_v24  ;;  %v1232_v25 = vadd.f32 %v3768_v56, %v998_v37  ;;  %v4111_v26 = vld [vmem:[#allocation10_spill] sm:$0xff]  ;;  %v4112_v56 = vld [vmem:[#allocation11_spill] sm:$0xff] }
 0x149   : > { %v3822_v49 = vpop.f32.mrf.mxu0  ;;  %v3825_v48 = vpop.f32.mrf.mxu1  ;;  %v3877_v10 = vadd.f32 %v3772_v38, %v999_v4  ;;  %v1609_v9 = vadd.f32 %v3778_v45, %v1428_v2  ;;  %v1434_v35 = vadd.f32 %v3788_v44, %v1224_v20  ;;  %v3882_v58 = vadd.f32 %v4109_v63, %v997_v14  ;;  %v4113_v45 = vld [vmem:[#allocation2_spill] sm:$0xff]  ;;  %v4118_v20 = vld [vmem:[#allocation8_spill] sm:$0xff]  ;;  %v4120_v4 = vld [vmem:[#allocation9_spill] sm:$0xff] }
 0x14a   : > { %v1611_v50 = vadd.f32 %v3776_v3, %v1430_v21  ;;  %v1432_v17 = vadd.f32 %v4110_v40, %v1222_v39  ;;  %v1435_v23 = vadd.f32 %v4111_v26, %v1225_v52  ;;  %v1433_v5 = vadd.f32 %v4112_v56, %v1223_v16  ;;  %v4115_v31 = vld [vmem:[#allocation14_spill] sm:$0xff]  ;;  %v4119_v39 = vld [vmem:[#allocation3_spill] sm:$0xff] }
 0x14b   : > { %v3830_v54 = vpop.f32.mrf.mxu0  ;;  %v3836_v6 = vpop.f32.mrf.mxu1  ;;  %v1612_v19 = vadd.f32 %v4113_v45, %v1431_v32  ;;  %v1610_v44 = vadd.f32 %v4114_v62, %v1429_v59  ;;  %v1438_v34 = vadd.f32 %v4115_v31, %v1228_v8  ;;  %v4116_v60 = vld [vmem:[#allocation16_spill] sm:$0xff]  ;;  %v1439_v22 = vadd.f32 %v3812_v43, %v1229_v0  ;;  %v3903_v53 = vld [vmem:[%s4028_s3] ss:$0 sm:$0xff]  ;;  %v4121_v32 = vld [vmem:[#allocation13_spill] sm:$0xff] }
 0x14c   : > { %v1436_v29 = vadd.f32 %v4116_v60, %v1226_v57  ;;  %v1437_v30 = vadd.f32 %v3818_v51, %v1227_v13  ;;  %v4117_v28 = vld [vmem:[#allocation6_spill] sm:$0xff]  ;;  %v1613_v43 = vadd.f32 %v4118_v20, %v1432_v17  ;;  %v1616_v51 = vadd.f32 %v4119_v39, %v1435_v23  ;;  %v4123_v13 = vld [vmem:[#allocation15_spill] sm:$0xff] }
 0x14d   : > { %v3847_v61 = vpop.f32.mrf.mxu0  ;;  %v3853_v36 = vpop.f32.mrf.mxu1  ;;  %v1615_v21 = vadd.f32 %v4117_v28, %v1434_v35  ;;  %v1614_v2 = vadd.f32 %v4120_v4, %v1433_v5  ;;  %v1619_v59 = vadd.f32 %v4121_v32, %v1438_v34  ;;  %v1440_v26 = vadd.f32 %v3836_v6, %v1230_v41 }
 0x14f   : > { %v2770_v42 = vpop.f32.mrf.mxu0  ;;  %v3862_v33 = vpop.f32.mrf.mxu1  ;;  %v4125_v40 = vld [vmem:[#allocation18_spill] sm:$0xff] }
 0x151   : > { %v1990_v27 = vpop.f32.mrf.mxu0  ;;  %v2752_v1 = vpop.f32.mrf.mxu1 }
 0x152   : > { %v1845_v18 = vadd.f32 %v2752_v1, %v1611_v50  ;;  %v3920_v1 = vadd.f32 %v4123_v13, %v1439_v22 }
 0x153   : > { %v2771_v3 = vpop.f32.mrf.mxu0  ;;  %v1780_v38 = vpop.f32.mrf.mxu1 }
 0x154   : > { %v2055_v47 = vadd.f32 %v2770_v42, %v1845_v18  ;;  %v1843_v7 = vadd.f32 %v1780_v38, %v1609_v9  ;;  %v1442_v42 = vadd.f32 %v3825_v48, %v1232_v25  ;;  %v4124_v9 = vld [vmem:[#allocation17_spill] sm:$0xff] }
 0x155   : > { %v1993_v12 = vpop.f32.mrf.mxu0  ;;  %v2753_v11 = vpop.f32.mrf.mxu1  ;;  %v3923_v35 = vadd.f32 %v4124_v9, %v1437_v30 }
 0x156   : > { %v2078_v15 = vmul.f32 %v3892_v46, %v2055_v47  ;;  %v2053_v24 = vadd.f32 %v1990_v27, %v1843_v7  ;;  %v1846_v37 = vadd.f32 %v2753_v11, %v1612_v19  ;;  %v4122_v27 = vld [vmem:[#allocation12_spill] sm:$0xff]  ;;  %v3929_v17 = vadd.f32 %v4125_v40, %v1442_v42 }
 0x157   : > { %v2774_v55 = vpop.f32.mrf.mxu0  ;;  %v1783_v52 = vpop.f32.mrf.mxu1  ;;  %v3917_v0 = vadd.f32 %v4122_v27, %v1436_v29 }
 0x158   : > { %v2101_v16 = vadd.f32 %v3903_v53, %v2078_v15  ;;  %v2076_v8 = vmul.f32 %v3892_v46, %v2053_v24  ;;  %v2056_v14 = vadd.f32 %v2771_v3, %v1846_v37  ;;  %v1844_v57 = vadd.f32 %v1783_v52, %v1610_v44 }
 0x159   : > { %v2006_v50 = vpop.f32.mrf.mxu0  ;;  %v2756_v48 = vpop.f32.mrf.mxu1 }
 0x15a   : > { %vm2117_vm4 = vcmp.ge.f32.partialorder %v2101_v16, 0.0  ;;  %v2133_v25 = vmul.f32 0.01, %v2101_v16  ;;  %v2099_v18 = vadd.f32 %v3903_v53, %v2076_v8  ;;  %v2079_v3 = vmul.f32 %v3892_v46, %v2056_v14 }
 0x15b   : > { %v2775_v63 = vpop.f32.mrf.mxu0  ;;  %v2054_v23 = vadd.f32 %v1993_v12, %v1844_v57  ;;  %v1849_v56 = vadd.f32 %v2756_v48, %v1615_v21  ;;  %v1796_v5 = vpop.f32.mrf.mxu1  ;;  %v3944_v21 = vadd.f32 %v3822_v49, %v1440_v26  ;;  %v1443_v8 = vadd.f32 %v3853_v36, %v3877_v10 }
 0x15c   : > { %v2149_v38 = vsel %vm2117_vm4, %v2101_v16, %v2133_v25  ;;  %vm2115_vm5 = vcmp.ge.f32.partialorder %v2099_v18, 0.0  ;;  %v2131_v45 = vmul.f32 0.01, %v2099_v18  ;;  %v2102_v19 = vadd.f32 %v3903_v53, %v2079_v3 }
 0x15d   : > { %v2009_v62 = vpop.f32.mrf.mxu0  ;;  %v2527_v44 = vpack.c.bf16 %v2149_v38, %v2149_v38  ;;  %v2077_v47 = vmul.f32 %v3892_v46, %v2054_v23  ;;  %v2059_v7 = vadd.f32 %v2774_v55, %v1849_v56  ;;  %v1847_v6 = vadd.f32 %v1796_v5, %v1613_v43  ;;  %v2757_v41 = vpop.f32.mrf.mxu1 }
 0x15e   : > { %v2147_v12 = vsel %vm2115_vm5, %v2099_v18, %v2131_v45  ;;  %vm2118_vm6 = vcmp.ge.f32.partialorder %v2102_v19, 0.0  ;;  %v2134_v31 = vmul.f32 0.01, %v2102_v19  ;;  %v1850_v34 = vadd.f32 %v2757_v41, %v1616_v51 }
 0x15f   : > { %v2778_v60 = vpop.f32.mrf.mxu0  ;;  %2230 = vst.msk [vmem:[%s3935_s11 + $0x8] sm:$0xf] %vm2227_vm3, %v2527_v44  ;;  %v2525_v29 = vpack.c.bf16 %v2147_v12, %v2147_v12  ;;  %v2100_v22 = vadd.f32 %v3903_v53, %v2077_v47  ;;  %v2082_v30 = vmul.f32 %v3892_v46, %v2059_v7  ;;  %v2057_v11 = vadd.f32 %v2006_v50, %v1847_v6  ;;  %v1799_v28 = vpop.f32.mrf.mxu1 }
 0x160   : > { %v2150_v15 = vsel %vm2118_vm6, %v2102_v19, %v2134_v31  ;;  %v2060_v24 = vadd.f32 %v2775_v63, %v1850_v34  ;;  %v1848_v37 = vadd.f32 %v1799_v28, %v1614_v2 }
 0x161   : > { %v2022_v55 = vpop.f32.mrf.mxu0  ;;  %2228 = vst.msk [vmem:[%s3935_s11] sm:$0xf] %vm2227_vm3, %v2525_v29  ;;  %v2528_v20 = vpack.c.bf16 %v2150_v15, %v2150_v15  ;;  %vm2116_vm7 = vcmp.ge.f32.partialorder %v2100_v22, 0.0  ;;  %v2132_v43 = vmul.f32 0.01, %v2100_v22  ;;  %v2105_v39 = vadd.f32 %v3903_v53, %v2082_v30  ;;  %v2760_v51 = vpop.f32.mrf.mxu1 }
 0x162   : > { %v2080_v4 = vmul.f32 %v3892_v46, %v2057_v11  ;;  %v2083_v42 = vmul.f32 %v3892_v46, %v2060_v24  ;;  %v2058_v52 = vadd.f32 %v2009_v62, %v1848_v37  ;;  %v1853_v49 = vadd.f32 %v2760_v51, %v1619_v59 }
 0x163   : > { %v2779_v16 = vpop.f32.mrf.mxu0  ;;  %2231 = vst.msk [vmem:[%s3935_s11 + $0xc] sm:$0xf] %vm2227_vm3, %v2528_v20  ;;  %v2148_v2 = vsel %vm2116_vm7, %v2100_v22, %v2132_v43  ;;  %vm2121_vm8 = vcmp.ge.f32.partialorder %v2105_v39, 0.0  ;;  %v2137_v14 = vmul.f32 0.01, %v2105_v39  ;;  %v1812_v57 = vpop.f32.mrf.mxu1  ;;  %v1441_v59 = vadd.f32 %v3862_v33, %v3882_v58 }
 0x164   : > { %v2526_v50 = vpack.c.bf16 %v2148_v2, %v2148_v2  ;;  %v2103_v32 = vadd.f32 %v3903_v53, %v2080_v4  ;;  %v2106_v27 = vadd.f32 %v3903_v53, %v2083_v42  ;;  %v2081_v13 = vmul.f32 %v3892_v46, %v2058_v52 }
 0x165   : > { %v2025_v9 = vpop.f32.mrf.mxu0  ;;  %v2153_v48 = vsel %vm2121_vm8, %v2105_v39, %v2137_v14  ;;  %v2063_v36 = vadd.f32 %v2778_v60, %v1853_v49  ;;  %v1851_v10 = vadd.f32 %v1812_v57, %v3917_v0  ;;  %v2761_v25 = vpop.f32.mrf.mxu1  ;;  %v1624_v58 = vadd.f32 %v3830_v54, %v1443_v8 }
 0x166   : > { %2229 = vst.msk [vmem:[%s3935_s11 + $0x4] sm:$0xf] %vm2227_vm3, %v2526_v50  ;;  %v2531_v18 = vpack.c.bf16 %v2153_v48, %v2153_v48  ;;  %vm2119_vm9 = vcmp.ge.f32.partialorder %v2103_v32, 0.0  ;;  %v2135_v3 = vmul.f32 0.01, %v2103_v32  ;;  %vm2122_vm10 = vcmp.ge.f32.partialorder %v2106_v27, 0.0 }
 0x167   : > { %v2782_v63 = vpop.f32.mrf.mxu0  ;;  %v2138_v40 = vmul.f32 0.01, %v2106_v27  ;;  %v2104_v26 = vadd.f32 %v3903_v53, %v2081_v13  ;;  %v2086_v23 = vmul.f32 %v3892_v46, %v2063_v36  ;;  %v2061_v56 = vadd.f32 %v2022_v55, %v1851_v10  ;;  %v1815_v33 = vpop.f32.mrf.mxu1 }
 0x168   : > { %2234 = vst.msk [vmem:[%s3935_s11 + $0x18] sm:$0xf] %vm2227_vm3, %v2531_v18  ;;  %v2151_v0 = vsel %vm2119_vm9, %v2103_v32, %v2135_v3  ;;  %v1854_v5 = vadd.f32 %v2761_v25, %v3920_v1  ;;  %v1852_v38 = vadd.f32 %v1815_v33, %v3923_v35  ;;  %v1622_v12 = vadd.f32 %v3847_v61, %v1441_v59 }
 0x169   : > { %v2529_v45 = vpack.c.bf16 %v2151_v0, %v2151_v0  ;;  %v2154_v19 = vsel %vm2122_vm10, %v2106_v27, %v2138_v40  ;;  %vm2120_vm11 = vcmp.ge.f32.partialorder %v2104_v26, 0.0  ;;  %v2136_v62 = vmul.f32 0.01, %v2104_v26  ;;  %v2764_v44 = vpop.f32.mrf.mxu1  ;;  %v2038_v41 = vpop.f32.mrf.mxu0 }
 0x16a   : > { %v2532_v47 = vpack.c.bf16 %v2154_v19, %v2154_v19  ;;  %v2109_v7 = vadd.f32 %v3903_v53, %v2086_v23  ;;  %v2084_v6 = vmul.f32 %v3892_v46, %v2061_v56  ;;  %v2064_v54 = vadd.f32 %v2779_v16, %v1854_v5 }
 0x16b   : > { %2232 = vst.msk [vmem:[%s3935_s11 + $0x10] sm:$0xf] %vm2227_vm3, %v2529_v45  ;;  %v2152_v1 = vsel %vm2120_vm11, %v2104_v26, %v2136_v62  ;;  %v2062_v35 = vadd.f32 %v2025_v9, %v1852_v38  ;;  %v1857_v31 = vadd.f32 %v2764_v44, %v3929_v17  ;;  %v1828_v34 = vpop.f32.mrf.mxu1  ;;  %v2783_v55 = vpop.f32.mrf.mxu0 }
 0x16c   : > { %2235 = vst.msk [vmem:[%s3935_s11 + $0x1c] sm:$0xf] %vm2227_vm3, %v2532_v47  ;;  %v2530_v60 = vpack.c.bf16 %v2152_v1, %v2152_v1  ;;  %vm2125_vm12 = vcmp.ge.f32.partialorder %v2109_v7, 0.0  ;;  %v2141_v29 = vmul.f32 0.01, %v2109_v7  ;;  %v2107_v22 = vadd.f32 %v3903_v53, %v2084_v6 }
 0x16d   : > { %v2087_v30 = vmul.f32 %v3892_v46, %v2064_v54  ;;  %v2085_v11 = vmul.f32 %v3892_v46, %v2062_v35  ;;  %v2067_v61 = vadd.f32 %v2782_v63, %v1857_v31  ;;  %v1855_v28 = vadd.f32 %v1828_v34, %v3944_v21  ;;  %v2765_v15 = vpop.f32.mrf.mxu1  ;;  %v2041_v32 = vpop.f32.mrf.mxu0 }
 0x16e   : > { %2233 = vst.msk [vmem:[%s3935_s11 + $0x14] sm:$0xf] %vm2227_vm3, %v2530_v60  ;;  %v2157_v17 = vsel %vm2125_vm12, %v2109_v7, %v2141_v29  ;;  %vm2123_vm13 = vcmp.ge.f32.partialorder %v2107_v22, 0.0  ;;  %v2139_v24 = vmul.f32 0.01, %v2107_v22  ;;  %v1858_v37 = vadd.f32 %v2765_v15, %v1624_v58 }
 0x16f   : > { %v2535_v20 = vpack.c.bf16 %v2157_v17, %v2157_v17  ;;  %v2110_v43 = vadd.f32 %v3903_v53, %v2087_v30  ;;  %v2108_v39 = vadd.f32 %v3903_v53, %v2085_v11  ;;  %v2090_v51 = vmul.f32 %v3892_v46, %v2067_v61  ;;  %v1831_v4 = vpop.f32.mrf.mxu1 }
 0x170   : > { %v2155_v42 = vsel %vm2123_vm13, %v2107_v22, %v2139_v24  ;;  %v2065_v21 = vadd.f32 %v2038_v41, %v1855_v28  ;;  %v2068_v52 = vadd.f32 %v2783_v55, %v1858_v37  ;;  %v1856_v49 = vadd.f32 %v1831_v4, %v1622_v12 }
 0x171   : > { %2238 = vst.msk [vmem:[%s3935_s11 + $0x28] sm:$0xf] %vm2227_vm3, %v2535_v20  ;;  %v2533_v16 = vpack.c.bf16 %v2155_v42, %v2155_v42  ;;  %vm2126_vm14 = vcmp.ge.f32.partialorder %v2110_v43, 0.0  ;;  %v2142_v8 = vmul.f32 0.01, %v2110_v43  ;;  %vm2124_vm15 = vcmp.ge.f32.partialorder %v2108_v39, 0.0 }
 0x172   : > { %v2140_v2 = vmul.f32 0.01, %v2108_v39  ;;  %v2113_v14 = vadd.f32 %v3903_v53, %v2090_v51  ;;  %v2088_v57 = vmul.f32 %v3892_v46, %v2065_v21  ;;  %v2091_v50 = vmul.f32 %v3892_v46, %v2068_v52 }
 0x173   : > { %2236 = vst.msk [vmem:[%s3935_s11 + $0x20] sm:$0xf] %vm2227_vm3, %v2533_v16  ;;  %v2158_v27 = vsel %vm2126_vm14, %v2110_v43, %v2142_v8  ;;  %v2066_v13 = vadd.f32 %v2041_v32, %v1856_v49 }
 0x174   : > { %v2536_v9 = vpack.c.bf16 %v2158_v27, %v2158_v27  ;;  %v2156_v59 = vsel %vm2124_vm15, %v2108_v39, %v2140_v2  ;;  %vm2129_vm0 = vcmp.ge.f32.partialorder %v2113_v14, 0.0  ;;  %v2145_v48 = vmul.f32 0.01, %v2113_v14 }
 0x175   : > { %v2534_v36 = vpack.c.bf16 %v2156_v59, %v2156_v59  ;;  %v2111_v10 = vadd.f32 %v3903_v53, %v2088_v57  ;;  %v2114_v25 = vadd.f32 %v3903_v53, %v2091_v50  ;;  %v2089_v18 = vmul.f32 %v3892_v46, %v2066_v13 }
 0x176   : > { %2239 = vst.msk [vmem:[%s3935_s11 + $0x2c] sm:$0xf] %vm2227_vm3, %v2536_v9  ;;  %v2161_v3 = vsel %vm2129_vm0, %v2113_v14, %v2145_v48 }
 0x177   : > { %2237 = vst.msk [vmem:[%s3935_s11 + $0x24] sm:$0xf] %vm2227_vm3, %v2534_v36  ;;  %v2539_v63 = vpack.c.bf16 %v2161_v3, %v2161_v3  ;;  %vm2127_vm1 = vcmp.ge.f32.partialorder %v2111_v10, 0.0  ;;  %v2143_v40 = vmul.f32 0.01, %v2111_v10  ;;  %vm2130_vm2 = vcmp.ge.f32.partialorder %v2114_v25, 0.0 }
 0x178   : > { %v2146_v26 = vmul.f32 0.01, %v2114_v25  ;;  %v2112_v23 = vadd.f32 %v3903_v53, %v2089_v18 }
 0x179   : > { %2242 = vst.msk [vmem:[%s3935_s11 + $0x38] sm:$0xf] %vm2227_vm3, %v2539_v63  ;;  %v2159_v56 = vsel %vm2127_vm1, %v2111_v10, %v2143_v40 }
 0x17a   : > { %v2537_v33 = vpack.c.bf16 %v2159_v56, %v2159_v56  ;;  %v2162_v46 = vsel %vm2130_vm2, %v2114_v25, %v2146_v26  ;;  %vm2128_vm4 = vcmp.ge.f32.partialorder %v2112_v23, 0.0  ;;  %v2144_v58 = vmul.f32 0.01, %v2112_v23 }
 0x17b   : > { %v2540_v0 = vpack.c.bf16 %v2162_v46, %v2162_v46 }
 0x17c   : > { %2240 = vst.msk [vmem:[%s3935_s11 + $0x30] sm:$0xf] %vm2227_vm3, %v2537_v33  ;;  %v2160_v5 = vsel %vm2128_vm4, %v2112_v23, %v2144_v58 }
 0x17d   : > { %2243 = vst.msk [vmem:[%s3935_s11 + $0x3c] sm:$0xf] %vm2227_vm3, %v2540_v0  ;;  %v2538_v38 = vpack.c.bf16 %v2160_v5, %v2160_v5 }
 0x17f   : > { %2241 = vst.msk [vmem:[%s3935_s11 + $0x34] sm:$0xf] %vm2227_vm3, %v2538_v38 }
 0x180 PF: > { %s14_s19 = sadd.s32 1, %s2874_s19   ;;  %s4126_s15 = smov %s2866_s17 }
 0x181   : > { %p11_p7 = scmp.ge.s32.totalorder %s14_s19, 6   ;;  %s4127_s16 = smov %s2870_s18 }
 0x182   : > { %s4128_s17 = smov %s4131_s20  ;;  %s4129_s18 = smov %s4135_s21 }
 0x183   :  { %13 = sbr.rel (!%p11_p7) target bundleno = 3 (0x3), region = 77 }

// kernel: gcb_module_forward.5
= control target key start
LH: loop header
LB: loop body
LE: loop exit
PB: predicated region body
PF: predicated region fallthrough
CT: control target
= control target key end

     0   :  { %s2989_s27 = smov 0   ;;  %s2991_s28 = smov 0   ;;  %s3594_s0 = inlined_call_operand.vmem [shape: bf16[2,256,4], index: 0, kind: input, shape index: {}, may-alias: {0,1}]   ;;  %s3595_s1 = inlined_call_operand.vmem [shape: bf16[2,256,4], index: 1, kind: input, shape index: {}, may-alias: {0,1}]   ;;  %s3596_s2 = inlined_call_operand.vmem [shape: bf16[4,128], index: 2, kind: input, shape index: {}]   ;;  %s3597_s3 = inlined_call_operand.vmem [shape: f32[1,128], index: 3, kind: input, shape index: {}]   ;;  %s3598_s4 = inlined_call_operand.vmem [shape: bf16[4,256], index: 4, kind: input, shape index: {}]   ;;  %s3599_s5 = inlined_call_operand.vmem [shape: f32[1,256], index: 5, kind: input, shape index: {}]   ;;  %s3600_s6 = inlined_call_operand.vmem [shape: bf16[128,4], index: 6, kind: input, shape index: {}]   ;;  %s3601_s7 = inlined_call_operand.vmem [shape: f32[1,4], index: 7, kind: input, shape index: {}]   ;;  %s3602_s8 = inlined_call_operand.vmem [shape: bf16[2,256,4], index: 8, kind: output, shape index: {}]  }
   0x1   :  { %s2993_s29 = smov 0   ;;  %s2995_s30 = smov 0  }
   0x2   :  { %s2997_s9 = smov 0   ;;  %s2999_s10 = smov 0  }
   0x3   :  { %s3001_s11 = smov 0  }
   0x4 LB: > { %s30_s12 = sadd.s32 1, %s2926_s30  ;;  %s33_s13 = sadd.s32 1, %s2930_s9  ;;  %s2938_s11 = sphi %s3001_s11, %s18_s11   ;;  %s2934_s10 = sphi %s2999_s10, %s3612_s10   ;;  %s2930_s9 = sphi %s2997_s9, %s3611_s9   ;;  %s2926_s30 = sphi %s2995_s30, %s3610_s30   ;;  %s2922_s29 = sphi %s2993_s29, %s3609_s29   ;;  %s2918_s28 = sphi %s2991_s28, %s3608_s28   ;;  %s2914_s27 = sphi %s2989_s27, %s3607_s27  }
   0x5   : > { %p31_p0 = scmp.ge.s32.totalorder %s30_s12, 2  ;;  %p2285_p1 = scmp.ge.s32.totalorder %s2938_s11, 1 }
   0x6   : > { %p307_p2 = scmp.lt.s32.totalorder %s2938_s11, 9  ;;  %s37_s14 = sadd.s32 1, %s2934_s10 }
   0x7   : > { %s3614_s12 = smov (%p31_p0, %s30_s12), 0  ;;  %s3616_s13 = smov (!%p31_p0, %s33_s13), %s2930_s9 }
   0x8   : > { %p308_p3 = pnand %p2285_p1, %p307_p2  ;;  %p35_p4 = scmp.ge.s32.totalorder %s3616_s13, 2 }
   0x9   : > { %s2286_s15 = sshll.u32 (!%p308_p3), %s2918_s28, 4  ;;  %p359_p6 = scmp.lt.s32.totalorder (!%p308_p3), %s2922_s29, 1 }
   0xa   : > { %s3618_s13 = smov (%p35_p4, %s3616_s13), 0  ;;  %s3620_s14 = smov (!%p35_p4, %s37_s14), %s2934_s10 }
   0xb   : > { %3603 = sst [smem:[#allocation6_spill]] %s3618_s13  ;;  %p39_p5 = scmp.ge.s32.totalorder %s3620_s14, 2 }
   0xc   : > { %311 = sbr.rel (%p308_p3) target bundleno = 1671 (0x687), region = 52  ;;  %p361_p7 = scmp.lt.s32.totalorder (!%p308_p3), %s2286_s15, 31 }
   0xd   : > { %s3622_s14 = smov (%p39_p5, %s3620_s14), 0  ;;  %s2289_s16 = sshll.u32 (!%p308_p3), %s2914_s27, 4 }
   0xe   : > { %3604 = sst [smem:[#allocation7_spill]] %s3622_s14  ;;  %p371_p8 = scmp.lt.s32.totalorder (!%p308_p3), %s2289_s16, 31 }
   0xf   : > { %p2295_p9 = scmp.ne.s32.totalorder (!%p308_p3), %s2914_s27, 0 }
  0x11   : > { %s3624_s29 = smov (!%p359_p6, %s2922_s29), 1  ;;  %s3626_s15 = smov (!%p361_p7, %s2286_s15), 31 }
  0x12   : > { %s2287_s17 = sshll.u32 %s3624_s29, 5  ;;  %s3628_s16 = smov (!%p371_p8, %s2289_s16), 31 }
  0x13   : > { %s364_s18 = sadd.s32 %s2287_s17, %s3626_s15  ;;  %s374_s26 = sadd.s32 %s2287_s17, %s3628_s16 }
  0x14   : > { %s2288_s19 = sshll.u32 %s364_s18, 2  ;;  %s2291_s28 = sshll.u32 %s374_s26, 2 }
  0x15   : > { %s3037_s22 = scalar_lea.vmem %s3594_s0, %s2288_s19  ;;  %s3042_s25 = scalar_lea.vmem %s3602_s8, %s2288_s19 }
  0x16   : > { %s3047_s29 = scalar_lea.vmem %s3595_s1, %s2291_s28  ;;  %392 = sbr.rel (%p2295_p9) target bundleno = 244 (0xf4), region = 56 }
  0x1b   : > { %v409_v0 = vld [vmem:[%s3596_s2] sm:$0x3]  ;;  %vm482_vm0 = vcmask 1041408   ;;  %vm457_vm1 = vcmask 31744   ;;  %v2754_v4 = vld [vmem:[%s3037_s22 + $0x8] sm:$0xff]   ;;  %v2756_v6 = vld [vmem:[%s3037_s22 + $0x10] sm:$0xff]  }
  0x1c   : > { %v2752_v1 = vld [vmem:[%s3037_s22] sm:$0xff]   ;;  %2690 = vmatprep.subr.msk.bf16.mxu0 %vm482_vm0, %v409_v0  ;;  %2691 = vmatprep.subr.msk.bf16.mxu1 %vm482_vm0, %v409_v0  ;;  %v484_v2 = vsel %vm482_vm0, %v409_v0, 0  ;;  %v2755_v5 = vld [vmem:[%s3037_s22 + $0x28] sm:$0xff]   ;;  %v2757_v7 = vld [vmem:[%s3037_s22 + $0x30] sm:$0xff]   ;;  %vm663_vm2 = vcmask 7168   ;;  %v2940_v10 = vmov -inf  }
  0x1d   : > { %2559 = vmatpush3.bf16.msra.mxu0 %v484_v2  ;;  %2673 = vmatpush3.bf16.msra.mxu1 %v484_v2  ;;  %v2753_v3 = vld [vmem:[%s3037_s22 + $0x20] sm:$0xff]   ;;  %v2758_v8 = vld [vmem:[%s3037_s22 + $0x18] sm:$0xff]   ;;  %664 = vst.msk [vmem:[#allocation3] sm:$0xff] %vm663_vm2, %v2940_v10  ;;  %665 = vst.msk [vmem:[#allocation3 + $0x8] sm:$0xff] %vm663_vm2, %v2940_v10  ;;  %v2941_v11 = vmov 0.0  }
  0x1e   : > { %2560 = vmatprep.mubr.msk.bf16.mxu0 %vm457_vm1, %v2752_v1  ;;  %2568 = vmatprep.mubr.msk.bf16.mxu1 %vm457_vm1, %v2753_v3  ;;  %v2759_v9 = vld [vmem:[%s3037_s22 + $0x38] sm:$0xff]   ;;  %666 = vst.msk [vmem:[#allocation3 + $0x10] sm:$0xff] %vm663_vm2, %v2940_v10  ;;  %667 = vst.msk [vmem:[#allocation3 + $0x18] sm:$0xff] %vm663_vm2, %v2940_v10  ;;  %v2296_v14 = vld [vmem:[%s3597_s3] ss:$0 sm:$0xff] }
  0x1f   : > { %668 = vst.msk [vmem:[#allocation3 + $0x20] sm:$0xff] %vm663_vm2, %v2940_v10  ;;  %669 = vst.msk [vmem:[#allocation3 + $0x28] sm:$0xff] %vm663_vm2, %v2940_v10 }
  0x20   : > { %2561 = vmatmul.mubr.msk.bf16.vlgmr.msra.gmra.mxu0 %vm457_vm1, %v2754_v4  ;;  %2569 = vmatmul.mubr.msk.bf16.vlgmr.msra.gmra.mxu1 %vm457_vm1, %v2755_v5  ;;  %670 = vst.msk [vmem:[#allocation3 + $0x30] sm:$0xff] %vm663_vm2, %v2940_v10  ;;  %671 = vst.msk [vmem:[#allocation3 + $0x38] sm:$0xff] %vm663_vm2, %v2940_v10 }
  0x21   : > { %2564 = vmatprep.mubr.msk.bf16.mxu0 %vm457_vm1, %v2756_v6  ;;  %2572 = vmatprep.mubr.msk.bf16.mxu1 %vm457_vm1, %v2757_v7  ;;  %672 = vst.msk [vmem:[#allocation3 + $0x40] sm:$0xff] %vm663_vm2, %v2940_v10  ;;  %673 = vst.msk [vmem:[#allocation3 + $0x48] sm:$0xff] %vm663_vm2, %v2940_v10 }
  0x22   : > { %674 = vst.msk [vmem:[#allocation3 + $0x50] sm:$0xff] %vm663_vm2, %v2940_v10  ;;  %675 = vst.msk [vmem:[#allocation3 + $0x58] sm:$0xff] %vm663_vm2, %v2940_v10 }
  0x23   : > { %676 = vst.msk [vmem:[#allocation3 + $0x60] sm:$0xff] %vm663_vm2, %v2940_v10  ;;  %677 = vst.msk [vmem:[#allocation3 + $0x68] sm:$0xff] %vm663_vm2, %v2940_v10 }
  0x24   : > { %678 = vst.msk [vmem:[#allocation3 + $0x70] sm:$0xff] %vm663_vm2, %v2940_v10  ;;  %679 = vst.msk [vmem:[#allocation3 + $0x78] sm:$0xff] %vm663_vm2, %v2940_v10 }
  0x25   : > { %680 = vst.msk [vmem:[#allocation4] sm:$0xff] %vm663_vm2, %v2941_v11  ;;  %681 = vst.msk [vmem:[#allocation4 + $0x8] sm:$0xff] %vm663_vm2, %v2941_v11 }
  0x26   : > { %682 = vst.msk [vmem:[#allocation4 + $0x10] sm:$0xff] %vm663_vm2, %v2941_v11  ;;  %683 = vst.msk [vmem:[#allocation4 + $0x18] sm:$0xff] %vm663_vm2, %v2941_v11 }
  0x27   : > { %684 = vst.msk [vmem:[#allocation4 + $0x20] sm:$0xff] %vm663_vm2, %v2941_v11  ;;  %685 = vst.msk [vmem:[#allocation4 + $0x28] sm:$0xff] %vm663_vm2, %v2941_v11 }
  0x28   : > { %2565 = vmatmul.mubr.msk.bf16.gmra.mxu0 %vm457_vm1, %v2758_v8  ;;  %2573 = vmatmul.mubr.msk.bf16.gmra.mxu1 %vm457_vm1, %v2759_v9  ;;  %686 = vst.msk [vmem:[#allocation4 + $0x30] sm:$0xff] %vm663_vm2, %v2941_v11  ;;  %687 = vst.msk [vmem:[#allocation4 + $0x38] sm:$0xff] %vm663_vm2, %v2941_v11 }
  0x29   : > { %688 = vst.msk [vmem:[#allocation4 + $0x40] sm:$0xff] %vm663_vm2, %v2941_v11  ;;  %689 = vst.msk [vmem:[#allocation4 + $0x48] sm:$0xff] %vm663_vm2, %v2941_v11 }
  0x2a   : > { %690 = vst.msk [vmem:[#allocation4 + $0x50] sm:$0xff] %vm663_vm2, %v2941_v11  ;;  %691 = vst.msk [vmem:[#allocation4 + $0x58] sm:$0xff] %vm663_vm2, %v2941_v11 }
  0x2b   : > { %692 = vst.msk [vmem:[#allocation4 + $0x60] sm:$0xff] %vm663_vm2, %v2941_v11  ;;  %693 = vst.msk [vmem:[#allocation4 + $0x68] sm:$0xff] %vm663_vm2, %v2941_v11 }
  0x2c   : > { %694 = vst.msk [vmem:[#allocation4 + $0x70] sm:$0xff] %vm663_vm2, %v2941_v11  ;;  %695 = vst.msk [vmem:[#allocation4 + $0x78] sm:$0xff] %vm663_vm2, %v2941_v11 }
  0x2d   : > { %696 = vst [vmem:[#allocation5 + $0x30] sm:$0xff] %v2941_v11  ;;  %697 = vst [vmem:[#allocation5] sm:$0xff] %v2941_v11 }
  0x2e   : > { %698 = vst [vmem:[#allocation5 + $0x58] sm:$0xff] %v2941_v11  ;;  %699 = vst [vmem:[#allocation5 + $0x18] sm:$0xff] %v2941_v11 }
  0x2f   : > { %700 = vst [vmem:[#allocation5 + $0x50] sm:$0xff] %v2941_v11  ;;  %701 = vst [vmem:[#allocation5 + $0x68] sm:$0xff] %v2941_v11 }
  0x30   : > { %702 = vst [vmem:[#allocation5 + $0x8] sm:$0xff] %v2941_v11  ;;  %703 = vst [vmem:[#allocation5 + $0x48] sm:$0xff] %v2941_v11 }
  0x31   : > { %704 = vst [vmem:[#allocation5 + $0x40] sm:$0xff] %v2941_v11  ;;  %705 = vst [vmem:[#allocation5 + $0x20] sm:$0xff] %v2941_v11 }
  0x32   : > { %706 = vst [vmem:[#allocation5 + $0x10] sm:$0xff] %v2941_v11  ;;  %707 = vst [vmem:[#allocation5 + $0x38] sm:$0xff] %v2941_v11 }
  0x33   : > { %708 = vst [vmem:[#allocation5 + $0x60] sm:$0xff] %v2941_v11  ;;  %709 = vst [vmem:[#allocation5 + $0x70] sm:$0xff] %v2941_v11 }
  0x34   : > { %710 = vst [vmem:[#allocation5 + $0x78] sm:$0xff] %v2941_v11  ;;  %711 = vst [vmem:[#allocation5 + $0x28] sm:$0xff] %v2941_v11 }
  0xe0   : > { %v2562_v12 = vpop.f32.mrf.mxu0  ;;  %v2570_v13 = vpop.f32.mrf.mxu1 }
  0xe1   : > { %v529_v18 = vadd.f32 %v2562_v12, %v2296_v14  ;;  %v561_v21 = vadd.f32 %v2570_v13, %v2296_v14 }
  0xe2   : > { %v520_v15 = vpop.f32.mrf.mxu0  ;;  %v552_v16 = vpop.f32.mrf.mxu1 }
  0xe3   : > { %v521_v24 = vadd.f32 %v2296_v14, %v520_v15  ;;  %v553_v28 = vadd.f32 %v2296_v14, %v552_v16 }
  0xe4   : > { %v2563_v17 = vpop.f32.mrf.mxu0  ;;  %v2571_v20 = vpop.f32.mrf.mxu1 }
  0xe5   : > { %v532_v19 = vadd.f32 %v2563_v17, %v2296_v14  ;;  %v564_v22 = vadd.f32 %v2571_v20, %v2296_v14 }
  0xe6   : > { %v523_v23 = vpop.f32.mrf.mxu0  ;;  %v555_v27 = vpop.f32.mrf.mxu1 }
  0xe7   : > { %v2423_v25 = vpack.c.bf16 %v532_v19, %v529_v18  ;;  %v524_v26 = vadd.f32 %v2296_v14, %v523_v23  ;;  %v2443_v29 = vpack.c.bf16 %v564_v22, %v561_v21  ;;  %v556_v30 = vadd.f32 %v2296_v14, %v555_v27 }
  0xe8   : > { %v2566_v31 = vpop.f32.mrf.mxu0  ;;  %v2574_v33 = vpop.f32.mrf.mxu1 }
  0xe9   : > { %2487 = vst [vmem:[#allocation2 + $0x8] sm:$0xff] %v2423_v25   ;;  %v2418_v32 = vpack.c.bf16 %v524_v26, %v521_v24  ;;  %2491 = vst [vmem:[#allocation2 + $0x28] sm:$0xff] %v2443_v29   ;;  %v2438_v34 = vpack.c.bf16 %v556_v30, %v553_v28  ;;  %v545_v38 = vadd.f32 %v2566_v31, %v2296_v14 }
  0xea   : > { %v536_v35 = vpop.f32.mrf.mxu0  ;;  %v568_v36 = vpop.f32.mrf.mxu1  ;;  %v577_v41 = vadd.f32 %v2574_v33, %v2296_v14 }
  0xeb   : > { %2419 = vst [vmem:[#allocation2] sm:$0xff] %v2418_v32   ;;  %2490 = vst [vmem:[#allocation2 + $0x20] sm:$0xff] %v2438_v34   ;;  %v537_v44 = vadd.f32 %v2296_v14, %v536_v35  ;;  %v569_v48 = vadd.f32 %v2296_v14, %v568_v36 }
  0xec   : > { %v2567_v37 = vpop.f32.mrf.mxu0  ;;  %v2575_v40 = vpop.f32.mrf.mxu1 }
  0xed   : > { %v548_v39 = vadd.f32 %v2567_v37, %v2296_v14  ;;  %v580_v42 = vadd.f32 %v2575_v40, %v2296_v14 }
  0xee   : > { %v539_v43 = vpop.f32.mrf.mxu0  ;;  %v571_v47 = vpop.f32.mrf.mxu1 }
  0xef   : > { %v2433_v45 = vpack.c.bf16 %v548_v39, %v545_v38  ;;  %v540_v46 = vadd.f32 %v2296_v14, %v539_v43  ;;  %v2453_v49 = vpack.c.bf16 %v580_v42, %v577_v41  ;;  %v572_v50 = vadd.f32 %v2296_v14, %v571_v47 }
  0xf1   : > { %2489 = vst [vmem:[#allocation2 + $0x18] sm:$0xff] %v2433_v45   ;;  %v2428_v51 = vpack.c.bf16 %v540_v46, %v537_v44  ;;  %2493 = vst [vmem:[#allocation2 + $0x38] sm:$0xff] %v2453_v49   ;;  %v2448_v52 = vpack.c.bf16 %v572_v50, %v569_v48 }
  0xf3   : > { %2488 = vst [vmem:[#allocation2 + $0x10] sm:$0xff] %v2428_v51   ;;  %2492 = vst [vmem:[#allocation2 + $0x30] sm:$0xff] %v2448_v52  }
  0xf4 PF: > { %v2337_v53 = vld.sshfl [vmem:[%s3598_s4] sm:$0x33 pattern:$0x76325410]  ;;  %vm815_vm3 = vcmask 1041408   ;;  %v2942_v56 = vmov 0   ;;  %v731_v1 = vlaneseq }
  0xf5   : > { %v789_v54 = vcombine.high %v2337_v53, %v2337_v53  ;;  %v817_v55 = vsel %vm815_vm3, %v2337_v53, 0  ;;  %854 = vmatprep.mubr.bf16.mxu0 %v2942_v56  ;;  %2761 = vset.pattern.permute.xlu1 %v2942_v56  ;;  %v2762_v57 = vld [vmem:[%s3047_s29] sm:$0xff]   ;;  %vm790_vm4 = vcmask 31744   ;;  %v2763_v58 = vld [vmem:[%s3047_s29 + $0x8] sm:$0xff]   ;;  %v2764_v59 = vld [vmem:[%s3047_s29 + $0x10] sm:$0xff]   ;;  %vm1432_vm5 = vcmask 7168  }
  0xf6   : > { %2760 = vset.pattern.permute.xlu0 %v2942_v56  ;;  %v2765_v60 = vld [vmem:[%s3047_s29 + $0x18] sm:$0xff]   ;;  %v2766_v61 = vld [vmem:[%s3047_s29 + $0x20] sm:$0xff]   ;;  %v2767_v62 = vld [vmem:[%s3047_s29 + $0x28] sm:$0xff]   ;;  %v732_v2 = vshrl.u32 %v731_v1, 7  ;;  %p2355_p10 = scmp.ne.s32.totalorder %s2914_s27, 1 }
  0xf7   : > { %2338 = vmatprep.subr.msk.bf16.mxu0 %vm815_vm3, %v789_v54  ;;  %v2768_v63 = vld [vmem:[%s3047_s29 + $0x30] sm:$0xff]   ;;  %v2769_v0 = vld [vmem:[%s3047_s29 + $0x38] sm:$0xff]   ;;  %v2770_v3 = vld [vmem:[#allocation2] sm:$0xff]  }
  0xf8   : > { %837 = vmatpush1.bf16.msra.mxu0 %v817_v55  ;;  %2592 = vmatprep.mubr.bf16.mxu1 %v2770_v3  ;;  %v733_v4 = vsub.s32 0, %v732_v2  ;;  %v729_v5 = vld [vmem:[%s3599_s5] sm:$0x3]  ;;  %v737_v6 = vsub.s32 1, %v732_v2 }
  0xfa   : > { %v3126_v8 = vrot.slane %v729_v5, %v733_v4  ;;  %v3128_v10 = vrot.slane %v729_v5, %v737_v6 }
  0xfb   : > { %2339 = vmatmul.mubr.msk.bf16.vlgmr.msra.gmra.mxu0 %vm790_vm4, %v2762_v57 }
  0xfc   : > { %864 = vmatprep.mubr.bf16.mxu0 %v2942_v56 }
 0x103   : > { %2340 = vmatmul.mubr.msk.bf16.gmra.mxu0 %vm790_vm4, %v2763_v58 }
 0x104   : > { %874 = vmatprep.mubr.bf16.mxu0 %v2942_v56 }
 0x10b   : > { %2341 = vmatmul.mubr.msk.bf16.gmra.mxu0 %vm790_vm4, %v2764_v59 }
 0x10c   : > { %884 = vmatprep.mubr.bf16.mxu0 %v2942_v56 }
 0x113   : > { %2342 = vmatmul.mubr.msk.bf16.gmra.mxu0 %vm790_vm4, %v2765_v60 }
 0x114   : > { %894 = vmatprep.mubr.bf16.mxu0 %v2942_v56 }
 0x11b   : > { %2343 = vmatmul.mubr.msk.bf16.gmra.mxu0 %vm790_vm4, %v2766_v61 }
 0x11c   : > { %904 = vmatprep.mubr.bf16.mxu0 %v2942_v56 }
 0x123   : > { %2344 = vmatmul.mubr.msk.bf16.gmra.mxu0 %vm790_vm4, %v2767_v62 }
 0x124   : > { %914 = vmatprep.mubr.bf16.mxu0 %v2942_v56 }
 0x12b   : > { %2345 = vmatmul.mubr.msk.bf16.gmra.mxu0 %vm790_vm4, %v2768_v63 }
 0x12c   : > { %924 = vmatprep.mubr.bf16.mxu0 %v2942_v56 }
 0x133   : > { %2346 = vmatmul.mubr.msk.bf16.gmra.mxu0 %vm790_vm4, %v2769_v0 }
 0x1bb   : > { %v856_v7 = vpop.f32.mrf.mxu0 }
 0x1bc   : > { %v857_v12 = vadd.f32 %v856_v7, %v3126_v8 }
 0x1bd   : > { %v858_v9 = vpop.f32.mrf.mxu0 }
 0x1be   : > { %v859_v15 = vadd.f32 %v858_v9, %v3128_v10 }
 0x1bf   : > { %v860_v11 = vpop.f32.mrf.mxu0 }
 0x1c0   : > { %v861_v13 = vadd.f32 %v860_v11, %v3126_v8 }
 0x1c1   : > { %v862_v14 = vpop.f32.mrf.mxu0 }
 0x1c2   : > { %v3133_v16 = vpack.c.bf16 %v861_v13, %v857_v12  ;;  %v863_v17 = vadd.f32 %v862_v14, %v3128_v10 }
 0x1c3   : > { %v866_v18 = vpop.f32.mrf.mxu0 }
 0x1c4   : > { %v3136_v19 = vpack.c.bf16 %v863_v17, %v859_v15  ;;  %v867_v22 = vadd.f32 %v866_v18, %v3126_v8 }
 0x1c5   : > { %v868_v20 = vpop.f32.mrf.mxu0 }
 0x1c6   : > { %v869_v25 = vadd.f32 %v868_v20, %v3128_v10 }
 0x1c7   : > { %v870_v21 = vpop.f32.mrf.mxu0 }
 0x1c8   : > { %v871_v23 = vadd.f32 %v870_v21, %v3126_v8 }
 0x1c9   : > { %v872_v24 = vpop.f32.mrf.mxu0 }
 0x1ca   : > { %v3141_v26 = vpack.c.bf16 %v871_v23, %v867_v22  ;;  %v873_v27 = vadd.f32 %v872_v24, %v3128_v10 }
 0x1cb   : > { %v876_v28 = vpop.f32.mrf.mxu0 }
 0x1cc   : > { %v3144_v29 = vpack.c.bf16 %v873_v27, %v869_v25  ;;  %v877_v32 = vadd.f32 %v876_v28, %v3126_v8 }
 0x1cd   : > { %v3146_v30 = vpop.f32.mrf.mxu0 }
 0x1ce   : > { %v879_v23 = vadd.f32 %v3146_v30, %v3128_v10  ;;  %v2774_v30 = vld [vmem:[#allocation2 + $0x20] sm:$0xff]  }
 0x1cf   : > { %v880_v31 = vpop.f32.mrf.mxu0 }
 0x1d0   : > { %v881_v33 = vadd.f32 %v880_v31, %v3126_v8 }
 0x1d1   : > { %v882_v34 = vpop.f32.mrf.mxu0 }
 0x1d2   : > { %v3150_v35 = vpack.c.bf16 %v881_v33, %v877_v32  ;;  %v883_v20 = vadd.f32 %v882_v34, %v3128_v10  ;;  %v2776_v32 = vld [vmem:[#allocation2 + $0x30] sm:$0xff]   ;;  %v2777_v33 = vld [vmem:[#allocation2 + $0x38] sm:$0xff]  }
 0x1d3   : > { %v3152_v36 = vpop.f32.mrf.mxu0 }
 0x1d4   : > { %v945_v25 = vpack.c.bf16 %v883_v20, %v879_v23  ;;  %v887_v28 = vadd.f32 %v3152_v36, %v3126_v8 }
 0x1d5   : > { %v888_v37 = vpop.f32.mrf.mxu0 }
 0x1d6   : > { %v889_v17 = vadd.f32 %v888_v37, %v3128_v10 }
 0x1d7   : > { %v3154_v38 = vpop.f32.mrf.mxu0 }
 0x1d8   : > { %v891_v27 = vadd.f32 %v3154_v38, %v3126_v8 }
 0x1d9   : > { %v892_v39 = vpop.f32.mrf.mxu0 }
 0x1da   : > { %v893_v14 = vadd.f32 %v892_v39, %v3128_v10  ;;  %v938_v31 = vpack.c.bf16 %v891_v27, %v887_v28 }
 0x1db   : > { %v896_v40 = vpop.f32.mrf.mxu0 }
 0x1dc   : > { %v946_v21 = vpack.c.bf16 %v893_v14, %v889_v17  ;;  %v897_v22 = vadd.f32 %v896_v40, %v3126_v8 }
 0x1dd   : > { %v898_v41 = vpop.f32.mrf.mxu0 }
 0x1de   : > { %v899_v12 = vadd.f32 %v898_v41, %v3128_v10 }
 0x1df   : > { %v900_v42 = vpop.f32.mrf.mxu0 }
 0x1e0   : > { %v901_v18 = vadd.f32 %v900_v42, %v3126_v8 }
 0x1e1   : > { %v902_v43 = vpop.f32.mrf.mxu0 }
 0x1e2   : > { %v903_v7 = vadd.f32 %v902_v43, %v3128_v10  ;;  %v939_v24 = vpack.c.bf16 %v901_v18, %v897_v22 }
 0x1e3   : > { %v906_v44 = vpop.f32.mrf.mxu0 }
 0x1e4   : > { %v907_v9 = vadd.f32 %v906_v44, %v3126_v8  ;;  %v947_v15 = vpack.c.bf16 %v903_v7, %v899_v12  ;;  %v3268_v7 = vld [vmem:[#allocation3 + $0x40] sm:$0xff]  ;;  %v3274_v12 = vld [vmem:[#allocation3 + $0x58] sm:$0xff] }
 0x1e5   : > { %v908_v45 = vpop.f32.mrf.mxu0 }
 0x1e6   : > { %v909_v5 = vadd.f32 %v908_v45, %v3128_v10 }
 0x1e7   : > { %v910_v46 = vpop.f32.mrf.mxu0 }
 0x1e8   : > { %v911_v6 = vadd.f32 %v910_v46, %v3126_v8 }
 0x1e9   : > { %v912_v47 = vpop.f32.mrf.mxu0 }
 0x1ea   : > { %v913_v3 = vadd.f32 %v912_v47, %v3128_v10  ;;  %v940_v13 = vpack.c.bf16 %v911_v6, %v907_v9 }
 0x1eb   : > { %v916_v48 = vpop.f32.mrf.mxu0 }
 0x1ec   : > { %v917_v58 = vadd.f32 %v916_v48, %v3126_v8  ;;  %v948_v11 = vpack.c.bf16 %v913_v3, %v909_v5  ;;  %v3239_v48 = vld [vmem:[#allocation3 + $0x10] sm:$0xff] }
 0x1ed   : > { %v918_v49 = vpop.f32.mrf.mxu0 }
 0x1ee   : > { %v919_v0 = vadd.f32 %v918_v49, %v3128_v10 }
 0x1ef   : > { %v920_v50 = vpop.f32.mrf.mxu0 }
 0x1f0   : > { %v921_v55 = vadd.f32 %v920_v50, %v3126_v8  ;;  %v1112_v50 = vld [vmem:[#allocation3] sm:$0xff] }
 0x1f1   : > { %v922_v51 = vpop.f32.mrf.mxu0 }
 0x1f2   : > { %v923_v60 = vadd.f32 %v922_v51, %v3128_v10  ;;  %v941_v1 = vpack.c.bf16 %v921_v55, %v917_v58 }
 0x1f3   : > { %v926_v52 = vpop.f32.mrf.mxu0 }
 0x1f4   : > { %v927_v56 = vadd.f32 %v926_v52, %v3126_v8  ;;  %v949_v4 = vpack.c.bf16 %v923_v60, %v919_v0  ;;  %v3252_v60 = vld [vmem:[#allocation3 + $0x20] sm:$0xff] }
 0x1f5   : > { %v928_v53 = vpop.f32.mrf.mxu0 }
 0x1f6   : > { %v929_v61 = vadd.f32 %v928_v53, %v3128_v10  ;;  %v1115_v53 = vld [vmem:[#allocation3 + $0x18] sm:$0xff] }
 0x1f7   : > { %v930_v54 = vpop.f32.mrf.mxu0 }
 0x1f8   : > { %v931_v57 = vadd.f32 %v930_v54, %v3126_v8  ;;  %v2771_v8 = vld [vmem:[#allocation2 + $0x8] sm:$0xff]  }
 0x1f9   : > { %v932_v59 = vpop.f32.mrf.mxu0 }
 0x1fa   : > { %v933_v62 = vadd.f32 %v932_v59, %v3128_v10  ;;  %v942_v63 = vpack.c.bf16 %v931_v57, %v927_v56  ;;  %v2772_v10 = vld [vmem:[#allocation2 + $0x10] sm:$0xff]   ;;  %v3247_v56 = vld [vmem:[#allocation3 + $0x8] sm:$0xff] }
 0x1fc   : > { %v950_v2 = vpack.c.bf16 %v933_v62, %v929_v61  ;;  %2576 = vmatprep.subr.bf16.mxu1 %v942_v63  ;;  %v1119_v62 = vld [vmem:[#allocation3 + $0x38] sm:$0xff] }
 0x1fd   : > { %2577 = vmatpush3.bf16.xpose.msra.mxu1 %v942_v63 }
 0x1fe   : > { %2578 = vmatprep.subr.bf16.mxu1 %v941_v1  ;;  %2608 = vmatprep.subr.bf16.mxu0 %v950_v2 }
 0x1ff   : > { %2609 = vmatpush3.bf16.msra.mxu0 %v950_v2 }
 0x200   : > { %2610 = vmatprep.subr.bf16.mxu0 %v949_v4 }
 0x203   : > { %2611 = vmatpush3.bf16.msra.mxu0 %v949_v4  ;;  %v3262_v4 = vld [vmem:[#allocation3 + $0x28] sm:$0xff] }
 0x204   : > { %2612 = vmatprep.subr.bf16.mxu0 %v948_v11 }
 0x205   : > { %2579 = vmatpush3.bf16.xpose.msra.mxu1 %v941_v1  ;;  %v3258_v1 = vld [vmem:[#allocation3 + $0x30] sm:$0xff] }
 0x206   : > { %2580 = vmatprep.subr.bf16.mxu1 %v940_v13 }
 0x207   : > { %2613 = vmatpush3.bf16.msra.mxu0 %v948_v11 }
 0x208   : > { %2614 = vmatprep.subr.bf16.mxu0 %v947_v15 }
 0x20b   : > { %2615 = vmatpush3.bf16.msra.mxu0 %v947_v15  ;;  %v3280_v15 = vld [vmem:[#allocation3 + $0x50] sm:$0xff] }
 0x20c   : > { %2616 = vmatprep.subr.bf16.mxu0 %v946_v21 }
 0x20d   : > { %2581 = vmatpush3.bf16.xpose.msra.mxu1 %v940_v13 }
 0x20e   : > { %2582 = vmatprep.subr.bf16.mxu1 %v939_v24 }
 0x20f   : > { %2617 = vmatpush3.bf16.msra.mxu0 %v946_v21  ;;  %v3286_v21 = vld [vmem:[#allocation3 + $0x48] sm:$0xff] }
 0x210   : > { %2618 = vmatprep.subr.bf16.mxu0 %v945_v25 }
 0x213   : > { %2619 = vmatpush3.bf16.msra.mxu0 %v945_v25  ;;  %v3292_v25 = vld [vmem:[#allocation3 + $0x60] sm:$0xff] }
 0x214   : > { %2620 = vmatprep.subr.bf16.mxu0 %v3144_v29 }
 0x215   : > { %2583 = vmatpush3.bf16.xpose.msra.mxu1 %v939_v24 }
 0x216   : > { %2584 = vmatprep.subr.bf16.mxu1 %v938_v31 }
 0x217   : > { %2621 = vmatpush3.bf16.msra.mxu0 %v3144_v29  ;;  %v2773_v29 = vld [vmem:[#allocation2 + $0x18] sm:$0xff]  }
 0x218   : > { %2622 = vmatprep.subr.bf16.mxu0 %v3136_v19 }
 0x21b   : > { %2623 = vmatpush3.bf16.msra.mxu0 %v3136_v19  ;;  %v2775_v19 = vld [vmem:[#allocation2 + $0x28] sm:$0xff]  }
 0x21d   : > { %2585 = vmatpush3.bf16.xpose.msra.mxu1 %v938_v31 }
 0x21e   : > { %2586 = vmatprep.subr.bf16.mxu1 %v3150_v35 }
 0x225   : > { %2587 = vmatpush3.bf16.xpose.msra.mxu1 %v3150_v35 }
 0x226   : > { %2588 = vmatprep.subr.bf16.mxu1 %v3141_v26 }
 0x22d   : > { %2589 = vmatpush3.bf16.xpose.msra.mxu1 %v3141_v26 }
 0x22e   : > { %2590 = vmatprep.subr.bf16.mxu1 %v3133_v16 }
 0x235   : > { %2591 = vmatpush3.bf16.xpose.msra.mxu1 %v3133_v16 }
 0x23c   : > { %2593 = vmatmul.mubr.bf16.vlgmr.msra.gmra.mxu1 %v2771_v8  ;;  %v3297_v8 = vld [vmem:[#allocation3 + $0x78] sm:$0xff] }
 0x23d   : > { %2596 = vmatprep.mubr.bf16.mxu1 %v2772_v10 }
 0x244   : > { %2597 = vmatmul.mubr.bf16.gmra.mxu1 %v2773_v29 }
 0x245   : > { %2600 = vmatprep.mubr.bf16.mxu1 %v2774_v30 }
 0x24c   : > { %2601 = vmatmul.mubr.bf16.gmra.mxu1 %v2775_v19 }
 0x24d   : > { %2604 = vmatprep.mubr.bf16.mxu1 %v2776_v32  ;;  %v3304_v32 = vld [vmem:[#allocation3 + $0x70] sm:$0xff] }
 0x254   : > { %2605 = vmatmul.mubr.bf16.gmra.mxu1 %v2777_v33 }
 0x2fc   : > { %v3191_v34 = vpop.f32.mrf.mxu1 }
 0x2fd   : > { %1132 = vmax.xlane.f32.xlu1 %v3191_v34 }
 0x2fe   : > { %v3194_v26 = vpop.f32.mrf.mxu1 }
 0x2ff   : > { %1128 = vmax.xlane.f32.xlu0 %v3194_v26 }
 0x300   : > { %v3197_v16 = vpop.f32.mrf.mxu1 }
 0x301   : > { %1134 = vmax.xlane.f32.xlu1 %v3197_v16 }
 0x302   : > { %v3200_v35 = vpop.f32.mrf.mxu1 }
 0x303   : > { %1130 = vmax.xlane.f32.xlu0 %v3200_v35 }
 0x304   : > { %v3203_v36 = vpop.f32.mrf.mxu1 }
 0x306   : > { %v3205_v37 = vpop.f32.mrf.mxu1 }
 0x307   : > { %1136 = vmax.xlane.f32.xlu0 %v3205_v37 }
 0x308   : > { %v3208_v38 = vpop.f32.mrf.mxu1 }
 0x309   : > { %1142 = vmax.xlane.f32.xlu1 %v3208_v38 }
 0x30a   : > { %v3211_v39 = vpop.f32.mrf.mxu1 }
 0x30b   : > { %1140 = vmax.xlane.f32.xlu0 %v3203_v36 }
 0x30c   : > { %v3214_v40 = vpop.f32.mrf.mxu1 }
 0x30d   : > { %1138 = vmax.xlane.f32.xlu1 %v3211_v39 }
 0x30e   : > { %v3217_v41 = vpop.f32.mrf.mxu1 }
 0x30f   : > { %1144 = vmax.xlane.f32.xlu0 %v3217_v41 }
 0x310   : > { %v3220_v42 = vpop.f32.mrf.mxu1 }
 0x311   : > { %1150 = vmax.xlane.f32.xlu1 %v3220_v42 }
 0x312   : > { %v3223_v43 = vpop.f32.mrf.mxu1 }
 0x313   : > { %1148 = vmax.xlane.f32.xlu0 %v3214_v40 }
 0x314   : > { %v3226_v44 = vpop.f32.mrf.mxu1 }
 0x315   : > { %1146 = vmax.xlane.f32.xlu1 %v3223_v43 }
 0x316   : > { %v3229_v45 = vpop.f32.mrf.mxu1 }
 0x317   : > { %1152 = vmax.xlane.f32.xlu0 %v3229_v45 }
 0x318   : > { %v3232_v46 = vpop.f32.mrf.mxu1 }
 0x319   : > { %1158 = vmax.xlane.f32.xlu1 %v3232_v46 }
 0x31a   : > { %v3236_v47 = vpop.f32.mrf.mxu1 }
 0x31b   : > { %1156 = vmax.xlane.f32.xlu0 %v3226_v44 }
 0x31d   : > { %1154 = vmax.xlane.f32.xlu1 %v3236_v47 }
 0x386   : > { %v1133_v49 = vpop.xlane.xlu1 %1132 }
 0x387   : > { %v3242_v51 = vmax.f32 %v3239_v48, %v1133_v49 }
 0x388   : > { %v1129_v52 = vpop.xlane.xlu0 %1128 }
 0x389   : > { %1700 = vst.msk [vmem:[#allocation3 + $0x10] sm:$0xff] %vm1432_vm5, %v3242_v51  ;;  %v1160_v54 = vmax.f32 %v1112_v50, %v1129_v52  ;;  %1236 = vperm.xlu1 %2761, %v3242_v51   ;;  %v1125_v52 = vld [vmem:[#allocation3 + $0x68] sm:$0xff] }
 0x38a   : > { %v1135_v55 = vpop.xlane.xlu1 %1134 }
 0x38b   : > { %1698 = vst.msk [vmem:[#allocation3] sm:$0xff] %vm1432_vm5, %v1160_v54  ;;  %v1163_v57 = vmax.f32 %v1115_v53, %v1135_v55  ;;  %1226 = vperm.xlu0 %2760, %v1160_v54   ;;  %v1176_v17 = vsub.f32 %v1112_v50, %v1160_v54 }
 0x38c   : > { %v1131_v58 = vpop.xlane.xlu0 %1130 }
 0x38d   : > { %1701 = vst.msk [vmem:[#allocation3 + $0x18] sm:$0xff] %vm1432_vm5, %v1163_v57  ;;  %v1161_v59 = vmax.f32 %v3247_v56, %v1131_v58  ;;  %1241 = vperm.xlu1 %2761, %v1163_v57   ;;  %v1179_v23 = vsub.f32 %v1115_v53, %v1163_v57  ;;  %v1192_v27 = vmul.f32 1.442695, %v1176_v17  ;;  %v1178_v53 = vsub.f32 %v3239_v48, %v3242_v51 }
 0x38f   : > { %1699 = vst.msk [vmem:[#allocation3 + $0x8] sm:$0xff] %vm1432_vm5, %v1161_v59  ;;  %v1177_v10 = vsub.f32 %v3247_v56, %v1161_v59  ;;  %v1198_v30 = vmul.f32 1.442695, %v1179_v23  ;;  %2778 = vpow2.f32 %v1192_v27  ;;  %v1196_v51 = vmul.f32 1.442695, %v1178_v53 }
 0x390   : > { %v1137_v61 = vpop.xlane.xlu0 %1136 }
 0x391   : > { %v3256_v63 = vmax.f32 %v3252_v60, %v1137_v61  ;;  %1231 = vperm.xlu1 %2761, %v1161_v59   ;;  %v1194_v54 = vmul.f32 1.442695, %v1177_v10  ;;  %2780 = vpow2.f32 %v1198_v30 }
 0x392   : > { %v1143_v0 = vpop.xlane.xlu1 %1142 }
 0x393   : > { %1702 = vst.msk [vmem:[#allocation3 + $0x20] sm:$0xff] %vm1432_vm5, %v3256_v63  ;;  %v1167_v2 = vmax.f32 %v1119_v62, %v1143_v0  ;;  %2782 = vpow2.f32 %v1194_v54 }
 0x394   : > { %v1141_v3 = vpop.xlane.xlu0 %1140 }
 0x395   : > { %1705 = vst.msk [vmem:[#allocation3 + $0x38] sm:$0xff] %vm1432_vm5, %v1167_v2  ;;  %v3266_v5 = vmax.f32 %v3258_v1, %v1141_v3  ;;  %v1183_v33 = vsub.f32 %v1119_v62, %v1167_v2  ;;  %v1180_v62 = vsub.f32 %v3252_v60, %v3256_v63 }
 0x396   : > { %v1139_v6 = vpop.xlane.xlu1 %1138 }
 0x397   : > { %1704 = vst.msk [vmem:[#allocation3 + $0x30] sm:$0xff] %vm1432_vm5, %v3266_v5  ;;  %v1165_v9 = vmax.f32 %v3262_v4, %v1139_v6  ;;  %1256 = vperm.xlu1 %2761, %v3266_v5   ;;  %v1206_v58 = vmul.f32 1.442695, %v1183_v33  ;;  %v1200_v3 = vmul.f32 1.442695, %v1180_v62 }
 0x398   : > { %v1145_v11 = vpop.xlane.xlu0 %1144 }
 0x399   : > { %1703 = vst.msk [vmem:[#allocation3 + $0x28] sm:$0xff] %vm1432_vm5, %v1165_v9  ;;  %v3278_v13 = vmax.f32 %v3268_v7, %v1145_v11  ;;  %v1181_v59 = vsub.f32 %v3262_v4, %v1165_v9  ;;  %2784 = vpow2.f32 %v1206_v58  ;;  %v1182_v4 = vsub.f32 %v3258_v1, %v3266_v5 }
 0x39a   : > { %v1151_v14 = vpop.xlane.xlu1 %1150  ;;  %2786 = vpow2.f32 %v1196_v51 }
 0x39b   : > { %1706 = vst.msk [vmem:[#allocation3 + $0x40] sm:$0xff] %vm1432_vm5, %v3278_v13  ;;  %v1171_v18 = vmax.f32 %v3274_v12, %v1151_v14  ;;  %1246 = vperm.xlu1 %2761, %v3256_v63   ;;  %v1202_v0 = vmul.f32 1.442695, %v1181_v59  ;;  %v1184_v14 = vsub.f32 %v3268_v7, %v3278_v13 }
 0x39c   : > { %v1149_v20 = vpop.xlane.xlu0 %1148  ;;  %v3336_v63 = vpop.eup %2778 }
 0x39d   : > { %1709 = vst.msk [vmem:[#allocation3 + $0x58] sm:$0xff] %vm1432_vm5, %v1171_v18  ;;  %v3290_v22 = vmax.f32 %v3280_v15, %v1149_v20  ;;  %2788 = vpow2.f32 %v1202_v0 }
 0x39e   : > { %v1147_v24 = vpop.xlane.xlu1 %1146  ;;  %2790 = vpow2.f32 %v1200_v3 }
 0x39f   : > { %1708 = vst.msk [vmem:[#allocation3 + $0x50] sm:$0xff] %vm1432_vm5, %v3290_v22  ;;  %v1169_v28 = vmax.f32 %v3286_v21, %v1147_v24  ;;  %1251 = vperm.xlu1 %2761, %v1165_v9   ;;  %v1204_v9 = vmul.f32 1.442695, %v1182_v4  ;;  %v1186_v11 = vsub.f32 %v3280_v15, %v3290_v22 }
 0x3a0   : > { %v1153_v31 = vpop.xlane.xlu0 %1152 }
 0x3a1   : > { %1707 = vst.msk [vmem:[#allocation3 + $0x48] sm:$0xff] %vm1432_vm5, %v1169_v28  ;;  %v3302_v29 = vmax.f32 %v3292_v25, %v1153_v31  ;;  %1271 = vperm.xlu0 %2760, %v1169_v28   ;;  %v1185_v60 = vsub.f32 %v3286_v21, %v1169_v28  ;;  %v1212_v17 = vmul.f32 1.442695, %v1186_v11  ;;  %v1208_v21 = vmul.f32 1.442695, %v1184_v14 }
 0x3a2   : > { %v1159_v19 = vpop.xlane.xlu1 %1158 }
 0x3a3   : > { %1710 = vst.msk [vmem:[#allocation3 + $0x60] sm:$0xff] %vm1432_vm5, %v3302_v29  ;;  %v3309_v49 = vmax.f32 %v3297_v8, %v1159_v19  ;;  %1261 = vperm.xlu1 %2761, %v1167_v2   ;;  %v1187_v2 = vsub.f32 %v3274_v12, %v1171_v18  ;;  %v3341_v12 = vpop.eup %2780  ;;  %v1210_v1 = vmul.f32 1.442695, %v1185_v60 }
 0x3a4   : > { %v1157_v50 = vpop.xlane.xlu0 %1156 }
 0x3a5   : > { %v1191_v55 = vsub.f32 %v3297_v8, %v3309_v49  ;;  %1713 = vst.msk [vmem:[#allocation3 + $0x78] sm:$0xff] %vm1432_vm5, %v3309_v49  ;;  %v3318_v56 = vmax.f32 %v3304_v32, %v1157_v50  ;;  %1281 = vperm.xlu0 %2760, %v1171_v18   ;;  %v1214_v6 = vmul.f32 1.442695, %v1187_v2  ;;  %v3347_v18 = vpop.eup %2782 }
 0x3a6   : > { %v1155_v57 = vpop.xlane.xlu1 %1154  ;;  %v3350_v20 = vpop.eup %2784 }
 0x3a7   : > { %v1190_v61 = vsub.f32 %v3304_v32, %v3318_v56  ;;  %1712 = vst.msk [vmem:[#allocation3 + $0x70] sm:$0xff] %vm1432_vm5, %v3318_v56  ;;  %v1173_v48 = vmax.f32 %v1125_v52, %v1155_v57  ;;  %1266 = vperm.xlu1 %2761, %v3278_v13   ;;  %2792 = vpow2.f32 %v1214_v6  ;;  %v3355_v23 = vpop.eup %2786 }
 0x3a8   : > { %2794 = vpow2.f32 %v1204_v9 }
 0x3a9   : > { %1711 = vst.msk [vmem:[#allocation3 + $0x68] sm:$0xff] %vm1432_vm5, %v1173_v48  ;;  %1291 = vperm.xlu0 %2760, %v1173_v48   ;;  %v1189_v5 = vsub.f32 %v1125_v52, %v1173_v48  ;;  %2796 = vpow2.f32 %v1210_v1 }
 0x3aa   : > { %2798 = vpow2.f32 %v1212_v17  ;;  %v3358_v7 = vpop.eup %2788 }
 0x3ab   : > { %1276 = vperm.xlu1 %2761, %v3290_v22   ;;  %v1218_v15 = vmul.f32 1.442695, %v1189_v5  ;;  %v1188_v22 = vsub.f32 %v3292_v25, %v3302_v29  ;;  %v3361_v24 = vpop.eup %2790 }
 0x3ad   : > { %1301 = vperm.xlu0 %2760, %v3309_v49   ;;  %2800 = vpow2.f32 %v1218_v15  ;;  %v1216_v13 = vmul.f32 1.442695, %v1188_v22 }
 0x3ae   : > { %2802 = vpow2.f32 %v1208_v21 }
 0x3af   : > { %1286 = vperm.xlu1 %2761, %v3302_v29   ;;  %2804 = vpow2.f32 %v1216_v13 }
 0x3b1   : > { %1467 = vperm.xlu0 %2760, %v3336_v63  }
 0x3b3   : > { %1296 = vperm.xlu1 %2761, %v3318_v56  }
 0x3b4   : > { %v3364_v27 = vpop.eup %2792 }
 0x3b5   : > { %1482 = vperm.xlu0 %2760, %v3341_v12   ;;  %v3367_v25 = vpop.eup %2794 }
 0x3b6   : > { %v3370_v28 = vpop.eup %2796 }
 0x3b7   : > { %1472 = vperm.xlu1 %2761, %v3347_v18   ;;  %v3373_v31 = vpop.eup %2798 }
 0x3b9   : > { %1502 = vperm.xlu0 %2760, %v3350_v20  }
 0x3ba   : > { %v3376_v10 = vpop.eup %2800 }
 0x3bb   : > { %1477 = vperm.xlu1 %2761, %v3355_v23   ;;  %v3379_v29 = vpop.eup %2802 }
 0x3bc   : > { %v3382_v30 = vpop.eup %2804 }
 0x3bd   : > { %1492 = vperm.xlu0 %2760, %v3358_v7  }
 0x3bf   : > { %1487 = vperm.xlu1 %2761, %v3361_v24  }
 0x3c1   : > { %1522 = vperm.xlu0 %2760, %v3364_v27  }
 0x3c3   : > { %1497 = vperm.xlu1 %2761, %v3367_v25  }
 0x3c5   : > { %1512 = vperm.xlu0 %2760, %v3370_v28  }
 0x3c7   : > { %1517 = vperm.xlu1 %2761, %v3373_v31  }
 0x3c9   : > { %1532 = vperm.xlu0 %2760, %v3376_v10  }
 0x3cb   : > { %1507 = vperm.xlu1 %2761, %v3379_v29  }
 0x3cf   : > { %1527 = vperm.xlu1 %2761, %v3382_v30  }
 0x404   : > { %v1237_v19 = vpop.permute.xlu1 %1236 }
 0x405   : > { %v1306_v33 = vsub.f32 %v3191_v34, %v1237_v19 }
 0x406   : > { %v1227_v50 = vpop.permute.xlu0 %1226 }
 0x407   : > { %v1324_v52 = vmul.f32 1.442695, %v1306_v33  ;;  %v1304_v53 = vsub.f32 %v3194_v26, %v1227_v50 }
 0x408   : > { %v1242_v54 = vpop.permute.xlu1 %1241 }
 0x409   : > { %2806 = vpow2.f32 %v1324_v52  ;;  %v1320_v57 = vmul.f32 1.442695, %v1304_v53  ;;  %v1307_v58 = vsub.f32 %v3197_v16, %v1242_v54 }
 0x40b   : > { %2808 = vpow2.f32 %v1320_v57  ;;  %v1326_v59 = vmul.f32 1.442695, %v1307_v58 }
 0x40c   : > { %v1232_v48 = vpop.permute.xlu1 %1231 }
 0x40d   : > { %v1305_v51 = vsub.f32 %v3200_v35, %v1232_v48  ;;  %2810 = vpow2.f32 %v1326_v59 }
 0x40f   : > { %v1322_v62 = vmul.f32 1.442695, %v1305_v51 }
 0x411   : > { %2812 = vpow2.f32 %v1322_v62 }
 0x412   : > { %v1257_v0 = vpop.permute.xlu1 %1256 }
 0x413   : > { %v1310_v34 = vsub.f32 %v3203_v36, %v1257_v0 }
 0x415   : > { %v1332_v2 = vmul.f32 1.442695, %v1310_v34 }
 0x416   : > { %v2807_v3 = vpop.eup %2806  ;;  %v1247_v4 = vpop.permute.xlu1 %1246 }
 0x417   : > { %2814 = vpow2.f32 %v1332_v2  ;;  %v1308_v26 = vsub.f32 %v3205_v37, %v1247_v4  ;;  %1388 = vadd.xlane.f32.xlu0 %v2807_v3 }
 0x418   : > { %v2809_v6 = vpop.eup %2808 }
 0x419   : > { %v1328_v16 = vmul.f32 1.442695, %v1308_v26  ;;  %1384 = vadd.xlane.f32.xlu1 %v2809_v6 }
 0x41a   : > { %v1252_v60 = vpop.permute.xlu1 %1251  ;;  %v2811_v9 = vpop.eup %2810 }
 0x41b   : > { %2816 = vpow2.f32 %v1328_v16  ;;  %v1309_v35 = vsub.f32 %v3211_v39, %v1252_v60  ;;  %v1562_v21 = vpack.c.bf16 %v2811_v9, %v2807_v3 }
 0x41c   : > { %v1272_v11 = vpop.permute.xlu0 %1271 }
 0x41d   : > { %v1330_v1 = vmul.f32 1.442695, %v1309_v35  ;;  %1390 = vadd.xlane.f32.xlu1 %v2811_v9  ;;  %v1313_v36 = vsub.f32 %v3223_v43, %v1272_v11 }
 0x41e   : > { %v2813_v5 = vpop.eup %2812  ;;  %v1262_v14 = vpop.permute.xlu1 %1261 }
 0x41f   : > { %2818 = vpow2.f32 %v1330_v1  ;;  %v1311_v17 = vsub.f32 %v3208_v38, %v1262_v14  ;;  %1386 = vadd.xlane.f32.xlu0 %v2813_v5  ;;  %v1561_v37 = vpack.c.bf16 %v2813_v5, %v2809_v6  ;;  %v1338_v13 = vmul.f32 1.442695, %v1313_v36 }
 0x420   : > { %v1282_v15 = vpop.permute.xlu0 %1281 }
 0x421   : > { %v1334_v22 = vmul.f32 1.442695, %v1311_v17  ;;  %2624 = vmatprep.mubr.bf16.mxu0 %v1561_v37  ;;  %v1315_v39 = vsub.f32 %v3220_v42, %v1282_v15  ;;  %v1220_v17 = vmul.f32 1.442695, %v1190_v61  ;;  %v1222_v37 = vmul.f32 1.442695, %v1191_v55 }
 0x422   : > { %2625 = vmatmul.mubr.bf16.vlgmr.msra.gmra.mxu0 %v1562_v21  ;;  %v1267_v19 = vpop.permute.xlu1 %1266 }
 0x423   : > { %2820 = vpow2.f32 %v1334_v22  ;;  %v1312_v33 = vsub.f32 %v3217_v41, %v1267_v19  ;;  %v1342_v38 = vmul.f32 1.442695, %v1315_v39 }
 0x424   : > { %v2815_v50 = vpop.eup %2814  ;;  %v1292_v43 = vpop.permute.xlu0 %1291  ;;  %2822 = vpow2.f32 %v1338_v13 }
 0x425   : > { %v1336_v52 = vmul.f32 1.442695, %v1312_v33  ;;  %1396 = vadd.xlane.f32.xlu0 %v2815_v50  ;;  %v1317_v53 = vsub.f32 %v3236_v47, %v1292_v43 }
 0x426   : > { %v1277_v54 = vpop.permute.xlu1 %1276 }
 0x427   : > { %2824 = vpow2.f32 %v1336_v52  ;;  %v1314_v57 = vsub.f32 %v3214_v40, %v1277_v54  ;;  %v1346_v48 = vmul.f32 1.442695, %v1317_v53  ;;  %v1354_v52 = vld [vmem:[#allocation4 + $0x10] sm:$0xff]  ;;  %v1352_v53 = vld [vmem:[#allocation4] sm:$0xff] }
 0x428   : > { %v2817_v58 = vpop.eup %2816  ;;  %v1302_v59 = vpop.permute.xlu0 %1301  ;;  %2826 = vpow2.f32 %v1342_v38  ;;  %v1370_v54 = vmul.f32 %v3355_v23, %v1354_v52 }
 0x429   : > { %v1340_v42 = vmul.f32 1.442695, %v1314_v57  ;;  %1392 = vadd.xlane.f32.xlu0 %v2817_v58  ;;  %v1319_v41 = vsub.f32 %v3232_v46, %v1302_v59  ;;  %v1368_v59 = vmul.f32 %v3336_v63, %v1352_v53 }
 0x42a   : > { %v1287_v51 = vpop.permute.xlu1 %1286 }
 0x42b   : > { %2828 = vpow2.f32 %v1340_v42  ;;  %v1316_v62 = vsub.f32 %v3229_v45, %v1287_v51  ;;  %v1350_v47 = vmul.f32 1.442695, %v1319_v41  ;;  %v1353_v51 = vld [vmem:[#allocation4 + $0x8] sm:$0xff] }
 0x42c   : > { %v2819_v0 = vpop.eup %2818  ;;  %2830 = vpow2.f32 %v1346_v48  ;;  %v3413_v22 = vpop.permute.xlu0 %1467  ;;  %v1355_v48 = vld [vmem:[#allocation4 + $0x18] sm:$0xff] }
 0x42d   : > { %v1344_v34 = vmul.f32 1.442695, %v1316_v62  ;;  %v1563_v2 = vpack.c.bf16 %v2819_v0, %v2817_v58  ;;  %v1371_v62 = vmul.f32 %v3341_v12, %v1355_v48 }
 0x42e   : > { %v1297_v3 = vpop.permute.xlu1 %1296 }
 0x42f   : > { %2832 = vpow2.f32 %v1344_v34  ;;  %v1318_v40 = vsub.f32 %v3226_v44, %v1297_v3  ;;  %2628 = vmatprep.mubr.bf16.mxu0 %v1563_v2  ;;  %v1369_v2 = vmul.f32 %v3347_v18, %v1353_v51  ;;  %v1358_v3 = vld [vmem:[#allocation4 + $0x30] sm:$0xff]  ;;  %v1359_v18 = vld [vmem:[#allocation4 + $0x38] sm:$0xff] }
 0x430   : > { %v2821_v4 = vpop.eup %2820  ;;  %2834 = vpow2.f32 %v1350_v47  ;;  %v3417_v56 = vpop.permute.xlu0 %1482  ;;  %v1374_v63 = vmul.f32 %v3367_v25, %v1358_v3 }
 0x431   : > { %v1348_v26 = vmul.f32 1.442695, %v1318_v40  ;;  %1398 = vadd.xlane.f32.xlu1 %v2821_v4  ;;  %v1564_v6 = vpack.c.bf16 %v2821_v4, %v2815_v50  ;;  %v2823_v46 = vpop.eup %2822  ;;  %v1356_v4 = vld [vmem:[#allocation4 + $0x20] sm:$0xff] }
 0x432   : > { %v3415_v32 = vpop.permute.xlu1 %1472  ;;  %v1372_v12 = vmul.f32 %v3361_v24, %v1356_v4  ;;  %v1452_v4 = vld [vmem:[#allocation5 + $0x18] sm:$0xff] }
 0x433   : > { %2836 = vpow2.f32 %v1348_v26  ;;  %2629 = vmatmul.mubr.bf16.gmra.mxu0 %v1564_v6 }
 0x434   : > { %v2825_v16 = vpop.eup %2824  ;;  %2838 = vpow2.f32 %v1220_v17  ;;  %v3421_v13 = vpop.permute.xlu0 %1502  ;;  %v1361_v17 = vld [vmem:[#allocation4 + $0x48] sm:$0xff] }
 0x435   : > { %1394 = vadd.xlane.f32.xlu1 %v2819_v0  ;;  %v1565_v45 = vpack.c.bf16 %v2823_v46, %v2825_v16  ;;  %v2827_v60 = vpop.eup %2826  ;;  %2840 = vpow2.f32 %v1222_v37  ;;  %v1377_v53 = vmul.f32 %v3370_v28, %v1361_v17 }
 0x436   : > { %v3419_v61 = vpop.permute.xlu1 %1477 }
 0x437   : > { %2632 = vmatprep.mubr.bf16.mxu0 %v1565_v45 }
 0x438   : > { %v2829_v35 = vpop.eup %2828  ;;  %v3425_v49 = vpop.permute.xlu0 %1492 }
 0x439   : > { %1406 = vadd.xlane.f32.xlu1 %v2827_v60  ;;  %1404 = vadd.xlane.f32.xlu0 %v2829_v35  ;;  %v1566_v9 = vpack.c.bf16 %v2827_v60, %v2829_v35  ;;  %v2831_v11 = vpop.eup %2830  ;;  %v1357_v60 = vld [vmem:[#allocation4 + $0x28] sm:$0xff] }
 0x43a   : > { %v3423_v8 = vpop.permute.xlu1 %1487  ;;  %v1373_v25 = vmul.f32 %v3358_v7, %v1357_v60 }
 0x43b   : > { %2633 = vmatmul.mubr.bf16.gmra.mxu0 %v1566_v9 }
 0x43c   : > { %v2833_v44 = vpop.eup %2832  ;;  %v3429_v39 = vpop.permute.xlu0 %1522 }
 0x43d   : > { %1402 = vadd.xlane.f32.xlu1 %v2823_v46  ;;  %1400 = vadd.xlane.f32.xlu0 %v2825_v16  ;;  %v1567_v1 = vpack.c.bf16 %v2831_v11, %v2833_v44  ;;  %v2835_v5 = vpop.eup %2834  ;;  %v1375_v16 = vmul.f32 %v3350_v20, %v1359_v18  ;;  %v1360_v20 = vld [vmem:[#allocation4 + $0x40] sm:$0xff] }
 0x43e   : > { %v3427_v55 = vpop.permute.xlu1 %1497  ;;  %v1376_v7 = vmul.f32 %v3379_v29, %v1360_v20  ;;  %v1365_v29 = vld [vmem:[#allocation4 + $0x68] sm:$0xff] }
 0x43f   : > { %2636 = vmatprep.mubr.bf16.mxu0 %v1567_v1 }
 0x440   : > { %v2837_v36 = vpop.eup %2836  ;;  %v3433_v33 = vpop.permute.xlu0 %1512 }
 0x441   : > { %1414 = vadd.xlane.f32.xlu1 %v2835_v5  ;;  %1412 = vadd.xlane.f32.xlu0 %v2837_v36  ;;  %v1568_v14 = vpack.c.bf16 %v2835_v5, %v2837_v36  ;;  %v3407_v15 = vpop.eup %2838 }
 0x442   : > { %v3410_v21 = vpop.eup %2840  ;;  %v3431_v19 = vpop.permute.xlu1 %1517 }
 0x443   : > { %2637 = vmatmul.mubr.bf16.gmra.mxu0 %v1568_v14 }
 0x444   : > { %v3437_v43 = vpop.permute.xlu0 %1532 }
 0x445   : > { %1410 = vadd.xlane.f32.xlu1 %v2831_v11  ;;  %1408 = vadd.xlane.f32.xlu0 %v2833_v44  ;;  %v1362_v11 = vld [vmem:[#allocation4 + $0x50] sm:$0xff]  ;;  %v1363_v44 = vld [vmem:[#allocation4 + $0x58] sm:$0xff] }
 0x446   : > { %v3435_v50 = vpop.permute.xlu1 %1507  ;;  %v1378_v24 = vmul.f32 %v3373_v31, %v1362_v11  ;;  %v1379_v5 = vmul.f32 %v3364_v27, %v1363_v44  ;;  %v1367_v31 = vld [vmem:[#allocation4 + $0x78] sm:$0xff]  ;;  %v1456_v11 = vld [vmem:[#allocation5 + $0x48] sm:$0xff] }
 0x447   : > { %v1383_v48 = vmul.f32 %v3410_v21, %v1367_v31 }
 0x44a   : > { %v3439_v38 = vpop.permute.xlu1 %1527 }
 0x456   : > { %1537 = vperm.xlu1 %2761, %v3407_v15  }
 0x45b   : > { %1542 = vperm.xlu0 %2760, %v3410_v21   ;;  %v1451_v21 = vld [vmem:[#allocation5 + $0x58] sm:$0xff] }
 0x4a0   : > { %v1389_v57 = vpop.xlane.xlu0 %1388 }
 0x4a1   : > { %v1418_v58 = vadd.f32 %v1389_v57, %v1370_v54 }
 0x4a2   : > { %v1385_v42 = vpop.xlane.xlu1 %1384 }
 0x4a3   : > { %1435 = vst.msk [vmem:[#allocation4 + $0x10] sm:$0xff] %vm1432_vm5, %v1418_v58  ;;  %v1416_v41 = vadd.f32 %v1385_v42, %v1368_v59  ;;  %v1366_v58 = vld [vmem:[#allocation4 + $0x70] sm:$0xff] }
 0x4a4   : > { %v1382_v42 = vmul.f32 %v3407_v15, %v1366_v58  ;;  %v1458_v58 = vld [vmem:[#allocation5 + $0x20] sm:$0xff] }
 0x4a5   : > { %1433 = vst.msk [vmem:[#allocation4] sm:$0xff] %vm1432_vm5, %v1416_v41 }
 0x4a6   : > { %v1391_v0 = vpop.xlane.xlu1 %1390 }
 0x4a7   : > { %v1419_v34 = vadd.f32 %v1391_v0, %v1371_v62  ;;  %v1364_v62 = vld [vmem:[#allocation4 + $0x60] sm:$0xff] }
 0x4a8   : > { %v1387_v47 = vpop.xlane.xlu0 %1386 }
 0x4a9   : > { %1436 = vst.msk [vmem:[#allocation4 + $0x18] sm:$0xff] %vm1432_vm5, %v1419_v34  ;;  %v1417_v23 = vadd.f32 %v1387_v47, %v1369_v2  ;;  %v1380_v34 = vmul.f32 %v3382_v30, %v1364_v62  ;;  %v1381_v2 = vmul.f32 %v3376_v10, %v1365_v29  ;;  %v1450_v30 = vld [vmem:[#allocation5] sm:$0xff]  ;;  %v1548_v10 = vmul.f32 %v3417_v56, %v1452_v4 }
 0x4ab   : > { %1434 = vst.msk [vmem:[#allocation4 + $0x8] sm:$0xff] %vm1432_vm5, %v1417_v23 }
 0x4ae   : > { %v1397_v40 = vpop.xlane.xlu0 %1396 }
 0x4af   : > { %v1422_v26 = vadd.f32 %v1397_v40, %v1374_v63  ;;  %v1449_v63 = vld [vmem:[#allocation5 + $0x30] sm:$0xff]  ;;  %v1547_v40 = vmul.f32 %v3419_v61, %v1451_v21  ;;  %v1455_v61 = vld [vmem:[#allocation5 + $0x8] sm:$0xff] }
 0x4b1   : > { %1439 = vst.msk [vmem:[#allocation4 + $0x30] sm:$0xff] %vm1432_vm5, %v1422_v26 }
 0x4b2   : > { %v1393_v6 = vpop.xlane.xlu0 %1392 }
 0x4b3   : > { %v1420_v46 = vadd.f32 %v1393_v6, %v1372_v12  ;;  %v1545_v12 = vmul.f32 %v3413_v22, %v1449_v63  ;;  %v1551_v22 = vmul.f32 %v3427_v55, %v1455_v61 }
 0x4b5   : > { %1437 = vst.msk [vmem:[#allocation4 + $0x20] sm:$0xff] %vm1432_vm5, %v1420_v46 }
 0x4ba   : > { %v1399_v45 = vpop.xlane.xlu1 %1398 }
 0x4bb   : > { %v1423_v35 = vadd.f32 %v1399_v45, %v1375_v16  ;;  %v1546_v45 = vmul.f32 %v3415_v32, %v1450_v30 }
 0x4bd   : > { %1440 = vst.msk [vmem:[#allocation4 + $0x38] sm:$0xff] %vm1432_vm5, %v1423_v35 }
 0x4be   : > { %v1395_v9 = vpop.xlane.xlu1 %1394 }
 0x4bf   : > { %v1421_v1 = vadd.f32 %v1395_v9, %v1373_v25  ;;  %v1453_v9 = vld [vmem:[#allocation5 + $0x50] sm:$0xff] }
 0x4c1   : > { %1438 = vst.msk [vmem:[#allocation4 + $0x28] sm:$0xff] %vm1432_vm5, %v1421_v1  ;;  %v1549_v1 = vmul.f32 %v3423_v8, %v1453_v9  ;;  %v1460_v8 = vld [vmem:[#allocation5 + $0x38] sm:$0xff] }
 0x4c2   : > { %v1405_v36 = vpop.xlane.xlu0 %1404  ;;  %v1407_v14 = vpop.xlane.xlu1 %1406 }
 0x4c3   : > { %v1426_v37 = vadd.f32 %v1405_v36, %v1378_v24  ;;  %v1427_v52 = vadd.f32 %v1407_v14, %v1379_v5  ;;  %v1454_v24 = vld [vmem:[#allocation5 + $0x68] sm:$0xff]  ;;  %v1552_v36 = vmul.f32 %v3421_v13, %v1456_v11  ;;  %v1459_v14 = vld [vmem:[#allocation5 + $0x10] sm:$0xff] }
 0x4c4   : > { %v1550_v17 = vmul.f32 %v3425_v49, %v1454_v24  ;;  %v1555_v55 = vmul.f32 %v3431_v19, %v1459_v14 }
 0x4c5   : > { %1443 = vst.msk [vmem:[#allocation4 + $0x50] sm:$0xff] %vm1432_vm5, %v1426_v37  ;;  %1444 = vst.msk [vmem:[#allocation4 + $0x58] sm:$0xff] %vm1432_vm5, %v1427_v52  ;;  %v1457_v52 = vld [vmem:[#allocation5 + $0x40] sm:$0xff] }
 0x4c6   : > { %v1401_v54 = vpop.xlane.xlu0 %1400  ;;  %v1403_v57 = vpop.xlane.xlu1 %1402 }
 0x4c7   : > { %v1424_v59 = vadd.f32 %v1401_v54, %v1376_v7  ;;  %v1425_v27 = vadd.f32 %v1403_v57, %v1377_v53  ;;  %v1553_v57 = vmul.f32 %v3435_v50, %v1457_v52 }
 0x4c9   : > { %1441 = vst.msk [vmem:[#allocation4 + $0x40] sm:$0xff] %vm1432_vm5, %v1424_v59  ;;  %1442 = vst.msk [vmem:[#allocation4 + $0x48] sm:$0xff] %vm1432_vm5, %v1425_v27  ;;  %v1556_v59 = vmul.f32 %v3429_v39, %v1460_v8  ;;  %v1463_v27 = vld [vmem:[#allocation5 + $0x78] sm:$0xff] }
 0x4ca   : > { %v1413_v41 = vpop.xlane.xlu0 %1412  ;;  %v1415_v51 = vpop.xlane.xlu1 %1414 }
 0x4cb   : > { %v1430_v0 = vadd.f32 %v1413_v41, %v1382_v42  ;;  %v1431_v28 = vadd.f32 %v1415_v51, %v1383_v48  ;;  %v1554_v41 = vmul.f32 %v3433_v33, %v1458_v58  ;;  %v1461_v51 = vld [vmem:[#allocation5 + $0x60] sm:$0xff] }
 0x4cd   : > { %1447 = vst.msk [vmem:[#allocation4 + $0x70] sm:$0xff] %vm1432_vm5, %v1430_v0  ;;  %1448 = vst.msk [vmem:[#allocation4 + $0x78] sm:$0xff] %vm1432_vm5, %v1431_v28  ;;  %v1464_v0 = vld [vmem:[#allocation5 + $0x28] sm:$0xff] }
 0x4ce   : > { %v1409_v47 = vpop.xlane.xlu0 %1408  ;;  %v1411_v23 = vpop.xlane.xlu1 %1410 }
 0x4cf   : > { %v1428_v3 = vadd.f32 %v1409_v47, %v1380_v34  ;;  %v1429_v15 = vadd.f32 %v1411_v23, %v1381_v2  ;;  %v1557_v2 = vmul.f32 %v3439_v38, %v1461_v51  ;;  %v1462_v47 = vld [vmem:[#allocation5 + $0x70] sm:$0xff] }
 0x4d0   : > { %v1558_v21 = vmul.f32 %v3437_v43, %v1462_v47 }
 0x4d1   : > { %1445 = vst.msk [vmem:[#allocation4 + $0x60] sm:$0xff] %vm1432_vm5, %v1428_v3  ;;  %1446 = vst.msk [vmem:[#allocation4 + $0x68] sm:$0xff] %vm1432_vm5, %v1429_v15 }
 0x4d2   : > { %v1538_v42 = vpop.permute.xlu1 %1537 }
 0x4d3   : > { %v1559_v29 = vmul.f32 %v1538_v42, %v1463_v27 }
 0x4d6   : > { %v1543_v28 = vpop.permute.xlu0 %1542 }
 0x4d7   : > { %v1560_v3 = vmul.f32 %v1543_v28, %v1464_v0 }
 0x4e2   : > { %v2626_v26 = vpop.f32.mrf.mxu0 }
 0x4e3   : > { %v1668_v6 = vadd.f32 %v2626_v26, %v1547_v40 }
 0x4e4   : > { %v1603_v46 = vpop.f32.mrf.mxu0 }
 0x4e5   : > { %1684 = vst [vmem:[#allocation5 + $0x58] sm:$0xff] %v1668_v6  ;;  %v1666_v18 = vadd.f32 %v1603_v46, %v1545_v12 }
 0x4e6   : > { %v2627_v16 = vpop.f32.mrf.mxu0 }
 0x4e7   : > { %1682 = vst [vmem:[#allocation5 + $0x30] sm:$0xff] %v1666_v18  ;;  %v1669_v60 = vadd.f32 %v2627_v16, %v1548_v10 }
 0x4e8   : > { %v1606_v35 = vpop.f32.mrf.mxu0 }
 0x4e9   : > { %1685 = vst [vmem:[#allocation5 + $0x18] sm:$0xff] %v1669_v60  ;;  %v1667_v25 = vadd.f32 %v1606_v35, %v1546_v45 }
 0x4eb   : > { %1683 = vst [vmem:[#allocation5] sm:$0xff] %v1667_v25 }
 0x4f3   : > { %v2630_v44 = vpop.f32.mrf.mxu0 }
 0x4f4   : > { %v1672_v56 = vadd.f32 %v2630_v44, %v1551_v22 }
 0x4f5   : > { %v1619_v5 = vpop.f32.mrf.mxu0 }
 0x4f6   : > { %1688 = vst [vmem:[#allocation5 + $0x8] sm:$0xff] %v1672_v56  ;;  %v1670_v32 = vadd.f32 %v1619_v5, %v1549_v1 }
 0x4f7   : > { %v2631_v20 = vpop.f32.mrf.mxu0 }
 0x4f8   : > { %1686 = vst [vmem:[#allocation5 + $0x50] sm:$0xff] %v1670_v32  ;;  %v1673_v37 = vadd.f32 %v2631_v20, %v1552_v36 }
 0x4f9   : > { %v1622_v7 = vpop.f32.mrf.mxu0 }
 0x4fa   : > { %1689 = vst [vmem:[#allocation5 + $0x48] sm:$0xff] %v1673_v37  ;;  %v1671_v53 = vadd.f32 %v1622_v7, %v1550_v17 }
 0x4fb   : > { %v2634_v54 = vpop.f32.mrf.mxu0 }
 0x4fc   : > { %1687 = vst [vmem:[#allocation5 + $0x68] sm:$0xff] %v1671_v53  ;;  %v1676_v13 = vadd.f32 %v2634_v54, %v1555_v55 }
 0x4fd   : > { %v1635_v31 = vpop.f32.mrf.mxu0 }
 0x4fe   : > { %1692 = vst [vmem:[#allocation5 + $0x10] sm:$0xff] %v1676_v13  ;;  %v1674_v49 = vadd.f32 %v1635_v31, %v1553_v57 }
 0x4ff   : > { %v2635_v48 = vpop.f32.mrf.mxu0 }
 0x500   : > { %1690 = vst [vmem:[#allocation5 + $0x40] sm:$0xff] %v1674_v49  ;;  %v1677_v19 = vadd.f32 %v2635_v48, %v1556_v59 }
 0x501   : > { %v1638_v62 = vpop.f32.mrf.mxu0 }
 0x502   : > { %1693 = vst [vmem:[#allocation5 + $0x38] sm:$0xff] %v1677_v19  ;;  %v1675_v50 = vadd.f32 %v1638_v62, %v1554_v41 }
 0x503   : > { %v2638_v34 = vpop.f32.mrf.mxu0 }
 0x504   : > { %1691 = vst [vmem:[#allocation5 + $0x20] sm:$0xff] %v1675_v50  ;;  %v1680_v39 = vadd.f32 %v2638_v34, %v1559_v29 }
 0x505   : > { %v1651_v23 = vpop.f32.mrf.mxu0 }
 0x506   : > { %1696 = vst [vmem:[#allocation5 + $0x78] sm:$0xff] %v1680_v39  ;;  %v1678_v15 = vadd.f32 %v1651_v23, %v1557_v2 }
 0x507   : > { %v2639_v33 = vpop.f32.mrf.mxu0 }
 0x508   : > { %1694 = vst [vmem:[#allocation5 + $0x60] sm:$0xff] %v1678_v15  ;;  %v1681_v63 = vadd.f32 %v2639_v33, %v1560_v3  ;;  %1717 = sbr.rel (%p2355_p10) target bundleno = 1671 (0x687), region = 60 }
 0x509   : > { %v1654_v40 = vpop.f32.mrf.mxu0 }
 0x50a   : > { %1697 = vst [vmem:[#allocation5 + $0x28] sm:$0xff] %v1681_v63  ;;  %v1679_v4 = vadd.f32 %v1654_v40, %v1558_v21 }
 0x50c   : > { %1695 = vst [vmem:[#allocation5 + $0x70] sm:$0xff] %v1679_v4 }
 0x50d   : > { %v1742_v38 = vld [vmem:[#allocation4 + $0x40] sm:$0xff]  ;;  %v1743_v12 = vld [vmem:[#allocation4 + $0x48] sm:$0xff]  ;;  %v2943_v6 = vmov 0   ;;  %v1737_v43 = vld [vmem:[#allocation4 + $0x18] sm:$0xff]  ;;  %vm2150_vm6 = vcmask 27648  }
 0x50e   : > { %v1734_v26 = vld [vmem:[#allocation4] sm:$0xff]  ;;  %2843 = vset.pattern.permute.xlu1 %v2943_v6  ;;  %2842 = vset.pattern.permute.xlu0 %v2943_v6  ;;  %2852 = vrcp.f32 %v1742_v38  ;;  %v1735_v30 = vld [vmem:[#allocation4 + $0x8] sm:$0xff]  ;;  %v1736_v46 = vld [vmem:[#allocation4 + $0x10] sm:$0xff] }
 0x50f   : > { %2854 = vrcp.f32 %v1734_v26  ;;  %v2844_v10 = vld [vmem:[%s3600_s6 + $0x38] sm:$0xff]   ;;  %v2845_v18 = vld [vmem:[%s3600_s6 + $0x30] sm:$0xff]   ;;  %v2846_v60 = vld [vmem:[%s3600_s6 + $0x28] sm:$0xff]  }
 0x510   : > { %2856 = vrcp.f32 %v1743_v12  ;;  %v1745_v16 = vld [vmem:[#allocation4 + $0x58] sm:$0xff]  ;;  %2640 = vmatprep.subr.bf16.mxu0 %v2844_v10  ;;  %2674 = vmatprep.subr.bf16.mxu1 %v2844_v10  ;;  %v1744_v45 = vld [vmem:[#allocation4 + $0x50] sm:$0xff]  ;;  %v1739_v35 = vld [vmem:[#allocation4 + $0x28] sm:$0xff] }
 0x511   : > { %2858 = vrcp.f32 %v1735_v30  ;;  %2641 = vmatpush3.bf16.msra.mxu0 %v2844_v10  ;;  %2682 = vmatpush3.bf16.msra.mxu1 %v2844_v10  ;;  %v1738_v25 = vld [vmem:[#allocation4 + $0x20] sm:$0xff]  ;;  %v1747_v44 = vld [vmem:[#allocation4 + $0x68] sm:$0xff]  ;;  %v2848_v24 = vld [vmem:[%s3600_s6 + $0x18] sm:$0xff]  }
 0x512   : > { %2860 = vrcp.f32 %v1737_v43  ;;  %2642 = vmatprep.subr.bf16.mxu0 %v2845_v18  ;;  %2675 = vmatprep.subr.bf16.mxu1 %v2845_v18  ;;  %v2847_v9 = vld [vmem:[%s3600_s6 + $0x20] sm:$0xff]   ;;  %v1741_v36 = vld [vmem:[#allocation4 + $0x38] sm:$0xff]  ;;  %v1740_v14 = vld [vmem:[#allocation4 + $0x30] sm:$0xff] }
 0x513   : > { %2862 = vrcp.f32 %v1736_v46  ;;  %v1746_v56 = vld [vmem:[#allocation4 + $0x60] sm:$0xff]  ;;  %v2849_v20 = vld [vmem:[%s3600_s6 + $0x10] sm:$0xff]   ;;  %v1749_v37 = vld [vmem:[#allocation4 + $0x78] sm:$0xff] }
 0x514   : > { %2864 = vrcp.f32 %v1745_v16  ;;  %v1748_v7 = vld [vmem:[#allocation4 + $0x70] sm:$0xff]  ;;  %v2850_v55 = vld [vmem:[%s3600_s6 + $0x8] sm:$0xff]   ;;  %v2851_v54 = vld [vmem:[%s3600_s6] sm:$0xff]  }
 0x515   : > { %2866 = vrcp.f32 %v1744_v45  ;;  %2643 = vmatpush3.bf16.msra.mxu0 %v2845_v18  ;;  %2683 = vmatpush3.bf16.msra.mxu1 %v2845_v18  ;;  %v1726_v48 = vld [vmem:[#allocation5 + $0x40] sm:$0xff]  ;;  %v1718_v19 = vld [vmem:[#allocation5 + $0x30] sm:$0xff]  ;;  %v1721_v2 = vld [vmem:[#allocation5 + $0x18] sm:$0xff] }
 0x516   : > { %2644 = vmatprep.subr.bf16.mxu0 %v2846_v60  ;;  %2676 = vmatprep.subr.bf16.mxu1 %v2846_v60  ;;  %2868 = vrcp.f32 %v1739_v35  ;;  %v1727_v41 = vld [vmem:[#allocation5 + $0x20] sm:$0xff]  ;;  %v1720_v39 = vld [vmem:[#allocation5 + $0x58] sm:$0xff]  ;;  %v1728_v40 = vld [vmem:[#allocation5 + $0x10] sm:$0xff] }
 0x517   : > { %2870 = vrcp.f32 %v1738_v25  ;;  %v1719_v51 = vld [vmem:[#allocation5] sm:$0xff]  ;;  %v1729_v63 = vld [vmem:[#allocation5 + $0x38] sm:$0xff]  ;;  %v1723_v30 = vld [vmem:[#allocation5 + $0x68] sm:$0xff] }
 0x518   : > { %2872 = vrcp.f32 %v1747_v44  ;;  %v1722_v43 = vld [vmem:[#allocation5 + $0x50] sm:$0xff]  ;;  %v1730_v35 = vld [vmem:[#allocation5 + $0x60] sm:$0xff]  ;;  %v1725_v44 = vld [vmem:[#allocation5 + $0x48] sm:$0xff] }
 0x519   : > { %2645 = vmatpush3.bf16.msra.mxu0 %v2846_v60  ;;  %2684 = vmatpush3.bf16.msra.mxu1 %v2846_v60  ;;  %2874 = vrcp.f32 %v1746_v56  ;;  %v1731_v60 = vld [vmem:[#allocation5 + $0x70] sm:$0xff] }
 0x51a   : > { %2646 = vmatprep.subr.bf16.mxu0 %v2847_v9  ;;  %2677 = vmatprep.subr.bf16.mxu1 %v2847_v9  ;;  %2876 = vrcp.f32 %v1741_v36 }
 0x51b   : > { %v2853_v61 = vpop.eup %2852  ;;  %2878 = vrcp.f32 %v1740_v14  ;;  %v1733_v14 = vld [vmem:[#allocation5 + $0x28] sm:$0xff] }
 0x51c   : > { %v2855_v22 = vpop.eup %2854  ;;  %1808 = vperm.xlu1 %2843, %v2853_v61   ;;  %2880 = vrcp.f32 %v1749_v37 }
 0x51d   : > { %v2857_v11 = vpop.eup %2856  ;;  %1768 = vperm.xlu0 %2842, %v2855_v22   ;;  %2647 = vmatpush3.bf16.msra.mxu0 %v2847_v9  ;;  %2882 = vrcp.f32 %v1748_v7 }
 0x51e   : > { %v2859_v1 = vpop.eup %2858  ;;  %2685 = vmatpush3.bf16.msra.mxu1 %v2847_v9  ;;  %2648 = vmatprep.subr.bf16.mxu0 %v2848_v24 }
 0x51f   : > { %v2861_v5 = vpop.eup %2860  ;;  %2678 = vmatprep.subr.bf16.mxu1 %v2848_v24 }
 0x520   : > { %1813 = vperm.xlu1 %2843, %v2857_v11   ;;  %v2863_v32 = vpop.eup %2862 }
 0x521   : > { %1773 = vperm.xlu0 %2842, %v2859_v1   ;;  %v2865_v17 = vpop.eup %2864  ;;  %2649 = vmatpush3.bf16.msra.mxu0 %v2848_v24  ;;  %v1724_v1 = vld [vmem:[#allocation5 + $0x8] sm:$0xff] }
 0x522   : > { %v2867_v52 = vpop.eup %2866  ;;  %2686 = vmatpush3.bf16.msra.mxu1 %v2848_v24  ;;  %2650 = vmatprep.subr.bf16.mxu0 %v2849_v20 }
 0x523   : > { %2679 = vmatprep.subr.bf16.mxu1 %v2849_v20  ;;  %v2869_v53 = vpop.eup %2868 }
 0x524   : > { %1783 = vperm.xlu1 %2843, %v2861_v5   ;;  %v2871_v8 = vpop.eup %2870 }
 0x525   : > { %1778 = vperm.xlu0 %2842, %v2863_v32   ;;  %2651 = vmatpush3.bf16.msra.mxu0 %v2849_v20  ;;  %v2873_v57 = vpop.eup %2872 }
 0x526   : > { %2687 = vmatpush3.bf16.msra.mxu1 %v2849_v20  ;;  %2652 = vmatprep.subr.bf16.mxu0 %v2850_v55  ;;  %v2875_v13 = vpop.eup %2874  ;;  %v1732_v20 = vld [vmem:[#allocation5 + $0x78] sm:$0xff] }
 0x527   : > { %2680 = vmatprep.subr.bf16.mxu1 %v2850_v55  ;;  %v2877_v58 = vpop.eup %2876 }
 0x528   : > { %1823 = vperm.xlu1 %2843, %v2865_v17   ;;  %v2879_v31 = vpop.eup %2878 }
 0x529   : > { %1818 = vperm.xlu0 %2842, %v2867_v52   ;;  %2653 = vmatpush3.bf16.msra.mxu0 %v2850_v55  ;;  %v2881_v59 = vpop.eup %2880 }
 0x52a   : > { %2688 = vmatpush3.bf16.msra.mxu1 %v2850_v55  ;;  %2654 = vmatprep.subr.bf16.mxu0 %v2851_v54  ;;  %v2883_v49 = vpop.eup %2882 }
 0x52b   : > { %2681 = vmatprep.subr.bf16.mxu1 %v2851_v54 }
 0x52c   : > { %1793 = vperm.xlu1 %2843, %v2869_v53  }
 0x52d   : > { %1788 = vperm.xlu0 %2842, %v2871_v8   ;;  %2655 = vmatpush3.bf16.msra.mxu0 %v2851_v54  ;;  %v2494_v8 = vld [vmem:[%s3037_s22 + $0x8] sm:$0xff]  }
 0x52e   : > { %2689 = vmatpush3.bf16.msra.mxu1 %v2851_v54  ;;  %v3516_v54 = vld [vmem:[%s3601_s7] ss:$0 sm:$0xff] }
 0x530   : > { %1833 = vperm.xlu1 %2843, %v2873_v57   ;;  %v2456_v57 = vld [vmem:[%s3037_s22] sm:$0xff]  }
 0x531   : > { %1828 = vperm.xlu0 %2842, %v2875_v13   ;;  %v2461_v13 = vunpack.c.l.bf16 %v2494_v8 }
 0x534   : > { %1803 = vperm.xlu1 %2843, %v2877_v58  }
 0x535   : > { %1798 = vperm.xlu0 %2842, %v2879_v31   ;;  %v2498_v31 = vld [vmem:[%s3037_s22 + $0x28] sm:$0xff]  }
 0x538   : > { %1843 = vperm.xlu1 %2843, %v2881_v59  }
 0x539   : > { %1838 = vperm.xlu0 %2842, %v2883_v49   ;;  %v2457_v49 = vunpack.c.l.bf16 %v2456_v57 }
 0x597   : > { %v1809_v27 = vpop.permute.xlu1 %1808 }
 0x598   : > { %v1769_v42 = vpop.permute.xlu0 %1768  ;;  %v1854_v29 = vmul.f32 %v1809_v27, %v1726_v48 }
 0x599   : > { %v1846_v28 = vmul.f32 %v1769_v42, %v1718_v19  ;;  %v2477_v19 = vunpack.c.l.bf16 %v2498_v31 }
 0x59b   : > { %v1814_v62 = vpop.permute.xlu1 %1813 }
 0x59c   : > { %v1855_v50 = vmul.f32 %v1814_v62, %v1727_v41  ;;  %v1774_v0 = vpop.permute.xlu0 %1773  ;;  %v2462_v41 = vunpack.c.h.bf16 %v2494_v8 }
 0x59d   : > { %v1847_v34 = vmul.f32 %v1774_v0, %v1719_v51  ;;  %v2497_v51 = vld [vmem:[%s3037_s22 + $0x20] sm:$0xff]  }
 0x59e   : > { %v1866_v47 = vpack.c.bf16 %v1855_v50, %v1854_v29  ;;  %v2458_v50 = vunpack.c.h.bf16 %v2456_v57 }
 0x59f   : > { %v1784_v23 = vpop.permute.xlu1 %1783  ;;  %v1862_v3 = vpack.c.bf16 %v1847_v34, %v1846_v28 }
 0x5a0   : > { %v1849_v15 = vmul.f32 %v1784_v23, %v1721_v2  ;;  %v1779_v33 = vpop.permute.xlu0 %1778  ;;  %2664 = vmatprep.mubr.bf16.mxu1 %v1866_v47  ;;  %v2473_v23 = vunpack.c.l.bf16 %v2497_v51 }
 0x5a1   : > { %v1848_v21 = vmul.f32 %v1779_v33, %v1720_v39  ;;  %2656 = vmatprep.mubr.bf16.mxu0 %v1862_v3  ;;  %v2478_v3 = vunpack.c.h.bf16 %v2498_v31 }
 0x5a3   : > { %v1863_v4 = vpack.c.bf16 %v1849_v15, %v1848_v21  ;;  %v1824_v38 = vpop.permute.xlu1 %1823 }
 0x5a4   : > { %v1857_v26 = vmul.f32 %v1824_v38, %v1729_v63  ;;  %v1819_v12 = vpop.permute.xlu0 %1818  ;;  %v2474_v38 = vunpack.c.h.bf16 %v2497_v51 }
 0x5a5   : > { %v1856_v6 = vmul.f32 %v1819_v12, %v1728_v40  ;;  %2657 = vmatmul.mubr.bf16.vlgmr.msra.gmra.mxu0 %v1863_v4 }
 0x5a7   : > { %v1867_v46 = vpack.c.bf16 %v1857_v26, %v1856_v6  ;;  %v1794_v10 = vpop.permute.xlu1 %1793 }
 0x5a8   : > { %v1851_v18 = vmul.f32 %v1794_v10, %v1723_v30  ;;  %v1789_v16 = vpop.permute.xlu0 %1788 }
 0x5a9   : > { %v1850_v45 = vmul.f32 %v1789_v16, %v1722_v43  ;;  %2665 = vmatmul.mubr.bf16.vlgmr.msra.gmra.mxu1 %v1867_v46 }
 0x5ab   : > { %v1864_v25 = vpack.c.bf16 %v1851_v18, %v1850_v45  ;;  %v1834_v61 = vpop.permute.xlu1 %1833 }
 0x5ac   : > { %v1859_v9 = vmul.f32 %v1834_v61, %v1731_v60  ;;  %v1829_v22 = vpop.permute.xlu0 %1828  ;;  %v2496_v60 = vld [vmem:[%s3037_s22 + $0x18] sm:$0xff]   ;;  %v2495_v61 = vld [vmem:[%s3037_s22 + $0x10] sm:$0xff]  }
 0x5ad   : > { %v1858_v11 = vmul.f32 %v1829_v22, %v1730_v35  ;;  %2660 = vmatprep.mubr.bf16.mxu0 %v1864_v25  ;;  %v2469_v22 = vunpack.c.l.bf16 %v2496_v60 }
 0x5af   : > { %v1868_v56 = vpack.c.bf16 %v1859_v9, %v1858_v11  ;;  %v1804_v24 = vpop.permute.xlu1 %1803 }
 0x5b0   : > { %v1853_v5 = vmul.f32 %v1804_v24, %v1725_v44  ;;  %v1799_v36 = vpop.permute.xlu0 %1798  ;;  %v2500_v44 = vld [vmem:[%s3037_s22 + $0x38] sm:$0xff]  }
 0x5b1   : > { %v1852_v32 = vmul.f32 %v1799_v36, %v1724_v1  ;;  %2668 = vmatprep.mubr.bf16.mxu1 %v1868_v56  ;;  %v2465_v56 = vunpack.c.l.bf16 %v2495_v61  ;;  %v2486_v31 = vunpack.c.h.bf16 %v2500_v44 }
 0x5b3   : > { %v1865_v17 = vpack.c.bf16 %v1853_v5, %v1852_v32  ;;  %v1844_v37 = vpop.permute.xlu1 %1843  ;;  %v2470_v32 = vunpack.c.h.bf16 %v2496_v60 }
 0x5b4   : > { %v1861_v52 = vmul.f32 %v1844_v37, %v1733_v14  ;;  %v1839_v7 = vpop.permute.xlu0 %1838  ;;  %v2485_v14 = vunpack.c.l.bf16 %v2500_v44 }
 0x5b5   : > { %v1860_v55 = vmul.f32 %v1839_v7, %v1732_v20  ;;  %2661 = vmatmul.mubr.bf16.gmra.mxu0 %v1865_v17  ;;  %v2499_v20 = vld [vmem:[%s3037_s22 + $0x30] sm:$0xff]  }
 0x5b7   : > { %v1869_v53 = vpack.c.bf16 %v1861_v52, %v1860_v55  ;;  %v2466_v52 = vunpack.c.h.bf16 %v2495_v61 }
 0x5b9   : > { %2669 = vmatmul.mubr.bf16.gmra.mxu1 %v1869_v53 }
 0x665   : > { %v2658_v58 = vpop.f32.mrf.mxu0 }
 0x666   : > { %v1984_v59 = vadd.f32 %v2658_v58, %v3516_v54  ;;  %v2481_v58 = vunpack.c.l.bf16 %v2499_v20 }
 0x667   : > { %v1975_v27 = vpop.f32.mrf.mxu0 }
 0x668   : > { %v2072_v42 = vadd.f32 %v2461_v13, %v1984_v59  ;;  %v1976_v48 = vadd.f32 %v3516_v54, %v1975_v27 }
 0x669   : > { %v2659_v62 = vpop.f32.mrf.mxu0  ;;  %v2666_v29 = vpop.f32.mrf.mxu1 }
 0x66a   : > { %v2401_v0 = vpack.c.bf16 %v2072_v42, %v2072_v42  ;;  %v2070_v28 = vadd.f32 %v2457_v49, %v1976_v48  ;;  %v1987_v34 = vadd.f32 %v2659_v62, %v3516_v54  ;;  %v2016_v2 = vadd.f32 %v2666_v29, %v3516_v54 }
 0x66b   : > { %v1978_v39 = vpop.f32.mrf.mxu0  ;;  %v2007_v47 = vpop.f32.mrf.mxu1 }
 0x66c   : > { %2153 = vst.msk [vmem:[%s3042_s25 + $0x8] sm:$0xf] %vm2150_vm6, %v2401_v0  ;;  %v2399_v15 = vpack.c.bf16 %v2070_v28, %v2070_v28  ;;  %v2073_v33 = vadd.f32 %v2462_v41, %v1987_v34  ;;  %v2080_v21 = vadd.f32 %v2477_v19, %v2016_v2  ;;  %v1979_v63 = vadd.f32 %v3516_v54, %v1978_v39 }
 0x66d   : > { %v2008_v40 = vadd.f32 %v3516_v54, %v2007_v47  ;;  %v2667_v4 = vpop.f32.mrf.mxu1  ;;  %v2482_v19 = vunpack.c.h.bf16 %v2499_v20 }
 0x66e   : > { %2151 = vst.msk [vmem:[%s3042_s25] sm:$0xf] %vm2150_vm6, %v2399_v15  ;;  %v2402_v26 = vpack.c.bf16 %v2073_v33, %v2073_v33  ;;  %v2409_v12 = vpack.c.bf16 %v2080_v21, %v2080_v21  ;;  %v2071_v6 = vadd.f32 %v2458_v50, %v1979_v63  ;;  %v2019_v30 = vadd.f32 %v2667_v4, %v3516_v54 }
 0x66f   : > { %v2078_v43 = vadd.f32 %v2473_v23, %v2008_v40  ;;  %v2010_v46 = vpop.f32.mrf.mxu1 }
 0x670   : > { %2154 = vst.msk [vmem:[%s3042_s25 + $0xc] sm:$0xf] %vm2150_vm6, %v2402_v26  ;;  %2161 = vst.msk [vmem:[%s3042_s25 + $0x28] sm:$0xf] %vm2150_vm6, %v2409_v12  ;;  %v2400_v10 = vpack.c.bf16 %v2071_v6, %v2071_v6  ;;  %v2081_v18 = vadd.f32 %v2478_v3, %v2019_v30  ;;  %v2011_v16 = vadd.f32 %v3516_v54, %v2010_v46 }
 0x671   : > { %v2407_v45 = vpack.c.bf16 %v2078_v43, %v2078_v43 }
 0x672   : > { %2152 = vst.msk [vmem:[%s3042_s25 + $0x4] sm:$0xf] %vm2150_vm6, %v2400_v10  ;;  %v2410_v35 = vpack.c.bf16 %v2081_v18, %v2081_v18  ;;  %v2079_v25 = vadd.f32 %v2474_v38, %v2011_v16 }
 0x673   : > { %2159 = vst.msk [vmem:[%s3042_s25 + $0x20] sm:$0xf] %vm2150_vm6, %v2407_v45 }
 0x674   : > { %2162 = vst.msk [vmem:[%s3042_s25 + $0x2c] sm:$0xf] %vm2150_vm6, %v2410_v35  ;;  %v2408_v9 = vpack.c.bf16 %v2079_v25, %v2079_v25 }
 0x675   : > { %v2662_v11 = vpop.f32.mrf.mxu0 }
 0x676   : > { %2160 = vst.msk [vmem:[%s3042_s25 + $0x24] sm:$0xf] %vm2150_vm6, %v2408_v9  ;;  %v2000_v1 = vadd.f32 %v2662_v11, %v3516_v54 }
 0x677   : > { %v1991_v24 = vpop.f32.mrf.mxu0 }
 0x678   : > { %v2076_v5 = vadd.f32 %v2469_v22, %v2000_v1  ;;  %v1992_v36 = vadd.f32 %v3516_v54, %v1991_v24 }
 0x679   : > { %v2663_v17 = vpop.f32.mrf.mxu0  ;;  %v2670_v37 = vpop.f32.mrf.mxu1 }
 0x67a   : > { %v2405_v7 = vpack.c.bf16 %v2076_v5, %v2076_v5  ;;  %v2074_v55 = vadd.f32 %v2465_v56, %v1992_v36  ;;  %v2003_v53 = vadd.f32 %v2663_v17, %v3516_v54  ;;  %v2032_v8 = vadd.f32 %v2670_v37, %v3516_v54 }
 0x67b   : > { %v1994_v57 = vpop.f32.mrf.mxu0  ;;  %v2023_v13 = vpop.f32.mrf.mxu1 }
 0x67c   : > { %2157 = vst.msk [vmem:[%s3042_s25 + $0x18] sm:$0xf] %vm2150_vm6, %v2405_v7  ;;  %v2403_v59 = vpack.c.bf16 %v2074_v55, %v2074_v55  ;;  %v2077_v49 = vadd.f32 %v2470_v32, %v2003_v53  ;;  %v2084_v27 = vadd.f32 %v2485_v14, %v2032_v8  ;;  %v1995_v42 = vadd.f32 %v3516_v54, %v1994_v57 }
 0x67d   : > { %v2024_v48 = vadd.f32 %v3516_v54, %v2023_v13  ;;  %v2671_v41 = vpop.f32.mrf.mxu1 }
 0x67e   : > { %2155 = vst.msk [vmem:[%s3042_s25 + $0x10] sm:$0xf] %vm2150_vm6, %v2403_v59  ;;  %v2406_v51 = vpack.c.bf16 %v2077_v49, %v2077_v49  ;;  %v2413_v62 = vpack.c.bf16 %v2084_v27, %v2084_v27  ;;  %v2075_v29 = vadd.f32 %v2466_v52, %v1995_v42  ;;  %v2035_v50 = vadd.f32 %v2671_v41, %v3516_v54 }
 0x67f   : > { %v2082_v0 = vadd.f32 %v2481_v58, %v2024_v48  ;;  %v2026_v28 = vpop.f32.mrf.mxu1 }
 0x680   : > { %2158 = vst.msk [vmem:[%s3042_s25 + $0x1c] sm:$0xf] %vm2150_vm6, %v2406_v51  ;;  %2165 = vst.msk [vmem:[%s3042_s25 + $0x38] sm:$0xf] %vm2150_vm6, %v2413_v62  ;;  %v2404_v34 = vpack.c.bf16 %v2075_v29, %v2075_v29  ;;  %v2085_v2 = vadd.f32 %v2486_v31, %v2035_v50  ;;  %v2027_v39 = vadd.f32 %v3516_v54, %v2026_v28 }
 0x681   : > { %v2411_v47 = vpack.c.bf16 %v2082_v0, %v2082_v0 }
 0x682   : > { %2156 = vst.msk [vmem:[%s3042_s25 + $0x14] sm:$0xf] %vm2150_vm6, %v2404_v34  ;;  %v2414_v23 = vpack.c.bf16 %v2085_v2, %v2085_v2  ;;  %v2083_v3 = vadd.f32 %v2482_v19, %v2027_v39 }
 0x683   : > { %2163 = vst.msk [vmem:[%s3042_s25 + $0x30] sm:$0xf] %vm2150_vm6, %v2411_v47 }
 0x684   : > { %2166 = vst.msk [vmem:[%s3042_s25 + $0x3c] sm:$0xf] %vm2150_vm6, %v2414_v23  ;;  %v2412_v15 = vpack.c.bf16 %v2083_v3, %v2083_v3 }
 0x686   : > { %2164 = vst.msk [vmem:[%s3042_s25 + $0x34] sm:$0xf] %vm2150_vm6, %v2412_v15 }
 0x687 PF: > { %s18_s11 = sadd.s32 1, %s2938_s11   ;;  %s3605_s22 = sld [smem:[#allocation6_spill]] }
 0x688   : > { %p15_p11 = scmp.ge.s32.totalorder %s18_s11, 10   ;;  %s3606_s24 = sld [smem:[#allocation7_spill]] }
 0x689   : > { %s3607_s27 = smov %s2926_s30  ;;  %s3608_s28 = smov %s2930_s9 }
 0x68a   : > { %s3609_s29 = smov %s2934_s10  ;;  %s3610_s30 = smov %s3614_s12 }
 0x68b   :  { %17 = sbr.rel (!%p15_p11) target bundleno = 4 (0x4), region = 93 }
 0x68d   : > { %s3611_s9 = smov %s3605_s22 }
 0x68e   : > { %s3612_s10 = smov %s3606_s24 }

// kernel: gcb_module_forward.6
= control target key start
LH: loop header
LB: loop body
LE: loop exit
PB: predicated region body
PF: predicated region fallthrough
CT: control target
= control target key end

     0   :  { %s2850_s15 = smov 0   ;;  %s2852_s16 = smov 0   ;;  %s3980_s0 = inlined_call_operand.vmem [shape: f32[2,18,18,4], index: 0, kind: input, shape index: {}]   ;;  %s3981_s1 = inlined_call_operand.vmem [shape: bf16[9,4,4], index: 1, kind: input, shape index: {}]   ;;  %s3982_s2 = inlined_call_operand.vmem [shape: f32[1,4], index: 2, kind: input, shape index: {}]   ;;  %s3983_s3 = inlined_call_operand.vmem [shape: f32[1,4], index: 3, kind: input, shape index: {}]   ;;  %s3984_s4 = inlined_call_operand.vmem [shape: bf16[2,16,16,4], index: 4, kind: output, shape index: {}]  }
   0x1   :  { %s2854_s17 = smov 0   ;;  %s2856_s18 = smov 0  }
   0x2   :  { %s2858_s19 = smov 0  }
   0x3 LB: > { %s23_s20 = sadd.s32 1, %s2815_s17  ;;  %s26_s21 = sadd.s32 1, %s2819_s18  ;;  %s2823_s19 = sphi %s2858_s19, %s14_s19   ;;  %s2819_s18 = sphi %s2856_s18, %s4084_s18   ;;  %s2815_s17 = sphi %s2854_s17, %s4083_s17   ;;  %s2811_s16 = sphi %s2852_s16, %s4082_s16   ;;  %s2807_s15 = sphi %s2850_s15, %s4081_s15  }
   0x4   : > { %p24_p0 = scmp.ge.s32.totalorder %s23_s20, 2  ;;  %p2313_p1 = scmp.ge.s32.totalorder %s2823_s19, 1 }
   0x5   : > { %p176_p2 = scmp.lt.s32.totalorder %s2823_s19, 5 }
   0x6   : > { %s4086_s20 = smov (%p24_p0, %s23_s20), 0  ;;  %s4088_s21 = smov (!%p24_p0, %s26_s21), %s2819_s18 }
   0x7   : > { %p177_p3 = pnand %p2313_p1, %p176_p2  ;;  %p28_p4 = scmp.ge.s32.totalorder %s4088_s21, 2 }
   0x9   : > { %s4090_s21 = smov (%p28_p4, %s4088_s21), 0  ;;  %180 = sbr.rel (%p177_p3) target bundleno = 384 (0x180), region = 36 }
   0xe   : > { %v2321_v0 = vld [vmem:[%s3981_s1 + $0x2] sm:$0x3]  ;;  %vm376_vm0 = vcmask 1041408   ;;  %p207_p5 = scmp.lt.s32.totalorder %s2811_s16, 1  ;;  %v259_v2 = vld [vmem:[%s3981_s1] sm:$0x3] }
   0xf   : > { %2735 = vmatprep.subr.msk.bf16.mxu1 %vm376_vm0, %v2321_v0  ;;  %2734 = vmatprep.subr.msk.bf16.mxu0 %vm376_vm0, %v2321_v0  ;;  %v378_v1 = vsel %vm376_vm0, %v2321_v0, 0  ;;  %v2338_v3 = vld [vmem:[%s3981_s1 + $0x4] sm:$0x3]  ;;  %s2320_s28 = smul.u32 192, %s2807_s15  ;;  %vm284_vm1 = vcmask 1046528   ;;  %vm351_vm2 = vcmask 31744  }
  0x10   : > { %2733 = vmatpush3.bf16.msra.mxu1 %v378_v1  ;;  %2571 = vmatpush3.bf16.msra.mxu0 %v378_v1  ;;  %s4092_s16 = smov (!%p207_p5, %s2811_s16), 1  ;;  %v2931_v15 = vsel %vm376_vm0, %v259_v2, 0  ;;  %v693_v16 = vsel %vm376_vm0, %v2338_v3, 0  ;;  %vm601_vm3 = vcmask 1045504   ;;  %v2382_v53 = vld [vmem:[%s3981_s1 + $0x8] sm:$0x3] }
  0x11   : > { %2736 = vmatprep.subr.msk.bf16.mxu1 %vm376_vm0, %v259_v2  ;;  %2737 = vmatprep.subr.msk.bf16.mxu0 %vm376_vm0, %v2338_v3  ;;  %s2744_s29 = smul.u32 432, %s4092_s16  ;;  %s2315_s27 = sshll.u32 %s2807_s15, 3  ;;  %vm2192_vm4 = vcmask 27648  }
  0x12   : > { %p3795_p6 = scmp.lt.s32.totalorder %s2315_s27, 15 }
  0x13   : > { %s211_s6 = scalar_lea.vmem %s3980_s0, %s2744_s29  ;;  %s2317_s29 = sshll.u32 %s4092_s16, 5 }
  0x14   : > { %s2903_s7 = scalar_lea.vmem %s211_s6, %s2320_s28  ;;  %s4094_s27 = smov (!%p3795_p6, %s2315_s27), 15 }
  0x15   : > { %v2906_v4 = vld [vmem:[%s2903_s7] sm:$0xff]  ;;  %v2909_v5 = vld [vmem:[%s2903_s7 + $0x8] sm:$0xff]  ;;  %v2912_v6 = vld [vmem:[%s2903_s7 + $0x10] sm:$0x3]  ;;  %s2316_s15 = sshll.u32 %s4094_s27, 1 }
  0x16   : > { %v285_v7 = vrot.slane %v2906_v4, 1  ;;  %v286_v8 = vrot.slane %v2909_v5, 1  ;;  %v288_v9 = vrot.slane %v2912_v6, 1  ;;  %v2918_v10 = vld [vmem:[%s2903_s7 + $0x60] sm:$0xff]  ;;  %v2921_v11 = vld [vmem:[%s2903_s7 + $0x68] sm:$0xff]  ;;  %v2938_v20 = vld [vmem:[%s2903_s7 + $0x18] sm:$0xff] }
  0x17   : > { %v2924_v12 = vld [vmem:[%s2903_s7 + $0x70] sm:$0x3]  ;;  %v305_v13 = vrot.slane %v2918_v10, 1  ;;  %v2928_v14 = vrot.slane %v2921_v11, 1  ;;  %v2941_v21 = vld [vmem:[%s2903_s7 + $0x20] sm:$0xff]  ;;  %v602_v24 = vrot.slane %v2906_v4, 2 }
  0x18   : > { %v287_v17 = vsel %vm284_vm1, %v285_v7, %v286_v8  ;;  %v289_v18 = vsel %vm284_vm1, %v286_v8, %v288_v9  ;;  %v308_v19 = vrot.slane %v2924_v12, 1  ;;  %v2944_v22 = vld [vmem:[%s2903_s7 + $0x28] sm:$0x3]  ;;  %v603_v25 = vrot.slane %v2909_v5, 2  ;;  %v2953_v27 = vld [vmem:[%s2903_s7 + $0x78] sm:$0xff]  ;;  %v2956_v28 = vld [vmem:[%s2903_s7 + $0x80] sm:$0xff] }
  0x19   : > { %v341_v23 = vpack.c.bf16 %v289_v18, %v287_v17  ;;  %v2950_v26 = vsel %vm284_vm1, %v305_v13, %v2928_v14  ;;  %v2959_v29 = vld [vmem:[%s2903_s7 + $0x88] sm:$0x3]  ;;  %v290_v31 = vrot.slane %v2938_v20, 1  ;;  %v2965_v32 = vrot.slane %v2941_v21, 1  ;;  %v2969_v34 = vld [vmem:[%s2903_s7 + $0x30] sm:$0xff]  ;;  %v2972_v35 = vld [vmem:[%s2903_s7 + $0x38] sm:$0xff] }
  0x1a   : > { %v309_v30 = vsel %vm284_vm1, %v2928_v14, %v308_v19  ;;  %v293_v33 = vrot.slane %v2944_v22, 1  ;;  %v605_v36 = vrot.slane %v2912_v6, 2  ;;  %v607_v38 = vrot.slane %v2938_v20, 2  ;;  %v2979_v39 = vld [vmem:[%s2903_s7 + $0x40] sm:$0x3]  ;;  %v2982_v40 = vld [vmem:[%s2903_s7 + $0x90] sm:$0xff] }
  0x1b   : > { %2572 = vmatprep.mubr.msk.bf16.mxu0 %vm351_vm2, %v341_v23  ;;  %v345_v37 = vpack.c.bf16 %v309_v30, %v2950_v26  ;;  %v2985_v41 = vld [vmem:[%s2903_s7 + $0x98] sm:$0xff]  ;;  %v2989_v42 = vsel %vm284_vm1, %v290_v31, %v2965_v32  ;;  %v310_v44 = vrot.slane %v2953_v27, 1  ;;  %v2995_v45 = vrot.slane %v2956_v28, 1  ;;  %v2998_v46 = vld [vmem:[%s2903_s7 + $0xa0] sm:$0x3]  ;;  %v3001_v47 = vld [vmem:[%s2903_s7 + $0x48] sm:$0xff] }
  0x1c   : > { %v294_v43 = vsel %vm284_vm1, %v2965_v32, %v293_v33  ;;  %v313_v49 = vrot.slane %v2959_v29, 1  ;;  %v295_v50 = vrot.slane %v2969_v34, 1  ;;  %v3008_v51 = vrot.slane %v2972_v35, 1  ;;  %v3011_v52 = vld [vmem:[%s2903_s7 + $0x50] sm:$0xff]  ;;  %v3026_v58 = vld [vmem:[%s2903_s7 + $0x58] sm:$0x3] }
  0x1d   : > { %2580 = vmatprep.mubr.msk.bf16.mxu1 %vm351_vm2, %v345_v37  ;;  %v342_v48 = vpack.c.bf16 %v294_v43, %v2989_v42  ;;  %v3018_v54 = vsel %vm284_vm1, %v310_v44, %v2995_v45  ;;  %v298_v55 = vrot.slane %v2979_v39, 1  ;;  %v315_v56 = vrot.slane %v2982_v40, 1  ;;  %v3029_v59 = vld [vmem:[%s2903_s7 + $0xa8] sm:$0xff]  ;;  %v3041_v0 = vld [vmem:[%s2903_s7 + $0xb0] sm:$0xff]  ;;  %v3044_v1 = vld [vmem:[%s2903_s7 + $0xb8] sm:$0x3] }
  0x1e   : > { %v3023_v57 = vrot.slane %v2985_v41, 1  ;;  %v314_v60 = vsel %vm284_vm1, %v2995_v45, %v313_v49  ;;  %v3036_v61 = vsel %vm284_vm1, %v295_v50, %v3008_v51  ;;  %v318_v62 = vrot.slane %v2998_v46, 1  ;;  %v2373_v30 = vld [vmem:[%s3981_s1 + $0x6] sm:$0x3] }
  0x1f   : > { %2573 = vmatmul.mubr.msk.bf16.vlgmr.msra.gmra.mxu0 %vm351_vm2, %v342_v48  ;;  %v300_v63 = vrot.slane %v3001_v47, 1  ;;  %v346_v2 = vpack.c.bf16 %v314_v60, %v3018_v54  ;;  %v299_v3 = vsel %vm284_vm1, %v3008_v51, %v298_v55  ;;  %v3054_v7 = vrot.slane %v3011_v52, 1 }
  0x20   : > { %2607 = vmatpush3.bf16.msra.mxu0 %v693_v16  ;;  %v3051_v6 = vsel %vm284_vm1, %v315_v56, %v3023_v57  ;;  %v343_v8 = vpack.c.bf16 %v299_v3, %v3036_v61  ;;  %v319_v9 = vsel %vm284_vm1, %v3023_v57, %v318_v62  ;;  %v303_v13 = vrot.slane %v3026_v58, 1 }
  0x21   : > { %v320_v17 = vrot.slane %v3029_v59, 1  ;;  %2739 = vmatprep.subr.msk.bf16.mxu0 %vm376_vm0, %v2382_v53  ;;  %2581 = vmatmul.mubr.msk.bf16.vlgmr.msra.gmra.mxu1 %vm351_vm2, %v346_v2  ;;  %v347_v16 = vpack.c.bf16 %v319_v9, %v3051_v6  ;;  %v3066_v18 = vsel %vm284_vm1, %v300_v63, %v3054_v7  ;;  %v3069_v19 = vrot.slane %v3041_v0, 1 }
  0x22   : > { %v323_v23 = vrot.slane %v3044_v1, 1  ;;  %v3076_v31 = vrot.slane %v2941_v21, 2  ;;  %v610_v33 = vrot.slane %v2944_v22, 2  ;;  %2589 = vmatpush3.bf16.msra.mxu1 %v2931_v15  ;;  %2576 = vmatprep.mubr.msk.bf16.mxu0 %vm351_vm2, %v343_v8  ;;  %v304_v37 = vsel %vm284_vm1, %v3054_v7, %v303_v13 }
  0x23   : > { %v604_v43 = vsel %vm601_vm3, %v602_v24, %v603_v25  ;;  %2584 = vmatprep.mubr.msk.bf16.mxu1 %vm351_vm2, %v347_v16  ;;  %v344_v44 = vpack.c.bf16 %v304_v37, %v3066_v18  ;;  %v3092_v22 = vsel %vm284_vm1, %v320_v17, %v3069_v19  ;;  %v606_v48 = vsel %vm601_vm3, %v603_v25, %v605_v36  ;;  %v3160_v37 = vld [vmem:[%s2903_s7 + $0xa0] sm:$0x3] }
  0x24   : > { %3998 = vst [vmem:[#allocation2_spill] sm:$0xff] %v3076_v31  ;;  %v324_v15 = vsel %vm284_vm1, %v3069_v19, %v323_v23  ;;  %v658_v49 = vpack.c.bf16 %v606_v48, %v604_v43  ;;  %2738 = vmatprep.subr.msk.bf16.mxu1 %vm376_vm0, %v2373_v30  ;;  %v612_v24 = vrot.slane %v2969_v34, 2  ;;  %v3103_v55 = vrot.slane %v2972_v35, 2 }
  0x25   : > { %v348_v50 = vpack.c.bf16 %v324_v15, %v3092_v22  ;;  %v615_v56 = vrot.slane %v2979_v39, 2  ;;  %v251_v60 = vpack.c.bf16 %v2909_v5, %v2906_v4  ;;  %v622_v62 = vrot.slane %v2918_v10, 2  ;;  %v3202_v15 = vld [vmem:[%s3981_s1 + $0xa] sm:$0x3] }
  0x26   : > { %v3111_v25 = vrot.slane %v2921_v11, 2  ;;  %v3118_v36 = vsel %vm601_vm3, %v607_v38, %v3076_v31  ;;  %v611_v39 = vsel %vm601_vm3, %v3076_v31, %v610_v33  ;;  %v625_v63 = vrot.slane %v2924_v12, 2 }
  0x27   : > { %2577 = vmatmul.mubr.msk.bf16.gmra.mxu0 %vm351_vm2, %v344_v44  ;;  %3999 = vst [vmem:[#allocation3_spill] sm:$0xff] %v3118_v36  ;;  %v3125_v4 = vsel %vm601_vm3, %v612_v24, %v3103_v55  ;;  %v616_v5 = vsel %vm601_vm3, %v3103_v55, %v615_v56  ;;  %v659_v38 = vpack.c.bf16 %v611_v39, %v3118_v36  ;;  %v1100_v2 = vsel %vm376_vm0, %v2382_v53, 0  ;;  %v3225_v39 = vld [vmem:[%s2903_s7 + $0xc8] sm:$0xff] }
  0x28   : > { %2608 = vmatprep.mubr.msk.bf16.mxu0 %vm351_vm2, %v658_v49  ;;  %v617_v3 = vrot.slane %v3001_v47, 2  ;;  %v660_v12 = vpack.c.bf16 %v616_v5, %v3125_v4  ;;  %v3136_v8 = vrot.slane %v3011_v52, 2  ;;  %v620_v9 = vrot.slane %v3026_v58, 2  ;;  %v3157_v58 = vld [vmem:[%s3981_s1 + $0xc] sm:$0x3]  ;;  %v3208_v49 = vld [vmem:[%s2903_s7 + $0xc0] sm:$0xff] }
  0x29   : > { %2585 = vmatmul.mubr.msk.bf16.gmra.mxu1 %vm351_vm2, %v348_v50  ;;  %v3141_v13 = vsel %vm601_vm3, %v622_v62, %v3111_v25  ;;  %v626_v17 = vsel %vm601_vm3, %v3111_v25, %v625_v63  ;;  %v627_v16 = vrot.slane %v2953_v27, 2  ;;  %v3147_v53 = vrot.slane %v2956_v28, 2  ;;  %4000 = vst [vmem:[#allocation4_spill] sm:$0xff] %v3208_v49  ;;  %v3222_v62 = vld [vmem:[%s2903_s7 + $0x28] sm:$0x3]  ;;  %4002 = vst [vmem:[#allocation6_spill] sm:$0xff] %v3225_v39 }
  0x2a   : > { %2590 = vmatprep.mubr.msk.bf16.mxu1 %vm351_vm2, %v251_v60  ;;  %v630_v23 = vrot.slane %v2959_v29, 2  ;;  %v3152_v33 = vpack.c.bf16 %v2941_v21, %v2938_v20  ;;  %v870_v43 = vsel %vm376_vm0, %v2373_v30, 0  ;;  %v3166_v44 = vpack.c.bf16 %v2972_v35, %v2969_v34  ;;  %4001 = vst [vmem:[#allocation5_spill] sm:$0xff] %v3222_v62 }
  0x2b   : > { %v3170_v20 = vpack.c.bf16 %v3011_v52, %v3001_v47  ;;  %v3174_v21 = vpack.c.bf16 %v2921_v11, %v2918_v10  ;;  %v3179_v29 = vsel %vm601_vm3, %v617_v3, %v3136_v8  ;;  %v621_v34 = vsel %vm601_vm3, %v3136_v8, %v620_v9  ;;  %v3186_v52 = vld [vmem:[%s2903_s7 + $0xb8] sm:$0x3] }
  0x2c   : > { %v662_v35 = vpack.c.bf16 %v626_v17, %v3141_v13  ;;  %v632_v47 = vrot.slane %v2982_v40, 2  ;;  %v3190_v10 = vsel %vm601_vm3, %v627_v16, %v3147_v53  ;;  %v3194_v11 = vsel %vm601_vm3, %v3147_v53, %v630_v23  ;;  %v3270_v23 = vld [vmem:[%s2903_s7 + $0x58] sm:$0x3] }
  0x2d   : > { %v3197_v30 = vrot.slane %v2985_v41, 2  ;;  %v1037_v48 = vrot.slane %v3160_v37, 1  ;;  %v3214_v24 = vpack.c.bf16 %v2956_v28, %v2953_v27  ;;  %v635_v50 = vrot.slane %v2998_v46, 2  ;;  %v2354_v46 = vld [vmem:[%s2903_s7 + $0x40] sm:$0x3]  ;;  %4003 = vst [vmem:[#allocation7_spill] sm:$0xff] %v3270_v23 }
  0x2e   : > { %v637_v56 = vrot.slane %v3029_v59, 2  ;;  %v3219_v60 = vrot.slane %v3041_v0, 2  ;;  %v661_v63 = vpack.c.bf16 %v621_v34, %v3179_v29  ;;  %v3232_v27 = vpack.c.bf16 %v2985_v41, %v2982_v40 }
  0x2f   : > { %2609 = vmatmul.mubr.msk.bf16.vlgmr.msra.gmra.mxu0 %vm351_vm2, %v659_v38  ;;  %v640_v28 = vrot.slane %v3044_v1, 2  ;;  %v1042_v5 = vrot.slane %v3186_v52, 1  ;;  %v2372_v38 = vld [vmem:[%s2903_s7 + $0xd0] sm:$0x3]  ;;  %v3242_v3 = vpack.c.bf16 %v3041_v0, %v3029_v59  ;;  %v3248_v40 = vsel %vm284_vm1, %v3023_v57, %v1037_v48 }
  0x30   : > { %2643 = vmatpush3.bf16.msra.mxu0 %v1100_v2  ;;  %2612 = vmatprep.mubr.msk.bf16.mxu0 %vm351_vm2, %v660_v12  ;;  %v663_v2 = vpack.c.bf16 %v3194_v11, %v3190_v10  ;;  %v1044_v41 = vrot.slane %v3208_v49, 1  ;;  %v3253_v1 = vsel %vm601_vm3, %v632_v47, %v3197_v30  ;;  %v1012_v12 = vrot.slane %v3222_v62, 1 }
  0x31   : > { %2741 = vmatprep.subr.msk.bf16.mxu0 %vm376_vm0, %v3157_v58  ;;  %2591 = vmatmul.mubr.msk.bf16.vlgmr.msra.gmra.mxu1 %vm351_vm2, %v3152_v33  ;;  %v3258_v9 = vsel %vm284_vm1, %v3069_v19, %v1042_v5  ;;  %v3261_v59 = vrot.slane %v3225_v39, 1  ;;  %v636_v0 = vsel %vm601_vm3, %v3197_v30, %v635_v50  ;;  %v3267_v17 = vsel %vm601_vm3, %v637_v56, %v3219_v60 }
  0x32   : > { %2625 = vmatpush3.bf16.msra.mxu1 %v870_v43  ;;  %2594 = vmatprep.mubr.msk.bf16.mxu1 %vm351_vm2, %v3166_v44  ;;  %v1017_v16 = vrot.slane %v2354_v46, 1  ;;  %v3273_v43 = vld [vmem:[%s2903_s7 + $0x70] sm:$0x3]  ;;  %v1047_v34 = vrot.slane %v2372_v38, 1  ;;  %v3278_v47 = vsel %vm601_vm3, %v3219_v60, %v640_v28  ;;  %v1223_v48 = vrot.slane %v2354_v46, 2 }
  0x33   : > { %2740 = vmatprep.subr.msk.bf16.mxu1 %vm376_vm0, %v3202_v15  ;;  %v3282_v11 = vsel %vm284_vm1, %v1044_v41, %v3261_v59  ;;  %v1233_v50 = vrot.slane %v3273_v43, 2  ;;  %v1250_v56 = vrot.slane %v3208_v49, 2  ;;  %v3288_v5 = vrot.slane %v3225_v39, 2 }
  0x34   : > { %v1243_v28 = vrot.slane %v3160_v37, 2  ;;  %v3297_v41 = vsel %vm284_vm1, %v2965_v32, %v1012_v12  ;;  %v1022_v46 = vrot.slane %v3270_v23, 1  ;;  %v3304_v36 = vsel %vm601_vm3, %v3103_v55, %v1223_v48 }
  0x35   : > { %4005 = vst [vmem:[#allocation9_spill] sm:$0xff] %v3304_v36  ;;  %v664_v37 = vpack.c.bf16 %v636_v0, %v3253_v1  ;;  %v3321_v48 = vsel %vm284_vm1, %v3008_v51, %v1017_v16  ;;  %v1248_v12 = vrot.slane %v3186_v52, 2  ;;  %v3337_v16 = vsel %vm601_vm3, %v1250_v56, %v3288_v5  ;;  %v3340_v0 = vld [vmem:[%s2903_s7 + $0xd8] sm:$0xff]  ;;  %v2410_v56 = vld [vmem:[%s2903_s7 + $0x70] sm:$0x3] }
  0x36   : > { %v1253_v23 = vrot.slane %v2372_v38, 2  ;;  %4008 = vst [vmem:[#allocation12_spill] sm:$0xff] %v3340_v0  ;;  %v3348_v52 = vsel %vm284_vm1, %v3054_v7, %v1022_v46  ;;  %v1657_v36 = vrot.slane %v3340_v0, 1  ;;  %v1863_v39 = vrot.slane %v3340_v0, 2 }
  0x37   : > { %2613 = vmatmul.mubr.msk.bf16.gmra.mxu0 %vm351_vm2, %v661_v63  ;;  %v3292_v63 = vsel %vm284_vm1, %v3261_v59, %v1047_v34  ;;  %v3315_v34 = vsel %vm601_vm3, %v3111_v25, %v1233_v50  ;;  %v2404_v50 = vld [vmem:[%s2903_s7 + $0x40] sm:$0x3]  ;;  %v3352_v32 = vsel %vm601_vm3, %v3219_v60, %v1248_v12  ;;  %v1635_v0 = vrot.slane %v2410_v56, 1 }
  0x38   : > { %2616 = vmatprep.mubr.msk.bf16.mxu0 %vm351_vm2, %v662_v35  ;;  %4004 = vst [vmem:[#allocation8_spill] sm:$0xff] %v3292_v63  ;;  %4006 = vst [vmem:[#allocation10_spill] sm:$0xff] %v3315_v34  ;;  %v3327_v35 = vsel %vm601_vm3, %v3197_v30, %v1243_v28  ;;  %v3343_v34 = vld [vmem:[%s2903_s7 + $0xe0] sm:$0xff]  ;;  %v2407_v28 = vld [vmem:[%s2903_s7 + $0x58] sm:$0x3]  ;;  %v3360_v38 = vsel %vm601_vm3, %v3288_v5, %v1253_v23  ;;  %v1625_v46 = vrot.slane %v2404_v50, 1 }
  0x39   : > { %2595 = vmatmul.mubr.msk.bf16.gmra.mxu1 %vm351_vm2, %v3170_v20  ;;  %4007 = vst [vmem:[#allocation11_spill] sm:$0xff] %v3327_v35  ;;  %4009 = vst [vmem:[#allocation13_spill] sm:$0xff] %v3352_v32  ;;  %v2413_v63 = vld [vmem:[%s2903_s7 + $0x88] sm:$0x3]  ;;  %v1831_v32 = vrot.slane %v2404_v50, 2  ;;  %v1630_v31 = vrot.slane %v2407_v28, 1 }
  0x3a   : > { %2598 = vmatprep.mubr.msk.bf16.mxu1 %vm351_vm2, %v3174_v21  ;;  %v1836_v35 = vrot.slane %v2407_v28, 2  ;;  %v3370_v23 = vsel %vm284_vm1, %v3008_v51, %v1625_v46  ;;  %v1841_v49 = vrot.slane %v2410_v56, 2  ;;  %v1640_v62 = vrot.slane %v2413_v63, 1  ;;  %v2416_v51 = vld [vmem:[%s2903_s7 + $0xa0] sm:$0x3] }
  0x3b   : > { %v3376_v12 = vsel %vm601_vm3, %v3103_v55, %v1831_v32  ;;  %v3380_v50 = vsel %vm284_vm1, %v3054_v7, %v1630_v31  ;;  %v3397_v7 = vsel %vm284_vm1, %v2928_v14, %v1635_v0  ;;  %v2419_v31 = vld [vmem:[%s2903_s7 + $0xb8] sm:$0x3]  ;;  %v1846_v55 = vrot.slane %v2413_v63, 2 }
  0x3c   : > { %4010 = vst [vmem:[#allocation14_spill] sm:$0xff] %v3380_v50  ;;  %4011 = vst [vmem:[#allocation15_spill] sm:$0xff] %v3397_v7  ;;  %v3407_v46 = vsel %vm601_vm3, %v3111_v25, %v1841_v49  ;;  %v3411_v56 = vsel %vm284_vm1, %v2995_v45, %v1640_v62  ;;  %v1645_v28 = vrot.slane %v2416_v51, 1  ;;  %v1851_v50 = vrot.slane %v2416_v51, 2  ;;  %v2425_v51 = vld [vmem:[%s2903_s7 + $0xe8] sm:$0x3] }
  0x3d   : > { %v3419_v32 = vsel %vm601_vm3, %v3147_v53, %v1846_v55  ;;  %v1650_v7 = vrot.slane %v2419_v31, 1  ;;  %v1856_v25 = vrot.slane %v2419_v31, 2  ;;  %v4012_v55 = vpack.c.bf16 %v3278_v47, %v3267_v17 }
  0x3e   : > { %v3425_v63 = vsel %vm284_vm1, %v3023_v57, %v1645_v28  ;;  %v3429_v0 = vsel %vm601_vm3, %v3197_v30, %v1851_v50  ;;  %v4013_v47 = vpack.c.bf16 %v3297_v41, %v2989_v42  ;;  %v4014_v41 = vrot.slane %v3343_v34, 1 }
  0x3f   : > { %2617 = vmatmul.mubr.msk.bf16.gmra.mxu0 %vm351_vm2, %v663_v2  ;;  %v1682_v31 = vpack.c.bf16 %v3425_v63, %v3051_v6  ;;  %v1888_v62 = vpack.c.bf16 %v3429_v0, %v3253_v1  ;;  %v3442_v57 = vsel %vm284_vm1, %v3069_v19, %v1650_v7  ;;  %v3446_v30 = vsel %vm601_vm3, %v3219_v60, %v1856_v25 }
  0x40   : > { %2620 = vmatprep.mubr.msk.bf16.mxu0 %vm351_vm2, %v664_v37  ;;  %v3384_v37 = vsel %vm601_vm3, %v3136_v8, %v1836_v35  ;;  %v2422_v35 = vld [vmem:[%s2903_s7 + $0xd0] sm:$0x3]  ;;  %v1683_v50 = vpack.c.bf16 %v3442_v57, %v3092_v22  ;;  %v1889_v28 = vpack.c.bf16 %v3446_v30, %v3267_v17  ;;  %v3471_v7 = vsel %vm284_vm1, %v1657_v36, %v4014_v41 }
  0x41   : > { %2599 = vmatmul.mubr.msk.bf16.gmra.mxu1 %vm351_vm2, %v3214_v24  ;;  %v1655_v49 = vrot.slane %v2422_v35, 1  ;;  %v1861_v2 = vrot.slane %v2422_v35, 2  ;;  %v1660_v25 = vrot.slane %v2425_v51, 1  ;;  %v4016_v36 = vmov %v4014_v41 }
  0x42   : > { %2602 = vmatprep.mubr.msk.bf16.mxu1 %vm351_vm2, %v3232_v27  ;;  %v1067_v41 = vpack.c.bf16 %v3348_v52, %v3066_v18  ;;  %v1027_v60 = vrot.slane %v3273_v43, 1  ;;  %v2444_v52 = vld [vmem:[%s3981_s1 + $0x10] sm:$0x3]  ;;  %v1306_v43 = vsel %vm376_vm0, %v3202_v15, 0 }
  0x43   : > { %v3458_v35 = vsel %vm284_vm1, %v3261_v59, %v1655_v49  ;;  %v3462_v19 = vsel %vm601_vm3, %v3288_v5, %v1861_v2  ;;  %v2363_v59 = vld [vmem:[%s2903_s7 + $0x88] sm:$0x3]  ;;  %v4015_v49 = vrot.slane %v3343_v34, 2  ;;  %v1866_v2 = vrot.slane %v2425_v51, 2  ;;  %s3861_s7 = sadd.s32 %s2317_s29, %s2316_s15 }
  0x44   : > { %v1890_v42 = vpack.c.bf16 %v3462_v19, %v3337_v16  ;;  %s2318_s8 = sshll.u32 %s3861_s7, 2 }
  0x45   : > { %v3479_v5 = vsel %vm601_vm3, %v1863_v39, %v4015_v49  ;;  %v4017_v51 = vmov %v4015_v49  ;;  %v1032_v49 = vrot.slane %v2363_v59, 1  ;;  %s3890_s11 = scalar_lea.vmem %s3984_s4, %s2318_s8 }
  0x47   : > { %2621 = vmatmul.mubr.msk.bf16.gmra.mxu0 %vm351_vm2, %v4012_v55  ;;  %v1066_v55 = vpack.c.bf16 %v3321_v48, %v3036_v61  ;;  %v1483_v48 = vsel %vm376_vm0, %v3157_v58, 0  ;;  %v1033_v58 = vsel %vm284_vm1, %v2995_v45, %v1032_v49  ;;  %v1070_v45 = vpack.c.bf16 %v3248_v40, %v3051_v6  ;;  %v4020_v49 = vld [vmem:[#allocation4_spill] sm:$0xff]  ;;  %v4021_v40 = vld [vmem:[#allocation6_spill] sm:$0xff] }
  0x48   : > { %2644 = vmatprep.mubr.msk.bf16.mxu0 %vm351_vm2, %v4013_v47  ;;  %v3488_v47 = vsel %vm284_vm1, %v4016_v36, %v1660_v25  ;;  %v2435_v36 = vld [vmem:[%s3981_s1 + $0xe] sm:$0x3] }
  0x49   : > { %2603 = vmatmul.mubr.msk.bf16.gmra.mxu1 %vm351_vm2, %v3242_v3  ;;  %v1685_v39 = vpack.c.bf16 %v3488_v47, %v3471_v7 }
  0x4a   : > { %2626 = vmatprep.mubr.msk.bf16.mxu1 %vm351_vm2, %v3152_v33  ;;  %v3498_v33 = vsel %vm601_vm3, %v4017_v51, %v1866_v2  ;;  %v1028_v2 = vsel %vm284_vm1, %v2928_v14, %v1027_v60  ;;  %v1069_v14 = vpack.c.bf16 %v1033_v58, %v3018_v54  ;;  %v1071_v60 = vpack.c.bf16 %v3258_v9, %v3092_v22  ;;  %v4019_v51 = vld [vmem:[#allocation2_spill] sm:$0xff]  ;;  %v4024_v58 = vld [vmem:[#allocation3_spill] sm:$0xff] }
  0x4b   : > { %v1891_v25 = vpack.c.bf16 %v3498_v33, %v3479_v5  ;;  %v1068_v15 = vpack.c.bf16 %v1028_v2, %v2950_v26  ;;  %v4022_v2 = vld [vmem:[#allocation8_spill] sm:$0xff] }
  0x4c   : > { %v4023_v9 = vpack.c.bf16 %v4022_v2, %v3282_v11  ;;  %v4036_v2 = vpack.c.bf16 %v3370_v23, %v3036_v61 }
  0x4f   : > { %2645 = vmatmul.mubr.msk.bf16.vlgmr.msra.gmra.mxu0 %vm351_vm2, %v1066_v55  ;;  %v4018_v55 = vld [vmem:[#allocation5_spill] sm:$0xff] }
  0x50   : > { %2679 = vmatpush3.bf16.msra.mxu0 %v1483_v48  ;;  %2648 = vmatprep.mubr.msk.bf16.mxu0 %vm351_vm2, %v1067_v41  ;;  %v1218_v41 = vrot.slane %v4018_v55, 2  ;;  %v1919_v55 = vsel %vm376_vm0, %v2444_v52, 0 }
  0x51   : > { %2743 = vmatprep.subr.msk.bf16.mxu0 %vm376_vm0, %v2444_v52  ;;  %2627 = vmatmul.mubr.msk.bf16.vlgmr.msra.gmra.mxu1 %vm351_vm2, %v3166_v44 }
  0x52   : > { %2661 = vmatpush3.bf16.msra.mxu1 %v1306_v43  ;;  %2630 = vmatprep.mubr.msk.bf16.mxu1 %vm351_vm2, %v3170_v20  ;;  %v1219_v48 = vsel %vm601_vm3, %v4019_v51, %v1218_v41  ;;  %v842_v43 = vpack.c.bf16 %v4021_v40, %v4020_v49  ;;  %v1713_v51 = vsel %vm376_vm0, %v2435_v36, 0 }
  0x53   : > { %2742 = vmatprep.subr.msk.bf16.mxu1 %vm376_vm0, %v2435_v36 }
  0x57   : > { %2649 = vmatmul.mubr.msk.bf16.gmra.mxu0 %vm351_vm2, %v1068_v15  ;;  %v1271_v15 = vpack.c.bf16 %v1219_v48, %v4024_v58  ;;  %v4026_v48 = vld [vmem:[#allocation9_spill] sm:$0xff] }
  0x58   : > { %2652 = vmatprep.mubr.msk.bf16.mxu0 %vm351_vm2, %v1069_v14  ;;  %v4025_v14 = vld [vmem:[#allocation7_spill] sm:$0xff]  ;;  %v4027_v49 = vpack.c.bf16 %v4026_v48, %v3125_v4 }
  0x59   : > { %2631 = vmatmul.mubr.msk.bf16.gmra.mxu1 %vm351_vm2, %v3174_v21 }
  0x5a   : > { %2634 = vmatprep.mubr.msk.bf16.mxu1 %vm351_vm2, %v3214_v24 }
  0x5f   : > { %2653 = vmatmul.mubr.msk.bf16.gmra.mxu0 %vm351_vm2, %v1070_v45  ;;  %v1228_v45 = vrot.slane %v4025_v14, 2 }
  0x60   : > { %2656 = vmatprep.mubr.msk.bf16.mxu0 %vm351_vm2, %v1071_v60 }
  0x61   : > { %2635 = vmatmul.mubr.msk.bf16.gmra.mxu1 %vm351_vm2, %v3232_v27  ;;  %v1229_v60 = vsel %vm601_vm3, %v3136_v8, %v1228_v45 }
  0x62   : > { %2638 = vmatprep.mubr.msk.bf16.mxu1 %vm351_vm2, %v3242_v3  ;;  %v1273_v41 = vpack.c.bf16 %v1229_v60, %v3179_v29 }
  0x67   : > { %2657 = vmatmul.mubr.msk.bf16.gmra.mxu0 %vm351_vm2, %v4023_v9  ;;  %v4041_v9 = vld [vmem:[#allocation15_spill] sm:$0xff] }
  0x68   : > { %2680 = vmatprep.mubr.msk.bf16.mxu0 %vm351_vm2, %v3166_v44  ;;  %v1238_v44 = vrot.slane %v2363_v59, 2  ;;  %v4042_v61 = vpack.c.bf16 %v4041_v9, %v2950_v26  ;;  %v4045_v26 = vpack.c.bf16 %v3458_v35, %v3282_v11 }
  0x69   : > { %2639 = vmatmul.mubr.msk.bf16.gmra.mxu1 %vm351_vm2, %v842_v43 }
  0x6a   : > { %2662 = vmatprep.mubr.msk.bf16.mxu1 %vm351_vm2, %v1271_v15  ;;  %v1239_v8 = vsel %vm601_vm3, %v3147_v53, %v1238_v44  ;;  %v4030_v53 = vld [vmem:[#allocation13_spill] sm:$0xff] }
  0x6b   : > { %v1277_v52 = vpack.c.bf16 %v4030_v53, %v3267_v17 }
  0x6f   : > { %2681 = vmatmul.mubr.msk.bf16.vlgmr.msra.gmra.mxu0 %vm351_vm2, %v3170_v20  ;;  %v1275_v20 = vpack.c.bf16 %v1239_v8, %v3190_v10 }
  0x70   : > { %2715 = vmatpush3.bf16.msra.mxu0 %v1919_v55  ;;  %2684 = vmatprep.mubr.msk.bf16.mxu0 %vm351_vm2, %v3174_v21  ;;  %v4028_v21 = vld [vmem:[#allocation10_spill] sm:$0xff] }
  0x71   : > { %2663 = vmatmul.mubr.msk.bf16.vlgmr.msra.gmra.mxu1 %vm351_vm2, %v4027_v49  ;;  %v4029_v59 = vpack.c.bf16 %v4028_v21, %v3141_v13 }
  0x72   : > { %2697 = vmatpush3.bf16.msra.mxu1 %v1713_v51  ;;  %2666 = vmatprep.mubr.msk.bf16.mxu1 %vm351_vm2, %v1273_v41 }
  0x77   : > { %2685 = vmatmul.mubr.msk.bf16.gmra.mxu0 %vm351_vm2, %v3214_v24  ;;  %v4031_v24 = vld [vmem:[#allocation11_spill] sm:$0xff] }
  0x78   : > { %2688 = vmatprep.mubr.msk.bf16.mxu0 %vm351_vm2, %v3232_v27  ;;  %v4032_v36 = vpack.c.bf16 %v4031_v24, %v3253_v1  ;;  %v4033_v27 = vld [vmem:[#allocation12_spill] sm:$0xff] }
  0x79   : > { %2667 = vmatmul.mubr.msk.bf16.gmra.mxu1 %vm351_vm2, %v4029_v59  ;;  %v1455_v40 = vpack.c.bf16 %v3343_v34, %v4033_v27  ;;  %v4037_v34 = vpack.c.bf16 %v3384_v37, %v3179_v29  ;;  %v4043_v29 = vpack.c.bf16 %v3419_v32, %v3190_v10 }
  0x7a   : > { %2670 = vmatprep.mubr.msk.bf16.mxu1 %vm351_vm2, %v1275_v20 }
  0x7f   : > { %2689 = vmatmul.mubr.msk.bf16.gmra.mxu0 %vm351_vm2, %v3242_v3  ;;  %v4034_v3 = vpack.c.bf16 %v3376_v12, %v3125_v4  ;;  %v4038_v4 = vpack.c.bf16 %v3407_v46, %v3141_v13  ;;  %v4039_v12 = vld [vmem:[#allocation14_spill] sm:$0xff] }
  0x80   : > { %2692 = vmatprep.mubr.msk.bf16.mxu0 %vm351_vm2, %v842_v43  ;;  %v4035_v43 = vpack.c.bf16 %v3360_v38, %v3337_v16  ;;  %v4040_v38 = vpack.c.bf16 %v4039_v12, %v3066_v18  ;;  %v4044_v18 = vpack.c.bf16 %v3411_v56, %v3018_v54 }
  0x81   : > { %2671 = vmatmul.mubr.msk.bf16.gmra.mxu1 %vm351_vm2, %v4032_v36 }
  0x82   : > { %2674 = vmatprep.mubr.msk.bf16.mxu1 %vm351_vm2, %v1277_v52 }
  0x87   : > { %2693 = vmatmul.mubr.msk.bf16.gmra.mxu0 %vm351_vm2, %v1455_v40 }
  0x88   : > { %2716 = vmatprep.mubr.msk.bf16.mxu0 %vm351_vm2, %v4034_v3 }
  0x89   : > { %2675 = vmatmul.mubr.msk.bf16.gmra.mxu1 %vm351_vm2, %v4035_v43 }
  0x8a   : > { %2698 = vmatprep.mubr.msk.bf16.mxu1 %vm351_vm2, %v4036_v2 }
  0x8f   : > { %2717 = vmatmul.mubr.msk.bf16.vlgmr.msra.gmra.mxu0 %vm351_vm2, %v4037_v34 }
  0x90   : > { %2720 = vmatprep.mubr.msk.bf16.mxu0 %vm351_vm2, %v4038_v4 }
  0x91   : > { %2699 = vmatmul.mubr.msk.bf16.vlgmr.msra.gmra.mxu1 %vm351_vm2, %v4040_v38 }
  0x92   : > { %2702 = vmatprep.mubr.msk.bf16.mxu1 %vm351_vm2, %v4042_v61 }
  0x97   : > { %2721 = vmatmul.mubr.msk.bf16.gmra.mxu0 %vm351_vm2, %v4043_v29 }
  0x98   : > { %2724 = vmatprep.mubr.msk.bf16.mxu0 %vm351_vm2, %v1888_v62 }
  0x99   : > { %2703 = vmatmul.mubr.msk.bf16.gmra.mxu1 %vm351_vm2, %v4044_v18 }
  0x9a   : > { %2706 = vmatprep.mubr.msk.bf16.mxu1 %vm351_vm2, %v1682_v31 }
  0x9f   : > { %2725 = vmatmul.mubr.msk.bf16.gmra.mxu0 %vm351_vm2, %v1889_v28 }
  0xa0   : > { %2728 = vmatprep.mubr.msk.bf16.mxu0 %vm351_vm2, %v1890_v42 }
  0xa1   : > { %2707 = vmatmul.mubr.msk.bf16.gmra.mxu1 %vm351_vm2, %v1683_v50 }
  0xa2   : > { %2710 = vmatprep.mubr.msk.bf16.mxu1 %vm351_vm2, %v4045_v26 }
  0xa7   : > { %2729 = vmatmul.mubr.msk.bf16.gmra.mxu0 %vm351_vm2, %v1891_v25 }
  0xa9   : > { %2711 = vmatmul.mubr.msk.bf16.gmra.mxu1 %vm351_vm2, %v1685_v39 }
  0xdf   : > { %v2574_v54 = vpop.f32.mrf.mxu0 }
  0xe1   : > { %v414_v6 = vpop.f32.mrf.mxu0  ;;  %v2582_v22 = vpop.f32.mrf.mxu1 }
  0xe3   : > { %v2575_v13 = vpop.f32.mrf.mxu0  ;;  %v446_v10 = vpop.f32.mrf.mxu1 }
  0xe5   : > { %v417_v1 = vpop.f32.mrf.mxu0  ;;  %v2583_v17 = vpop.f32.mrf.mxu1 }
  0xe7   : > { %v2578_v11 = vpop.f32.mrf.mxu0  ;;  %v449_v16 = vpop.f32.mrf.mxu1 }
  0xe9   : > { %v430_v23 = vpop.f32.mrf.mxu0  ;;  %v2586_v37 = vpop.f32.mrf.mxu1 }
  0xeb   : > { %v2579_v56 = vpop.f32.mrf.mxu0  ;;  %v462_v32 = vpop.f32.mrf.mxu1 }
  0xed   : > { %v433_v46 = vpop.f32.mrf.mxu0  ;;  %v2587_v0 = vpop.f32.mrf.mxu1 }
  0xef   : > { %v2610_v62 = vpop.f32.mrf.mxu0  ;;  %v3664_v63 = vpop.f32.mrf.mxu1 }
  0xf1   : > { %v729_v31 = vpop.f32.mrf.mxu0  ;;  %v2592_v57 = vpop.f32.mrf.mxu1 }
  0xf2   : > { %v547_v30 = vadd.f32 %v2592_v57, %v2574_v54 }
  0xf3   : > { %v2611_v50 = vpop.f32.mrf.mxu0  ;;  %v538_v28 = vpop.f32.mrf.mxu1 }
  0xf4   : > { %v3666_v35 = vadd.f32 %v2610_v62, %v547_v30  ;;  %v539_v19 = vadd.f32 %v538_v28, %v414_v6 }
  0xf5   : > { %v732_v42 = vpop.f32.mrf.mxu0  ;;  %v2593_v7 = vpop.f32.mrf.mxu1 }
  0xf6   : > { %v3668_v5 = vadd.f32 %v729_v31, %v539_v19  ;;  %v550_v47 = vadd.f32 %v2593_v7, %v2575_v13 }
  0xf7   : > { %v2614_v39 = vpop.f32.mrf.mxu0  ;;  %v541_v33 = vpop.f32.mrf.mxu1 }
  0xf8   : > { %v3670_v25 = vadd.f32 %v2611_v50, %v550_v47  ;;  %v542_v58 = vadd.f32 %v541_v33, %v417_v1 }
  0xf9   : > { %v745_v15 = vpop.f32.mrf.mxu0  ;;  %v2596_v14 = vpop.f32.mrf.mxu1 }
  0xfa   : > { %v3672_v45 = vadd.f32 %v732_v42, %v542_v58  ;;  %v563_v60 = vadd.f32 %v2596_v14, %v2578_v11 }
  0xfb   : > { %v2615_v55 = vpop.f32.mrf.mxu0  ;;  %v554_v41 = vpop.f32.mrf.mxu1 }
  0xfc   : > { %v3674_v51 = vadd.f32 %v2614_v39, %v563_v60  ;;  %v555_v44 = vadd.f32 %v554_v41, %v430_v23 }
  0xfd   : > { %v748_v48 = vpop.f32.mrf.mxu0  ;;  %v2597_v49 = vpop.f32.mrf.mxu1 }
  0xfe   : > { %v3676_v8 = vadd.f32 %v745_v15, %v555_v44  ;;  %v566_v20 = vadd.f32 %v2597_v49, %v2579_v56 }
  0xff   : > { %v2618_v21 = vpop.f32.mrf.mxu0  ;;  %v557_v59 = vpop.f32.mrf.mxu1 }
 0x100   : > { %v3678_v53 = vadd.f32 %v2615_v55, %v566_v20  ;;  %v558_v52 = vadd.f32 %v557_v59, %v433_v46 }
 0x101   : > { %v761_v24 = vpop.f32.mrf.mxu0  ;;  %v2600_v36 = vpop.f32.mrf.mxu1 }
 0x102   : > { %v3680_v27 = vadd.f32 %v748_v48, %v558_v52  ;;  %v579_v40 = vadd.f32 %v2600_v36, %v2582_v22 }
 0x103   : > { %v2619_v3 = vpop.f32.mrf.mxu0  ;;  %v570_v43 = vpop.f32.mrf.mxu1 }
 0x104   : > { %v3682_v2 = vadd.f32 %v2618_v21, %v579_v40  ;;  %v571_v34 = vadd.f32 %v570_v43, %v446_v10 }
 0x105   : > { %v764_v4 = vpop.f32.mrf.mxu0  ;;  %v2601_v12 = vpop.f32.mrf.mxu1 }
 0x106   : > { %v3684_v38 = vadd.f32 %v761_v24, %v571_v34  ;;  %v582_v9 = vadd.f32 %v2601_v12, %v2583_v17 }
 0x107   : > { %v2622_v61 = vpop.f32.mrf.mxu0  ;;  %v573_v29 = vpop.f32.mrf.mxu1 }
 0x108   : > { %v3686_v18 = vadd.f32 %v2619_v3, %v582_v9  ;;  %v574_v26 = vadd.f32 %v573_v29, %v449_v16 }
 0x109   : > { %v777_v54 = vpop.f32.mrf.mxu0  ;;  %v2604_v6 = vpop.f32.mrf.mxu1 }
 0x10a   : > { %v3688_v13 = vadd.f32 %v764_v4, %v574_v26  ;;  %v595_v22 = vadd.f32 %v2604_v6, %v2586_v37 }
 0x10b   : > { %v2623_v1 = vpop.f32.mrf.mxu0  ;;  %v586_v11 = vpop.f32.mrf.mxu1 }
 0x10c   : > { %v3690_v23 = vadd.f32 %v2622_v61, %v595_v22  ;;  %v587_v10 = vadd.f32 %v586_v11, %v462_v32 }
 0x10d   : > { %v780_v56 = vpop.f32.mrf.mxu0  ;;  %v2605_v46 = vpop.f32.mrf.mxu1 }
 0x10e   : > { %v3692_v62 = vadd.f32 %v777_v54, %v587_v10  ;;  %v598_v17 = vadd.f32 %v2605_v46, %v2587_v0 }
 0x10f   : > { %v3694_v31 = vpop.f32.mrf.mxu0  ;;  %v589_v57 = vpop.f32.mrf.mxu1 }
 0x110   : > { %v3696_v30 = vadd.f32 %v2623_v1, %v598_v17  ;;  %v590_v16 = vadd.f32 %v589_v57, %v3664_v63 }
 0x111   : > { %v3699_v50 = vpop.f32.mrf.mxu0  ;;  %v2628_v37 = vpop.f32.mrf.mxu1 }
 0x112   : > { %v3701_v28 = vadd.f32 %v780_v56, %v590_v16 }
 0x113   : > { %v3703_v19 = vpop.f32.mrf.mxu0  ;;  %v906_v32 = vpop.f32.mrf.mxu1 }
 0x115   : > { %v3705_v42 = vpop.f32.mrf.mxu0  ;;  %v2629_v7 = vpop.f32.mrf.mxu1 }
 0x117   : > { %v3707_v47 = vpop.f32.mrf.mxu0  ;;  %v909_v0 = vpop.f32.mrf.mxu1 }
 0x119   : > { %v3709_v39 = vpop.f32.mrf.mxu0  ;;  %v2632_v33 = vpop.f32.mrf.mxu1 }
 0x11b   : > { %v3711_v58 = vpop.f32.mrf.mxu0  ;;  %v922_v63 = vpop.f32.mrf.mxu1 }
 0x11d   : > { %v3713_v15 = vpop.f32.mrf.mxu0  ;;  %v2633_v14 = vpop.f32.mrf.mxu1 }
 0x11f   : > { %v3715_v60 = vpop.f32.mrf.mxu0  ;;  %v925_v55 = vpop.f32.mrf.mxu1 }
 0x121   : > { %v3717_v41 = vpop.f32.mrf.mxu0  ;;  %v2636_v44 = vpop.f32.mrf.mxu1 }
 0x123   : > { %v3719_v48 = vpop.f32.mrf.mxu0  ;;  %v938_v49 = vpop.f32.mrf.mxu1 }
 0x125   : > { %v3721_v20 = vpop.f32.mrf.mxu0  ;;  %v2637_v21 = vpop.f32.mrf.mxu1 }
 0x127   : > { %v3723_v59 = vpop.f32.mrf.mxu0  ;;  %v941_v52 = vpop.f32.mrf.mxu1 }
 0x129   : > { %v3725_v24 = vpop.f32.mrf.mxu0  ;;  %v2640_v36 = vpop.f32.mrf.mxu1 }
 0x12b   : > { %v3727_v40 = vpop.f32.mrf.mxu0  ;;  %v954_v3 = vpop.f32.mrf.mxu1 }
 0x12d   : > { %v3729_v43 = vpop.f32.mrf.mxu0  ;;  %v2641_v34 = vpop.f32.mrf.mxu1 }
 0x12e   : > { %4046 = vst [vmem:[#allocation5_spill] sm:$0xff] %v3729_v43 }
 0x12f   : > { %v3731_v4 = vpop.f32.mrf.mxu0  ;;  %v957_v12 = vpop.f32.mrf.mxu1 }
 0x131   : > { %v3733_v9 = vpop.f32.mrf.mxu0  ;;  %v2664_v61 = vpop.f32.mrf.mxu1 }
 0x133   : > { %v3735_v29 = vpop.f32.mrf.mxu0  ;;  %v1342_v26 = vpop.f32.mrf.mxu1 }
 0x134   : > { %4047 = vst [vmem:[#allocation2_spill] sm:$0xff] %v3735_v29 }
 0x135   : > { %v3737_v54 = vpop.f32.mrf.mxu0  ;;  %v2665_v6 = vpop.f32.mrf.mxu1 }
 0x136   : > { %4048 = vst [vmem:[#allocation4_spill] sm:$0xff] %v3737_v54 }
 0x137   : > { %v3739_v22 = vpop.f32.mrf.mxu0  ;;  %v1345_v1 = vpop.f32.mrf.mxu1 }
 0x138   : > { %4049 = vst [vmem:[#allocation6_spill] sm:$0xff] %v3739_v22 }
 0x139   : > { %v3741_v11 = vpop.f32.mrf.mxu0  ;;  %v3743_v10 = vpop.f32.mrf.mxu1 }
 0x13a   : > { %4050 = vst [vmem:[#allocation8_spill] sm:$0xff] %v3741_v11 }
 0x13b   : > { %v3745_v56 = vpop.f32.mrf.mxu0  ;;  %v3747_v46 = vpop.f32.mrf.mxu1 }
 0x13c   : > { %4051 = vst [vmem:[#allocation3_spill] sm:$0xff] %v3745_v56  ;;  %4052 = vst [vmem:[#allocation7_spill] sm:$0xff] %v3747_v46 }
 0x13d   : > { %v3749_v17 = vpop.f32.mrf.mxu0  ;;  %v3751_v57 = vpop.f32.mrf.mxu1 }
 0x13e   : > { %4053 = vst [vmem:[#allocation9_spill] sm:$0xff] %v3749_v17  ;;  %4054 = vst [vmem:[#allocation10_spill] sm:$0xff] %v3751_v57  ;;  %v971_v17 = vadd.f32 %v2628_v37, %v3666_v35  ;;  %v975_v35 = vadd.f32 %v2632_v33, %v3674_v51  ;;  %v973_v37 = vadd.f32 %v922_v63, %v3676_v8 }
 0x13f   : > { %v3753_v16 = vpop.f32.mrf.mxu0  ;;  %v3755_v54 = vpop.f32.mrf.mxu1  ;;  %v981_v33 = vadd.f32 %v954_v3, %v3692_v62 }
 0x140   : > { %4055 = vst [vmem:[#allocation13_spill] sm:$0xff] %v3753_v16  ;;  %4056 = vst [vmem:[#allocation11_spill] sm:$0xff] %v3755_v54  ;;  %v969_v16 = vadd.f32 %v906_v32, %v3668_v5  ;;  %v976_v32 = vadd.f32 %v2633_v14, %v3678_v53  ;;  %v980_v53 = vadd.f32 %v2637_v21, %v3686_v18 }
 0x141   : > { %v3757_v29 = vpop.f32.mrf.mxu0  ;;  %v3759_v22 = vpop.f32.mrf.mxu1  ;;  %v1211_v21 = vadd.f32 %v3725_v24, %v981_v33  ;;  %v3847_v24 = vld [vmem:[%s3982_s2] ss:$0 sm:$0xff] }
 0x142   : > { %4057 = vst [vmem:[#allocation12_spill] sm:$0xff] %v3757_v29  ;;  %4058 = vst [vmem:[#allocation14_spill] sm:$0xff] %v3759_v22  ;;  %v972_v29 = vadd.f32 %v2629_v7, %v3670_v25  ;;  %v970_v22 = vadd.f32 %v909_v0, %v3672_v45  ;;  %v1199_v5 = vadd.f32 %v3699_v50, %v969_v16 }
 0x143   : > { %v3761_v11 = vpop.f32.mrf.mxu0  ;;  %v3763_v43 = vpop.f32.mrf.mxu1  ;;  %v974_v25 = vadd.f32 %v925_v55, %v3680_v27  ;;  %v979_v45 = vadd.f32 %v2636_v44, %v3682_v2  ;;  %v978_v27 = vadd.f32 %v941_v52, %v3688_v13  ;;  %v983_v2 = vadd.f32 %v2640_v36, %v3690_v23 }
 0x144   : > { %4059 = vst [vmem:[#allocation15_spill] sm:$0xff] %v3761_v11  ;;  %4060 = vst [vmem:[#allocation16_spill] sm:$0xff] %v3763_v43  ;;  %v1202_v51 = vadd.f32 %v3703_v19, %v972_v29  ;;  %v1200_v8 = vadd.f32 %v3705_v42, %v970_v22  ;;  %v1205_v19 = vadd.f32 %v3707_v47, %v975_v35 }
 0x145   : > { %v3765_v56 = vpop.f32.mrf.mxu0  ;;  %v3767_v46 = vpop.f32.mrf.mxu1  ;;  %v1203_v42 = vadd.f32 %v3709_v39, %v973_v37  ;;  %v1405_v14 = vadd.f32 %v1342_v26, %v1199_v5  ;;  %v1206_v44 = vadd.f32 %v3711_v58, %v976_v32  ;;  %v1204_v18 = vadd.f32 %v3713_v15, %v974_v25 }
 0x146   : > { %4061 = vst [vmem:[#allocation17_spill] sm:$0xff] %v3765_v56  ;;  %v1201_v56 = vadd.f32 %v3694_v31, %v971_v17  ;;  %v977_v31 = vadd.f32 %v938_v49, %v3684_v38  ;;  %v984_v38 = vadd.f32 %v2641_v34, %v3696_v30  ;;  %v1209_v13 = vadd.f32 %v3715_v60, %v979_v45 }
 0x147   : > { %v3770_v57 = vpop.f32.mrf.mxu0  ;;  %v3773_v54 = vpop.f32.mrf.mxu1  ;;  %v982_v23 = vadd.f32 %v957_v12, %v3701_v28  ;;  %v1408_v47 = vadd.f32 %v2665_v6, %v1202_v51  ;;  %v1406_v39 = vadd.f32 %v1345_v1, %v1200_v8  ;;  %v1210_v15 = vadd.f32 %v3719_v48, %v980_v53  ;;  %v4064_v12 = vld [vmem:[#allocation5_spill] sm:$0xff]  ;;  %v4065_v48 = vld [vmem:[#allocation7_spill] sm:$0xff]  ;;  %v4069_v1 = vld [vmem:[#allocation4_spill] sm:$0xff] }
 0x148   : > { %4062 = vst [vmem:[#allocation18_spill] sm:$0xff] %v3770_v57  ;;  %v1407_v50 = vadd.f32 %v2664_v61, %v1201_v56  ;;  %v1207_v62 = vadd.f32 %v3717_v41, %v977_v31  ;;  %v1208_v60 = vadd.f32 %v3721_v20, %v978_v27  ;;  %v1213_v28 = vadd.f32 %v3723_v59, %v983_v2  ;;  %v4066_v20 = vld [vmem:[#allocation10_spill] sm:$0xff]  ;;  %v4067_v59 = vld [vmem:[#allocation11_spill] sm:$0xff] }
 0x149   : > { %v3777_v11 = vpop.f32.mrf.mxu0  ;;  %v3780_v43 = vpop.f32.mrf.mxu1  ;;  %v3832_v36 = vadd.f32 %v3727_v40, %v984_v38  ;;  %v1582_v41 = vadd.f32 %v3733_v9, %v1405_v14  ;;  %v1411_v3 = vadd.f32 %v3743_v10, %v1205_v19  ;;  %v3837_v61 = vadd.f32 %v4064_v12, %v982_v23  ;;  %v4068_v9 = vld [vmem:[#allocation2_spill] sm:$0xff]  ;;  %v4073_v19 = vld [vmem:[#allocation8_spill] sm:$0xff]  ;;  %v4075_v38 = vld [vmem:[#allocation9_spill] sm:$0xff] }
 0x14a   : > { %v1584_v30 = vadd.f32 %v3731_v4, %v1407_v50  ;;  %v1409_v29 = vadd.f32 %v4065_v48, %v1203_v42  ;;  %v1412_v26 = vadd.f32 %v4066_v20, %v1206_v44  ;;  %v1410_v6 = vadd.f32 %v4067_v59, %v1204_v18  ;;  %v4070_v35 = vld [vmem:[#allocation14_spill] sm:$0xff]  ;;  %v4074_v42 = vld [vmem:[#allocation3_spill] sm:$0xff] }
 0x14b   : > { %v3785_v57 = vpop.f32.mrf.mxu0  ;;  %v3791_v7 = vpop.f32.mrf.mxu1  ;;  %v1585_v22 = vadd.f32 %v4068_v9, %v1408_v47  ;;  %v1583_v10 = vadd.f32 %v4069_v1, %v1406_v39  ;;  %v1415_v37 = vadd.f32 %v4070_v35, %v1209_v13  ;;  %v4071_v5 = vld [vmem:[#allocation16_spill] sm:$0xff]  ;;  %v1416_v25 = vadd.f32 %v3767_v46, %v1210_v15  ;;  %v3858_v51 = vld [vmem:[%s3983_s3] ss:$0 sm:$0xff]  ;;  %v4076_v47 = vld [vmem:[#allocation13_spill] sm:$0xff] }
 0x14c   : > { %v1413_v32 = vadd.f32 %v4071_v5, %v1207_v62  ;;  %v1414_v45 = vadd.f32 %v3773_v54, %v1208_v60  ;;  %v4072_v31 = vld [vmem:[#allocation6_spill] sm:$0xff]  ;;  %v1586_v46 = vadd.f32 %v4073_v19, %v1409_v29  ;;  %v1589_v54 = vadd.f32 %v4074_v42, %v1412_v26  ;;  %v4078_v60 = vld [vmem:[#allocation15_spill] sm:$0xff] }
 0x14d   : > { %v3802_v0 = vpop.f32.mrf.mxu0  ;;  %v3808_v63 = vpop.f32.mrf.mxu1  ;;  %v1588_v50 = vadd.f32 %v4072_v31, %v1411_v3  ;;  %v1587_v14 = vadd.f32 %v4075_v38, %v1410_v6  ;;  %v1592_v39 = vadd.f32 %v4076_v47, %v1415_v37  ;;  %v1417_v20 = vadd.f32 %v3791_v7, %v1211_v21 }
 0x14f   : > { %v2718_v55 = vpop.f32.mrf.mxu0  ;;  %v3817_v49 = vpop.f32.mrf.mxu1  ;;  %v4080_v48 = vld [vmem:[#allocation18_spill] sm:$0xff] }
 0x151   : > { %v1955_v58 = vpop.f32.mrf.mxu0  ;;  %v2700_v52 = vpop.f32.mrf.mxu1 }
 0x152   : > { %v1814_v34 = vadd.f32 %v2700_v52, %v1584_v30  ;;  %v3875_v52 = vadd.f32 %v4078_v60, %v1416_v25 }
 0x153   : > { %v2719_v4 = vpop.f32.mrf.mxu0  ;;  %v1749_v40 = vpop.f32.mrf.mxu1 }
 0x154   : > { %v2020_v56 = vadd.f32 %v2718_v55, %v1814_v34  ;;  %v1812_v17 = vadd.f32 %v1749_v40, %v1582_v41  ;;  %v1419_v55 = vadd.f32 %v3780_v43, %v1213_v28  ;;  %v4079_v41 = vld [vmem:[#allocation17_spill] sm:$0xff] }
 0x155   : > { %v1958_v16 = vpop.f32.mrf.mxu0  ;;  %v2701_v8 = vpop.f32.mrf.mxu1  ;;  %v3878_v3 = vadd.f32 %v4079_v41, %v1414_v45 }
 0x156   : > { %v2043_v53 = vmul.f32 %v3847_v24, %v2020_v56  ;;  %v2018_v27 = vadd.f32 %v1955_v58, %v1812_v17  ;;  %v1815_v2 = vadd.f32 %v2701_v8, %v1585_v22  ;;  %v4077_v58 = vld [vmem:[#allocation12_spill] sm:$0xff]  ;;  %v3884_v29 = vadd.f32 %v4080_v48, %v1419_v55 }
 0x157   : > { %v2722_v33 = vpop.f32.mrf.mxu0  ;;  %v1752_v44 = vpop.f32.mrf.mxu1  ;;  %v3872_v15 = vadd.f32 %v4077_v58, %v1413_v32 }
 0x158   : > { %v2066_v18 = vadd.f32 %v3858_v51, %v2043_v53  ;;  %v2041_v13 = vmul.f32 %v3847_v24, %v2018_v27  ;;  %v2021_v23 = vadd.f32 %v2719_v4, %v1815_v2  ;;  %v1813_v62 = vadd.f32 %v1752_v44, %v1583_v10 }
 0x159   : > { %v1971_v30 = vpop.f32.mrf.mxu0  ;;  %v2704_v43 = vpop.f32.mrf.mxu1 }
 0x15a   : > { %vm2082_vm5 = vcmp.ge.f32.partialorder %v2066_v18, 0.0  ;;  %v2098_v28 = vmul.f32 0.01, %v2066_v18  ;;  %v2064_v34 = vadd.f32 %v3858_v51, %v2041_v13  ;;  %v2044_v4 = vmul.f32 %v3847_v24, %v2021_v23 }
 0x15b   : > { %v2723_v12 = vpop.f32.mrf.mxu0  ;;  %v2019_v26 = vadd.f32 %v1958_v16, %v1813_v62  ;;  %v1818_v59 = vadd.f32 %v2704_v43, %v1588_v50  ;;  %v1765_v6 = vpop.f32.mrf.mxu1  ;;  %v3899_v50 = vadd.f32 %v3777_v11, %v1417_v20  ;;  %v1420_v13 = vadd.f32 %v3808_v63, %v3832_v36 }
 0x15c   : > { %v2114_v40 = vsel %vm2082_vm5, %v2066_v18, %v2098_v28  ;;  %vm2080_vm6 = vcmp.ge.f32.partialorder %v2064_v34, 0.0  ;;  %v2096_v9 = vmul.f32 0.01, %v2064_v34  ;;  %v2067_v22 = vadd.f32 %v3858_v51, %v2044_v4 }
 0x15d   : > { %v1974_v1 = vpop.f32.mrf.mxu0  ;;  %v2475_v10 = vpack.c.bf16 %v2114_v40, %v2114_v40  ;;  %v2042_v56 = vmul.f32 %v3847_v24, %v2019_v26  ;;  %v2024_v17 = vadd.f32 %v2722_v33, %v1818_v59  ;;  %v1816_v7 = vadd.f32 %v1765_v6, %v1586_v46  ;;  %v2705_v21 = vpop.f32.mrf.mxu1 }
 0x15e   : > { %v2112_v16 = vsel %vm2080_vm6, %v2064_v34, %v2096_v9  ;;  %vm2083_vm7 = vcmp.ge.f32.partialorder %v2067_v22, 0.0  ;;  %v2099_v35 = vmul.f32 0.01, %v2067_v22  ;;  %v1819_v37 = vadd.f32 %v2705_v21, %v1589_v54 }
 0x15f   : > { %v2726_v5 = vpop.f32.mrf.mxu0  ;;  %2195 = vst.msk [vmem:[%s3890_s11 + $0x8] sm:$0xf] %vm2192_vm4, %v2475_v10  ;;  %v2473_v32 = vpack.c.bf16 %v2112_v16, %v2112_v16  ;;  %v2065_v25 = vadd.f32 %v3858_v51, %v2042_v56  ;;  %v2047_v45 = vmul.f32 %v3847_v24, %v2024_v17  ;;  %v2022_v8 = vadd.f32 %v1971_v30, %v1816_v7  ;;  %v1768_v31 = vpop.f32.mrf.mxu1 }
 0x160   : > { %v2115_v53 = vsel %vm2083_vm7, %v2067_v22, %v2099_v35  ;;  %v2025_v27 = vadd.f32 %v2723_v12, %v1819_v37  ;;  %v1817_v2 = vadd.f32 %v1768_v31, %v1587_v14 }
 0x161   : > { %v1987_v33 = vpop.f32.mrf.mxu0  ;;  %2193 = vst.msk [vmem:[%s3890_s11] sm:$0xf] %vm2192_vm4, %v2473_v32  ;;  %v2476_v19 = vpack.c.bf16 %v2115_v53, %v2115_v53  ;;  %vm2081_vm8 = vcmp.ge.f32.partialorder %v2065_v25, 0.0  ;;  %v2097_v46 = vmul.f32 0.01, %v2065_v25  ;;  %v2070_v42 = vadd.f32 %v3858_v51, %v2047_v45  ;;  %v2708_v54 = vpop.f32.mrf.mxu1 }
 0x162   : > { %v2045_v38 = vmul.f32 %v3847_v24, %v2022_v8  ;;  %v2048_v55 = vmul.f32 %v3847_v24, %v2025_v27  ;;  %v2023_v44 = vadd.f32 %v1974_v1, %v1817_v2  ;;  %v1822_v11 = vadd.f32 %v2708_v54, %v1592_v39 }
 0x163   : > { %v2727_v18 = vpop.f32.mrf.mxu0  ;;  %2196 = vst.msk [vmem:[%s3890_s11 + $0xc] sm:$0xf] %vm2192_vm4, %v2476_v19  ;;  %v2113_v14 = vsel %vm2081_vm8, %v2065_v25, %v2097_v46  ;;  %vm2086_vm9 = vcmp.ge.f32.partialorder %v2070_v42, 0.0  ;;  %v2102_v23 = vmul.f32 0.01, %v2070_v42  ;;  %v1781_v62 = vpop.f32.mrf.mxu1  ;;  %v1418_v39 = vadd.f32 %v3817_v49, %v3837_v61 }
 0x164   : > { %v2474_v30 = vpack.c.bf16 %v2113_v14, %v2113_v14  ;;  %v2068_v47 = vadd.f32 %v3858_v51, %v2045_v38  ;;  %v2071_v58 = vadd.f32 %v3858_v51, %v2048_v55  ;;  %v2046_v60 = vmul.f32 %v3847_v24, %v2023_v44 }
 0x165   : > { %v1990_v41 = vpop.f32.mrf.mxu0  ;;  %v2118_v43 = vsel %vm2086_vm9, %v2070_v42, %v2102_v23  ;;  %v2028_v63 = vadd.f32 %v2726_v5, %v1822_v11  ;;  %v1820_v36 = vadd.f32 %v1781_v62, %v3872_v15  ;;  %v2709_v28 = vpop.f32.mrf.mxu1  ;;  %v1597_v61 = vadd.f32 %v3785_v57, %v1420_v13 }
 0x166   : > { %2194 = vst.msk [vmem:[%s3890_s11 + $0x4] sm:$0xf] %vm2192_vm4, %v2474_v30  ;;  %v2479_v34 = vpack.c.bf16 %v2118_v43, %v2118_v43  ;;  %vm2084_vm10 = vcmp.ge.f32.partialorder %v2068_v47, 0.0  ;;  %v2100_v4 = vmul.f32 0.01, %v2068_v47  ;;  %vm2087_vm11 = vcmp.ge.f32.partialorder %v2071_v58, 0.0 }
 0x167   : > { %v2730_v12 = vpop.f32.mrf.mxu0  ;;  %v2103_v48 = vmul.f32 0.01, %v2071_v58  ;;  %v2069_v20 = vadd.f32 %v3858_v51, %v2046_v60  ;;  %v2051_v26 = vmul.f32 %v3847_v24, %v2028_v63  ;;  %v2026_v59 = vadd.f32 %v1987_v33, %v1820_v36  ;;  %v1784_v49 = vpop.f32.mrf.mxu1 }
 0x168   : > { %2199 = vst.msk [vmem:[%s3890_s11 + $0x18] sm:$0xf] %vm2192_vm4, %v2479_v34  ;;  %v2116_v15 = vsel %vm2084_vm10, %v2068_v47, %v2100_v4  ;;  %v1823_v6 = vadd.f32 %v2709_v28, %v3875_v52  ;;  %v1821_v40 = vadd.f32 %v1784_v49, %v3878_v3  ;;  %v1595_v16 = vadd.f32 %v3802_v0, %v1418_v39 }
 0x169   : > { %v2477_v9 = vpack.c.bf16 %v2116_v15, %v2116_v15  ;;  %v2119_v22 = vsel %vm2087_vm11, %v2071_v58, %v2103_v48  ;;  %vm2085_vm12 = vcmp.ge.f32.partialorder %v2069_v20, 0.0  ;;  %v2101_v1 = vmul.f32 0.01, %v2069_v20  ;;  %v2712_v10 = vpop.f32.mrf.mxu1  ;;  %v2003_v21 = vpop.f32.mrf.mxu0 }
 0x16a   : > { %v2480_v56 = vpack.c.bf16 %v2119_v22, %v2119_v22  ;;  %v2074_v17 = vadd.f32 %v3858_v51, %v2051_v26  ;;  %v2049_v7 = vmul.f32 %v3847_v24, %v2026_v59  ;;  %v2029_v57 = vadd.f32 %v2727_v18, %v1823_v6 }
 0x16b   : > { %2197 = vst.msk [vmem:[%s3890_s11 + $0x10] sm:$0xf] %vm2192_vm4, %v2477_v9  ;;  %v2117_v52 = vsel %vm2085_vm12, %v2069_v20, %v2101_v1  ;;  %v2027_v3 = vadd.f32 %v1990_v41, %v1821_v40  ;;  %v1826_v35 = vadd.f32 %v2712_v10, %v3884_v29  ;;  %v1797_v37 = vpop.f32.mrf.mxu1  ;;  %v2731_v33 = vpop.f32.mrf.mxu0 }
 0x16c   : > { %2200 = vst.msk [vmem:[%s3890_s11 + $0x1c] sm:$0xf] %vm2192_vm4, %v2480_v56  ;;  %v2478_v5 = vpack.c.bf16 %v2117_v52, %v2117_v52  ;;  %vm2090_vm13 = vcmp.ge.f32.partialorder %v2074_v17, 0.0  ;;  %v2106_v32 = vmul.f32 0.01, %v2074_v17  ;;  %v2072_v25 = vadd.f32 %v3858_v51, %v2049_v7 }
 0x16d   : > { %v2052_v45 = vmul.f32 %v3847_v24, %v2029_v57  ;;  %v2050_v8 = vmul.f32 %v3847_v24, %v2027_v3  ;;  %v2032_v0 = vadd.f32 %v2730_v12, %v1826_v35  ;;  %v1824_v31 = vadd.f32 %v1797_v37, %v3899_v50  ;;  %v2713_v53 = vpop.f32.mrf.mxu1  ;;  %v2006_v47 = vpop.f32.mrf.mxu0 }
 0x16e   : > { %2198 = vst.msk [vmem:[%s3890_s11 + $0x14] sm:$0xf] %vm2192_vm4, %v2478_v5  ;;  %v2122_v29 = vsel %vm2090_vm13, %v2074_v17, %v2106_v32  ;;  %vm2088_vm14 = vcmp.ge.f32.partialorder %v2072_v25, 0.0  ;;  %v2104_v27 = vmul.f32 0.01, %v2072_v25  ;;  %v1827_v2 = vadd.f32 %v2713_v53, %v1597_v61 }
 0x16f   : > { %v2483_v19 = vpack.c.bf16 %v2122_v29, %v2122_v29  ;;  %v2075_v46 = vadd.f32 %v3858_v51, %v2052_v45  ;;  %v2073_v42 = vadd.f32 %v3858_v51, %v2050_v8  ;;  %v2055_v54 = vmul.f32 %v3847_v24, %v2032_v0  ;;  %v1800_v38 = vpop.f32.mrf.mxu1 }
 0x170   : > { %v2120_v55 = vsel %vm2088_vm14, %v2072_v25, %v2104_v27  ;;  %v2030_v50 = vadd.f32 %v2003_v21, %v1824_v31  ;;  %v2033_v44 = vadd.f32 %v2731_v33, %v1827_v2  ;;  %v1825_v11 = vadd.f32 %v1800_v38, %v1595_v16 }
 0x171   : > { %2203 = vst.msk [vmem:[%s3890_s11 + $0x28] sm:$0xf] %vm2192_vm4, %v2483_v19  ;;  %v2481_v18 = vpack.c.bf16 %v2120_v55, %v2120_v55  ;;  %vm2091_vm15 = vcmp.ge.f32.partialorder %v2075_v46, 0.0  ;;  %v2107_v13 = vmul.f32 0.01, %v2075_v46  ;;  %vm2089_vm0 = vcmp.ge.f32.partialorder %v2073_v42, 0.0 }
 0x172   : > { %v2105_v14 = vmul.f32 0.01, %v2073_v42  ;;  %v2078_v23 = vadd.f32 %v3858_v51, %v2055_v54  ;;  %v2053_v62 = vmul.f32 %v3847_v24, %v2030_v50  ;;  %v2056_v30 = vmul.f32 %v3847_v24, %v2033_v44 }
 0x173   : > { %2201 = vst.msk [vmem:[%s3890_s11 + $0x20] sm:$0xf] %vm2192_vm4, %v2481_v18  ;;  %v2123_v58 = vsel %vm2091_vm15, %v2075_v46, %v2107_v13  ;;  %v2031_v60 = vadd.f32 %v2006_v47, %v1825_v11 }
 0x174   : > { %v2484_v41 = vpack.c.bf16 %v2123_v58, %v2123_v58  ;;  %v2121_v39 = vsel %vm2089_vm0, %v2073_v42, %v2105_v14  ;;  %vm2094_vm1 = vcmp.ge.f32.partialorder %v2078_v23, 0.0  ;;  %v2110_v43 = vmul.f32 0.01, %v2078_v23 }
 0x175   : > { %v2482_v63 = vpack.c.bf16 %v2121_v39, %v2121_v39  ;;  %v2076_v36 = vadd.f32 %v3858_v51, %v2053_v62  ;;  %v2079_v28 = vadd.f32 %v3858_v51, %v2056_v30  ;;  %v2054_v34 = vmul.f32 %v3847_v24, %v2031_v60 }
 0x176   : > { %2204 = vst.msk [vmem:[%s3890_s11 + $0x2c] sm:$0xf] %vm2192_vm4, %v2484_v41  ;;  %v2126_v4 = vsel %vm2094_vm1, %v2078_v23, %v2110_v43 }
 0x177   : > { %2202 = vst.msk [vmem:[%s3890_s11 + $0x24] sm:$0xf] %vm2192_vm4, %v2482_v63  ;;  %v2487_v12 = vpack.c.bf16 %v2126_v4, %v2126_v4  ;;  %vm2092_vm2 = vcmp.ge.f32.partialorder %v2076_v36, 0.0  ;;  %v2108_v48 = vmul.f32 0.01, %v2076_v36  ;;  %vm2095_vm3 = vcmp.ge.f32.partialorder %v2079_v28, 0.0 }
 0x178   : > { %v2111_v20 = vmul.f32 0.01, %v2079_v28  ;;  %v2077_v26 = vadd.f32 %v3858_v51, %v2054_v34 }
 0x179   : > { %2207 = vst.msk [vmem:[%s3890_s11 + $0x38] sm:$0xf] %vm2192_vm4, %v2487_v12  ;;  %v2124_v59 = vsel %vm2092_vm2, %v2076_v36, %v2108_v48 }
 0x17a   : > { %v2485_v49 = vpack.c.bf16 %v2124_v59, %v2124_v59  ;;  %v2127_v24 = vsel %vm2095_vm3, %v2079_v28, %v2111_v20  ;;  %vm2093_vm5 = vcmp.ge.f32.partialorder %v2077_v26, 0.0  ;;  %v2109_v61 = vmul.f32 0.01, %v2077_v26 }
 0x17b   : > { %v2488_v15 = vpack.c.bf16 %v2127_v24, %v2127_v24 }
 0x17c   : > { %2205 = vst.msk [vmem:[%s3890_s11 + $0x30] sm:$0xf] %vm2192_vm4, %v2485_v49  ;;  %v2125_v6 = vsel %vm2093_vm5, %v2077_v26, %v2109_v61 }
 0x17d   : > { %2208 = vst.msk [vmem:[%s3890_s11 + $0x3c] sm:$0xf] %vm2192_vm4, %v2488_v15  ;;  %v2486_v40 = vpack.c.bf16 %v2125_v6, %v2125_v6 }
 0x17f   : > { %2206 = vst.msk [vmem:[%s3890_s11 + $0x34] sm:$0xf] %vm2192_vm4, %v2486_v40 }
 0x180 PF: > { %s14_s19 = sadd.s32 1, %s2823_s19   ;;  %s4081_s15 = smov %s2815_s17 }
 0x181   : > { %p11_p7 = scmp.ge.s32.totalorder %s14_s19, 6   ;;  %s4082_s16 = smov %s2819_s18 }
 0x182   : > { %s4083_s17 = smov %s4086_s20  ;;  %s4084_s18 = smov %s4090_s21 }
 0x183   :  { %13 = sbr.rel (!%p11_p7) target bundleno = 3 (0x3), region = 77 }

// kernel: gcb_module_forward.7
= control target key start
LH: loop header
LB: loop body
LE: loop exit
PB: predicated region body
PF: predicated region fallthrough
CT: control target
= control target key end

     0   :  { %s5389_s27 = smov 0   ;;  %s5391_s28 = smov 0   ;;  %s7215_s0 = inlined_call_operand.vmem [shape: f32[2,18,18,16], index: 0, kind: input, shape index: {}]   ;;  %s7216_s1 = inlined_call_operand.vmem [shape: f32[2,18,18,4], index: 1, kind: input, shape index: {}]   ;;  %s7217_s2 = inlined_call_operand.vmem [shape: bf16[9,16,32], index: 2, kind: input, shape index: {}]   ;;  %s7218_s3 = inlined_call_operand.vmem [shape: bf16[9,4,32], index: 3, kind: input, shape index: {}]   ;;  %s7219_s4 = inlined_call_operand.vmem [shape: f32[1,32], index: 4, kind: input, shape index: {}]   ;;  %s7220_s5 = inlined_call_operand.vmem [shape: f32[1,32], index: 5, kind: input, shape index: {}]   ;;  %s7221_s6 = inlined_call_operand.vmem [shape: bf16[32,128], index: 6, kind: input, shape index: {}]   ;;  %s7222_s7 = inlined_call_operand.vmem [shape: f32[1,128], index: 7, kind: input, shape index: {}]   ;;  %s7223_s8 = inlined_call_operand.vmem [shape: f32[2,16,16,128], index: 8, kind: output, shape index: {}]  }
   0x1   :  { %s5393_s29 = smov 0   ;;  %s5395_s30 = smov 0  }
   0x2   :  { %s5397_s9 = smov 0  }
   0x3 LB: > { %s27_s10 = sadd.s32 1, %s5334_s29  ;;  %s30_s11 = sadd.s32 1, %s5338_s30  ;;  %s5342_s9 = sphi %s5397_s9, %s18_s9   ;;  %s5338_s30 = sphi %s5395_s30, %s7313_s30   ;;  %s5334_s29 = sphi %s5393_s29, %s7312_s29   ;;  %s5330_s28 = sphi %s5391_s28, %s7311_s28   ;;  %s5326_s27 = sphi %s5389_s27, %s7310_s27  }
   0x4   : > { %p28_p0 = scmp.ge.s32.totalorder %s27_s10, 2  ;;  %p4420_p1 = scmp.ge.s32.totalorder %s5342_s9, 1 }
   0x5   : > { %p286_p2 = scmp.lt.s32.totalorder %s5342_s9, 5 }
   0x6   : > { %s7315_s10 = smov (%p28_p0, %s27_s10), 0  ;;  %s7317_s11 = smov (!%p28_p0, %s30_s11), %s5338_s30 }
   0x7   : > { %p287_p3 = pnand %p4420_p1, %p286_p2  ;;  %p32_p4 = scmp.ge.s32.totalorder %s7317_s11, 2 }
   0x9   : > { %s7319_s11 = smov (%p32_p4, %s7317_s11), 0  ;;  %290 = sbr.rel (%p287_p3) target bundleno = 740 (0x2e4), region = 52 }
   0xe   : > { %v5293_v0 = vld [vmem:[%s7217_s2 + $0x8] sm:$0xff]   ;;  %p330_p5 = scmp.lt.s32.totalorder %s5330_s28, 1  ;;  %s4428_s14 = smul.u32 192, %s5326_s27  ;;  %v5294_v1 = vld [vmem:[%s7217_s2] sm:$0xff]   ;;  %v5433_v2 = vld [vmem:[%s7217_s2 + $0x10] sm:$0xff]   ;;  %vm413_vm0 = vcmask 1046528  }
   0xf   : > { %5241 = vmatprep.subr.bf16.mxu1 %v5293_v0  ;;  %4897 = vmatprep.subr.bf16.mxu0 %v5293_v0  ;;  %vm487_vm1 = vcmask 130048   ;;  %vm736_vm2 = vcmask 1045504   ;;  %v5525_v36 = vld [vmem:[%s7217_s2 + $0x18] sm:$0xff]   ;;  %v5577_v60 = vld [vmem:[%s7217_s2 + $0x20] sm:$0xff]   ;;  %vm2256_vm3 = vcmask 1041408   ;;  %vm2231_vm4 = vcmask 31744  }
  0x10   : > { %s7321_s28 = smov (!%p330_p5, %s5330_s28), 1  ;;  %5242 = vmatpush3.bf16.msra.mxu1 %v5293_v0  ;;  %4898 = vmatpush3.bf16.msra.mxu0 %v5293_v0  ;;  %vm4156_vm6 = vcmask 261120  }
  0x11   : > { %s5252_s19 = smul.u32 432, %s7321_s28  ;;  %4915 = vmatprep.subr.bf16.mxu1 %v5294_v1  ;;  %4933 = vmatprep.subr.bf16.mxu0 %v5433_v2  ;;  %s4425_s25 = sshll.u32 %s7321_s28, 5 }
  0x13   : > { %s334_s22 = scalar_lea.vmem %s7215_s0, %s5252_s19  ;;  %s339_s16 = scalar_lea.vmem %s7216_s1, %s5252_s19 }
  0x14   : > { %s5444_s23 = scalar_lea.vmem %s334_s22, %s4428_s14  ;;  %s5646_s17 = scalar_lea.vmem %s339_s16, %s4428_s14 }
  0x15   : > { %v5447_v3 = vld [vmem:[%s5444_s23 + $0x60] sm:$0xff]  ;;  %v5450_v4 = vld [vmem:[%s5444_s23 + $0x68] sm:$0xff]  ;;  %v5453_v5 = vld [vmem:[%s5444_s23 + $0x70] sm:$0x3]  ;;  %s4423_s22 = sshll.u32 %s5326_s27, 3 }
  0x16   : > { %v434_v6 = vrot.slane %v5447_v3, 1  ;;  %v5457_v7 = vrot.slane %v5450_v4, 1  ;;  %v437_v8 = vrot.slane %v5453_v5, 1  ;;  %v5461_v9 = vld [vmem:[%s5444_s23 + $0x78] sm:$0xff]  ;;  %v5464_v10 = vld [vmem:[%s5444_s23 + $0x80] sm:$0xff]  ;;  %v5484_v18 = vld [vmem:[%s5444_s23 + $0x8] sm:$0xff] }
  0x17   : > { %v5467_v11 = vld [vmem:[%s5444_s23 + $0x88] sm:$0x3]  ;;  %v439_v12 = vrot.slane %v5461_v9, 1  ;;  %v5471_v13 = vrot.slane %v5464_v10, 1  ;;  %v5481_v17 = vld [vmem:[%s5444_s23] sm:$0xff]  ;;  %v415_v23 = vrot.slane %v5484_v18, 1 }
  0x18   : > { %v5475_v14 = vsel %vm413_vm0, %v434_v6, %v5457_v7  ;;  %v438_v15 = vsel %vm413_vm0, %v5457_v7, %v437_v8  ;;  %v442_v16 = vrot.slane %v5467_v11, 1  ;;  %v5487_v19 = vld [vmem:[%s5444_s23 + $0x10] sm:$0x3]  ;;  %v414_v22 = vrot.slane %v5481_v17, 1  ;;  %v5497_v24 = vld [vmem:[%s5444_s23 + $0x18] sm:$0xff]  ;;  %v5500_v25 = vld [vmem:[%s5444_s23 + $0x20] sm:$0xff] }
  0x19   : > { %v474_v20 = vpack.c.bf16 %v438_v15, %v5475_v14  ;;  %v5492_v21 = vsel %vm413_vm0, %v439_v12, %v5471_v13  ;;  %v5503_v26 = vld [vmem:[%s5444_s23 + $0x28] sm:$0x3]  ;;  %v417_v28 = vrot.slane %v5487_v19, 1  ;;  %v5509_v29 = vld [vmem:[%s5444_s23 + $0x90] sm:$0xff]  ;;  %v737_v32 = vrot.slane %v5481_v17, 2  ;;  %v5517_v34 = vld [vmem:[%s5444_s23 + $0x98] sm:$0xff] }
  0x1a   : > { %v443_v27 = vsel %vm413_vm0, %v5471_v13, %v442_v16  ;;  %v416_v31 = vsel %vm413_vm0, %v414_v22, %v415_v23  ;;  %v419_v33 = vrot.slane %v5497_v24, 1  ;;  %v5520_v35 = vld [vmem:[%s5444_s23 + $0xa0] sm:$0x3]  ;;  %v5529_v38 = vrot.slane %v5500_v25, 1  ;;  %v5533_v40 = vld [vmem:[%s5444_s23 + $0xa8] sm:$0xff]  ;;  %v5536_v41 = vld [vmem:[%s5444_s23 + $0xb0] sm:$0xff] }
  0x1b   : > { %4907 = vmatprep.mubr.msk.bf16.mxu1 %vm487_vm1, %v474_v20  ;;  %v475_v30 = vpack.c.bf16 %v443_v27, %v5492_v21  ;;  %v418_v37 = vsel %vm413_vm0, %v415_v23, %v417_v28  ;;  %v422_v39 = vrot.slane %v5503_v26, 1  ;;  %v5539_v42 = vld [vmem:[%s5444_s23 + $0xb8] sm:$0x3]  ;;  %v738_v44 = vrot.slane %v5484_v18, 2  ;;  %v5546_v47 = vld [vmem:[%s5444_s23 + $0x30] sm:$0xff]  ;;  %v5568_v58 = vld [vmem:[%s5444_s23 + $0x48] sm:$0xff] }
  0x1c   : > { %v470_v43 = vpack.c.bf16 %v418_v37, %v416_v31  ;;  %v740_v45 = vrot.slane %v5487_v19, 2  ;;  %v444_v46 = vrot.slane %v5509_v29, 1  ;;  %v362_v48 = vld [vmem:[%s5444_s23 + $0x38] sm:$0xff]  ;;  %v5551_v49 = vsel %vm413_vm0, %v419_v33, %v5529_v38  ;;  %v363_v53 = vld [vmem:[%s5444_s23 + $0x40] sm:$0x3]  ;;  %v5571_v59 = vld [vmem:[%s5444_s23 + $0x50] sm:$0xff] }
  0x1d   : > { %4908 = vmatmul.mubr.msk.bf16.vlgmr.msra.gmra.mxu1 %vm487_vm1, %v475_v30  ;;  %v423_v50 = vsel %vm413_vm0, %v5529_v38, %v422_v39  ;;  %v5556_v51 = vrot.slane %v5517_v34, 1  ;;  %v447_v52 = vrot.slane %v5520_v35, 1  ;;  %v449_v55 = vrot.slane %v5533_v40, 1  ;;  %p343_p6 = scmp.lt.s32.totalorder %s4423_s22, 15 }
  0x1e   : > { %4916 = vmatpush3.bf16.msra.mxu1 %v5294_v1  ;;  %4899 = vmatprep.mubr.msk.bf16.mxu0 %vm487_vm1, %v470_v43  ;;  %v471_v54 = vpack.c.bf16 %v423_v50, %v5551_v49  ;;  %v5564_v56 = vrot.slane %v5536_v41, 1  ;;  %v452_v57 = vrot.slane %v5539_v42, 1  ;;  %v424_v63 = vrot.slane %v5546_v47, 1  ;;  %v366_v1 = vld [vmem:[%s5444_s23 + $0x58] sm:$0x3] }
  0x1f   : > { %4951 = vmatprep.subr.bf16.mxu1 %v5525_v36  ;;  %v5581_v61 = vsel %vm413_vm0, %v444_v46, %v5556_v51  ;;  %v448_v62 = vsel %vm413_vm0, %v5556_v51, %v447_v52  ;;  %v5586_v0 = vrot.slane %v362_v48, 1  ;;  %v427_v15 = vrot.slane %v363_v53, 1  ;;  %s7323_s22 = smov (!%p343_p6, %s4423_s22), 15 }
  0x20   : > { %4900 = vmatmul.mubr.msk.bf16.vlgmr.msra.gmra.mxu0 %vm487_vm1, %v471_v54  ;;  %v476_v6 = vpack.c.bf16 %v448_v62, %v5581_v61  ;;  %v5593_v8 = vsel %vm413_vm0, %v449_v55, %v5564_v56  ;;  %v453_v12 = vsel %vm413_vm0, %v5564_v56, %v452_v57  ;;  %v429_v20 = vrot.slane %v5568_v58, 1  ;;  %s4424_s24 = sshll.u32 %s7323_s22, 1 }
  0x21   : > { %v477_v16 = vpack.c.bf16 %v453_v12, %v5593_v8  ;;  %v5600_v19 = vsel %vm413_vm0, %v424_v63, %v5586_v0  ;;  %v5604_v22 = vrot.slane %v5571_v59, 1  ;;  %4934 = vmatpush3.bf16.msra.mxu0 %v5433_v2  ;;  %v428_v23 = vsel %vm413_vm0, %v5586_v0, %v427_v15  ;;  %s347_s26 = sadd.s32 %s4425_s25, %s4424_s24 }
  0x22   : > { %4911 = vmatprep.mubr.msk.bf16.mxu1 %vm487_vm1, %v476_v6  ;;  %v432_v27 = vrot.slane %v366_v1, 1  ;;  %v379_v28 = vpack.c.bf16 %v5484_v18, %v5481_v17  ;;  %4969 = vmatprep.subr.bf16.mxu0 %v5577_v60  ;;  %v472_v30 = vpack.c.bf16 %v428_v23, %v5600_v19  ;;  %v739_v2 = vsel %vm736_vm2, %v737_v32, %v738_v44  ;;  %s4426_s12 = sshll.u32 %s347_s26, 3 }
  0x23   : > { %v5616_v31 = vsel %vm413_vm0, %v429_v20, %v5604_v22  ;;  %v741_v33 = vsel %vm736_vm2, %v738_v44, %v740_v45  ;;  %v742_v37 = vrot.slane %v5497_v24, 2  ;;  %v5625_v18 = vrot.slane %v5500_v25, 2  ;;  %s7182_s14 = scalar_lea.vmem %s7223_s8, %s4426_s12 }
  0x24   : > { %v433_v17 = vsel %vm413_vm0, %v5604_v22, %v432_v27  ;;  %v745_v39 = vrot.slane %v5503_v26, 2  ;;  %4903 = vmatprep.mubr.msk.bf16.mxu0 %vm487_vm1, %v472_v30  ;;  %v793_v32 = vpack.c.bf16 %v741_v33, %v739_v2  ;;  %v747_v44 = vrot.slane %v5546_v47, 2  ;;  %v5732_v2 = vld [vmem:[%s5444_s23 + $0x28] sm:$0x3] }
  0x25   : > { %4912 = vmatmul.mubr.msk.bf16.gmra.mxu1 %vm487_vm1, %v477_v16  ;;  %v473_v43 = vpack.c.bf16 %v433_v17, %v5616_v31  ;;  %v5632_v45 = vrot.slane %v362_v48, 2  ;;  %v750_v46 = vrot.slane %v363_v53, 2  ;;  %v5642_v26 = vpack.c.bf16 %v5500_v25, %v5497_v24  ;;  %v5667_v25 = vld [vmem:[%s7217_s2 + $0x28] sm:$0xff]  }
  0x26   : > { %4917 = vmatprep.mubr.msk.bf16.mxu1 %vm487_vm1, %v379_v28  ;;  %v5651_v50 = vsel %vm736_vm2, %v742_v37, %v5625_v18  ;;  %v746_v52 = vsel %vm736_vm2, %v5625_v18, %v745_v39  ;;  %v5656_v53 = vpack.c.bf16 %v362_v48, %v5546_v47  ;;  %v752_v47 = vrot.slane %v5568_v58, 2 }
  0x27   : > { %v5660_v54 = vsel %vm736_vm2, %v747_v44, %v5632_v45  ;;  %v751_v24 = vsel %vm736_vm2, %v5632_v45, %v750_v46  ;;  %v794_v55 = vpack.c.bf16 %v746_v52, %v5651_v50  ;;  %v5678_v57 = vrot.slane %v5571_v59, 2  ;;  %v4526_v44 = vld [vmem:[%s5444_s23 + $0x58] sm:$0x3] }
  0x28   : > { %4904 = vmatmul.mubr.msk.bf16.gmra.mxu0 %vm487_vm1, %v473_v43  ;;  %v795_v48 = vpack.c.bf16 %v751_v24, %v5660_v54  ;;  %v755_v62 = vrot.slane %v366_v1, 2  ;;  %v757_v63 = vrot.slane %v5447_v3, 2  ;;  %v5682_v6 = vrot.slane %v5450_v4, 2  ;;  %v5763_v43 = vld [vmem:[%s5444_s23 + $0x40] sm:$0x3] }
  0x29   : > { %4935 = vmatprep.mubr.msk.bf16.mxu0 %vm487_vm1, %v793_v32  ;;  %v760_v12 = vrot.slane %v5453_v5, 2  ;;  %v5694_v15 = vpack.c.bf16 %v5571_v59, %v5568_v58  ;;  %v5699_v1 = vsel %vm736_vm2, %v752_v47, %v5678_v57  ;;  %v5705_v16 = vpack.c.bf16 %v5450_v4, %v5447_v3  ;;  %v4523_v32 = vld [vmem:[%s5444_s23 + $0x40] sm:$0x3]  ;;  %v4529_v24 = vld [vmem:[%s5444_s23 + $0x70] sm:$0x3] }
  0x2a   : > { %v756_v5 = vsel %vm736_vm2, %v5678_v57, %v755_v62  ;;  %v5710_v58 = vsel %vm736_vm2, %v757_v63, %v5682_v6  ;;  %v762_v4 = vrot.slane %v5461_v9, 2  ;;  %v765_v23 = vrot.slane %v5467_v11, 2 }
  0x2b   : > { %v761_v59 = vsel %vm736_vm2, %v5682_v6, %v760_v12  ;;  %v796_v20 = vpack.c.bf16 %v756_v5, %v5699_v1  ;;  %v767_v27 = vrot.slane %v5509_v29, 2  ;;  %v5728_v28 = vrot.slane %v5517_v34, 2 }
  0x2c   : > { %v797_v3 = vpack.c.bf16 %v761_v59, %v5710_v58  ;;  %v770_v30 = vrot.slane %v5520_v35, 2  ;;  %v5737_v33 = vpack.c.bf16 %v5464_v10, %v5461_v9  ;;  %v5741_v11 = vpack.c.bf16 %v5517_v34, %v5509_v29 }
  0x2d   : > { %4918 = vmatmul.mubr.msk.bf16.vlgmr.msra.gmra.mxu1 %vm487_vm1, %v5642_v26  ;;  %v772_v17 = vrot.slane %v5533_v40, 2  ;;  %v5752_v9 = vrot.slane %v5536_v41, 2  ;;  %v775_v34 = vrot.slane %v5539_v42, 2  ;;  %v1155_v39 = vrot.slane %v5732_v2, 1 }
  0x2e   : > { %4952 = vmatpush3.bf16.msra.mxu1 %v5525_v36  ;;  %4921 = vmatprep.mubr.msk.bf16.mxu1 %vm487_vm1, %v5656_v53  ;;  %v5689_v36 = vld [vmem:[%s7217_s2 + $0x30] sm:$0xff]   ;;  %v771_v29 = vsel %vm736_vm2, %v5728_v28, %v770_v30  ;;  %v5772_v52 = vpack.c.bf16 %v5536_v41, %v5533_v40  ;;  %v1780_v62 = vrot.slane %v4523_v32, 1  ;;  %v1785_v41 = vrot.slane %v4526_v44, 1  ;;  %v4535_v30 = vld [vmem:[%s5444_s23 + $0xa0] sm:$0x3] }
  0x2f   : > { %4987 = vmatprep.subr.bf16.mxu1 %v5667_v25  ;;  %v5781_v47 = vsel %vm736_vm2, %v772_v17, %v5752_v9  ;;  %v776_v63 = vsel %vm736_vm2, %v5752_v9, %v775_v34  ;;  %v1156_v40 = vsel %vm413_vm0, %v5529_v38, %v1155_v39  ;;  %v1990_v12 = vrot.slane %v4523_v32, 2  ;;  %v4538_v39 = vld [vmem:[%s5444_s23 + $0xb8] sm:$0x3] }
  0x30   : > { %4936 = vmatmul.mubr.msk.bf16.vlgmr.msra.gmra.mxu0 %vm487_vm1, %v794_v55  ;;  %v4532_v55 = vld [vmem:[%s5444_s23 + $0x88] sm:$0x3]  ;;  %v5790_v5 = vsel %vm413_vm0, %v5586_v0, %v1780_v62  ;;  %v1995_v59 = vrot.slane %v4526_v44, 2  ;;  %v5819_v32 = vld [vmem:[%s5444_s23 + $0x58] sm:$0x3]  ;;  %v1805_v44 = vrot.slane %v4538_v39, 1 }
  0x31   : > { %4939 = vmatprep.mubr.msk.bf16.mxu0 %vm487_vm1, %v795_v48  ;;  %4970 = vmatpush3.bf16.msra.mxu0 %v5577_v60  ;;  %v5723_v60 = vrot.slane %v5464_v10, 2  ;;  %v5756_v10 = vsel %vm736_vm2, %v767_v27, %v5728_v28  ;;  %v1160_v48 = vrot.slane %v5763_v43, 1  ;;  %v5801_v38 = vsel %vm736_vm2, %v5632_v45, %v1990_v12 }
  0x32   : > { %5005 = vmatprep.subr.bf16.mxu0 %v5689_v36  ;;  %v799_v42 = vpack.c.bf16 %v771_v29, %v5756_v10  ;;  %v2000_v27 = vrot.slane %v4529_v24, 2  ;;  %v2043_v17 = vpack.c.bf16 %v5801_v38, %v5660_v54  ;;  %v5811_v29 = vsel %vm736_vm2, %v5678_v57, %v1995_v59 }
  0x33   : > { %v5746_v35 = vsel %vm736_vm2, %v762_v4, %v5723_v60  ;;  %v766_v37 = vsel %vm736_vm2, %v5723_v60, %v765_v23  ;;  %v1833_v4 = vpack.c.bf16 %v5790_v5, %v5600_v19  ;;  %v5797_v23 = vsel %vm413_vm0, %v5604_v22, %v1785_v41 }
  0x34   : > { %v798_v46 = vpack.c.bf16 %v766_v37, %v5746_v35  ;;  %v2005_v12 = vrot.slane %v4532_v55, 2  ;;  %v1800_v59 = vrot.slane %v4535_v30, 1  ;;  %v1165_v62 = vrot.slane %v5819_v32, 1 }
  0x35   : > { %4922 = vmatmul.mubr.msk.bf16.gmra.mxu1 %vm487_vm1, %v5694_v15  ;;  %v1375_v37 = vrot.slane %v5819_v32, 2 }
  0x36   : > { %4925 = vmatprep.mubr.msk.bf16.mxu1 %vm487_vm1, %v5705_v16  ;;  %v5850_v41 = vsel %vm413_vm0, %v5556_v51, %v1800_v59  ;;  %v1161_v59 = vsel %vm413_vm0, %v5586_v0, %v1160_v48 }
  0x38   : > { %4940 = vmatmul.mubr.msk.bf16.gmra.mxu0 %vm487_vm1, %v796_v20  ;;  %v1790_v20 = vrot.slane %v4529_v24, 1 }
  0x39   : > { %4943 = vmatprep.mubr.msk.bf16.mxu0 %vm487_vm1, %v797_v3  ;;  %v1795_v3 = vrot.slane %v4532_v55, 1  ;;  %v5846_v55 = vsel %vm736_vm2, %v5723_v60, %v2005_v12 }
  0x3a   : > { %v5815_v34 = vsel %vm413_vm0, %v5457_v7, %v1790_v20  ;;  %v800_v20 = vpack.c.bf16 %v776_v63, %v5781_v47 }
  0x3b   : > { %v5827_v24 = vsel %vm413_vm0, %v5471_v13, %v1795_v3  ;;  %v2010_v3 = vrot.slane %v4535_v30, 2  ;;  %v5881_v30 = vld [vmem:[%s5444_s23 + $0x70] sm:$0x3] }
  0x3c   : > { %v1380_v32 = vrot.slane %v5881_v30, 2 }
  0x3d   : > { %4926 = vmatmul.mubr.msk.bf16.gmra.mxu1 %vm487_vm1, %v5737_v33 }
  0x3e   : > { %4929 = vmatprep.mubr.msk.bf16.mxu1 %vm487_vm1, %v5741_v11 }
  0x40   : > { %4944 = vmatmul.mubr.msk.bf16.gmra.mxu0 %vm487_vm1, %v798_v46  ;;  %v2015_v46 = vrot.slane %v4538_v39, 2  ;;  %v4485_v39 = vld [vmem:[%s5444_s23 + $0xd0] sm:$0x3] }
  0x41   : > { %4947 = vmatprep.mubr.msk.bf16.mxu0 %vm487_vm1, %v799_v42  ;;  %v5831_v42 = vsel %vm736_vm2, %v5682_v6, %v2000_v27  ;;  %v1208_v27 = vpack.c.bf16 %v1156_v40, %v5551_v49  ;;  %v5858_v49 = vsel %vm413_vm0, %v5564_v56, %v1805_v44  ;;  %v5862_v40 = vsel %vm736_vm2, %v5728_v28, %v2010_v3  ;;  %v5918_v44 = vld [vmem:[%s5444_s23 + $0xb8] sm:$0x3] }
  0x42   : > { %v5870_v12 = vsel %vm736_vm2, %v5752_v9, %v2015_v46  ;;  %v1166_v3 = vsel %vm413_vm0, %v5604_v22, %v1165_v62  ;;  %v5886_v46 = vld [vmem:[%s7217_s2 + $0x38] sm:$0xff]   ;;  %v1170_v22 = vrot.slane %v5881_v30, 1  ;;  %v5904_v62 = vld [vmem:[%s7217_s2 + $0x40] sm:$0xff]  }
  0x43   : > { %v1210_v0 = vpack.c.bf16 %v1166_v3, %v5616_v31  ;;  %v5914_v3 = vld [vmem:[%s5444_s23 + $0xa0] sm:$0x3] }
  0x45   : > { %4930 = vmatmul.mubr.msk.bf16.gmra.mxu1 %vm487_vm1, %v5772_v52 }
  0x46   : > { %4953 = vmatprep.mubr.msk.bf16.mxu1 %vm487_vm1, %v5642_v26 }
  0x48   : > { %4948 = vmatmul.mubr.msk.bf16.gmra.mxu0 %vm487_vm1, %v800_v20  ;;  %v5889_v20 = vld [vmem:[%s5444_s23 + $0x88] sm:$0x3] }
  0x49   : > { %4971 = vmatprep.mubr.msk.bf16.mxu0 %vm487_vm1, %v1208_v27  ;;  %v1209_v27 = vpack.c.bf16 %v1161_v59, %v5600_v19  ;;  %v1175_v48 = vrot.slane %v5889_v20, 1 }
  0x4b   : > { %v1176_v59 = vsel %vm413_vm0, %v5471_v13, %v1175_v48  ;;  %v1185_v13 = vrot.slane %v5918_v44, 1  ;;  %v4484_v48 = vld [vmem:[%s5444_s23 + $0xc8] sm:$0xff] }
  0x4d   : > { %4954 = vmatmul.mubr.msk.bf16.vlgmr.msra.gmra.mxu1 %vm487_vm1, %v5656_v53 }
  0x4e   : > { %4988 = vmatpush3.bf16.msra.mxu1 %v5667_v25  ;;  %4957 = vmatprep.mubr.msk.bf16.mxu1 %vm487_vm1, %v5694_v15  ;;  %v1171_v25 = vsel %vm413_vm0, %v5457_v7, %v1170_v22  ;;  %v1212_v7 = vpack.c.bf16 %v1176_v59, %v5492_v21  ;;  %v5933_v22 = vld [vmem:[%s5444_s23 + $0xc0] sm:$0xff]  ;;  %v1365_v59 = vrot.slane %v5732_v2, 2 }
  0x4f   : > { %5023 = vmatprep.subr.bf16.mxu1 %v5886_v46  ;;  %v981_v2 = vpack.c.bf16 %v4484_v48, %v5933_v22 }
  0x50   : > { %4972 = vmatmul.mubr.msk.bf16.vlgmr.msra.gmra.mxu0 %vm487_vm1, %v1209_v27  ;;  %v1211_v27 = vpack.c.bf16 %v1171_v25, %v5475_v14  ;;  %v1186_v25 = vsel %vm413_vm0, %v5564_v56, %v1185_v13  ;;  %v1366_v56 = vsel %vm736_vm2, %v5625_v18, %v1365_v59  ;;  %v1376_v59 = vsel %vm736_vm2, %v5678_v57, %v1375_v37  ;;  %v4586_v37 = vld [vmem:[%s7218_s3 + $0x2] sm:$0x3] }
  0x51   : > { %4975 = vmatprep.mubr.msk.bf16.mxu0 %vm487_vm1, %v1210_v0  ;;  %5006 = vmatpush3.bf16.msra.mxu0 %v5689_v36  ;;  %v1180_v36 = vrot.slane %v5914_v3, 1  ;;  %v1418_v26 = vpack.c.bf16 %v1366_v56, %v5651_v50 }
  0x52   : > { %5041 = vmatprep.subr.bf16.mxu0 %v5904_v62 }
  0x53   : > { %v1181_v0 = vsel %vm413_vm0, %v5556_v51, %v1180_v36  ;;  %v5946_v51 = vrot.slane %v4484_v48, 1  ;;  %v1190_v36 = vrot.slane %v4485_v39, 1 }
  0x54   : > { %v1213_v63 = vpack.c.bf16 %v1181_v0, %v5581_v61 }
  0x55   : > { %4958 = vmatmul.mubr.msk.bf16.gmra.mxu1 %vm487_vm1, %v5705_v16  ;;  %v1191_v0 = vsel %vm413_vm0, %v5946_v51, %v1190_v36  ;;  %v6051_v36 = vld [vmem:[%s5646_s17 + $0x50] sm:$0xff] }
  0x56   : > { %4961 = vmatprep.mubr.msk.bf16.mxu1 %vm487_vm1, %v5737_v33  ;;  %v6064_v5 = vrot.slane %v6051_v36, 1 }
  0x58   : > { %4976 = vmatmul.mubr.msk.bf16.gmra.mxu0 %vm487_vm1, %v1211_v27  ;;  %v1187_v27 = vrot.slane %v5933_v22, 1 }
  0x59   : > { %4979 = vmatprep.mubr.msk.bf16.mxu0 %vm487_vm1, %v1212_v7  ;;  %v1214_v7 = vpack.c.bf16 %v1186_v25, %v5593_v8  ;;  %v1370_v25 = vrot.slane %v5763_v43, 2  ;;  %v1420_v43 = vpack.c.bf16 %v1376_v59, %v5699_v1 }
  0x5a   : > { %v5956_v13 = vsel %vm413_vm0, %v1187_v27, %v5946_v51  ;;  %v1385_v27 = vrot.slane %v5889_v20, 2  ;;  %v6011_v20 = vrot.slane %v4484_v48, 2  ;;  %v6045_v48 = vld [vmem:[%s5646_s17 + $0x38] sm:$0xff] }
  0x5b   : > { %v1215_v18 = vpack.c.bf16 %v1191_v0, %v5956_v13 }
  0x5c   : > { %v1386_v57 = vsel %vm736_vm2, %v5723_v60, %v1385_v27  ;;  %v1395_v60 = vrot.slane %v5918_v44, 2  ;;  %v1397_v44 = vrot.slane %v5933_v22, 2 }
  0x5d   : > { %4962 = vmatmul.mubr.msk.bf16.gmra.mxu1 %vm487_vm1, %v5741_v11  ;;  %v1422_v30 = vpack.c.bf16 %v1386_v57, %v5746_v35  ;;  %v4541_v57 = vld [vmem:[%s5444_s23 + $0xd0] sm:$0x3] }
  0x5e   : > { %4965 = vmatprep.mubr.msk.bf16.mxu1 %vm487_vm1, %v5772_v52 }
  0x60   : > { %4980 = vmatmul.mubr.msk.bf16.gmra.mxu0 %vm487_vm1, %v1213_v63  ;;  %v1371_v63 = vsel %vm736_vm2, %v5632_v45, %v1370_v25  ;;  %v2230_v45 = vld [vmem:[%s7218_s3] sm:$0x3] }
  0x61   : > { %4983 = vmatprep.mubr.msk.bf16.mxu0 %vm487_vm1, %v1214_v7  ;;  %v1419_v50 = vpack.c.bf16 %v1371_v63, %v5660_v54  ;;  %v6048_v7 = vld [vmem:[%s5646_s17 + $0x48] sm:$0xff]  ;;  %v2258_v0 = vsel %vm2256_vm3, %v2230_v45, 0  ;;  %v6077_v54 = vld [vmem:[%s7218_s3 + $0x4] sm:$0x3] }
  0x62   : > { %v2412_v19 = vrot.slane %v6048_v7, 1 }
  0x65   : > { %4966 = vmatmul.mubr.msk.bf16.gmra.mxu1 %vm487_vm1, %v981_v2 }
  0x66   : > { %4989 = vmatprep.mubr.msk.bf16.mxu1 %vm487_vm1, %v1418_v26 }
  0x68   : > { %4984 = vmatmul.mubr.msk.bf16.gmra.mxu0 %vm487_vm1, %v1215_v18  ;;  %v6072_v18 = vld [vmem:[%s5646_s17 + $0x58] sm:$0x3] }
  0x69   : > { %5007 = vmatprep.mubr.msk.bf16.mxu0 %vm487_vm1, %v5656_v53  ;;  %v1381_v53 = vsel %vm736_vm2, %v5682_v6, %v1380_v32  ;;  %v1390_v6 = vrot.slane %v5914_v3, 2  ;;  %v6032_v3 = vld [vmem:[%s5444_s23 + $0xe0] sm:$0xff]  ;;  %7237 = vst [vmem:[#allocation3_spill] sm:$0xff] %v6072_v18  ;;  %v3627_v38 = vrot.slane %v6072_v18, 1  ;;  %v4620_v18 = vld [vmem:[%s5646_s17 + $0x88] sm:$0x3] }
  0x6a   : > { %v1421_v26 = vpack.c.bf16 %v1381_v53, %v5710_v58 }
  0x6b   : > { %v6110_v27 = vsel %vm413_vm0, %v6064_v5, %v3627_v38  ;;  %v7248_v38 = vpack.c.bf16 %v5862_v40, %v5756_v10 }
  0x6d   : > { %4990 = vmatmul.mubr.msk.bf16.vlgmr.msra.gmra.mxu1 %vm487_vm1, %v1419_v50  ;;  %v7239_v50 = vpack.c.bf16 %v5815_v34, %v5475_v14  ;;  %v2488_v14 = vsel %vm2256_vm3, %v4586_v37, 0  ;;  %v6116_v34 = vld [vmem:[%s5646_s17 + $0x78] sm:$0xff] }
  0x6e   : > { %5024 = vmatpush3.bf16.msra.mxu1 %v5886_v46  ;;  %4993 = vmatprep.mubr.msk.bf16.mxu1 %vm487_vm1, %v1420_v43  ;;  %v6104_v43 = vld [vmem:[%s5646_s17 + $0x68] sm:$0xff] }
  0x6f   : > { %5243 = vmatprep.subr.msk.bf16.mxu1 %vm2256_vm3, %v2230_v45  ;;  %v6119_v45 = vld [vmem:[%s5646_s17 + $0x80] sm:$0xff] }
  0x70   : > { %5008 = vmatmul.mubr.msk.bf16.vlgmr.msra.gmra.mxu0 %vm487_vm1, %v5694_v15  ;;  %v1391_v15 = vsel %vm736_vm2, %v5728_v28, %v1390_v6  ;;  %v6135_v6 = vrot.slane %v6104_v43, 1 }
  0x71   : > { %5011 = vmatprep.mubr.msk.bf16.mxu0 %vm487_vm1, %v5705_v16  ;;  %5042 = vmatpush3.bf16.msra.mxu0 %v5904_v62  ;;  %v1396_v16 = vsel %vm736_vm2, %v5752_v9, %v1395_v60  ;;  %v1423_v46 = vpack.c.bf16 %v1391_v15, %v5756_v10  ;;  %v1400_v62 = vrot.slane %v4485_v39, 2  ;;  %v6029_v39 = vld [vmem:[%s5444_s23 + $0xd8] sm:$0xff]  ;;  %v7241_v60 = vpack.c.bf16 %v5831_v42, %v5710_v58 }
  0x72   : > { %5244 = vmatprep.subr.msk.bf16.mxu0 %vm2256_vm3, %v4586_v37  ;;  %v1424_v28 = vpack.c.bf16 %v1396_v16, %v5781_v47  ;;  %v1606_v22 = vpack.c.bf16 %v6032_v3, %v6029_v39  ;;  %v7240_v37 = vpack.c.bf16 %v5811_v29, %v5699_v1  ;;  %v2422_v15 = vrot.slane %v6116_v34, 1  ;;  %v6146_v1 = vld [vmem:[%s5646_s17 + $0x70] sm:$0x3] }
  0x73   : > { %v1401_v9 = vsel %vm736_vm2, %v6011_v20, %v1400_v62  ;;  %v6143_v16 = vrot.slane %v6119_v45, 1  ;;  %7242 = vst [vmem:[#allocation4_spill] sm:$0xff] %v6146_v1  ;;  %v1810_v29 = vrot.slane %v4541_v57, 1  ;;  %v7244_v42 = vpack.c.bf16 %v5827_v24, %v5492_v21 }
  0x74   : > { %v7249_v10 = vpack.c.bf16 %v5858_v49, %v5593_v8  ;;  %v7250_v49 = vpack.c.bf16 %v5870_v12, %v5781_v47  ;;  %v6239_v12 = vld [vmem:[%s5646_s17 + $0x28] sm:$0x3] }
  0x75   : > { %4994 = vmatmul.mubr.msk.bf16.gmra.mxu1 %vm487_vm1, %v1421_v26  ;;  %v6127_v26 = vld [vmem:[%s7218_s3 + $0x6] sm:$0x3]  ;;  %v6173_v21 = vsel %vm413_vm0, %v2422_v15, %v6143_v16 }
  0x76   : > { %4997 = vmatprep.mubr.msk.bf16.mxu1 %vm487_vm1, %v1422_v30 }
  0x78   : > { %5012 = vmatmul.mubr.msk.bf16.gmra.mxu0 %vm487_vm1, %v5737_v33  ;;  %v6020_v33 = vsel %vm736_vm2, %v1397_v44, %v6011_v20  ;;  %v6152_v44 = vld [vmem:[%s5646_s17 + $0x88] sm:$0x3] }
  0x79   : > { %5015 = vmatprep.mubr.msk.bf16.mxu0 %vm487_vm1, %v5741_v11  ;;  %v1425_v11 = vpack.c.bf16 %v1401_v9, %v6020_v33  ;;  %7243 = vst [vmem:[#allocation5_spill] sm:$0xff] %v6152_v44  ;;  %v3637_v58 = vrot.slane %v6152_v44, 1  ;;  %v7245_v9 = vpack.c.bf16 %v5850_v41, %v5581_v61  ;;  %v4544_v61 = vld [vmem:[%s5444_s23 + $0xe8] sm:$0x3]  ;;  %v2020_v41 = vrot.slane %v4541_v57, 2 }
  0x7a   : > { %v2022_v57 = vrot.slane %v6029_v39, 2 }
  0x7d   : > { %4998 = vmatmul.mubr.msk.bf16.gmra.mxu1 %vm487_vm1, %v1423_v46  ;;  %v3632_v46 = vrot.slane %v6146_v1, 1  ;;  %v4617_v1 = vld [vmem:[%s5646_s17 + $0x70] sm:$0x3] }
  0x7e   : > { %5001 = vmatprep.mubr.msk.bf16.mxu1 %vm487_vm1, %v1424_v28 }
  0x7f   : > { %v6165_v62 = vsel %vm413_vm0, %v6135_v6, %v3632_v46  ;;  %v6231_v46 = vld [vmem:[%s5646_s17 + $0x18] sm:$0xff] }
  0x80   : > { %5016 = vmatmul.mubr.msk.bf16.gmra.mxu0 %vm487_vm1, %v5772_v52  ;;  %v6042_v52 = vld [vmem:[%s5646_s17 + $0x30] sm:$0xff]  ;;  %v2608_v24 = vrot.slane %v6231_v46, 2 }
  0x81   : > { %5019 = vmatprep.mubr.msk.bf16.mxu0 %vm487_vm1, %v981_v2  ;;  %v2407_v56 = vrot.slane %v6042_v52, 1  ;;  %v6056_v2 = vrot.slane %v6045_v48, 1 }
  0x83   : > { %v6086_v63 = vsel %vm413_vm0, %v2407_v56, %v6056_v2 }
  0x85   : > { %5002 = vmatmul.mubr.msk.bf16.gmra.mxu1 %vm487_vm1, %v1425_v11  ;;  %v6179_v11 = vsel %vm413_vm0, %v6143_v16, %v3637_v58  ;;  %v6234_v58 = vld [vmem:[%s5646_s17 + $0x20] sm:$0xff] }
  0x86   : > { %5025 = vmatprep.mubr.msk.bf16.mxu1 %vm487_vm1, %v1833_v4  ;;  %v6067_v4 = vld [vmem:[%s5646_s17 + $0x40] sm:$0x3]  ;;  %7246 = vst [vmem:[#allocation6_spill] sm:$0xff] %v6179_v11 }
  0x87   : > { %7236 = vst [vmem:[#allocation2_spill] sm:$0xff] %v6067_v4  ;;  %v3622_v25 = vrot.slane %v6067_v4, 1 }
  0x88   : > { %5020 = vmatmul.mubr.msk.bf16.gmra.mxu0 %vm487_vm1, %v1606_v22  ;;  %v1811_v22 = vsel %vm413_vm0, %v5946_v51, %v1810_v29 }
  0x89   : > { %5043 = vmatprep.mubr.msk.bf16.mxu0 %vm487_vm1, %v2043_v17  ;;  %v7238_v17 = vpack.c.bf16 %v5797_v23, %v5616_v31  ;;  %v6090_v59 = vsel %vm413_vm0, %v6056_v2, %v3622_v25  ;;  %v6098_v31 = vsel %vm413_vm0, %v2412_v19, %v6064_v5  ;;  %v6101_v23 = vld [vmem:[%s5646_s17 + $0x60] sm:$0xff]  ;;  %v7247_v19 = vpack.c.bf16 %v5846_v55, %v5746_v35  ;;  %v6203_v35 = vld [vmem:[%s5646_s17 + $0x8] sm:$0xff]  ;;  %v6206_v55 = vld [vmem:[%s5646_s17 + $0x10] sm:$0x3] }
  0x8a   : > { %v2417_v30 = vrot.slane %v6101_v23, 1  ;;  %v1813_v25 = vrot.slane %v6032_v3, 1  ;;  %v1839_v51 = vpack.c.bf16 %v1811_v22, %v5956_v13  ;;  %v2400_v8 = vrot.slane %v6206_v55, 1 }
  0x8c   : > { %v6161_v28 = vsel %vm413_vm0, %v2417_v30, %v6135_v6  ;;  %v2025_v30 = vrot.slane %v4544_v61, 2 }
  0x8d   : > { %5026 = vmatmul.mubr.msk.bf16.vlgmr.msra.gmra.mxu1 %vm487_vm1, %v7238_v17  ;;  %v1815_v17 = vrot.slane %v4544_v61, 1  ;;  %v2402_v61 = vrot.slane %v6231_v46, 1 }
  0x8e   : > { %5060 = vmatpush3.bf16.msra.mxu1 %v2258_v0  ;;  %5029 = vmatprep.mubr.msk.bf16.mxu1 %vm487_vm1, %v7239_v50  ;;  %v1812_v0 = vrot.slane %v6029_v39, 1  ;;  %v2021_v50 = vsel %vm736_vm2, %v6011_v20, %v2020_v41  ;;  %v6248_v41 = vrot.slane %v6234_v58, 1 }
  0x8f   : > { %5245 = vmatprep.subr.msk.bf16.mxu1 %vm2256_vm3, %v6077_v54  ;;  %v1816_v13 = vsel %vm413_vm0, %v1813_v25, %v1815_v17  ;;  %v2049_v20 = vpack.c.bf16 %v2021_v50, %v6020_v33  ;;  %v6266_v50 = vpack.c.bf16 %v6045_v48, %v6042_v52 }
  0x90   : > { %5044 = vmatmul.mubr.msk.bf16.vlgmr.msra.gmra.mxu0 %vm487_vm1, %v7240_v37  ;;  %v2023_v37 = vrot.slane %v6032_v3, 2  ;;  %v1814_v40 = vsel %vm413_vm0, %v1812_v0, %v1813_v25  ;;  %v2398_v3 = vrot.slane %v6203_v35, 1  ;;  %v2405_v0 = vrot.slane %v6239_v12, 1 }
  0x91   : > { %5047 = vmatprep.mubr.msk.bf16.mxu0 %vm487_vm1, %v7241_v60  ;;  %5078 = vmatpush3.bf16.msra.mxu0 %v2488_v14  ;;  %v6200_v14 = vld [vmem:[%s5646_s17] sm:$0xff]  ;;  %v1840_v60 = vpack.c.bf16 %v1816_v13, %v1814_v40  ;;  %v6276_v40 = vld [vmem:[%s5646_s17 + $0x70] sm:$0x3]  ;;  %v6281_v13 = vld [vmem:[%s7218_s3 + $0x8] sm:$0x3] }
  0x92   : > { %5246 = vmatprep.subr.msk.bf16.mxu0 %vm2256_vm3, %v6127_v26  ;;  %v2397_v39 = vrot.slane %v6200_v14, 1  ;;  %v2024_v15 = vsel %vm736_vm2, %v2022_v57, %v2023_v37  ;;  %v2026_v33 = vsel %vm736_vm2, %v2023_v37, %v2025_v30  ;;  %v2222_v29 = vpack.c.bf16 %v6203_v35, %v6200_v14 }
  0x93   : > { %v2401_v47 = vsel %vm413_vm0, %v2398_v3, %v2400_v8  ;;  %v2050_v22 = vpack.c.bf16 %v2026_v33, %v2024_v15  ;;  %v2406_v17 = vsel %vm413_vm0, %v6248_v41, %v2405_v0  ;;  %v2694_v57 = vsel %vm2256_vm3, %v6077_v54, 0  ;;  %v6298_v8 = vld [vmem:[%s7218_s3 + $0xa] sm:$0x3]  ;;  %v6315_v33 = vld [vmem:[%s5646_s17 + $0x88] sm:$0x3] }
  0x95   : > { %5030 = vmatmul.mubr.msk.bf16.gmra.mxu1 %vm487_vm1, %v7244_v42  ;;  %v2399_v42 = vsel %vm413_vm0, %v2397_v39, %v2398_v3  ;;  %v2420_v39 = vrot.slane %v6276_v40, 1  ;;  %v2869_v3 = vsel %vm2256_vm3, %v6127_v26, 0  ;;  %v6310_v26 = vpack.c.bf16 %v6104_v43, %v6101_v23 }
  0x96   : > { %5033 = vmatprep.mubr.msk.bf16.mxu1 %vm487_vm1, %v7245_v9  ;;  %v6242_v9 = vld [vmem:[%s5646_s17 + $0x40] sm:$0x3] }
  0x97   : > { %v2410_v25 = vrot.slane %v6242_v9, 1  ;;  %v2421_v15 = vsel %vm413_vm0, %v6135_v6, %v2420_v39  ;;  %v6355_v39 = vld [vmem:[%s5646_s17 + $0xa8] sm:$0xff] }
  0x98   : > { %5048 = vmatmul.mubr.msk.bf16.gmra.mxu0 %vm487_vm1, %v7247_v19  ;;  %v2453_v19 = vpack.c.bf16 %v2401_v47, %v2399_v42  ;;  %v6323_v42 = vld [vmem:[%s5646_s17 + $0x98] sm:$0xff]  ;;  %v6326_v47 = vld [vmem:[%s5646_s17 + $0xa0] sm:$0x3] }
  0x99   : > { %5051 = vmatprep.mubr.msk.bf16.mxu0 %vm487_vm1, %v7248_v38  ;;  %v6255_v38 = vpack.c.bf16 %v6234_v58, %v6231_v46  ;;  %v2411_v37 = vsel %vm413_vm0, %v6056_v2, %v2410_v25  ;;  %v6337_v25 = vrot.slane %v6323_v42, 1  ;;  %v2611_v46 = vrot.slane %v6239_v12, 2 }
  0x9a   : > { %v2455_v54 = vpack.c.bf16 %v2411_v37, %v6086_v63  ;;  %v2603_v37 = vrot.slane %v6200_v14, 2 }
  0x9d   : > { %5034 = vmatmul.mubr.msk.bf16.gmra.mxu1 %vm487_vm1, %v7249_v10  ;;  %v6273_v10 = vld [vmem:[%s5646_s17 + $0x58] sm:$0x3] }
  0x9e   : > { %5037 = vmatprep.mubr.msk.bf16.mxu1 %vm487_vm1, %v1839_v51  ;;  %v6260_v51 = vsel %vm413_vm0, %v2402_v61, %v6248_v41  ;;  %v2415_v30 = vrot.slane %v6273_v10, 1  ;;  %v2457_v61 = vpack.c.bf16 %v2421_v15, %v6161_v28  ;;  %v6367_v15 = vld [vmem:[%s5646_s17 + $0xb8] sm:$0x3] }
  0xa0   : > { %5052 = vmatmul.mubr.msk.bf16.gmra.mxu0 %vm487_vm1, %v7250_v49  ;;  %v6303_v49 = vpack.c.bf16 %v6051_v36, %v6048_v7 }
  0xa1   : > { %5055 = vmatprep.mubr.msk.bf16.mxu0 %vm487_vm1, %v2049_v20  ;;  %v2454_v20 = vpack.c.bf16 %v2406_v17, %v6260_v51  ;;  %v2430_v17 = vrot.slane %v6326_v47, 1 }
  0xa3   : > { %v2431_v14 = vsel %vm413_vm0, %v6337_v25, %v2430_v17  ;;  %v2435_v17 = vrot.slane %v6367_v15, 1 }
  0xa5   : > { %5038 = vmatmul.mubr.msk.bf16.gmra.mxu1 %vm487_vm1, %v1840_v60  ;;  %v2416_v60 = vsel %vm413_vm0, %v6064_v5, %v2415_v30  ;;  %v2604_v30 = vrot.slane %v6203_v35, 2 }
  0xa6   : > { %5061 = vmatprep.mubr.msk.bf16.mxu1 %vm2231_vm4, %v2222_v29  ;;  %v6320_v29 = vld [vmem:[%s5646_s17 + $0x90] sm:$0xff] }
  0xa7   : > { %v2427_v0 = vrot.slane %v6320_v29, 1  ;;  %v2605_v56 = vsel %vm736_vm2, %v2603_v37, %v2604_v30 }
  0xa8   : > { %5056 = vmatmul.mubr.msk.bf16.gmra.mxu0 %vm487_vm1, %v2050_v22  ;;  %v2456_v22 = vpack.c.bf16 %v2416_v60, %v6098_v31 }
  0xa9   : > { %5079 = vmatprep.mubr.msk.bf16.mxu0 %vm2231_vm4, %v2453_v19  ;;  %v2425_v19 = vrot.slane %v6315_v33, 1  ;;  %v6362_v60 = vsel %vm413_vm0, %v2427_v0, %v6337_v25 }
  0xaa   : > { %v2459_v0 = vpack.c.bf16 %v2431_v14, %v6362_v60 }
  0xad   : > { %5062 = vmatmul.mubr.msk.bf16.vlgmr.msra.gmra.mxu1 %vm2231_vm4, %v6255_v38 }
  0xae   : > { %5096 = vmatpush3.bf16.msra.mxu1 %v2694_v57  ;;  %5065 = vmatprep.mubr.msk.bf16.mxu1 %vm2231_vm4, %v6266_v50  ;;  %v6343_v57 = vpack.c.bf16 %v6119_v45, %v6116_v34 }
  0xaf   : > { %5247 = vmatprep.subr.msk.bf16.mxu1 %vm2256_vm3, %v6281_v13 }
  0xb0   : > { %5080 = vmatmul.mubr.msk.bf16.vlgmr.msra.gmra.mxu0 %vm2231_vm4, %v2454_v20  ;;  %7251 = vst [vmem:[#allocation7_spill] sm:$0xff] %v6343_v57  ;;  %v2426_v20 = vsel %vm413_vm0, %v6143_v16, %v2425_v19 }
  0xb1   : > { %5083 = vmatprep.mubr.msk.bf16.mxu0 %vm2231_vm4, %v2455_v54  ;;  %5114 = vmatpush3.bf16.msra.mxu0 %v2869_v3  ;;  %v6351_v54 = vpack.c.bf16 %v6323_v42, %v6320_v29  ;;  %v6358_v3 = vld [vmem:[%s5646_s17 + $0xb0] sm:$0xff]  ;;  %v2458_v35 = vpack.c.bf16 %v2426_v20, %v6173_v21  ;;  %v6385_v20 = vrot.slane %v6234_v58, 2  ;;  %v2613_v58 = vrot.slane %v6042_v52, 2 }
  0xb2   : > { %5248 = vmatprep.subr.msk.bf16.mxu0 %vm2256_vm3, %v6298_v8  ;;  %v6377_v19 = vrot.slane %v6358_v3, 1  ;;  %v6390_v53 = vpack.c.bf16 %v6358_v3, %v6355_v39 }
  0xb3   : > { %7252 = vst [vmem:[#allocation8_spill] sm:$0xff] %v6351_v54 }
  0xb4   : > { %7253 = vst [vmem:[#allocation9_spill] sm:$0xff] %v6390_v53  ;;  %v2436_v37 = vsel %vm413_vm0, %v6377_v19, %v2435_v17  ;;  %v6425_v17 = vrot.slane %v6051_v36, 2  ;;  %v6441_v36 = vld [vmem:[%s7218_s3 + $0xc] sm:$0x3] }
  0xb5   : > { %5066 = vmatmul.mubr.msk.bf16.gmra.mxu1 %vm2231_vm4, %v6303_v49 }
  0xb6   : > { %5069 = vmatprep.mubr.msk.bf16.mxu1 %vm2231_vm4, %v6310_v26  ;;  %7255 = vst [vmem:[#allocation11_spill] sm:$0xff] %v6425_v17 }
  0xb8   : > { %5084 = vmatmul.mubr.msk.bf16.gmra.mxu0 %vm2231_vm4, %v2456_v22  ;;  %v2606_v22 = vrot.slane %v6206_v55, 2 }
  0xb9   : > { %5087 = vmatprep.mubr.msk.bf16.mxu0 %vm2231_vm4, %v2457_v61  ;;  %v2432_v61 = vrot.slane %v6355_v39, 1 }
  0xba   : > { %v2607_v55 = vsel %vm736_vm2, %v2604_v30, %v2606_v22  ;;  %v6402_v22 = vrot.slane %v6045_v48, 2 }
  0xbb   : > { %v6395_v14 = vsel %vm413_vm0, %v2432_v61, %v6377_v19  ;;  %v2659_v30 = vpack.c.bf16 %v2607_v55, %v2605_v56  ;;  %v6411_v61 = vsel %vm736_vm2, %v2608_v24, %v6385_v20  ;;  %v2612_v56 = vsel %vm736_vm2, %v6385_v20, %v2611_v46 }
  0xbc   : > { %7254 = vst [vmem:[#allocation10_spill] sm:$0xff] %v6402_v22  ;;  %v6417_v52 = vsel %vm736_vm2, %v2613_v58, %v6402_v22  ;;  %v2660_v12 = vpack.c.bf16 %v2612_v56, %v6411_v61  ;;  %v2621_v55 = vrot.slane %v6273_v10, 2  ;;  %v3099_v46 = vsel %vm2256_vm3, %v6281_v13, 0  ;;  %v6464_v13 = vld [vmem:[%s7218_s3 + $0xe] sm:$0x3] }
  0xbd   : > { %5070 = vmatmul.mubr.msk.bf16.gmra.mxu1 %vm2231_vm4, %v6343_v57  ;;  %v2631_v56 = vrot.slane %v6315_v33, 2 }
  0xbe   : > { %5073 = vmatprep.mubr.msk.bf16.mxu1 %vm2231_vm4, %v6351_v54 }
  0xc0   : > { %5088 = vmatmul.mubr.msk.bf16.gmra.mxu0 %vm2231_vm4, %v2458_v35  ;;  %v2616_v35 = vrot.slane %v6242_v9, 2  ;;  %v2618_v9 = vrot.slane %v6048_v7, 2  ;;  %v2626_v7 = vrot.slane %v6276_v40, 2  ;;  %v3305_v40 = vsel %vm2256_vm3, %v6298_v8, 0 }
  0xc1   : > { %5091 = vmatprep.mubr.msk.bf16.mxu0 %vm2231_vm4, %v2459_v0  ;;  %v2460_v0 = vpack.c.bf16 %v2436_v37, %v6395_v14  ;;  %v2623_v37 = vrot.slane %v6101_v23, 2 }
  0xc2   : > { %v2617_v48 = vsel %vm736_vm2, %v6402_v22, %v2616_v35  ;;  %v6447_v23 = vsel %vm736_vm2, %v2618_v9, %v6425_v17  ;;  %v2628_v35 = vrot.slane %v6116_v34, 2  ;;  %v2636_v9 = vrot.slane %v6326_v47, 2 }
  0xc3   : > { %v2661_v24 = vpack.c.bf16 %v2617_v48, %v6417_v52  ;;  %7256 = vst [vmem:[#allocation12_spill] sm:$0xff] %v6447_v23  ;;  %v2633_v48 = vrot.slane %v6320_v29, 2 }
  0xc5   : > { %5074 = vmatmul.mubr.msk.bf16.gmra.mxu1 %vm2231_vm4, %v6390_v53 }
  0xc6   : > { %5097 = vmatprep.mubr.msk.bf16.mxu1 %vm2231_vm4, %v2659_v30  ;;  %v6433_v30 = vrot.slane %v6104_v43, 2  ;;  %v2622_v43 = vsel %vm736_vm2, %v6425_v17, %v2621_v55  ;;  %v6504_v55 = vrot.slane %v6358_v3, 2 }
  0xc7   : > { %v2662_v58 = vpack.c.bf16 %v2622_v43, %v6447_v23 }
  0xc8   : > { %5092 = vmatmul.mubr.msk.bf16.gmra.mxu0 %vm2231_vm4, %v2460_v0  ;;  %v2627_v10 = vsel %vm736_vm2, %v6433_v30, %v2626_v7  ;;  %v6471_v0 = vrot.slane %v6119_v45, 2 }
  0xc9   : > { %5115 = vmatprep.mubr.msk.bf16.mxu0 %vm2231_vm4, %v6255_v38  ;;  %v6453_v38 = vsel %vm736_vm2, %v2623_v37, %v6433_v30 }
  0xca   : > { %v2663_v8 = vpack.c.bf16 %v2627_v10, %v6453_v38  ;;  %v6488_v34 = vsel %vm736_vm2, %v2628_v35, %v6471_v0  ;;  %v2632_v45 = vsel %vm736_vm2, %v6471_v0, %v2631_v56  ;;  %v4614_v35 = vld [vmem:[%s5646_s17 + $0x58] sm:$0x3] }
  0xcb   : > { %v2664_v47 = vpack.c.bf16 %v2632_v45, %v6488_v34  ;;  %v6537_v45 = vld [vmem:[%s5646_s17 + $0xc8] sm:$0xff] }
  0xcd   : > { %5098 = vmatmul.mubr.msk.bf16.vlgmr.msra.gmra.mxu1 %vm2231_vm4, %v2660_v12  ;;  %v6479_v12 = vrot.slane %v6323_v42, 2  ;;  %v4608_v42 = vld [vmem:[%s5646_s17 + $0x28] sm:$0x3] }
  0xce   : > { %5132 = vmatpush3.bf16.msra.mxu1 %v3099_v46  ;;  %5101 = vmatprep.mubr.msk.bf16.mxu1 %vm2231_vm4, %v2661_v24  ;;  %v2638_v24 = vrot.slane %v6355_v39, 2  ;;  %v2641_v46 = vrot.slane %v6367_v15, 2  ;;  %v3011_v7 = vrot.slane %v4608_v42, 1 }
  0xcf   : > { %5249 = vmatprep.subr.msk.bf16.mxu1 %vm2256_vm3, %v6441_v36  ;;  %v6494_v33 = vsel %vm736_vm2, %v2633_v48, %v6479_v12  ;;  %v2637_v29 = vsel %vm736_vm2, %v6479_v12, %v2636_v9  ;;  %v6534_v9 = vld [vmem:[%s5646_s17 + $0xc0] sm:$0xff] }
  0xd0   : > { %5116 = vmatmul.mubr.msk.bf16.vlgmr.msra.gmra.mxu0 %vm2231_vm4, %v6266_v50  ;;  %v2665_v37 = vpack.c.bf16 %v2637_v29, %v6494_v33  ;;  %v6516_v39 = vsel %vm736_vm2, %v2638_v24, %v6504_v55  ;;  %v2642_v3 = vsel %vm736_vm2, %v6504_v55, %v2641_v46  ;;  %v3012_v15 = vsel %vm413_vm0, %v6248_v41, %v3011_v7 }
  0xd1   : > { %5119 = vmatprep.mubr.msk.bf16.mxu0 %vm2231_vm4, %v6303_v49  ;;  %5150 = vmatpush3.bf16.msra.mxu0 %v3305_v40  ;;  %v4611_v40 = vld [vmem:[%s5646_s17 + $0x40] sm:$0x3]  ;;  %v2666_v48 = vpack.c.bf16 %v2642_v3, %v6516_v39  ;;  %v3064_v41 = vpack.c.bf16 %v3012_v15, %v6260_v51  ;;  %v6549_v3 = vpack.c.bf16 %v6537_v45, %v6534_v9 }
  0xd2   : > { %5250 = vmatprep.subr.msk.bf16.mxu0 %vm2256_vm3, %v6464_v13  ;;  %v3016_v29 = vrot.slane %v4611_v40, 1  ;;  %v3222_v32 = vrot.slane %v4611_v40, 2 }
  0xd3   : > { %7257 = vst [vmem:[#allocation13_spill] sm:$0xff] %v6549_v3 }
  0xd4   : > { %v3017_v51 = vsel %vm413_vm0, %v6056_v2, %v3016_v29  ;;  %v3026_v29 = vrot.slane %v4617_v1, 1 }
  0xd5   : > { %5102 = vmatmul.mubr.msk.bf16.gmra.mxu1 %vm2231_vm4, %v2662_v58  ;;  %v3217_v58 = vrot.slane %v4608_v42, 2  ;;  %v3065_v2 = vpack.c.bf16 %v3017_v51, %v6086_v63  ;;  %v6579_v51 = vld [vmem:[%s7218_s3 + $0x10] sm:$0x3] }
  0xd6   : > { %5105 = vmatprep.mubr.msk.bf16.mxu1 %vm2231_vm4, %v2663_v8 }
  0xd7   : > { %v3218_v24 = vsel %vm736_vm2, %v6385_v20, %v3217_v58 }
  0xd8   : > { %5120 = vmatmul.mubr.msk.bf16.gmra.mxu0 %vm2231_vm4, %v6310_v26  ;;  %v3270_v15 = vpack.c.bf16 %v3218_v24, %v6411_v61  ;;  %v3223_v61 = vsel %vm736_vm2, %v6402_v22, %v3222_v32  ;;  %v3480_v24 = vsel %vm2256_vm3, %v6441_v36, 0  ;;  %v3232_v22 = vrot.slane %v4617_v1, 2 }
  0xd9   : > { %5123 = vmatprep.mubr.msk.bf16.mxu0 %vm2231_vm4, %v6343_v57  ;;  %v3027_v36 = vsel %vm413_vm0, %v6135_v6, %v3026_v29 }
  0xda   : > { %v3067_v29 = vpack.c.bf16 %v3027_v36, %v6161_v28 }
  0xdd   : > { %v6510_v43 = vpop.f32.mrf.mxu1  ;;  %5106 = vmatmul.mubr.msk.bf16.gmra.mxu1 %vm2231_vm4, %v2664_v47 }
  0xde   : > { %5109 = vmatprep.mubr.msk.bf16.mxu1 %vm2231_vm4, %v2665_v37  ;;  %v3021_v37 = vrot.slane %v4614_v35, 1 }
  0xdf   : > { %v6520_v10 = vpop.f32.mrf.mxu1 }
  0xe0   : > { %v4901_v8 = vpop.f32.mrf.mxu0  ;;  %5124 = vmatmul.mubr.msk.bf16.gmra.mxu0 %vm2231_vm4, %v6351_v54  ;;  %v3022_v58 = vsel %vm413_vm0, %v6064_v5, %v3021_v37 }
  0xe1   : > { %v6528_v56 = vpop.f32.mrf.mxu1  ;;  %5127 = vmatprep.mubr.msk.bf16.mxu0 %vm2231_vm4, %v6390_v53  ;;  %v3066_v40 = vpack.c.bf16 %v3022_v58, %v6098_v31  ;;  %v3271_v58 = vpack.c.bf16 %v3223_v61, %v6417_v52  ;;  %v3710_v61 = vsel %vm2256_vm3, %v6464_v13, 0 }
  0xe2   : > { %v546_v42 = vpop.f32.mrf.mxu0 }
  0xe3   : > { %v6540_v47 = vpop.f32.mrf.mxu1 }
  0xe4   : > { %v4902_v46 = vpop.f32.mrf.mxu0 }
  0xe5   : > { %v6544_v7 = vpop.f32.mrf.mxu1  ;;  %5110 = vmatmul.mubr.msk.bf16.gmra.mxu1 %vm2231_vm4, %v2666_v48  ;;  %v3227_v48 = vrot.slane %v4614_v35, 2 }
  0xe6   : > { %5133 = vmatprep.mubr.msk.bf16.mxu1 %vm2231_vm4, %v3064_v41  ;;  %v549_v44 = vpop.f32.mrf.mxu0 }
  0xe7   : > { %v6555_v20 = vpop.f32.mrf.mxu1  ;;  %v3228_v37 = vsel %vm736_vm2, %v6425_v17, %v3227_v48  ;;  %v4623_v17 = vld [vmem:[%s5646_s17 + $0xa0] sm:$0x3] }
  0xe8   : > { %v4905_v53 = vpop.f32.mrf.mxu0  ;;  %5128 = vmatmul.mubr.msk.bf16.gmra.mxu0 %vm2231_vm4, %v6549_v3  ;;  %v3031_v3 = vrot.slane %v4620_v18, 1  ;;  %v3272_v48 = vpack.c.bf16 %v3228_v37, %v6447_v23  ;;  %v3036_v37 = vrot.slane %v4623_v17, 1 }
  0xe9   : > { %v6563_v41 = vpop.f32.mrf.mxu1  ;;  %5151 = vmatprep.mubr.msk.bf16.mxu0 %vm2231_vm4, %v3270_v15 }
  0xea   : > { %v562_v5 = vpop.f32.mrf.mxu0  ;;  %v3032_v57 = vsel %vm413_vm0, %v6143_v16, %v3031_v3 }
  0xeb   : > { %v6570_v35 = vpop.f32.mrf.mxu1  ;;  %v3068_v13 = vpack.c.bf16 %v3032_v57, %v6173_v21  ;;  %v3037_v57 = vsel %vm413_vm0, %v6337_v25, %v3036_v37  ;;  %v3043_v37 = vrot.slane %v6534_v9, 1 }
  0xec   : > { %v4906_v32 = vpop.f32.mrf.mxu0 }
  0xed   : > { %v4919_v15 = vpop.f32.mrf.mxu1  ;;  %5134 = vmatmul.mubr.msk.bf16.vlgmr.msra.gmra.mxu1 %vm2231_vm4, %v3065_v2  ;;  %v3237_v2 = vrot.slane %v4620_v18, 2 }
  0xee   : > { %v682_v4 = vadd.f32 %v4919_v15, %v4901_v8  ;;  %5168 = vmatpush3.bf16.msra.mxu1 %v3480_v24  ;;  %5137 = vmatprep.mubr.msk.bf16.mxu1 %vm2231_vm4, %v3066_v40  ;;  %v565_v11 = vpop.f32.mrf.mxu0  ;;  %v4626_v8 = vld [vmem:[%s5646_s17 + $0xb8] sm:$0x3]  ;;  %v3233_v24 = vsel %vm736_vm2, %v6433_v30, %v3232_v22 }
  0xef   : > { %v673_v54 = vpop.f32.mrf.mxu1  ;;  %5251 = vmatprep.subr.msk.bf16.mxu1 %vm2256_vm3, %v6579_v51  ;;  %v3238_v3 = vsel %vm736_vm2, %v6471_v0, %v3237_v2  ;;  %v3041_v15 = vrot.slane %v4626_v8, 1 }
  0xf0   : > { %v674_v1 = vadd.f32 %v673_v54, %v546_v42  ;;  %v4937_v40 = vpop.f32.mrf.mxu0  ;;  %5152 = vmatmul.mubr.msk.bf16.vlgmr.msra.gmra.mxu0 %vm2231_vm4, %v3271_v58  ;;  %v3274_v2 = vpack.c.bf16 %v3238_v3, %v6488_v34 }
  0xf1   : > { %v4920_v6 = vpop.f32.mrf.mxu1  ;;  %v6599_v16 = vadd.f32 %v4937_v40, %v682_v4  ;;  %5155 = vmatprep.mubr.msk.bf16.mxu0 %vm2231_vm4, %v3272_v48  ;;  %5186 = vmatpush3.bf16.msra.mxu0 %v3710_v61  ;;  %v3273_v4 = vpack.c.bf16 %v3233_v24, %v6453_v38  ;;  %v3242_v61 = vrot.slane %v4623_v17, 2  ;;  %v3069_v17 = vpack.c.bf16 %v3037_v57, %v6362_v60 }
  0xf2   : > { %v685_v18 = vadd.f32 %v4920_v6, %v4902_v46  ;;  %v868_v54 = vpop.f32.mrf.mxu0  ;;  %v3042_v6 = vsel %vm413_vm0, %v6377_v19, %v3041_v15 }
  0xf3   : > { %v676_v42 = vpop.f32.mrf.mxu1  ;;  %v6605_v58 = vadd.f32 %v868_v54, %v674_v1  ;;  %v4629_v1 = vld [vmem:[%s5646_s17 + $0xd0] sm:$0x3] }
  0xf4   : > { %v677_v36 = vadd.f32 %v676_v42, %v549_v44  ;;  %v4938_v22 = vpop.f32.mrf.mxu0 }
  0xf5   : > { %v4923_v23 = vpop.f32.mrf.mxu1  ;;  %5138 = vmatmul.mubr.msk.bf16.gmra.mxu1 %vm2231_vm4, %v3067_v29  ;;  %v6611_v46 = vadd.f32 %v4938_v22, %v685_v18  ;;  %v3247_v29 = vrot.slane %v4626_v8, 2  ;;  %v6622_v18 = vrot.slane %v6537_v45, 1  ;;  %v3070_v8 = vpack.c.bf16 %v3042_v6, %v6395_v14 }
  0xf6   : > { %v698_v48 = vadd.f32 %v4923_v23, %v4905_v53  ;;  %5141 = vmatprep.mubr.msk.bf16.mxu1 %vm2231_vm4, %v3068_v13  ;;  %v871_v40 = vpop.f32.mrf.mxu0  ;;  %v3046_v13 = vrot.slane %v4629_v1, 1 }
  0xf7   : > { %v689_v44 = vpop.f32.mrf.mxu1  ;;  %v6618_v54 = vadd.f32 %v871_v40, %v677_v36  ;;  %v3248_v22 = vsel %vm736_vm2, %v6504_v55, %v3247_v29  ;;  %v3252_v29 = vrot.slane %v4629_v1, 2 }
  0xf8   : > { %v690_v24 = vadd.f32 %v689_v44, %v562_v5  ;;  %v4941_v53 = vpop.f32.mrf.mxu0  ;;  %5156 = vmatmul.mubr.msk.bf16.gmra.mxu0 %vm2231_vm4, %v3273_v4  ;;  %v3243_v5 = vsel %vm736_vm2, %v6479_v12, %v3242_v61  ;;  %v3249_v4 = vrot.slane %v6534_v9, 2  ;;  %v6644_v44 = vsel %vm413_vm0, %v3043_v37, %v6622_v18 }
  0xf9   : > { %v4924_v23 = vpop.f32.mrf.mxu1  ;;  %v6626_v42 = vadd.f32 %v4941_v53, %v698_v48  ;;  %5159 = vmatprep.mubr.msk.bf16.mxu0 %vm2231_vm4, %v3274_v2  ;;  %v6638_v48 = vrot.slane %v6537_v45, 2  ;;  %v3275_v61 = vpack.c.bf16 %v3243_v5, %v6494_v33  ;;  %v3047_v6 = vsel %vm413_vm0, %v6622_v18, %v3046_v13 }
  0xfa   : > { %v701_v3 = vadd.f32 %v4924_v23, %v4906_v32  ;;  %v884_v15 = vpop.f32.mrf.mxu0  ;;  %v3276_v45 = vpack.c.bf16 %v3248_v22, %v6516_v39  ;;  %v3071_v13 = vpack.c.bf16 %v3047_v6, %v6644_v44 }
  0xfb   : > { %v692_v36 = vpop.f32.mrf.mxu1  ;;  %v6635_v40 = vadd.f32 %v884_v15, %v690_v24  ;;  %v6664_v1 = vsel %vm736_vm2, %v3249_v4, %v6638_v48 }
  0xfc   : > { %v693_v57 = vadd.f32 %v692_v36, %v565_v11  ;;  %v4942_v32 = vpop.f32.mrf.mxu0 }
  0xfd   : > { %v4927_v2 = vpop.f32.mrf.mxu1  ;;  %5142 = vmatmul.mubr.msk.bf16.gmra.mxu1 %vm2231_vm4, %v3069_v17  ;;  %v6648_v9 = vadd.f32 %v4942_v32, %v701_v3 }
  0xfe   : > { %v714_v11 = vadd.f32 %v4927_v2, %v6510_v43  ;;  %5145 = vmatprep.mubr.msk.bf16.mxu1 %vm2231_vm4, %v3070_v8  ;;  %v887_v24 = vpop.f32.mrf.mxu0  ;;  %v3253_v8 = vsel %vm736_vm2, %v6638_v48, %v3252_v29 }
  0xff   : > { %v705_v53 = vpop.f32.mrf.mxu1  ;;  %v6653_v23 = vadd.f32 %v887_v24, %v693_v57 }
 0x100   : > { %v706_v17 = vadd.f32 %v705_v53, %v6520_v10  ;;  %v4945_v37 = vpop.f32.mrf.mxu0  ;;  %5160 = vmatmul.mubr.msk.bf16.gmra.mxu0 %vm2231_vm4, %v3275_v61 }
 0x101   : > { %v4928_v5 = vpop.f32.mrf.mxu1  ;;  %v6658_v3 = vadd.f32 %v4945_v37, %v714_v11  ;;  %5163 = vmatprep.mubr.msk.bf16.mxu0 %vm2231_vm4, %v3276_v45  ;;  %v3916_v37 = vsel %vm2256_vm3, %v6579_v51, 0 }
 0x102   : > { %v717_v43 = vadd.f32 %v4928_v5, %v6528_v56  ;;  %v900_v10 = vpop.f32.mrf.mxu0  ;;  %v3277_v56 = vpack.c.bf16 %v3253_v8, %v6664_v1 }
 0x103   : > { %v708_v15 = vpop.f32.mrf.mxu1  ;;  %v6668_v36 = vadd.f32 %v900_v10, %v706_v17 }
 0x104   : > { %v709_v22 = vadd.f32 %v708_v15, %v6540_v47  ;;  %v4946_v57 = vpop.f32.mrf.mxu0 }
 0x105   : > { %v4931_v32 = vpop.f32.mrf.mxu1  ;;  %5146 = vmatmul.mubr.msk.bf16.gmra.mxu1 %vm2231_vm4, %v3071_v13  ;;  %v6673_v2 = vadd.f32 %v4946_v57, %v717_v43  ;;  %v6695_v13 = vld [vmem:[%s5646_s17 + $0xa0] sm:$0x3] }
 0x106   : > { %v730_v4 = vadd.f32 %v4931_v32, %v6544_v7  ;;  %5169 = vmatprep.mubr.msk.bf16.mxu1 %vm2231_vm4, %v6266_v50  ;;  %v903_v61 = vpop.f32.mrf.mxu0  ;;  %v7258_v7 = vpack.c.bf16 %v6090_v59, %v6086_v63  ;;  %v7260_v32 = vpack.c.bf16 %v6165_v62, %v6161_v28 }
 0x107   : > { %v721_v6 = vpop.f32.mrf.mxu1  ;;  %v6678_v11 = vadd.f32 %v903_v61, %v709_v22  ;;  %v6722_v61 = vld [vmem:[%s5646_s17 + $0xb8] sm:$0x3] }
 0x108   : > { %v722_v47 = vadd.f32 %v721_v6, %v6555_v20  ;;  %v4949_v45 = vpop.f32.mrf.mxu0  ;;  %5164 = vmatmul.mubr.msk.bf16.gmra.mxu0 %vm2231_vm4, %v3277_v56  ;;  %v6730_v6 = vld [vmem:[%s5646_s17 + $0xd0] sm:$0x3] }
 0x109   : > { %v4932_v29 = vpop.f32.mrf.mxu1  ;;  %v6682_v24 = vadd.f32 %v4949_v45, %v730_v4  ;;  %5187 = vmatprep.mubr.msk.bf16.mxu0 %vm2231_vm4, %v7258_v7  ;;  %v7261_v45 = vld [vmem:[#allocation7_spill] sm:$0xff] }
 0x10a   : > { %v733_v53 = vadd.f32 %v4932_v29, %v6563_v41  ;;  %v916_v50 = vpop.f32.mrf.mxu0  ;;  %v3647_v29 = vrot.slane %v6722_v61, 1 }
 0x10b   : > { %v724_v17 = vpop.f32.mrf.mxu1  ;;  %v6691_v5 = vadd.f32 %v916_v50, %v722_v47  ;;  %v3652_v50 = vrot.slane %v6730_v6, 1 }
 0x10c   : > { %v725_v20 = vadd.f32 %v724_v17, %v6570_v35  ;;  %v4950_v43 = vpop.f32.mrf.mxu0  ;;  %v3642_v35 = vrot.slane %v6695_v13, 1 }
 0x10d   : > { %v4955_v8 = vpop.f32.mrf.mxu1  ;;  %5170 = vmatmul.mubr.msk.bf16.vlgmr.msra.gmra.mxu1 %vm2231_vm4, %v6303_v49  ;;  %v6699_v41 = vadd.f32 %v4950_v43, %v733_v53  ;;  %v7259_v49 = vpack.c.bf16 %v6110_v27, %v6098_v31 }
 0x10e   : > { %v1114_v63 = vadd.f32 %v4955_v8, %v6599_v16  ;;  %5204 = vmatpush3.bf16.msra.mxu1 %v3916_v37  ;;  %5173 = vmatprep.mubr.msk.bf16.mxu1 %vm2231_vm4, %v6310_v26  ;;  %v919_v59 = vpop.f32.mrf.mxu0 }
 0x10f   : > { %v1049_v51 = vpop.f32.mrf.mxu1  ;;  %v6705_v10 = vadd.f32 %v919_v59, %v725_v20  ;;  %v7263_v20 = vld [vmem:[#allocation6_spill] sm:$0xff]  ;;  %v6756_v59 = vld [vmem:[%s5646_s17 + $0xd8] sm:$0xff] }
 0x110   : > { %v1112_v15 = vadd.f32 %v1049_v51, %v6605_v58  ;;  %v4973_v22 = vpop.f32.mrf.mxu0  ;;  %5188 = vmatmul.mubr.msk.bf16.vlgmr.msra.gmra.mxu0 %vm2231_vm4, %v7259_v49  ;;  %v3643_v58 = vsel %vm413_vm0, %v6337_v25, %v3642_v35  ;;  %v7262_v25 = vld [vmem:[#allocation8_spill] sm:$0xff]  ;;  %v6759_v51 = vld [vmem:[%s5646_s17 + $0xe0] sm:$0xff] }
 0x111   : > { %v4956_v16 = vpop.f32.mrf.mxu1  ;;  %v6712_v57 = vadd.f32 %v4973_v22, %v1114_v63  ;;  %5191 = vmatprep.mubr.msk.bf16.mxu0 %vm2231_vm4, %v7260_v32  ;;  %v3648_v63 = vsel %vm413_vm0, %v6377_v19, %v3647_v29  ;;  %v7265_v22 = vld [vmem:[#allocation2_spill] sm:$0xff]  ;;  %v7266_v32 = vld [vmem:[#allocation9_spill] sm:$0xff] }
 0x112   : > { %v1115_v26 = vadd.f32 %v4956_v16, %v6611_v46  ;;  %v1283_v56 = vpop.f32.mrf.mxu0  ;;  %v3828_v49 = vrot.slane %v7265_v22, 2 }
 0x113   : > { %v1052_v4 = vpop.f32.mrf.mxu1  ;;  %v6724_v31 = vadd.f32 %v1283_v56, %v1112_v15  ;;  %v3653_v15 = vsel %vm413_vm0, %v6622_v18, %v3652_v50  ;;  %v3680_v56 = vpack.c.bf16 %v3648_v63, %v6395_v14 }
 0x114   : > { %v6727_v27 = vadd.f32 %v1052_v4, %v6618_v54  ;;  %v4974_v46 = vpop.f32.mrf.mxu0  ;;  %v3679_v54 = vpack.c.bf16 %v3643_v58, %v6362_v60  ;;  %v3654_v4 = vrot.slane %v6756_v59, 1  ;;  %v3655_v58 = vrot.slane %v6759_v51, 1 }
 0x115   : > { %v4959_v47 = vpop.f32.mrf.mxu1  ;;  %5174 = vmatmul.mubr.msk.bf16.gmra.mxu1 %vm2231_vm4, %v7261_v45  ;;  %v6734_v28 = vadd.f32 %v4974_v46, %v1115_v26  ;;  %v7267_v45 = vld [vmem:[#allocation13_spill] sm:$0xff] }
 0x116   : > { %v1118_v62 = vadd.f32 %v4959_v47, %v6626_v42  ;;  %5177 = vmatprep.mubr.msk.bf16.mxu1 %vm2231_vm4, %v7262_v25  ;;  %v6741_v53 = vpop.f32.mrf.mxu0  ;;  %v7264_v42 = vpack.c.bf16 %v7263_v20, %v6173_v21 }
 0x117   : > { %v1065_v7 = vpop.f32.mrf.mxu1 }
 0x118   : > { %v1116_v17 = vadd.f32 %v1065_v7, %v6635_v40  ;;  %v4977_v37 = vpop.f32.mrf.mxu0  ;;  %5192 = vmatmul.mubr.msk.bf16.gmra.mxu0 %vm2231_vm4, %v7264_v42  ;;  %v6762_v40 = vld [vmem:[%s5646_s17 + $0xe8] sm:$0x3] }
 0x119   : > { %v4960_v43 = vpop.f32.mrf.mxu1  ;;  %v6749_v8 = vadd.f32 %v4977_v37, %v1118_v62  ;;  %5195 = vmatprep.mubr.msk.bf16.mxu0 %vm2231_vm4, %v3679_v54  ;;  %v3657_v18 = vrot.slane %v6762_v40, 1  ;;  %v7268_v54 = vld [vmem:[#allocation10_spill] sm:$0xff] }
 0x11a   : > { %v1119_v60 = vadd.f32 %v4960_v43, %v6648_v9  ;;  %v1299_v35 = vpop.f32.mrf.mxu0  ;;  %v3829_v14 = vsel %vm736_vm2, %v7268_v54, %v3828_v49 }
 0x11b   : > { %v1068_v21 = vpop.f32.mrf.mxu1  ;;  %v6767_v16 = vadd.f32 %v1299_v35, %v1116_v17  ;;  %v3656_v17 = vsel %vm413_vm0, %v3654_v4, %v3655_v58  ;;  %v3658_v37 = vsel %vm413_vm0, %v3655_v58, %v3657_v18  ;;  %v3881_v42 = vpack.c.bf16 %v3829_v14, %v6417_v52  ;;  %v7270_v35 = vld [vmem:[#allocation4_spill] sm:$0xff] }
 0x11c   : > { %v6770_v9 = vadd.f32 %v1068_v21, %v6653_v23  ;;  %v4978_v26 = vpop.f32.mrf.mxu0  ;;  %v3681_v23 = vpack.c.bf16 %v3653_v15, %v6644_v44  ;;  %v3838_v21 = vrot.slane %v7270_v35, 2 }
 0x11d   : > { %v4963_v19 = vpop.f32.mrf.mxu1  ;;  %5178 = vmatmul.mubr.msk.bf16.gmra.mxu1 %vm2231_vm4, %v7266_v32  ;;  %v6778_v46 = vadd.f32 %v4978_v26, %v1119_v60  ;;  %v7271_v32 = vld [vmem:[#allocation11_spill] sm:$0xff] }
 0x11e   : > { %v1122_v47 = vadd.f32 %v4963_v19, %v6658_v3  ;;  %5181 = vmatprep.mubr.msk.bf16.mxu1 %vm2231_vm4, %v7267_v45  ;;  %v6784_v62 = vpop.f32.mrf.mxu0  ;;  %v3452_v3 = vpack.c.bf16 %v6759_v51, %v6756_v59 }
 0x11f   : > { %v1081_v25 = vpop.f32.mrf.mxu1 }
 0x120   : > { %v1120_v29 = vadd.f32 %v1081_v25, %v6668_v36  ;;  %v4981_v7 = vpop.f32.mrf.mxu0  ;;  %5196 = vmatmul.mubr.msk.bf16.gmra.mxu0 %vm2231_vm4, %v3680_v56  ;;  %v7269_v36 = vld [vmem:[#allocation3_spill] sm:$0xff] }
 0x121   : > { %v4964_v50 = vpop.f32.mrf.mxu1  ;;  %v6794_v44 = vadd.f32 %v4981_v7, %v1122_v47  ;;  %5199 = vmatprep.mubr.msk.bf16.mxu0 %vm2231_vm4, %v3681_v23  ;;  %v3833_v43 = vrot.slane %v7269_v36, 2  ;;  %v7272_v23 = vld [vmem:[#allocation12_spill] sm:$0xff] }
 0x122   : > { %v1123_v20 = vadd.f32 %v4964_v50, %v6673_v2  ;;  %v1315_v60 = vpop.f32.mrf.mxu0  ;;  %v3682_v2 = vpack.c.bf16 %v3658_v37, %v3656_v17 }
 0x123   : > { %v1084_v63 = vpop.f32.mrf.mxu1  ;;  %v6801_v15 = vadd.f32 %v1315_v60, %v1120_v29  ;;  %v3834_v56 = vsel %vm736_vm2, %v7271_v32, %v3833_v43  ;;  %v7273_v29 = vld [vmem:[#allocation5_spill] sm:$0xff] }
 0x124   : > { %v6804_v22 = vadd.f32 %v1084_v63, %v6678_v11  ;;  %v4982_v49 = vpop.f32.mrf.mxu0  ;;  %v3839_v11 = vsel %vm736_vm2, %v6433_v30, %v3838_v21  ;;  %v3882_v25 = vpack.c.bf16 %v3834_v56, %v7272_v23  ;;  %v3843_v7 = vrot.slane %v7273_v29, 2 }
 0x125   : > { %v4967_v26 = vpop.f32.mrf.mxu1  ;;  %5182 = vmatmul.mubr.msk.bf16.gmra.mxu1 %vm2231_vm4, %v3452_v3  ;;  %v6807_v19 = vadd.f32 %v4982_v49, %v1123_v20  ;;  %v3883_v14 = vpack.c.bf16 %v3839_v11, %v6453_v38  ;;  %v3848_v30 = vrot.slane %v6695_v13, 2  ;;  %v3853_v21 = vrot.slane %v6722_v61, 2 }
 0x126   : > { %v1126_v52 = vadd.f32 %v4967_v26, %v6682_v24  ;;  %5205 = vmatprep.mubr.msk.bf16.mxu1 %vm2231_vm4, %v3881_v42  ;;  %v6813_v4 = vpop.f32.mrf.mxu0  ;;  %v3844_v38 = vsel %vm736_vm2, %v6471_v0, %v3843_v7 }
 0x127   : > { %v1097_v58 = vpop.f32.mrf.mxu1  ;;  %v3884_v35 = vpack.c.bf16 %v3844_v38, %v6488_v34  ;;  %v1355_v38 = vadd.f32 %v6813_v4, %v6804_v22 }
 0x128   : > { %v1124_v18 = vadd.f32 %v1097_v58, %v6691_v5  ;;  %v4985_v47 = vpop.f32.mrf.mxu0  ;;  %5200 = vmatmul.mubr.msk.bf16.gmra.mxu0 %vm2231_vm4, %v3682_v2 }
 0x129   : > { %v4968_v45 = vpop.f32.mrf.mxu1  ;;  %v6820_v24 = vadd.f32 %v4985_v47, %v1126_v52  ;;  %v3861_v47 = vrot.slane %v6759_v51, 2 }
 0x12a   : > { %v1127_v54 = vadd.f32 %v4968_v45, %v6699_v41  ;;  %v1331_v50 = vpop.f32.mrf.mxu0 }
 0x12b   : > { %v1100_v3 = vpop.f32.mrf.mxu1  ;;  %v6826_v17 = vadd.f32 %v1331_v50, %v1124_v18  ;;  %v3860_v18 = vrot.slane %v6756_v59, 2 }
 0x12c   : > { %v6829_v5 = vadd.f32 %v1100_v3, %v6705_v10  ;;  %v4986_v37 = vpop.f32.mrf.mxu0  ;;  %v3849_v10 = vsel %vm736_vm2, %v6479_v12, %v3848_v30  ;;  %v3858_v12 = vrot.slane %v6730_v6, 2 }
 0x12d   : > { %v4991_v20 = vpop.f32.mrf.mxu1  ;;  %5206 = vmatmul.mubr.msk.bf16.vlgmr.msra.gmra.mxu1 %vm2231_vm4, %v3882_v25  ;;  %v6832_v42 = vadd.f32 %v4986_v37, %v1127_v54  ;;  %v3885_v26 = vpack.c.bf16 %v3849_v10, %v6494_v33  ;;  %v3854_v33 = vsel %vm736_vm2, %v6504_v55, %v3853_v21  ;;  %v3863_v25 = vrot.slane %v6762_v40, 2 }
 0x12e   : > { %v1558_v41 = vadd.f32 %v4991_v20, %v6712_v57  ;;  %5209 = vmatprep.mubr.msk.bf16.mxu1 %vm2231_vm4, %v3883_v14  ;;  %v6838_v36 = vpop.f32.mrf.mxu0  ;;  %v1347_v57 = vadd.f32 %v6741_v53, %v6727_v27  ;;  %v3859_v6 = vsel %vm736_vm2, %v6638_v48, %v3858_v12  ;;  %v3886_v23 = vpack.c.bf16 %v3854_v33, %v6516_v39 }
 0x12f   : > { %v1493_v13 = vpop.f32.mrf.mxu1  ;;  %v1351_v55 = vadd.f32 %v6784_v62, %v6770_v9  ;;  %v3887_v14 = vpack.c.bf16 %v3859_v6, %v6664_v1  ;;  %v3862_v9 = vsel %vm736_vm2, %v3860_v18, %v3861_v47 }
 0x130   : > { %v1556_v43 = vadd.f32 %v1493_v13, %v6724_v31  ;;  %v5009_v60 = vpop.f32.mrf.mxu0 }
 0x131   : > { %v4992_v63 = vpop.f32.mrf.mxu1  ;;  %v6847_v49 = vadd.f32 %v5009_v60, %v1558_v41 }
 0x132   : > { %v1559_v0 = vadd.f32 %v4992_v63, %v6734_v28  ;;  %v1674_v2 = vpop.f32.mrf.mxu0 }
 0x133   : > { %v1496_v52 = vpop.f32.mrf.mxu1  ;;  %v6852_v31 = vadd.f32 %v1674_v2, %v1556_v43 }
 0x134   : > { %v1557_v32 = vadd.f32 %v1496_v52, %v1347_v57  ;;  %v5010_v56 = vpop.f32.mrf.mxu0 }
 0x135   : > { %v4995_v34 = vpop.f32.mrf.mxu1  ;;  %5210 = vmatmul.mubr.msk.bf16.gmra.mxu1 %vm2231_vm4, %v3884_v35  ;;  %v6855_v61 = vadd.f32 %v5010_v56, %v1559_v0 }
 0x136   : > { %v1562_v27 = vadd.f32 %v4995_v34, %v6749_v8  ;;  %5213 = vmatprep.mubr.msk.bf16.mxu1 %vm2231_vm4, %v3885_v26  ;;  %v1677_v28 = vpop.f32.mrf.mxu0 }
 0x137   : > { %v1509_v53 = vpop.f32.mrf.mxu1  ;;  %v6863_v58 = vadd.f32 %v1677_v28, %v1557_v32 }
 0x138   : > { %v1560_v11 = vadd.f32 %v1509_v53, %v6767_v16  ;;  %v5013_v45 = vpop.f32.mrf.mxu0 }
 0x139   : > { %v4996_v8 = vpop.f32.mrf.mxu1  ;;  %v6872_v54 = vadd.f32 %v5013_v45, %v1562_v27 }
 0x13a   : > { %v1563_v48 = vadd.f32 %v4996_v8, %v6778_v46  ;;  %v1690_v16 = vpop.f32.mrf.mxu0  ;;  %v3864_v46 = vsel %vm736_vm2, %v3861_v47, %v3863_v25 }
 0x13b   : > { %v1512_v29 = vpop.f32.mrf.mxu1  ;;  %v6876_v59 = vadd.f32 %v1690_v16, %v1560_v11  ;;  %v3888_v41 = vpack.c.bf16 %v3864_v46, %v3862_v9 }
 0x13c   : > { %v1561_v51 = vadd.f32 %v1512_v29, %v1351_v55  ;;  %v5014_v7 = vpop.f32.mrf.mxu0 }
 0x13d   : > { %v4999_v50 = vpop.f32.mrf.mxu1  ;;  %5214 = vmatmul.mubr.msk.bf16.gmra.mxu1 %vm2231_vm4, %v3886_v23  ;;  %v6879_v39 = vadd.f32 %v5014_v7, %v1563_v48 }
 0x13e   : > { %v1566_v40 = vadd.f32 %v4999_v50, %v6794_v44  ;;  %5217 = vmatprep.mubr.msk.bf16.mxu1 %vm2231_vm4, %v3887_v14  ;;  %v1693_v1 = vpop.f32.mrf.mxu0 }
 0x13f   : > { %v1525_v62 = vpop.f32.mrf.mxu1  ;;  %v1742_v3 = vadd.f32 %v1693_v1, %v1561_v51 }
 0x140   : > { %v1564_v30 = vadd.f32 %v1525_v62, %v6801_v15  ;;  %v5017_v37 = vpop.f32.mrf.mxu0 }
 0x141   : > { %v5000_v20 = vpop.f32.mrf.mxu1  ;;  %v1747_v13 = vadd.f32 %v5017_v37, %v1566_v40 }
 0x142   : > { %v1567_v44 = vadd.f32 %v5000_v20, %v6807_v19  ;;  %v1706_v10 = vpop.f32.mrf.mxu0  ;;  %v1359_v19 = vadd.f32 %v6838_v36, %v6829_v5 }
 0x143   : > { %v1528_v43 = vpop.f32.mrf.mxu1  ;;  %v1745_v60 = vadd.f32 %v1706_v10, %v1564_v30 }
 0x144   : > { %v1565_v63 = vadd.f32 %v1528_v43, %v1355_v38  ;;  %v5018_v35 = vpop.f32.mrf.mxu0 }
 0x145   : > { %v5003_v21 = vpop.f32.mrf.mxu1  ;;  %5218 = vmatmul.mubr.msk.bf16.gmra.mxu1 %vm2231_vm4, %v3888_v41  ;;  %v1748_v57 = vadd.f32 %v5018_v35, %v1567_v44 }
 0x146   : > { %v1570_v15 = vadd.f32 %v5003_v21, %v6820_v24  ;;  %v1709_v0 = vpop.f32.mrf.mxu0 }
 0x147   : > { %v1541_v26 = vpop.f32.mrf.mxu1  ;;  %v1746_v2 = vadd.f32 %v1709_v0, %v1565_v63 }
 0x148   : > { %v1568_v52 = vadd.f32 %v1541_v26, %v6826_v17  ;;  %v5021_v22 = vpop.f32.mrf.mxu0 }
 0x149   : > { %v5004_v4 = vpop.f32.mrf.mxu1  ;;  %v1751_v12 = vadd.f32 %v5021_v22, %v1570_v15 }
 0x14a   : > { %v1571_v32 = vadd.f32 %v5004_v4, %v6832_v42  ;;  %v1722_v56 = vpop.f32.mrf.mxu0 }
 0x14b   : > { %v1544_v34 = vpop.f32.mrf.mxu1  ;;  %v1749_v27 = vadd.f32 %v1722_v56, %v1568_v52 }
 0x14c   : > { %v1569_v33 = vadd.f32 %v1544_v34, %v1359_v19  ;;  %v5022_v28 = vpop.f32.mrf.mxu0 }
 0x14d   : > { %v5027_v53 = vpop.f32.mrf.mxu1  ;;  %v1752_v24 = vadd.f32 %v5022_v28, %v1571_v32 }
 0x14e   : > { %v1973_v6 = vadd.f32 %v5027_v53, %v6847_v49  ;;  %v1725_v11 = vpop.f32.mrf.mxu0 }
 0x14f   : > { %v1908_v18 = vpop.f32.mrf.mxu1  ;;  %v1750_v17 = vadd.f32 %v1725_v11, %v1569_v33 }
 0x150   : > { %v1971_v47 = vadd.f32 %v1908_v18, %v6852_v31  ;;  %v5045_v45 = vpop.f32.mrf.mxu0 }
 0x151   : > { %v5028_v8 = vpop.f32.mrf.mxu1  ;;  %v2183_v5 = vadd.f32 %v5045_v45, %v1973_v6 }
 0x152   : > { %v1974_v36 = vadd.f32 %v5028_v8, %v6855_v61  ;;  %v2118_v42 = vpop.f32.mrf.mxu0 }
 0x153   : > { %v1911_v23 = vpop.f32.mrf.mxu1  ;;  %v2181_v25 = vadd.f32 %v2118_v42, %v1971_v47 }
 0x154   : > { %v1972_v55 = vadd.f32 %v1911_v23, %v6863_v58  ;;  %v5046_v48 = vpop.f32.mrf.mxu0 }
 0x155   : > { %v5031_v14 = vpop.f32.mrf.mxu1  ;;  %v2184_v16 = vadd.f32 %v5046_v48, %v1974_v36 }
 0x156   : > { %v1977_v49 = vadd.f32 %v5031_v14, %v6872_v54  ;;  %v2121_v29 = vpop.f32.mrf.mxu0 }
 0x157   : > { %v1924_v51 = vpop.f32.mrf.mxu1  ;;  %v2182_v7 = vadd.f32 %v2121_v29, %v1972_v55 }
 0x158   : > { %v1975_v31 = vadd.f32 %v1924_v51, %v6876_v59  ;;  %v5049_v50 = vpop.f32.mrf.mxu0 }
 0x159   : > { %v5032_v40 = vpop.f32.mrf.mxu1  ;;  %v2187_v9 = vadd.f32 %v5049_v50, %v1977_v49 }
 0x15a   : > { %v1978_v61 = vadd.f32 %v5032_v40, %v6879_v39  ;;  %v2134_v46 = vpop.f32.mrf.mxu0  ;;  %v5302_v39 = vld [vmem:[%s7221_s6 + $0x8] sm:$0xff]  }
 0x15b   : > { %v1927_v1 = vpop.f32.mrf.mxu1  ;;  %v2185_v62 = vadd.f32 %v2134_v46, %v1975_v31  ;;  %5221 = vmatprep.subr.bf16.mxu0 %v5302_v39 }
 0x15c   : > { %v1976_v30 = vadd.f32 %v1927_v1, %v1742_v3  ;;  %v5050_v58 = vpop.f32.mrf.mxu0  ;;  %5222 = vmatpush3.bf16.msra.mxu0 %v5302_v39 }
 0x15d   : > { %v5035_v37 = vpop.f32.mrf.mxu1  ;;  %v6902_v20 = vadd.f32 %v5050_v58, %v1978_v61 }
 0x15e   : > { %v1981_v41 = vadd.f32 %v5035_v37, %v1747_v13  ;;  %v2137_v54 = vpop.f32.mrf.mxu0 }
 0x15f   : > { %v1940_v38 = vpop.f32.mrf.mxu1  ;;  %v6904_v44 = vadd.f32 %v2137_v54, %v1976_v30 }
 0x160   : > { %v1979_v10 = vadd.f32 %v1940_v38, %v1745_v60  ;;  %v5053_v59 = vpop.f32.mrf.mxu0 }
 0x161   : > { %v5036_v43 = vpop.f32.mrf.mxu1  ;;  %v6906_v63 = vadd.f32 %v5053_v59, %v1981_v41 }
 0x162   : > { %v1982_v35 = vadd.f32 %v5036_v43, %v1748_v57  ;;  %v2150_v3 = vpop.f32.mrf.mxu0 }
 0x163   : > { %v1943_v21 = vpop.f32.mrf.mxu1  ;;  %v2189_v15 = vadd.f32 %v2150_v3, %v1979_v10 }
 0x164   : > { %v1980_v0 = vadd.f32 %v1943_v21, %v1746_v2  ;;  %v5054_v13 = vpop.f32.mrf.mxu0 }
 0x165   : > { %v5039_v26 = vpop.f32.mrf.mxu1  ;;  %v2192_v52 = vadd.f32 %v5054_v13, %v1982_v35 }
 0x166   : > { %v1985_v22 = vadd.f32 %v5039_v26, %v1751_v12  ;;  %v2153_v60 = vpop.f32.mrf.mxu0 }
 0x167   : > { %v1956_v4 = vpop.f32.mrf.mxu1  ;;  %v2190_v19 = vadd.f32 %v2153_v60, %v1980_v0 }
 0x168   : > { %v1983_v32 = vadd.f32 %v1956_v4, %v1749_v27  ;;  %v5057_v56 = vpop.f32.mrf.mxu0 }
 0x169   : > { %v5040_v57 = vpop.f32.mrf.mxu1  ;;  %v2195_v34 = vadd.f32 %v5057_v56, %v1985_v22 }
 0x16a   : > { %v1986_v33 = vadd.f32 %v5040_v57, %v1752_v24  ;;  %v2166_v28 = vpop.f32.mrf.mxu0 }
 0x16b   : > { %v1959_v53 = vpop.f32.mrf.mxu1  ;;  %v2193_v6 = vadd.f32 %v2166_v28, %v1983_v32 }
 0x16c   : > { %v1984_v11 = vadd.f32 %v1959_v53, %v1750_v17  ;;  %v5058_v18 = vpop.f32.mrf.mxu0 }
 0x16d   : > { %v5063_v2 = vpop.f32.mrf.mxu1  ;;  %v2196_v47 = vadd.f32 %v5058_v18, %v1986_v33 }
 0x16e   : > { %v2359_v45 = vadd.f32 %v5063_v2, %v2183_v5  ;;  %v2169_v8 = vpop.f32.mrf.mxu0  ;;  %v5303_v5 = vld [vmem:[%s7221_s6] sm:$0xff]  }
 0x16f   : > { %v2294_v36 = vpop.f32.mrf.mxu1  ;;  %v2194_v42 = vadd.f32 %v2169_v8, %v1984_v11  ;;  %5223 = vmatprep.subr.bf16.mxu0 %v5303_v5 }
 0x170   : > { %v2357_v12 = vadd.f32 %v2294_v36, %v2181_v25  ;;  %v5081_v23 = vpop.f32.mrf.mxu0  ;;  %5224 = vmatpush3.bf16.msra.mxu0 %v5303_v5 }
 0x171   : > { %v5064_v55 = vpop.f32.mrf.mxu1  ;;  %v2589_v48 = vadd.f32 %v5081_v23, %v2359_v45 }
 0x172   : > { %v2360_v27 = vadd.f32 %v5064_v55, %v2184_v16  ;;  %v2524_v14 = vpop.f32.mrf.mxu0 }
 0x173   : > { %v2297_v49 = vpop.f32.mrf.mxu1  ;;  %v2587_v29 = vadd.f32 %v2524_v14, %v2357_v12 }
 0x174   : > { %v2358_v24 = vadd.f32 %v2297_v49, %v2182_v7  ;;  %v5082_v51 = vpop.f32.mrf.mxu0 }
 0x175   : > { %v5067_v31 = vpop.f32.mrf.mxu1  ;;  %v2590_v50 = vadd.f32 %v5082_v51, %v2360_v27 }
 0x176   : > { %v2363_v17 = vadd.f32 %v5067_v31, %v2187_v9  ;;  %v2527_v40 = vpop.f32.mrf.mxu0 }
 0x177   : > { %v2310_v61 = vpop.f32.mrf.mxu1  ;;  %v2588_v46 = vadd.f32 %v2527_v40, %v2358_v24 }
 0x178   : > { %v2361_v25 = vadd.f32 %v2310_v61, %v2185_v62  ;;  %v5085_v1 = vpop.f32.mrf.mxu0 }
 0x179   : > { %v5068_v30 = vpop.f32.mrf.mxu1  ;;  %v2593_v16 = vadd.f32 %v5085_v1, %v2363_v17 }
 0x17a   : > { %v2364_v58 = vadd.f32 %v5068_v30, %v6902_v20  ;;  %v2540_v7 = vpop.f32.mrf.mxu0 }
 0x17b   : > { %v2313_v37 = vpop.f32.mrf.mxu1  ;;  %v2591_v41 = vadd.f32 %v2540_v7, %v2361_v25 }
 0x17c   : > { %v2362_v9 = vadd.f32 %v2313_v37, %v6904_v44  ;;  %v5086_v54 = vpop.f32.mrf.mxu0 }
 0x17d   : > { %v5071_v38 = vpop.f32.mrf.mxu1  ;;  %v2594_v10 = vadd.f32 %v5086_v54, %v2364_v58 }
 0x17e   : > { %v2367_v59 = vadd.f32 %v5071_v38, %v6906_v63  ;;  %v2543_v43 = vpop.f32.mrf.mxu0 }
 0x17f   : > { %v2326_v35 = vpop.f32.mrf.mxu1  ;;  %v2592_v62 = vadd.f32 %v2543_v43, %v2362_v9 }
 0x180   : > { %v2365_v39 = vadd.f32 %v2326_v35, %v2189_v15  ;;  %v5089_v3 = vpop.f32.mrf.mxu0 }
 0x181   : > { %v5072_v21 = vpop.f32.mrf.mxu1  ;;  %v2597_v0 = vadd.f32 %v5089_v3, %v2367_v59 }
 0x182   : > { %v2368_v13 = vadd.f32 %v5072_v21, %v2192_v52  ;;  %v2556_v26 = vpop.f32.mrf.mxu0 }
 0x183   : > { %v2329_v20 = vpop.f32.mrf.mxu1  ;;  %v2595_v22 = vadd.f32 %v2556_v26, %v2365_v39 }
 0x184   : > { %v2366_v60 = vadd.f32 %v2329_v20, %v2190_v19  ;;  %v5090_v4 = vpop.f32.mrf.mxu0 }
 0x185   : > { %v5075_v32 = vpop.f32.mrf.mxu1  ;;  %v2598_v44 = vadd.f32 %v5090_v4, %v2368_v13 }
 0x186   : > { %v2371_v56 = vadd.f32 %v5075_v32, %v2195_v34  ;;  %v2559_v57 = vpop.f32.mrf.mxu0 }
 0x187   : > { %v2342_v33 = vpop.f32.mrf.mxu1  ;;  %v2596_v28 = vadd.f32 %v2559_v57, %v2366_v60 }
 0x188   : > { %v2369_v63 = vadd.f32 %v2342_v33, %v2193_v6  ;;  %v5093_v53 = vpop.f32.mrf.mxu0 }
 0x189   : > { %v5076_v11 = vpop.f32.mrf.mxu1  ;;  %v2601_v18 = vadd.f32 %v5093_v53, %v2371_v56 }
 0x18a   : > { %v2372_v15 = vadd.f32 %v5076_v11, %v2196_v47  ;;  %v2572_v2 = vpop.f32.mrf.mxu0 }
 0x18b   : > { %v2345_v45 = vpop.f32.mrf.mxu1  ;;  %v2599_v8 = vadd.f32 %v2572_v2, %v2369_v63 }
 0x18c   : > { %v2370_v52 = vadd.f32 %v2345_v45, %v2194_v42  ;;  %v5094_v36 = vpop.f32.mrf.mxu0 }
 0x18d   : > { %v5099_v12 = vpop.f32.mrf.mxu1  ;;  %v2602_v23 = vadd.f32 %v5094_v36, %v2372_v15 }
 0x18e   : > { %v2795_v19 = vadd.f32 %v5099_v12, %v2589_v48  ;;  %v2575_v55 = vpop.f32.mrf.mxu0 }
 0x18f   : > { %v2730_v27 = vpop.f32.mrf.mxu1  ;;  %v2600_v14 = vadd.f32 %v2575_v55, %v2370_v52 }
 0x190   : > { %v6917_v34 = vadd.f32 %v2730_v27, %v2587_v29  ;;  %v5117_v49 = vpop.f32.mrf.mxu0 }
 0x191   : > { %v5100_v24 = vpop.f32.mrf.mxu1  ;;  %v2970_v6 = vadd.f32 %v5117_v49, %v2795_v19 }
 0x192   : > { %v6919_v51 = vadd.f32 %v5100_v24, %v2590_v50  ;;  %v6921_v31 = vpop.f32.mrf.mxu0 }
 0x193   : > { %v2733_v47 = vpop.f32.mrf.mxu1 }
 0x194   : > { %v6923_v17 = vadd.f32 %v2733_v47, %v2588_v46  ;;  %v6925_v42 = vpop.f32.mrf.mxu0 }
 0x195   : > { %v5103_v5 = vpop.f32.mrf.mxu1 }
 0x196   : > { %v2799_v40 = vadd.f32 %v5103_v5, %v2593_v16  ;;  %v6927_v48 = vpop.f32.mrf.mxu0 }
 0x197   : > { %v2746_v61 = vpop.f32.mrf.mxu1 }
 0x198   : > { %v6929_v25 = vadd.f32 %v2746_v61, %v2591_v41  ;;  %v5121_v29 = vpop.f32.mrf.mxu0 }
 0x199   : > { %v5104_v1 = vpop.f32.mrf.mxu1  ;;  %v2974_v30 = vadd.f32 %v5121_v29, %v2799_v40 }
 0x19a   : > { %v6931_v58 = vadd.f32 %v5104_v1, %v2594_v10  ;;  %v6933_v50 = vpop.f32.mrf.mxu0 }
 0x19b   : > { %v2749_v7 = vpop.f32.mrf.mxu1 }
 0x19c   : > { %v6935_v37 = vadd.f32 %v2749_v7, %v2592_v62  ;;  %v6937_v46 = vpop.f32.mrf.mxu0 }
 0x19d   : > { %v5107_v9 = vpop.f32.mrf.mxu1 }
 0x19e   : > { %v2803_v54 = vadd.f32 %v5107_v9, %v2597_v0  ;;  %v6939_v16 = vpop.f32.mrf.mxu0 }
 0x19f   : > { %v2762_v38 = vpop.f32.mrf.mxu1 }
 0x1a0   : > { %v6941_v59 = vadd.f32 %v2762_v38, %v2595_v22  ;;  %v5125_v41 = vpop.f32.mrf.mxu0 }
 0x1a1   : > { %v5108_v43 = vpop.f32.mrf.mxu1  ;;  %v2978_v35 = vadd.f32 %v5125_v41, %v2803_v54 }
 0x1a2   : > { %v6943_v39 = vadd.f32 %v5108_v43, %v2598_v44  ;;  %v6945_v10 = vpop.f32.mrf.mxu0 }
 0x1a3   : > { %v2765_v3 = vpop.f32.mrf.mxu1 }
 0x1a4   : > { %v6947_v21 = vadd.f32 %v2765_v3, %v2596_v28  ;;  %v6949_v62 = vpop.f32.mrf.mxu0 }
 0x1a5   : > { %v5111_v13 = vpop.f32.mrf.mxu1 }
 0x1a6   : > { %v2807_v26 = vadd.f32 %v5111_v13, %v2601_v18  ;;  %v6951_v0 = vpop.f32.mrf.mxu0 }
 0x1a7   : > { %v2778_v20 = vpop.f32.mrf.mxu1 }
 0x1a8   : > { %v6953_v60 = vadd.f32 %v2778_v20, %v2599_v8  ;;  %v5129_v22 = vpop.f32.mrf.mxu0 }
 0x1a9   : > { %v5112_v4 = vpop.f32.mrf.mxu1  ;;  %v2982_v32 = vadd.f32 %v5129_v22, %v2807_v26 }
 0x1aa   : > { %v6955_v56 = vadd.f32 %v5112_v4, %v2602_v23  ;;  %v6957_v44 = vpop.f32.mrf.mxu0 }
 0x1ab   : > { %v2781_v57 = vpop.f32.mrf.mxu1 }
 0x1ac   : > { %v6959_v33 = vadd.f32 %v2781_v57, %v2600_v14  ;;  %v6961_v28 = vpop.f32.mrf.mxu0 }
 0x1ad   : > { %v5135_v63 = vpop.f32.mrf.mxu1 }
 0x1ae   : > { %v6963_v53 = vadd.f32 %v5135_v63, %v2970_v6  ;;  %v6965_v11 = vpop.f32.mrf.mxu0 }
 0x1af   : > { %v3135_v18 = vpop.f32.mrf.mxu1 }
 0x1b0   : > { %v5153_v15 = vpop.f32.mrf.mxu0 }
 0x1b1   : > { %v5136_v2 = vpop.f32.mrf.mxu1 }
 0x1b2   : > { %v6967_v45 = vpop.f32.mrf.mxu0 }
 0x1b3   : > { %v3138_v8 = vpop.f32.mrf.mxu1 }
 0x1b4   : > { %v6969_v52 = vpop.f32.mrf.mxu0 }
 0x1b5   : > { %v5139_v36 = vpop.f32.mrf.mxu1 }
 0x1b6   : > { %v6971_v12 = vadd.f32 %v5139_v36, %v2974_v30  ;;  %v6973_v23 = vpop.f32.mrf.mxu0 }
 0x1b7   : > { %v3151_v19 = vpop.f32.mrf.mxu1 }
 0x1b8   : > { %v6975_v55 = vpop.f32.mrf.mxu0 }
 0x1b9   : > { %v5140_v27 = vpop.f32.mrf.mxu1 }
 0x1ba   : > { %v6977_v14 = vpop.f32.mrf.mxu0 }
 0x1bb   : > { %v3154_v49 = vpop.f32.mrf.mxu1 }
 0x1bc   : > { %v6979_v24 = vpop.f32.mrf.mxu0 }
 0x1bd   : > { %v5143_v6 = vpop.f32.mrf.mxu1 }
 0x1be   : > { %v6981_v47 = vadd.f32 %v5143_v6, %v2978_v35  ;;  %v6983_v5 = vpop.f32.mrf.mxu0 }
 0x1bf   : > { %v3167_v40 = vpop.f32.mrf.mxu1 }
 0x1c0   : > { %v6985_v61 = vpop.f32.mrf.mxu0 }
 0x1c1   : > { %v6987_v29 = vpop.f32.mrf.mxu1 }
 0x1c2   : > { %v6989_v1 = vpop.f32.mrf.mxu0 }
 0x1c3   : > { %v6991_v30 = vpop.f32.mrf.mxu1 }
 0x1c4   : > { %v6993_v7 = vpop.f32.mrf.mxu0 }
 0x1c5   : > { %7274 = vst [vmem:[#allocation7_spill] sm:$0xff] %v6993_v7  ;;  %v5147_v9 = vpop.f32.mrf.mxu1 }
 0x1c6   : > { %v6995_v54 = vadd.f32 %v5147_v9, %v2982_v32  ;;  %v6997_v38 = vpop.f32.mrf.mxu0 }
 0x1c7   : > { %7276 = vst [vmem:[#allocation6_spill] sm:$0xff] %v6997_v38  ;;  %v6999_v41 = vpop.f32.mrf.mxu1 }
 0x1c8   : > { %7275 = vst [vmem:[#allocation8_spill] sm:$0xff] %v6995_v54  ;;  %v7001_v43 = vpop.f32.mrf.mxu0 }
 0x1c9   : > { %7277 = vst [vmem:[#allocation2_spill] sm:$0xff] %v7001_v43  ;;  %v7003_v35 = vpop.f32.mrf.mxu1 }
 0x1ca   : > { %7278 = vst [vmem:[#allocation9_spill] sm:$0xff] %v7003_v35  ;;  %v7005_v3 = vpop.f32.mrf.mxu0 }
 0x1cb   : > { %7279 = vst [vmem:[#allocation13_spill] sm:$0xff] %v7005_v3  ;;  %v7007_v13 = vpop.f32.mrf.mxu1 }
 0x1cc   : > { %7280 = vst [vmem:[#allocation10_spill] sm:$0xff] %v7007_v13  ;;  %v7009_v26 = vpop.f32.mrf.mxu0 }
 0x1cd   : > { %7281 = vst [vmem:[#allocation3_spill] sm:$0xff] %v7009_v26  ;;  %v5171_v20 = vpop.f32.mrf.mxu1 }
 0x1ce   : > { %v7011_v22 = vpop.f32.mrf.mxu0 }
 0x1cf   : > { %7282 = vst [vmem:[#allocation4_spill] sm:$0xff] %v7011_v22  ;;  %v3516_v4 = vpop.f32.mrf.mxu1 }
 0x1d0   : > { %v5189_v32 = vpop.f32.mrf.mxu0 }
 0x1d1   : > { %v5172_v57 = vpop.f32.mrf.mxu1 }
 0x1d2   : > { %v3746_v63 = vpop.f32.mrf.mxu0 }
 0x1d3   : > { %v3519_v36 = vpop.f32.mrf.mxu1 }
 0x1d4   : > { %v5190_v6 = vpop.f32.mrf.mxu0 }
 0x1d5   : > { %v7013_v9 = vpop.f32.mrf.mxu1 }
 0x1d6   : > { %7283 = vst [vmem:[#allocation11_spill] sm:$0xff] %v7013_v9  ;;  %v7015_v43 = vpop.f32.mrf.mxu0  ;;  %v2968_v9 = vadd.f32 %v6921_v31, %v6917_v34  ;;  %v2975_v34 = vadd.f32 %v6937_v46, %v6931_v58  ;;  %v3406_v31 = vadd.f32 %v5153_v15, %v6963_v53  ;;  %v2979_v58 = vadd.f32 %v6949_v62, %v6943_v39 }
 0x1d7   : > { %7284 = vst [vmem:[#allocation12_spill] sm:$0xff] %v7015_v43  ;;  %v7017_v54 = vpop.f32.mrf.mxu1  ;;  %v2971_v43 = vadd.f32 %v6925_v42, %v6919_v51  ;;  %v2973_v51 = vadd.f32 %v6939_v16, %v6935_v37  ;;  %v2976_v42 = vadd.f32 %v6945_v10, %v6941_v59  ;;  %v2977_v16 = vadd.f32 %v6951_v0, %v6947_v21 }
 0x1d8   : > { %7285 = vst [vmem:[#allocation5_spill] sm:$0xff] %v7017_v54  ;;  %v7021_v38 = vpop.f32.mrf.mxu0  ;;  %v2980_v59 = vadd.f32 %v6957_v44, %v6953_v60  ;;  %v3410_v21 = vadd.f32 %v6975_v55, %v6971_v12 }
 0x1d9   : > { %v7019_v3 = vpop.f32.mrf.mxu1  ;;  %7287 = vst [vmem:[#allocation15_spill] sm:$0xff] %v7021_v38  ;;  %v3198_v38 = vadd.f32 %v3135_v18, %v2968_v9  ;;  %v3203_v53 = vadd.f32 %v3154_v49, %v2973_v51  ;;  %v3206_v10 = vadd.f32 %v3167_v40, %v2976_v42  ;;  %v7293_v40 = vld [vmem:[#allocation10_spill] sm:$0xff] }
 0x1da   : > { %7286 = vst [vmem:[#allocation14_spill] sm:$0xff] %v7019_v3  ;;  %v7027_v22 = vpop.f32.mrf.mxu0  ;;  %v3210_v55 = vadd.f32 %v6999_v41, %v2980_v59 }
 0x1db   : > { %v7023_v26 = vpop.f32.mrf.mxu1  ;;  %7290 = vst [vmem:[#allocation18_spill] sm:$0xff] %v7027_v22  ;;  %v3412_v12 = vadd.f32 %v6989_v1, %v3206_v10 }
 0x1dc   : > { %7288 = vst [vmem:[#allocation16_spill] sm:$0xff] %v7023_v26  ;;  %v7037_v54 = vpop.f32.mrf.mxu0  ;;  %v3201_v26 = vadd.f32 %v5136_v2, %v2971_v43 }
 0x1dd   : > { %v7025_v7 = vpop.f32.mrf.mxu1  ;;  %v7294_v43 = vld [vmem:[#allocation11_spill] sm:$0xff] }
 0x1de   : > { %7289 = vst [vmem:[#allocation17_spill] sm:$0xff] %v7025_v7  ;;  %v2969_v7 = vadd.f32 %v6927_v48, %v6923_v17  ;;  %v7054_v9 = vpop.f32.mrf.mxu0  ;;  %v3404_v48 = vadd.f32 %v6967_v45, %v3198_v38  ;;  %v3407_v46 = vadd.f32 %v6969_v52, %v3201_v26  ;;  %v2983_v45 = vadd.f32 %v6961_v28, %v6955_v56  ;;  %v7304_v59 = vld [vmem:[#allocation12_spill] sm:$0xff] }
 0x1df   : > { %v7029_v13 = vpop.f32.mrf.mxu1  ;;  %v3414_v56 = vadd.f32 %v6985_v61, %v6981_v47  ;;  %v3207_v28 = vadd.f32 %v6991_v30, %v2977_v16  ;;  %v7096_v30 = vld [vmem:[%s7220_s5] ss:$0 sm:$0xff]  ;;  %v7295_v1 = vld [vmem:[#allocation5_spill] sm:$0xff] }
 0x1e0   : > { %v3199_v18 = vadd.f32 %v3138_v8, %v2969_v7  ;;  %v3579_v15 = vadd.f32 %v3516_v4, %v3404_v48  ;;  %v2981_v8 = vadd.f32 %v6965_v11, %v6959_v33  ;;  %v3582_v62 = vadd.f32 %v5172_v57, %v3407_v46  ;;  %v5197_v52 = vpop.f32.mrf.mxu0  ;;  %v7296_v4 = vld [vmem:[#allocation7_spill] sm:$0xff]  ;;  %v7297_v57 = vld [vmem:[#allocation6_spill] sm:$0xff] }
 0x1e1   : > { %v7031_v35 = vpop.f32.mrf.mxu1  ;;  %v3209_v33 = vadd.f32 %v6987_v29, %v2979_v58  ;;  %v7302_v58 = vld [vmem:[#allocation13_spill] sm:$0xff] }
 0x1e2   : > { %7291 = vst [vmem:[#allocation19_spill] sm:$0xff] %v7031_v35  ;;  %v2972_v35 = vadd.f32 %v6933_v50, %v6929_v25  ;;  %v3205_v25 = vadd.f32 %v5140_v27, %v2975_v34  ;;  %v3581_v50 = vadd.f32 %v5171_v20, %v3406_v31  ;;  %v3405_v39 = vadd.f32 %v6973_v23, %v3199_v18  ;;  %v7087_v23 = vld [vmem:[%s7219_s4] ss:$0 sm:$0xff]  ;;  %v3778_v7 = vpop.f32.mrf.mxu0 }
 0x1e3   : > { %v7039_v3 = vpop.f32.mrf.mxu1  ;;  %v3409_v27 = vadd.f32 %v6983_v5, %v3203_v53  ;;  %v3211_v47 = vadd.f32 %v7293_v40, %v2981_v8  ;;  %v3812_v29 = vadd.f32 %v5190_v6, %v3582_v62  ;;  %v7299_v6 = vld [vmem:[#allocation2_spill] sm:$0xff]  ;;  %v7301_v18 = vld [vmem:[#allocation16_spill] sm:$0xff]  ;;  %v7110_v46 = vadd.f32 %v7302_v58, %v3210_v55  ;;  %v7303_v53 = vld [vmem:[#allocation3_spill] sm:$0xff] }
 0x1e4   : > { %v3202_v2 = vadd.f32 %v3151_v19, %v2972_v35  ;;  %v3411_v60 = vadd.f32 %v6979_v24, %v3205_v25  ;;  %v3811_v44 = vadd.f32 %v5189_v32, %v3581_v50  ;;  %v7292_v24 = vld [vmem:[#allocation9_spill] sm:$0xff]  ;;  %v3580_v61 = vadd.f32 %v3519_v36, %v3405_v39  ;;  %v7298_v36 = vld [vmem:[#allocation8_spill] sm:$0xff]  ;;  %v7300_v31 = vld [vmem:[#allocation14_spill] sm:$0xff]  ;;  %v5198_v8 = vpop.f32.mrf.mxu0 }
 0x1e5   : > { %v7043_v22 = vpop.f32.mrf.mxu1  ;;  %v3213_v5 = vadd.f32 %v7292_v24, %v2983_v45  ;;  %v3585_v35 = vadd.f32 %v7294_v43, %v3410_v21  ;;  %v3415_v32 = vadd.f32 %v7296_v4, %v3209_v33  ;;  %v3418_v34 = vadd.f32 %v7299_v6, %v7298_v36  ;;  %v7306_v62 = vld [vmem:[#allocation4_spill] sm:$0xff] }
 0x1e6   : > { %v3408_v0 = vadd.f32 %v6977_v14, %v3202_v2  ;;  %v3809_v14 = vadd.f32 %v3746_v63, %v3579_v15  ;;  %v3413_v63 = vadd.f32 %v7297_v57, %v3207_v28  ;;  %v3586_v51 = vadd.f32 %v7300_v31, %v3411_v60  ;;  %v7305_v15 = vld [vmem:[#allocation17_spill] sm:$0xff] }
 0x1e7   : > { %v7056_v17 = vpop.f32.mrf.mxu1  ;;  %v3584_v48 = vadd.f32 %v7301_v18, %v3409_v27  ;;  %v7113_v16 = vadd.f32 %v7303_v53, %v3213_v5  ;;  %v3810_v10 = vadd.f32 %v7304_v59, %v3580_v61  ;;  %v3589_v45 = vadd.f32 %v7305_v15, %v3414_v56 }
 0x1e8   : > { %v3583_v26 = vadd.f32 %v7295_v1, %v3408_v0  ;;  %v7118_v21 = vadd.f32 %v7306_v62, %v3211_v47  ;;  %v7307_v0 = vld [vmem:[#allocation15_spill] sm:$0xff]  ;;  %v3816_v28 = vadd.f32 %v7037_v54, %v3586_v51  ;;  %v3587_v24 = vadd.f32 %v7029_v13, %v3412_v12 }
 0x1e9   : > { %v7062_v37 = vpop.f32.mrf.mxu1  ;;  %v3815_v60 = vadd.f32 %v7307_v0, %v3585_v35  ;;  %v3814_v56 = vadd.f32 %v7054_v9, %v3584_v48  ;;  %v3819_v40 = vadd.f32 %v5197_v52, %v3589_v45  ;;  %v7309_v47 = vld [vmem:[#allocation19_spill] sm:$0xff]  ;;  %v3588_v35 = vadd.f32 %v7039_v3, %v3413_v63 }
 0x1ea   : > { %v3590_v61 = vadd.f32 %v7309_v47, %v3415_v32  ;;  %v3817_v31 = vadd.f32 %v3778_v7, %v3587_v24 }
 0x1eb   : > { %v7073_v19 = vpop.f32.mrf.mxu1 }
 0x1ec   : > { %v3820_v48 = vadd.f32 %v5198_v8, %v3590_v61 }
 0x1ed   : > { %v5207_v11 = vpop.f32.mrf.mxu1 }
 0x1ee   : > { %v4017_v49 = vadd.f32 %v5207_v11, %v3811_v44  ;;  %v7308_v44 = vld [vmem:[#allocation18_spill] sm:$0xff] }
 0x1ef   : > { %v3952_v38 = vpop.f32.mrf.mxu1  ;;  %v3813_v27 = vadd.f32 %v7308_v44, %v3583_v26 }
 0x1f0   : > { %v4040_v41 = vmul.f32 %v7087_v23, %v4017_v49  ;;  %v4015_v20 = vadd.f32 %v3952_v38, %v3809_v14 }
 0x1f1   : > { %v5208_v42 = vpop.f32.mrf.mxu1 }
 0x1f2   : > { %v4063_v2 = vadd.f32 %v7096_v30, %v4040_v41  ;;  %v4038_v25 = vmul.f32 %v7087_v23, %v4015_v20  ;;  %v4018_v50 = vadd.f32 %v5208_v42, %v3812_v29  ;;  %v3781_v29 = vpop.f32.mrf.mxu0 }
 0x1f3   : > { %v3955_v39 = vpop.f32.mrf.mxu1  ;;  %v3818_v15 = vadd.f32 %v3781_v29, %v3588_v35  ;;  %v3594_v29 = vadd.f32 %v7062_v37, %v7113_v16 }
 0x1f4   : > { %v4041_v33 = vmul.f32 %v7087_v23, %v4018_v50  ;;  %v4095_v11 = vmul.f32 0.01, %v4063_v2  ;;  %v4061_v55 = vadd.f32 %v7096_v30, %v4038_v25  ;;  %v4016_v14 = vadd.f32 %v3955_v39, %v3810_v10  ;;  %v5201_v57 = vpop.f32.mrf.mxu0 }
 0x1f5   : > { %v5211_v49 = vpop.f32.mrf.mxu1  ;;  %vm4079_vm5 = vcmp.ge.f32.partialorder %v4063_v2, 0.0 }
 0x1f6   : > { %v4064_v5 = vadd.f32 %v7096_v30, %v4041_v33  ;;  %v4039_v38 = vmul.f32 %v7087_v23, %v4016_v14  ;;  %v4021_v54 = vadd.f32 %v5211_v49, %v3815_v60  ;;  %v4111_v9 = vsel %vm4079_vm5, %v4063_v2, %v4095_v11  ;;  %v3794_v7 = vpop.f32.mrf.mxu0 }
 0x1f7   : > { %v3968_v43 = vpop.f32.mrf.mxu1  ;;  %vm4077_vm8 = vcmp.ge.f32.partialorder %v4061_v55, 0.0  ;;  %v4093_v52 = vmul.f32 0.01, %v4061_v55  ;;  %v3593_v2 = vadd.f32 %v7043_v22, %v3418_v34  ;;  %v3591_v60 = vadd.f32 %v7056_v17, %v7110_v46 }
 0x1f8   : > { %vm4080_vm7 = vcmp.ge.f32.partialorder %v4064_v5, 0.0  ;;  %v4096_v1 = vmul.f32 0.01, %v4064_v5  ;;  %v4019_v26 = vadd.f32 %v3968_v43, %v3813_v27  ;;  %v4062_v13 = vadd.f32 %v7096_v30, %v4039_v38  ;;  %v5202_v49 = vpop.f32.mrf.mxu0 }
 0x1f9   : > { %v4044_v12 = vmul.f32 %v7087_v23, %v4021_v54  ;;  %v5212_v41 = vpop.f32.mrf.mxu1  ;;  %v4109_v10 = vsel %vm4077_vm8, %v4061_v55, %v4093_v52  ;;  %v3823_v14 = vadd.f32 %v5201_v57, %v3593_v2  ;;  %v3821_v35 = vadd.f32 %v3794_v7, %v3591_v60 }
 0x1fa   : > { %v4112_v20 = vsel %vm4080_vm7, %v4064_v5, %v4096_v1  ;;  %v4042_v4 = vmul.f32 %v7087_v23, %v4019_v26  ;;  %v4022_v32 = vadd.f32 %v5212_v41, %v3816_v28  ;;  %vm4078_vm9 = vcmp.ge.f32.partialorder %v4062_v13, 0.0 }
 0x1fb   : > { %v4126_v36 = vpack.c.bf16 %v4112_v20, %v4111_v9  ;;  %v4094_v6 = vmul.f32 0.01, %v4062_v13  ;;  %v4067_v3 = vadd.f32 %v7096_v30, %v4044_v12  ;;  %v3971_v63 = vpop.f32.mrf.mxu1  ;;  %v3592_v1 = vadd.f32 %v7073_v19, %v7118_v21 }
 0x1fc   : > { %v4065_v51 = vadd.f32 %v7096_v30, %v4042_v4  ;;  %v4045_v42 = vmul.f32 %v7087_v23, %v4022_v32  ;;  %v4020_v18 = vadd.f32 %v3971_v63, %v3814_v56  ;;  %v3824_v32 = vadd.f32 %v5202_v49, %v3594_v29 }
 0x1fd   : > { %v4099_v25 = vmul.f32 0.01, %v4067_v3  ;;  %v5215_v50 = vpop.f32.mrf.mxu1  ;;  %v4110_v58 = vsel %vm4078_vm9, %v4062_v13, %v4094_v6  ;;  %vm4083_vm10 = vcmp.ge.f32.partialorder %v4067_v3, 0.0  ;;  %v3797_v13 = vpop.f32.mrf.mxu0 }
 0x1fe   : > { %v4068_v53 = vadd.f32 %v7096_v30, %v4045_v42  ;;  %v4043_v59 = vmul.f32 %v7087_v23, %v4020_v18  ;;  %v4097_v45 = vmul.f32 0.01, %v4065_v51  ;;  %v4025_v39 = vadd.f32 %v5215_v50, %v3819_v40 }
 0x1ff   : > { %v3984_v62 = vpop.f32.mrf.mxu1  ;;  %v4125_v0 = vpack.c.bf16 %v4110_v58, %v4109_v10  ;;  %v4115_v44 = vsel %vm4083_vm10, %v4067_v3, %v4099_v25  ;;  %vm4081_vm12 = vcmp.ge.f32.partialorder %v4065_v51, 0.0  ;;  %v3822_v57 = vadd.f32 %v3797_v13, %v3592_v1 }
 0x200   : > { %vm4084_vm11 = vcmp.ge.f32.partialorder %v4068_v53, 0.0  ;;  %v4100_v8 = vmul.f32 0.01, %v4068_v53  ;;  %v4066_v22 = vadd.f32 %v7096_v30, %v4043_v59  ;;  %v4023_v34 = vadd.f32 %v3984_v62, %v3817_v31 }
 0x201   : > { %v4048_v27 = vmul.f32 %v7087_v23, %v4025_v39  ;;  %5225 = vmatprep.mubr.msk.bf16.mxu0 %vm4156_vm6, %v4125_v0  ;;  %v5216_v33 = vpop.f32.mrf.mxu1  ;;  %v4113_v47 = vsel %vm4081_vm12, %v4065_v51, %v4097_v45 }
 0x202   : > { %v4116_v28 = vsel %vm4084_vm11, %v4068_v53, %v4100_v8  ;;  %vm4082_vm13 = vcmp.ge.f32.partialorder %v4066_v22, 0.0  ;;  %v4098_v11 = vmul.f32 0.01, %v4066_v22  ;;  %v4046_v55 = vmul.f32 %v7087_v23, %v4023_v34  ;;  %5226 = vmatmul.mubr.msk.bf16.vlgmr.msra.gmra.mxu0 %vm4156_vm6, %v4126_v36 }
 0x203   : > { %v4128_v56 = vpack.c.bf16 %v4116_v28, %v4115_v44  ;;  %v4071_v24 = vadd.f32 %v7096_v30, %v4048_v27  ;;  %v4026_v17 = vadd.f32 %v5216_v33, %v3820_v48  ;;  %v3987_v46 = vpop.f32.mrf.mxu1 }
 0x204   : > { %v4069_v5 = vadd.f32 %v7096_v30, %v4046_v55  ;;  %v4024_v40 = vadd.f32 %v3987_v46, %v3818_v15  ;;  %v4114_v61 = vsel %vm4082_vm13, %v4066_v22, %v4098_v11 }
 0x205   : > { %v4049_v38 = vmul.f32 %v7087_v23, %v4026_v17  ;;  %v5219_v54 = vpop.f32.mrf.mxu1  ;;  %v4127_v43 = vpack.c.bf16 %v4114_v61, %v4113_v47  ;;  %vm4087_vm14 = vcmp.ge.f32.partialorder %v4071_v24, 0.0  ;;  %v4103_v12 = vmul.f32 0.01, %v4071_v24 }
 0x206   : > { %v4047_v26 = vmul.f32 %v7087_v23, %v4024_v40  ;;  %v4029_v9 = vadd.f32 %v5219_v54, %v3823_v14  ;;  %v4101_v37 = vmul.f32 0.01, %v4069_v5  ;;  %vm4085_vm15 = vcmp.ge.f32.partialorder %v4069_v5, 0.0 }
 0x207   : > { %v4072_v41 = vadd.f32 %v7096_v30, %v4049_v38  ;;  %v4000_v52 = vpop.f32.mrf.mxu1  ;;  %5229 = vmatprep.mubr.msk.bf16.mxu0 %vm4156_vm6, %v4127_v43  ;;  %v4119_v3 = vsel %vm4087_vm14, %v4071_v24, %v4103_v12 }
 0x208   : > { %v4070_v16 = vadd.f32 %v7096_v30, %v4047_v26  ;;  %v4052_v20 = vmul.f32 %v7087_v23, %v4029_v9  ;;  %v4027_v4 = vadd.f32 %v4000_v52, %v3821_v35  ;;  %v4117_v48 = vsel %vm4085_vm15, %v4069_v5, %v4101_v37 }
 0x209   : > { %vm4088_vm0 = vcmp.ge.f32.partialorder %v4072_v41, 0.0  ;;  %v4104_v19 = vmul.f32 0.01, %v4072_v41  ;;  %v5220_v21 = vpop.f32.mrf.mxu1 }
 0x20a   : > { %vm4086_vm1 = vcmp.ge.f32.partialorder %v4070_v16, 0.0  ;;  %v4102_v36 = vmul.f32 0.01, %v4070_v16  ;;  %v4050_v6 = vmul.f32 %v7087_v23, %v4027_v4  ;;  %5230 = vmatmul.mubr.msk.bf16.gmra.mxu0 %vm4156_vm6, %v4128_v56  ;;  %v4075_v31 = vadd.f32 %v7096_v30, %v4052_v20 }
 0x20b   : > { %v4120_v63 = vsel %vm4088_vm0, %v4072_v41, %v4104_v19  ;;  %v4030_v51 = vadd.f32 %v5220_v21, %v3824_v32  ;;  %v4003_v42 = vpop.f32.mrf.mxu1 }
 0x20c   : > { %v4130_v18 = vpack.c.bf16 %v4120_v63, %v4119_v3  ;;  %v4073_v2 = vadd.f32 %v7096_v30, %v4050_v6  ;;  %v4028_v50 = vadd.f32 %v4003_v42, %v3822_v57  ;;  %v4118_v58 = vsel %vm4086_vm1, %v4070_v16, %v4102_v36 }
 0x20d   : > { %v4053_v25 = vmul.f32 %v7087_v23, %v4030_v51  ;;  %v4129_v53 = vpack.c.bf16 %v4118_v58, %v4117_v48  ;;  %v4107_v59 = vmul.f32 0.01, %v4075_v31  ;;  %vm4091_vm2 = vcmp.ge.f32.partialorder %v4075_v31, 0.0 }
 0x20e   : > { %v4051_v15 = vmul.f32 %v7087_v23, %v4028_v50  ;;  %v4105_v7 = vmul.f32 0.01, %v4073_v2  ;;  %vm4089_vm4 = vcmp.ge.f32.partialorder %v4073_v2, 0.0 }
 0x20f   : > { %v4076_v10 = vadd.f32 %v7096_v30, %v4053_v25  ;;  %5233 = vmatprep.mubr.msk.bf16.mxu0 %vm4156_vm6, %v4129_v53  ;;  %v4123_v62 = vsel %vm4091_vm2, %v4075_v31, %v4107_v59 }
 0x210   : > { %v4074_v39 = vadd.f32 %v7096_v30, %v4051_v15  ;;  %v4121_v34 = vsel %vm4089_vm4, %v4073_v2, %v4105_v7  ;;  %v4712_v30 = vld [vmem:[%s7222_s7] ss:$0 sm:$0xff] }
 0x211   : > { %vm4092_vm3 = vcmp.ge.f32.partialorder %v4076_v10, 0.0  ;;  %v4108_v45 = vmul.f32 0.01, %v4076_v10 }
 0x212   : > { %5234 = vmatmul.mubr.msk.bf16.gmra.mxu0 %vm4156_vm6, %v4130_v18  ;;  %vm4090_vm5 = vcmp.ge.f32.partialorder %v4074_v39, 0.0  ;;  %v4106_v8 = vmul.f32 0.01, %v4074_v39 }
 0x213   : > { %v4124_v0 = vsel %vm4092_vm3, %v4076_v10, %v4108_v45 }
 0x214   : > { %v4132_v22 = vpack.c.bf16 %v4124_v0, %v4123_v62  ;;  %v4122_v23 = vsel %vm4090_vm5, %v4074_v39, %v4106_v8 }
 0x215   : > { %v4131_v60 = vpack.c.bf16 %v4122_v23, %v4121_v34 }
 0x217   : > { %5237 = vmatprep.mubr.msk.bf16.mxu0 %vm4156_vm6, %v4131_v60 }
 0x21a   : > { %5238 = vmatmul.mubr.msk.bf16.gmra.mxu0 %vm4156_vm6, %v4132_v22 }
 0x2c2   : > { %v5227_v44 = vpop.f32.mrf.mxu0 }
 0x2c3   : > { %v4224_v27 = vadd.f32 %v5227_v44, %v4712_v30 }
 0x2c4   : > { %v4215_v33 = vpop.f32.mrf.mxu0 }
 0x2c5   : > { %4280 = vst [vmem:[%s7182_s14 + $0x10] sm:$0xff] %v4224_v27  ;;  %v4216_v28 = vadd.f32 %v4712_v30, %v4215_v33 }
 0x2c6   : > { %v5228_v11 = vpop.f32.mrf.mxu0 }
 0x2c7   : > { %4278 = vst [vmem:[%s7182_s14] sm:$0xff] %v4216_v28  ;;  %v4227_v55 = vadd.f32 %v5228_v11, %v4712_v30 }
 0x2c8   : > { %v4218_v14 = vpop.f32.mrf.mxu0 }
 0x2c9   : > { %4281 = vst [vmem:[%s7182_s14 + $0x18] sm:$0xff] %v4227_v55  ;;  %v4219_v49 = vadd.f32 %v4712_v30, %v4218_v14 }
 0x2ca   : > { %v5231_v56 = vpop.f32.mrf.mxu0 }
 0x2cb   : > { %4279 = vst [vmem:[%s7182_s14 + $0x8] sm:$0xff] %v4219_v49  ;;  %v4240_v24 = vadd.f32 %v5231_v56, %v4712_v30 }
 0x2cc   : > { %v4231_v17 = vpop.f32.mrf.mxu0 }
 0x2cd   : > { %4284 = vst [vmem:[%s7182_s14 + $0x30] sm:$0xff] %v4240_v24  ;;  %v4232_v46 = vadd.f32 %v4712_v30, %v4231_v17 }
 0x2ce   : > { %v5232_v5 = vpop.f32.mrf.mxu0 }
 0x2cf   : > { %4282 = vst [vmem:[%s7182_s14 + $0x20] sm:$0xff] %v4232_v46  ;;  %v4243_v40 = vadd.f32 %v5232_v5, %v4712_v30 }
 0x2d0   : > { %v4234_v47 = vpop.f32.mrf.mxu0 }
 0x2d1   : > { %4285 = vst [vmem:[%s7182_s14 + $0x38] sm:$0xff] %v4243_v40  ;;  %v4235_v61 = vadd.f32 %v4712_v30, %v4234_v47 }
 0x2d2   : > { %v5235_v29 = vpop.f32.mrf.mxu0 }
 0x2d3   : > { %4283 = vst [vmem:[%s7182_s14 + $0x28] sm:$0xff] %v4235_v61  ;;  %v4256_v38 = vadd.f32 %v5235_v29, %v4712_v30 }
 0x2d4   : > { %v4247_v54 = vpop.f32.mrf.mxu0 }
 0x2d5   : > { %4288 = vst [vmem:[%s7182_s14 + $0x50] sm:$0xff] %v4256_v38  ;;  %v4248_v43 = vadd.f32 %v4712_v30, %v4247_v54 }
 0x2d6   : > { %v5236_v35 = vpop.f32.mrf.mxu0 }
 0x2d7   : > { %4286 = vst [vmem:[%s7182_s14 + $0x40] sm:$0xff] %v4248_v43  ;;  %v4259_v1 = vadd.f32 %v5236_v35, %v4712_v30 }
 0x2d8   : > { %v4250_v26 = vpop.f32.mrf.mxu0 }
 0x2d9   : > { %4289 = vst [vmem:[%s7182_s14 + $0x58] sm:$0xff] %v4259_v1  ;;  %v4251_v9 = vadd.f32 %v4712_v30, %v4250_v26 }
 0x2da   : > { %v5239_v13 = vpop.f32.mrf.mxu0 }
 0x2db   : > { %4287 = vst [vmem:[%s7182_s14 + $0x48] sm:$0xff] %v4251_v9  ;;  %v4272_v12 = vadd.f32 %v5239_v13, %v4712_v30 }
 0x2dc   : > { %v4263_v41 = vpop.f32.mrf.mxu0 }
 0x2dd   : > { %4292 = vst [vmem:[%s7182_s14 + $0x70] sm:$0xff] %v4272_v12  ;;  %v4264_v52 = vadd.f32 %v4712_v30, %v4263_v41 }
 0x2de   : > { %v5240_v37 = vpop.f32.mrf.mxu0 }
 0x2df   : > { %4290 = vst [vmem:[%s7182_s14 + $0x60] sm:$0xff] %v4264_v52  ;;  %v4275_v16 = vadd.f32 %v5240_v37, %v4712_v30 }
 0x2e0   : > { %v4266_v20 = vpop.f32.mrf.mxu0 }
 0x2e1   : > { %4293 = vst [vmem:[%s7182_s14 + $0x78] sm:$0xff] %v4275_v16  ;;  %v4267_v4 = vadd.f32 %v4712_v30, %v4266_v20 }
 0x2e3   : > { %4291 = vst [vmem:[%s7182_s14 + $0x68] sm:$0xff] %v4267_v4 }
 0x2e4 PF: > { %s18_s9 = sadd.s32 1, %s5342_s9   ;;  %s7310_s27 = smov %s5334_s29 }
 0x2e5   : > { %p15_p7 = scmp.ge.s32.totalorder %s18_s9, 6   ;;  %s7311_s28 = smov %s5338_s30 }
 0x2e6   : > { %s7312_s29 = smov %s7315_s10  ;;  %s7313_s30 = smov %s7319_s11 }
 0x2e7   :  { %17 = sbr.rel (!%p15_p7) target bundleno = 3 (0x3), region = 107 }

</bundles_post_ra>
